<compile_context>
chip_gen: v6e
topology: v6e:2x2x1
jax: 0.10.0
libtpu: 0.0.40
codegen_flags: <defaults>
</compile_context>

<pallas_src>
import jax
import jax.numpy as jnp
from jax.experimental import pallas as pl
from jax.experimental.pallas import tpu as pltpu

# ----- hyper-parameters (small shapes consistent with the module) -----
B = 2        # batch
T = 8        # num_timesteps
V = 16       # num_vertices
NF = 8       # num_features
K = 3        # Chebyshev order
CC = 16      # num_of_chev_filters
CT = 16      # num_of_time_filters
KT = 3       # time_conv_kernel (odd -> symmetric 'same' padding), stride = 1
HID = 100    # classifier hidden width (padded to HP lanes below)
HP = 128     # padded hidden width (lane aligned)
NCLASS = 5
NDOM = 3
EPS = 1e-5   # LayerNorm eps (PyTorch default)
D = 2 * T * V * CT          # flattened block_out width = 4096
TK = 512                    # K tile for the classifier matmul (D // TK grid steps)

# The torch reshape_dot does a raw (B, V*F, T) -> (B, T, V, F) buffer reinterpretation.
# With T == NF (this config) that reinterpretation makes x_TAtt[t] a contiguous row
# block of the bmm result, which we exploit inside the kernel (no in-kernel relayout).
assert T == NF, "reshape_dot row-block shortcut in the kernel assumes T == num_features"
assert D % TK == 0

PARAM_ORDER = (
    "ta_u1", "ta_u2", "ta_u3", "ta_be", "ta_ve",
    "sa_w1", "sa_w2", "sa_w3", "sa_bs", "sa_vs",
    "gl_a", "theta_gl", "theta_sd", "cheb",
    "tc_gl_w", "tc_gl_b", "ln_gl_g", "ln_gl_b",
    "tc_sd_w", "tc_sd_b", "ln_sd_g", "ln_sd_b",
)


# =====================  fused MSTGCN block kernel  =====================

def _mstgcn_block_kernel(
        x_ref, xvft_ref,
        ta_u1_ref, ta_u2_ref, ta_u3_ref, ta_be_ref, ta_ve_ref,
        sa_w1_ref, sa_w2_ref, sa_w3_ref, sa_bs_ref, sa_vs_ref,
        gl_a_ref, theta_gl_ref, theta_sd_ref, cheb_ref,
        tc_gl_w_ref, tc_gl_b_ref, ln_gl_g_ref, ln_gl_b_ref,
        tc_sd_w_ref, tc_sd_b_ref, ln_sd_g_ref, ln_sd_b_ref,
        out_gl_ref, out_sd_ref,
        rows_sc, conv_sc):
    """One batch element of the MSTGCN block, everything resident in VMEM."""
    f32 = jnp.float32
    x = x_ref[0]                                        # (T, V, NF)

    # ---------------- TemporalAttention ----------------
    u1 = ta_u1_ref[...]                                 # (V, 1)
    u3 = ta_u3_ref[...]                                 # (1, NF)
    lhs_t = jnp.sum(x * u1[None, :, :], axis=1)         # (T, NF)   sum_v x*U1
    lhs_t = jnp.dot(lhs_t, ta_u2_ref[...], preferred_element_type=f32)   # (T, V)
    rhs_t = jnp.sum(x * u3[None, :, :], axis=-1)        # (T, V)    sum_f x*U3
    prod_t = jax.lax.dot_general(lhs_t, rhs_t, (((1,), (1,)), ((), ())),
                                 preferred_element_type=f32)             # (T, T)
    sig_t = jax.nn.sigmoid(prod_t + ta_be_ref[...])
    st = jax.lax.dot_general(sig_t, ta_ve_ref[...], (((1,), (1,)), ((), ())),
                             preferred_element_type=f32)                 # sig @ V_e^T
    st = st - jnp.max(st, axis=0, keepdims=True)        # torch softmax over dim=1
    et = jnp.exp(st)
    t_att = et / jnp.sum(et, axis=0, keepdims=True)     # (T, T)

    # ---------------- reshape_dot ----------------
    # torch: bmm(x.permute(0,2,3,1).reshape(B, V*F, T), TAtt) then raw reshape.
    res = jnp.dot(xvft_ref[0], t_att, preferred_element_type=f32)        # (V*NF, T)
    # With T == NF, torch's raw reshape gives  x_TAtt[t] == res[t*V:(t+1)*V, :].

    # ---------------- SpatialAttention (on x_TAtt) ----------------
    w1v = sa_w1_ref[...]                                # (T, 1)
    w3 = sa_w3_ref[...]                                 # (1, NF)
    col_ids = jax.lax.broadcasted_iota(jnp.int32, (V, T), 1)
    lhs_s = jnp.zeros((V, NF), f32)
    rhsT = jnp.zeros((V, T), f32)                       # rhsT[j, t] = sum_f xTAtt[t,j,f]*W3[f]
    for t in range(T):
        xat = res[t * V:(t + 1) * V, :]                 # x_TAtt at time t, (V, NF)
        lhs_s = lhs_s + w1v[t:t + 1, 0:1] * xat
        q_t = jnp.sum(xat * w3, axis=-1, keepdims=True)                  # (V, 1)
        rhsT = rhsT + jnp.where(col_ids == t, q_t, 0.0)
    lhs_s = jnp.dot(lhs_s, sa_w2_ref[...], preferred_element_type=f32)   # (V, T)
    prod_s = jax.lax.dot_general(lhs_s, rhsT, (((1,), (1,)), ((), ())),
                                 preferred_element_type=f32)             # (V, V)
    sig_s = jax.nn.sigmoid(prod_s + sa_bs_ref[...])
    ss = jax.lax.dot_general(sig_s, sa_vs_ref[...], (((1,), (1,)), ((), ())),
                             preferred_element_type=f32)                 # sig @ V_s^T
    ss = ss - jnp.max(ss, axis=0, keepdims=True)
    es = jnp.exp(ss)
    s_att = es / jnp.sum(es, axis=0, keepdims=True)     # (V, V)

    # ---------------- Graph_Learn + Chebyshev terms (per time step) ----------------
    a_gl = gl_a_ref[...]                                # (1, NF)
    tka = [cheb_ref[k] * s_att for k in range(K)]       # static-graph T_k * Att
    for t in range(T):
        xt = x_ref[0, t]                                # (V, NF)
        # Graph_Learn distance: per-feature accumulation on a single (V,V) tile.
        d = jnp.zeros((V, V), f32)
        for ff in range(NF):
            col = jnp.broadcast_to(xt[:, ff:ff + 1], (V, V))   # xt[i, ff]
            d = d + a_gl[0:1, ff:ff + 1] * jnp.abs(col - col.T)
        eg = jnp.exp(-d)
        S = eg / jnp.sum(eg, axis=1, keepdims=True)     # row-normalised
        # TODO(synk): F.dropout(S, 0.3) omitted (deterministic inference semantics).
        S = jnp.minimum(S, S.T)                         # ChebConvWithAttGL symmetrisation
        # GL Chebyshev recursion (Theta matmuls batched over all T below).
        # NOTE: matches the reference exactly -- ChebConvWithAttGL only uses
        # Theta[0..K-2] and has no T_0 (identity) term.
        tx0 = xt
        tx1 = jnp.dot(S, xt, preferred_element_type=f32)
        rows_sc[0, t * V:(t + 1) * V, :] = tx1
        for k in range(2, K):
            tx2 = 2.0 * jnp.dot(S, tx1, preferred_element_type=f32) - tx0
            rows_sc[k - 1, t * V:(t + 1) * V, :] = tx2
            tx0, tx1 = tx1, tx2
        # Static-graph branch: (T_k * Att) @ x_t.
        for k in range(K):
            # TODO(synk): F.dropout(T_k_with_at, 0.6) omitted (inference semantics).
            rows_sc[K - 1 + k, t * V:(t + 1) * V, :] = jnp.dot(
                tka[k], xt, preferred_element_type=f32)

    # ---------------- batched Theta matmuls over all T*V = 128 rows ----------------
    gl_acc = jnp.dot(rows_sc[0], theta_gl_ref[0], preferred_element_type=f32)
    for k in range(2, K):
        gl_acc = gl_acc + jnp.dot(rows_sc[k - 1], theta_gl_ref[k - 1],
                                  preferred_element_type=f32)
    gl_feat = jnp.maximum(gl_acc, 0.0)                  # (T*V, CC), ReLU

    sd_acc = jnp.dot(rows_sc[K - 1], theta_sd_ref[0], preferred_element_type=f32)
    for k in range(1, K):
        sd_acc = sd_acc + jnp.dot(rows_sc[K - 1 + k], theta_sd_ref[k],
                                  preferred_element_type=f32)
    sd_feat = jnp.maximum(sd_acc, 0.0)                  # (T*V, CC), ReLU

    # ---------------- time conv ('same' over T) + LayerNorm(CT) ----------------
    def time_conv_layernorm(y, w_ref, b_ref, g_ref, beta_ref, out_ref):
        pad = (KT - 1) // 2
        conv_sc[...] = jnp.broadcast_to(b_ref[...], (T * V, CT))
        for j in range(KT):
            sft = j - pad                               # tap j reads time t + sft
            lo = max(0, -sft)
            hi = T - max(0, sft)
            conv_sc[lo * V:hi * V, :] = (
                conv_sc[lo * V:hi * V, :]
                + jnp.dot(y[(lo + sft) * V:(hi + sft) * V, :], w_ref[j],
                          preferred_element_type=f32))
        acc = conv_sc[...]                              # (T*V, CT)
        mean = jnp.mean(acc, axis=-1, keepdims=True)
        var = jnp.mean((acc - mean) ** 2, axis=-1, keepdims=True)
        out_ref[0] = ((acc - mean) * jax.lax.rsqrt(var + EPS)) * g_ref[...] + beta_ref[...]

    time_conv_layernorm(gl_feat, tc_gl_w_ref, tc_gl_b_ref, ln_gl_g_ref, ln_gl_b_ref,
                        out_gl_ref)
    time_conv_layernorm(sd_feat, tc_sd_w_ref, tc_sd_b_ref, ln_sd_g_ref, ln_sd_b_ref,
                        out_sd_ref)


def mstgcn_block(x4, x_vft, p):
    def const_spec(arr):
        nd = arr.ndim
        return pl.BlockSpec(arr.shape, lambda b, _n=nd: (0,) * _n)

    in_specs = [
        pl.BlockSpec((1, T, V, NF), lambda b: (b, 0, 0, 0)),
        pl.BlockSpec((1, V * NF, T), lambda b: (b, 0, 0)),
    ] + [const_spec(p[name]) for name in PARAM_ORDER]

    return pl.pallas_call(
        _mstgcn_block_kernel,
        out_shape=(jax.ShapeDtypeStruct((B, T * V, CT), jnp.float32),
                   jax.ShapeDtypeStruct((B, T * V, CT), jnp.float32)),
        grid=(B,),
        in_specs=in_specs,
        out_specs=(pl.BlockSpec((1, T * V, CT), lambda b: (b, 0, 0)),
                   pl.BlockSpec((1, T * V, CT), lambda b: (b, 0, 0))),
        scratch_shapes=[
            pltpu.VMEM((2 * K - 1, T * V, NF), jnp.float32),   # Chebyshev row blocks
            pltpu.VMEM((T * V, CT), jnp.float32),              # time-conv accumulator
        ],
        compiler_params=pltpu.CompilerParams(
            dimension_semantics=("parallel",),                 # v7x: one batch elem / core
            vmem_limit_bytes=16 * 1024 * 1024),
    )(x4, x_vft, *[p[name] for name in PARAM_ORDER])


# =====================  fused feature/domain classifier kernel  =====================

def _classifier_kernel(act_ref, w1_ref, b1_ref, w2f_ref, b2f_ref, w2d_ref, b2d_ref,
                       feat_ref, dom_ref, acc_sc):
    """K-tiled (B, D) @ (D, 2*HP) with bf16 weights, then two small f32 heads."""
    kk = pl.program_id(0)

    @pl.when(kk == 0)
    def _():
        acc_sc[...] = jnp.broadcast_to(b1_ref[...], (B, 2 * HP))

    acc_sc[...] += jnp.dot(act_ref[...].astype(jnp.bfloat16), w1_ref[...],
                           preferred_element_type=jnp.float32)

    @pl.when(kk == pl.num_programs(0) - 1)
    def _():
        h = jnp.maximum(acc_sc[...], 0.0)                       # (B, 2*HP)
        feat_ref[...] = jnp.dot(h[:, :HP], w2f_ref[...],
                                preferred_element_type=jnp.float32) + b2f_ref[...]
        dom_ref[...] = jnp.dot(h[:, HP:], w2d_ref[...],
                               preferred_element_type=jnp.float32) + b2d_ref[...]


def classifiers(block_out, p):
    def const_spec(arr):
        nd = arr.ndim
        return pl.BlockSpec(arr.shape, lambda k, _n=nd: (0,) * _n)

    return pl.pallas_call(
        _classifier_kernel,
        out_shape=(jax.ShapeDtypeStruct((B, NCLASS), jnp.float32),
                   jax.ShapeDtypeStruct((B, NDOM), jnp.float32)),
        grid=(D // TK,),
        in_specs=[
            pl.BlockSpec((B, TK), lambda k: (0, k)),
            pl.BlockSpec((TK, 2 * HP), lambda k: (k, 0)),
            const_spec(p["cls_b1"]),
            const_spec(p["fc_w2"]), const_spec(p["fc_b2"]),
            const_spec(p["dc_w2"]), const_spec(p["dc_b2"]),
        ],
        out_specs=(pl.BlockSpec((B, NCLASS), lambda k: (0, 0)),
                   pl.BlockSpec((B, NDOM), lambda k: (0, 0))),
        scratch_shapes=[pltpu.VMEM((B, 2 * HP), jnp.float32)],
        compiler_params=pltpu.CompilerParams(
            dimension_semantics=("arbitrary",),                # reduction over K tiles
            vmem_limit_bytes=16 * 1024 * 1024),
    )(block_out, p["cls_w1"], p["cls_b1"], p["fc_w2"], p["fc_b2"],
      p["dc_w2"], p["dc_b2"])


# =====================  model (glue)  =====================

def mstgcn_forward(x, p):
    # x: (B, T*V, NF)
    # TODO(synk): the original `x.view(B, T, V, Fea)` is only shape-consistent for T==1;
    # we perform the intended reshape of a (B, T*V, F) input to (B, T, V, F).
    x4 = x.reshape(B, T, V, NF)
    # reshape_dot input (B, V*F, T); tiny one-off XLA transpose (8 KB) feeding the
    # fused kernel -- kept outside to avoid an in-kernel major<->minor relayout.
    x_vft = jnp.transpose(x4, (0, 2, 3, 1)).reshape(B, V * NF, T)
    out_gl, out_sd = mstgcn_block(x4, x_vft, p)                 # each (B, T*V, CT)
    # torch: cat([GL, SD], dim=1).view(B, -1)  (row-major flatten matches this layout)
    block_out = jnp.concatenate([out_gl.reshape(B, T * V * CT),
                                 out_sd.reshape(B, T * V * CT)], axis=1)   # (B, D)
    # TODO(synk): F.dropout(block_out, 0.5) is training-only -> identity; GRL fwd = identity.
    feature_out, domain_out = classifiers(block_out, p)
    return feature_out, domain_out


# =====================  deterministic parameter init  =====================

def chebyshev_polynomials():
    idx = jnp.arange(V)
    dist = jnp.abs(idx[:, None] - idx[None, :])
    A = ((dist == 1) | (dist == V - 1)).astype(jnp.float32)     # ring graph adjacency
    L = jnp.diag(jnp.sum(A, axis=1)) - A
    L_t = L - jnp.eye(V, dtype=jnp.float32)                     # 2*L/lambda_max - I
    polys = [jnp.eye(V, dtype=jnp.float32), L_t]
    for _ in range(2, K):
        polys.append(2.0 * (L_t @ polys[-1]) - polys[-2])
    return jnp.stack(polys[:K])                                  # (K, V, V)


def init_params(key):
    ks = jax.random.split(key, 24)
    u = lambda k, s: jax.random.uniform(k, s, jnp.float32)
    n = lambda k, s: jax.random.normal(k, s, jnp.float32)
    p = {}
    # TemporalAttention
    p["ta_u1"] = u(ks[0], (V, 1))
    p["ta_u2"] = u(ks[1], (NF, V))
    p["ta_u3"] = u(ks[2], (1, NF))
    p["ta_be"] = u(ks[3], (T, T))
    p["ta_ve"] = u(ks[4], (T, T))
    # SpatialAttention
    p["sa_w1"] = u(ks[5], (T, 1))
    p["sa_w2"] = u(ks[6], (NF, T))
    p["sa_w3"] = u(ks[7], (1, NF))
    p["sa_bs"] = u(ks[8], (V, V))
    p["sa_vs"] = u(ks[9], (V, V))
    # Graph_Learn
    p["gl_a"] = u(ks[10], (1, NF))
    # Cheb convs
    p["theta_gl"] = jax.random.uniform(ks[11], (K, NF, CC), jnp.float32, -1.0, 1.0)
    p["theta_sd"] = n(ks[12], (K, NF, CC))
    p["cheb"] = chebyshev_polynomials()
    # time convs (weight stored as (KT, C_in, C_out) == conv_w[co, ci, j, 0] transposed)
    p["tc_gl_w"] = n(ks[13], (KT, CC, CT)) * 0.1
    p["tc_gl_b"] = n(ks[14], (1, CT)) * 0.1
    p["tc_sd_w"] = n(ks[15], (KT, CC, CT)) * 0.1
    p["tc_sd_b"] = n(ks[16], (1, CT)) * 0.1
    # LayerNorms (PyTorch default init)
    p["ln_gl_g"] = jnp.ones((1, CT), jnp.float32)
    p["ln_gl_b"] = jnp.zeros((1, CT), jnp.float32)
    p["ln_sd_g"] = jnp.ones((1, CT), jnp.float32)
    p["ln_sd_b"] = jnp.zeros((1, CT), jnp.float32)
    # classifiers: feature and domain heads fused, hidden padded 100 -> 128,
    # big first-layer weights quantised to bf16 (f32 accumulation in the kernel).
    fc_w1 = n(ks[17], (D, HID)) * 0.02
    dc_w1 = n(ks[19], (D, HID)) * 0.02
    w1 = jnp.zeros((D, 2 * HP), jnp.float32)
    w1 = w1.at[:, :HID].set(fc_w1).at[:, HP:HP + HID].set(dc_w1)
    p["cls_w1"] = w1.astype(jnp.bfloat16)
    p["cls_b1"] = jnp.zeros((1, 2 * HP), jnp.float32)
    fc_w2 = n(ks[18], (HID, NCLASS)) * 0.02
    p["fc_w2"] = jnp.zeros((HP, NCLASS), jnp.float32).at[:HID, :].set(fc_w2)
    p["fc_b2"] = jnp.zeros((1, NCLASS), jnp.float32)
    dc_w2 = n(ks[20], (HID, NDOM)) * 0.02
    p["dc_w2"] = jnp.zeros((HP, NDOM), jnp.float32).at[:HID, :].set(dc_w2)
    p["dc_b2"] = jnp.zeros((1, NDOM), jnp.float32)
    return p


if __name__ == "__main__":
    key = jax.random.PRNGKey(0)
    pkey, xkey = jax.random.split(key)
    params = init_params(pkey)
    x = jax.random.normal(xkey, (B, T * V, NF), jnp.float32)

    fwd = jax.jit(mstgcn_forward)
    feat, dom = fwd(x, params)
    jax.block_until_ready((feat, dom))

    assert feat.shape == (B, NCLASS) and dom.shape == (B, NDOM)
    assert bool(jnp.all(jnp.isfinite(feat))) and bool(jnp.all(jnp.isfinite(dom)))
    print("KERNEL_OK")
</pallas_src>

<mosaic_0001>
module attributes {stable_mosaic.version = 11 : i64} {
  func.func @_classifier_kernel(%arg0: i32, %arg1: memref<2x512xf32, #tpu.memory_space<vmem>>, %arg2: memref<512x256xbf16, #tpu.memory_space<vmem>>, %arg3: memref<1x256xf32, #tpu.memory_space<vmem>>, %arg4: memref<128x5xf32, #tpu.memory_space<vmem>>, %arg5: memref<1x5xf32, #tpu.memory_space<vmem>>, %arg6: memref<128x3xf32, #tpu.memory_space<vmem>>, %arg7: memref<1x3xf32, #tpu.memory_space<vmem>>, %arg8: memref<2x5xf32, #tpu.memory_space<vmem>>, %arg9: memref<2x3xf32, #tpu.memory_space<vmem>>, %arg10: memref<2x256xf32, #tpu.memory_space<vmem>>) attributes {dimension_semantics = [#tpu.dimension_semantics<arbitrary>], iteration_bounds = array<i64: 8>, scalar_prefetch = 0 : i64, scratch_operands = 1 : i64, tpu.core_type = #tpu.core_type<tc>, window_params = [{transform_indices = @transform_0, window_bounds = array<i64: 2, 512>}, {transform_indices = @transform_1, window_bounds = array<i64: 512, 256>}, {pipeline_mode = #tpu.pipeline_mode<synchronous>, transform_indices = @transform_2, window_bounds = array<i64: 1, 256>}, {pipeline_mode = #tpu.pipeline_mode<synchronous>, transform_indices = @transform_3, window_bounds = array<i64: 128, 5>}, {pipeline_mode = #tpu.pipeline_mode<synchronous>, transform_indices = @transform_4, window_bounds = array<i64: 1, 5>}, {pipeline_mode = #tpu.pipeline_mode<synchronous>, transform_indices = @transform_5, window_bounds = array<i64: 128, 3>}, {pipeline_mode = #tpu.pipeline_mode<synchronous>, transform_indices = @transform_6, window_bounds = array<i64: 1, 3>}, {pipeline_mode = #tpu.pipeline_mode<synchronous>, transform_indices = @transform_7, window_bounds = array<i64: 2, 5>}, {pipeline_mode = #tpu.pipeline_mode<synchronous>, transform_indices = @transform_8, window_bounds = array<i64: 2, 3>}]} {
    %c0_i32 = arith.constant 0 : i32
    %0 = arith.cmpi eq, %arg0, %c0_i32 : i32
    %1 = arith.extui %0 : i1 to i32
    %c0_i32_0 = arith.constant 0 : i32
    %2 = arith.cmpi ne, %1, %c0_i32_0 : i32
    scf.if %2 {
      %c0_9 = arith.constant 0 : index
      %c0_10 = arith.constant 0 : index
      %13 = vector.load %arg3[%c0_9, %c0_10] : memref<1x256xf32, #tpu.memory_space<vmem>>, vector<1x256xf32>
      %14 = vector.shape_cast %13 : vector<1x256xf32> to vector<1x256xf32>
      %15 = vector.broadcast %14 : vector<1x256xf32> to vector<2x256xf32>
      %c0_11 = arith.constant 0 : index
      %c0_12 = arith.constant 0 : index
      %16 = vector.load %arg10[%c0_11, %c0_12] : memref<2x256xf32, #tpu.memory_space<vmem>>, vector<2x256xf32>
      tpu.vector_store %arg10[%c0_11, %c0_12], %15 {strides = array<i32>} : memref<2x256xf32, #tpu.memory_space<vmem>>, vector<2x256xf32>,
    } else {
    }
    %c0 = arith.constant 0 : index
    %c0_1 = arith.constant 0 : index
    %3 = vector.load %arg10[%c0, %c0_1] : memref<2x256xf32, #tpu.memory_space<vmem>>, vector<2x256xf32>
    %c0_2 = arith.constant 0 : index
    %c0_3 = arith.constant 0 : index
    %4 = vector.load %arg1[%c0_2, %c0_3] : memref<2x512xf32, #tpu.memory_space<vmem>>, vector<2x512xf32>
    %5 = arith.truncf %4 : vector<2x512xf32> to vector<2x512xbf16>
    %c0_4 = arith.constant 0 : index
    %c0_5 = arith.constant 0 : index
    %6 = vector.load %arg2[%c0_4, %c0_5] : memref<512x256xbf16, #tpu.memory_space<vmem>>, vector<512x256xbf16>
    %cst = arith.constant dense<0.000000e+00> : vector<2x256xf32>
    %7 = tpu.matmul %5, %6, %cst {dimension_numbers = #tpu.dot_dimension_numbers<[1], [0], [0], [1], [0, 0, 1, 1], [], []>} : vector<2x512xbf16>, vector<512x256xbf16>, vector<2x256xf32> -> vector<2x256xf32>
    %8 = arith.addf %3, %7 : vector<2x256xf32>
    %c0_6 = arith.constant 0 : index
    %c0_7 = arith.constant 0 : index
    %9 = vector.load %arg10[%c0_6, %c0_7] : memref<2x256xf32, #tpu.memory_space<vmem>>, vector<2x256xf32>
    tpu.vector_store %arg10[%c0_6, %c0_7], %8 {strides = array<i32>} : memref<2x256xf32, #tpu.memory_space<vmem>>, vector<2x256xf32>,
    %c7_i32 = arith.constant 7 : i32
    %10 = arith.cmpi eq, %arg0, %c7_i32 : i32
    %11 = arith.extui %10 : i1 to i32
    %c0_i32_8 = arith.constant 0 : i32
    %12 = arith.cmpi ne, %11, %c0_i32_8 : i32
    scf.if %12 {
      %c0_9 = arith.constant 0 : index
      %c0_10 = arith.constant 0 : index
      %13 = vector.load %arg10[%c0_9, %c0_10] : memref<2x256xf32, #tpu.memory_space<vmem>>, vector<2x256xf32>
      %cst_11 = arith.constant 0.000000e+00 : f32
      %14 = vector.broadcast %cst_11 : f32 to vector<2x256xf32>
      %15 = arith.maximumf %13, %14 : vector<2x256xf32>
      %16 = vector.extract_strided_slice %15 {offsets = [0, 0], sizes = [2, 128], strides = [1, 1]} : vector<2x256xf32> to vector<2x128xf32>
      %c0_12 = arith.constant 0 : index
      %c0_13 = arith.constant 0 : index
      %17 = vector.load %arg4[%c0_12, %c0_13] : memref<128x5xf32, #tpu.memory_space<vmem>>, vector<128x5xf32>
      %cst_14 = arith.constant dense<0.000000e+00> : vector<2x5xf32>
      %18 = tpu.matmul %16, %17, %cst_14 {dimension_numbers = #tpu.dot_dimension_numbers<[1], [0], [0], [1], [0, 0, 1, 1], [], []>} : vector<2x128xf32>, vector<128x5xf32>, vector<2x5xf32> -> vector<2x5xf32>
      %c0_15 = arith.constant 0 : index
      %c0_16 = arith.constant 0 : index
      %19 = vector.load %arg5[%c0_15, %c0_16] : memref<1x5xf32, #tpu.memory_space<vmem>>, vector<1x5xf32>
      %20 = vector.broadcast %19 : vector<1x5xf32> to vector<2x5xf32>
      %21 = arith.addf %18, %20 : vector<2x5xf32>
      %c0_17 = arith.constant 0 : index
      %c0_18 = arith.constant 0 : index
      %22 = vector.load %arg8[%c0_17, %c0_18] : memref<2x5xf32, #tpu.memory_space<vmem>>, vector<2x5xf32>
      tpu.vector_store %arg8[%c0_17, %c0_18], %21 {strides = array<i32>} : memref<2x5xf32, #tpu.memory_space<vmem>>, vector<2x5xf32>,
      %23 = vector.extract_strided_slice %15 {offsets = [0, 128], sizes = [2, 128], strides = [1, 1]} : vector<2x256xf32> to vector<2x128xf32>
      %c0_19 = arith.constant 0 : index
      %c0_20 = arith.constant 0 : index
      %24 = vector.load %arg6[%c0_19, %c0_20] : memref<128x3xf32, #tpu.memory_space<vmem>>, vector<128x3xf32>
      %cst_21 = arith.constant dense<0.000000e+00> : vector<2x3xf32>
      %25 = tpu.matmul %23, %24, %cst_21 {dimension_numbers = #tpu.dot_dimension_numbers<[1], [0], [0], [1], [0, 0, 1, 1], [], []>} : vector<2x128xf32>, vector<128x3xf32>, vector<2x3xf32> -> vector<2x3xf32>
      %c0_22 = arith.constant 0 : index
      %c0_23 = arith.constant 0 : index
      %26 = vector.load %arg7[%c0_22, %c0_23] : memref<1x3xf32, #tpu.memory_space<vmem>>, vector<1x3xf32>
      %27 = vector.broadcast %26 : vector<1x3xf32> to vector<2x3xf32>
      %28 = arith.addf %25, %27 : vector<2x3xf32>
      %c0_24 = arith.constant 0 : index
      %c0_25 = arith.constant 0 : index
      %29 = vector.load %arg9[%c0_24, %c0_25] : memref<2x3xf32, #tpu.memory_space<vmem>>, vector<2x3xf32>
      tpu.vector_store %arg9[%c0_24, %c0_25], %28 {strides = array<i32>} : memref<2x3xf32, #tpu.memory_space<vmem>>, vector<2x3xf32>,
    } else {
    }
    return
  }
  func.func @transform_0(%arg0: i32) -> (i32, i32) {
    %c0_i32 = arith.constant 0 : i32
    %c0_i32_0 = arith.constant 0 : i32
    return %c0_i32, %arg0 : i32, i32
  }
  func.func @transform_1(%arg0: i32) -> (i32, i32) {
    %c0_i32 = arith.constant 0 : i32
    %c0_i32_0 = arith.constant 0 : i32
    return %arg0, %c0_i32 : i32, i32
  }
  func.func @transform_2(%arg0: i32) -> (i32, i32) {
    %c0_i32 = arith.constant 0 : i32
    %c0_i32_0 = arith.constant 0 : i32
    %c0_i32_1 = arith.constant 0 : i32
    return %c0_i32, %c0_i32_0 : i32, i32
  }
  func.func @transform_3(%arg0: i32) -> (i32, i32) {
    %c0_i32 = arith.constant 0 : i32
    %c0_i32_0 = arith.constant 0 : i32
    %c0_i32_1 = arith.constant 0 : i32
    return %c0_i32, %c0_i32_0 : i32, i32
  }
  func.func @transform_4(%arg0: i32) -> (i32, i32) {
    %c0_i32 = arith.constant 0 : i32
    %c0_i32_0 = arith.constant 0 : i32
    %c0_i32_1 = arith.constant 0 : i32
    return %c0_i32, %c0_i32_0 : i32, i32
  }
  func.func @transform_5(%arg0: i32) -> (i32, i32) {
    %c0_i32 = arith.constant 0 : i32
    %c0_i32_0 = arith.constant 0 : i32
    %c0_i32_1 = arith.constant 0 : i32
    return %c0_i32, %c0_i32_0 : i32, i32
  }
  func.func @transform_6(%arg0: i32) -> (i32, i32) {
    %c0_i32 = arith.constant 0 : i32
    %c0_i32_0 = arith.constant 0 : i32
    %c0_i32_1 = arith.constant 0 : i32
    return %c0_i32, %c0_i32_0 : i32, i32
  }
  func.func @transform_7(%arg0: i32) -> (i32, i32) {
    %c0_i32 = arith.constant 0 : i32
    %c0_i32_0 = arith.constant 0 : i32
    %c0_i32_1 = arith.constant 0 : i32
    return %c0_i32, %c0_i32_0 : i32, i32
  }
  func.func @transform_8(%arg0: i32) -> (i32, i32) {
    %c0_i32 = arith.constant 0 : i32
    %c0_i32_0 = arith.constant 0 : i32
    %c0_i32_1 = arith.constant 0 : i32
    return %c0_i32, %c0_i32_0 : i32, i32
  }
}

module attributes {stable_mosaic.version = 11 : i64} {
  func.func @_mstgcn_block_kernel(%arg0: i32, %arg1: memref<1x8x16x8xf32, #tpu.memory_space<vmem>>, %arg2: memref<1x128x8xf32, #tpu.memory_space<vmem>>, %arg3: memref<16x1xf32, #tpu.memory_space<vmem>>, %arg4: memref<8x16xf32, #tpu.memory_space<vmem>>, %arg5: memref<1x8xf32, #tpu.memory_space<vmem>>, %arg6: memref<8x8xf32, #tpu.memory_space<vmem>>, %arg7: memref<8x8xf32, #tpu.memory_space<vmem>>, %arg8: memref<8x1xf32, #tpu.memory_space<vmem>>, %arg9: memref<8x8xf32, #tpu.memory_space<vmem>>, %arg10: memref<1x8xf32, #tpu.memory_space<vmem>>, %arg11: memref<16x16xf32, #tpu.memory_space<vmem>>, %arg12: memref<16x16xf32, #tpu.memory_space<vmem>>, %arg13: memref<1x8xf32, #tpu.memory_space<vmem>>, %arg14: memref<3x8x16xf32, #tpu.memory_space<vmem>>, %arg15: memref<3x8x16xf32, #tpu.memory_space<vmem>>, %arg16: memref<3x16x16xf32, #tpu.memory_space<vmem>>, %arg17: memref<3x16x16xf32, #tpu.memory_space<vmem>>, %arg18: memref<1x16xf32, #tpu.memory_space<vmem>>, %arg19: memref<1x16xf32, #tpu.memory_space<vmem>>, %arg20: memref<1x16xf32, #tpu.memory_space<vmem>>, %arg21: memref<3x16x16xf32, #tpu.memory_space<vmem>>, %arg22: memref<1x16xf32, #tpu.memory_space<vmem>>, %arg23: memref<1x16xf32, #tpu.memory_space<vmem>>, %arg24: memref<1x16xf32, #tpu.memory_space<vmem>>, %arg25: memref<1x128x16xf32, #tpu.memory_space<vmem>>, %arg26: memref<1x128x16xf32, #tpu.memory_space<vmem>>, %arg27: memref<5x128x8xf32, #tpu.memory_space<vmem>>, %arg28: memref<128x16xf32, #tpu.memory_space<vmem>>) attributes {dimension_semantics = [#tpu.dimension_semantics<parallel>], iteration_bounds = array<i64: 2>, scalar_prefetch = 0 : i64, scratch_operands = 2 : i64, tpu.core_type = #tpu.core_type<tc>, window_params = [{transform_indices = @transform_0, window_bounds = array<i64: 1, 8, 16, 8>}, {transform_indices = @transform_1, window_bounds = array<i64: 1, 128, 8>}, {pipeline_mode = #tpu.pipeline_mode<synchronous>, transform_indices = @transform_2, window_bounds = array<i64: 16, 1>}, {pipeline_mode = #tpu.pipeline_mode<synchronous>, transform_indices = @transform_3, window_bounds = array<i64: 8, 16>}, {pipeline_mode = #tpu.pipeline_mode<synchronous>, transform_indices = @transform_4, window_bounds = array<i64: 1, 8>}, {pipeline_mode = #tpu.pipeline_mode<synchronous>, transform_indices = @transform_5, window_bounds = array<i64: 8, 8>}, {pipeline_mode = #tpu.pipeline_mode<synchronous>, transform_indices = @transform_6, window_bounds = array<i64: 8, 8>}, {pipeline_mode = #tpu.pipeline_mode<synchronous>, transform_indices = @transform_7, window_bounds = array<i64: 8, 1>}, {pipeline_mode = #tpu.pipeline_mode<synchronous>, transform_indices = @transform_8, window_bounds = array<i64: 8, 8>}, {pipeline_mode = #tpu.pipeline_mode<synchronous>, transform_indices = @transform_9, window_bounds = array<i64: 1, 8>}, {pipeline_mode = #tpu.pipeline_mode<synchronous>, transform_indices = @transform_10, window_bounds = array<i64: 16, 16>}, {pipeline_mode = #tpu.pipeline_mode<synchronous>, transform_indices = @transform_11, window_bounds = array<i64: 16, 16>}, {pipeline_mode = #tpu.pipeline_mode<synchronous>, transform_indices = @transform_12, window_bounds = array<i64: 1, 8>}, {pipeline_mode = #tpu.pipeline_mode<synchronous>, transform_indices = @transform_13, window_bounds = array<i64: 3, 8, 16>}, {pipeline_mode = #tpu.pipeline_mode<synchronous>, transform_indices = @transform_14, window_bounds = array<i64: 3, 8, 16>}, {pipeline_mode = #tpu.pipeline_mode<synchronous>, transform_indices = @transform_15, window_bounds = array<i64: 3, 16, 16>}, {pipeline_mode = #tpu.pipeline_mode<synchronous>, transform_indices = @transform_16, window_bounds = array<i64: 3, 16, 16>}, {pipeline_mode = #tpu.pipeline_mode<synchronous>, transform_indices = @transform_17, window_bounds = array<i64: 1, 16>}, {pipeline_mode = #tpu.pipeline_mode<synchronous>, transform_indices = @transform_18, window_bounds = array<i64: 1, 16>}, {pipeline_mode = #tpu.pipeline_mode<synchronous>, transform_indices = @transform_19, window_bounds = array<i64: 1, 16>}, {pipeline_mode = #tpu.pipeline_mode<synchronous>, transform_indices = @transform_20, window_bounds = array<i64: 3, 16, 16>}, {pipeline_mode = #tpu.pipeline_mode<synchronous>, transform_indices = @transform_21, window_bounds = array<i64: 1, 16>}, {pipeline_mode = #tpu.pipeline_mode<synchronous>, transform_indices = @transform_22, window_bounds = array<i64: 1, 16>}, {pipeline_mode = #tpu.pipeline_mode<synchronous>, transform_indices = @transform_23, window_bounds = array<i64: 1, 16>}, {transform_indices = @transform_24, window_bounds = array<i64: 1, 128, 16>}, {transform_indices = @transform_25, window_bounds = array<i64: 1, 128, 16>}]} {
    %c0 = arith.constant 0 : index
    %c0_0 = arith.constant 0 : index
    %c0_1 = arith.constant 0 : index
    %c0_2 = arith.constant 0 : index
    %0 = vector.load %arg1[%c0, %c0_0, %c0_1, %c0_2] : memref<1x8x16x8xf32, #tpu.memory_space<vmem>>, vector<1x8x16x8xf32>
    %1 = vector.shape_cast %0 : vector<1x8x16x8xf32> to vector<8x16x8xf32>
    %c0_3 = arith.constant 0 : index
    %c0_4 = arith.constant 0 : index
    %2 = vector.load %arg3[%c0_3, %c0_4] : memref<16x1xf32, #tpu.memory_space<vmem>>, vector<16x1xf32>
    %c0_5 = arith.constant 0 : index
    %c0_6 = arith.constant 0 : index
    %3 = vector.load %arg5[%c0_5, %c0_6] : memref<1x8xf32, #tpu.memory_space<vmem>>, vector<1x8xf32>
    %4 = vector.shape_cast %2 : vector<16x1xf32> to vector<1x16x1xf32>
    %5 = vector.broadcast %4 : vector<1x16x1xf32> to vector<8x16x8xf32>
    %6 = arith.mulf %1, %5 : vector<8x16x8xf32>
    %cst = arith.constant dense<0.000000e+00> : vector<8x8xf32>
    %7 = vector.multi_reduction <add>, %6, %cst [1] : vector<8x16x8xf32> to vector<8x8xf32>
    %c0_7 = arith.constant 0 : index
    %c0_8 = arith.constant 0 : index
    %8 = vector.load %arg4[%c0_7, %c0_8] : memref<8x16xf32, #tpu.memory_space<vmem>>, vector<8x16xf32>
    %cst_9 = arith.constant dense<0.000000e+00> : vector<8x16xf32>
    %9 = tpu.matmul %7, %8, %cst_9 {dimension_numbers = #tpu.dot_dimension_numbers<[1], [0], [0], [1], [0, 0, 1, 1], [], []>} : vector<8x8xf32>, vector<8x16xf32>, vector<8x16xf32> -> vector<8x16xf32>
    %10 = vector.shape_cast %3 : vector<1x8xf32> to vector<1x1x8xf32>
    %11 = vector.broadcast %10 : vector<1x1x8xf32> to vector<8x16x8xf32>
    %12 = arith.mulf %1, %11 : vector<8x16x8xf32>
    %cst_10 = arith.constant dense<0.000000e+00> : vector<8x16xf32>
    %13 = vector.multi_reduction <add>, %12, %cst_10 [2] : vector<8x16x8xf32> to vector<8x16xf32>
    %cst_11 = arith.constant dense<0.000000e+00> : vector<8x8xf32>
    %14 = tpu.matmul %9, %13, %cst_11 {dimension_numbers = #tpu.dot_dimension_numbers<[1], [1], [0], [0], [0, 0, 1, 0], [], []>} : vector<8x16xf32>, vector<8x16xf32>, vector<8x8xf32> -> vector<8x8xf32>
    %c0_12 = arith.constant 0 : index
    %c0_13 = arith.constant 0 : index
    %15 = vector.load %arg6[%c0_12, %c0_13] : memref<8x8xf32, #tpu.memory_space<vmem>>, vector<8x8xf32>
    %16 = arith.addf %14, %15 : vector<8x8xf32>
    %17 = arith.negf %16 : vector<8x8xf32>
    %18 = math.exp %17 : vector<8x8xf32>
    %cst_14 = arith.constant 1.000000e+00 : f32
    %19 = vector.broadcast %cst_14 : f32 to vector<8x8xf32>
    %20 = arith.addf %19, %18 : vector<8x8xf32>
    %21 = arith.divf %19, %20 : vector<8x8xf32>
    %c0_15 = arith.constant 0 : index
    %c0_16 = arith.constant 0 : index
    %22 = vector.load %arg7[%c0_15, %c0_16] : memref<8x8xf32, #tpu.memory_space<vmem>>, vector<8x8xf32>
    %cst_17 = arith.constant dense<0.000000e+00> : vector<8x8xf32>
    %23 = tpu.matmul %21, %22, %cst_17 {dimension_numbers = #tpu.dot_dimension_numbers<[1], [1], [0], [0], [0, 0, 1, 0], [], []>} : vector<8x8xf32>, vector<8x8xf32>, vector<8x8xf32> -> vector<8x8xf32>
    %cst_18 = arith.constant dense<0xFF800000> : vector<8xf32>
    %24 = vector.multi_reduction <maximumf>, %23, %cst_18 [0] : vector<8x8xf32> to vector<8xf32>
    %25 = vector.shape_cast %24 : vector<8xf32> to vector<1x8xf32>
    %26 = vector.broadcast %25 : vector<1x8xf32> to vector<8x8xf32>
    %27 = arith.subf %23, %26 : vector<8x8xf32>
    %28 = math.exp %27 : vector<8x8xf32>
    %cst_19 = arith.constant dense<0.000000e+00> : vector<8xf32>
    %29 = vector.multi_reduction <add>, %28, %cst_19 [0] : vector<8x8xf32> to vector<8xf32>
    %30 = vector.shape_cast %29 : vector<8xf32> to vector<1x8xf32>
    %31 = vector.broadcast %30 : vector<1x8xf32> to vector<8x8xf32>
    %32 = arith.divf %28, %31 : vector<8x8xf32>
    %c0_20 = arith.constant 0 : index
    %c0_21 = arith.constant 0 : index
    %c0_22 = arith.constant 0 : index
    %33 = vector.load %arg2[%c0_20, %c0_21, %c0_22] : memref<1x128x8xf32, #tpu.memory_space<vmem>>, vector<1x128x8xf32>
    %34 = vector.shape_cast %33 : vector<1x128x8xf32> to vector<128x8xf32>
    %cst_23 = arith.constant dense<0.000000e+00> : vector<128x8xf32>
    %35 = tpu.matmul %34, %32, %cst_23 {dimension_numbers = #tpu.dot_dimension_numbers<[1], [0], [0], [1], [0, 0, 1, 1], [], []>} : vector<128x8xf32>, vector<8x8xf32>, vector<128x8xf32> -> vector<128x8xf32>
    %c0_24 = arith.constant 0 : index
    %c0_25 = arith.constant 0 : index
    %36 = vector.load %arg8[%c0_24, %c0_25] : memref<8x1xf32, #tpu.memory_space<vmem>>, vector<8x1xf32>
    %c0_26 = arith.constant 0 : index
    %c0_27 = arith.constant 0 : index
    %37 = vector.load %arg10[%c0_26, %c0_27] : memref<1x8xf32, #tpu.memory_space<vmem>>, vector<1x8xf32>
    %38 = tpu.iota {dimensions = array<i32: 1>} : vector<16x8xi32>
    %cst_28 = arith.constant 0.000000e+00 : f32
    %39 = vector.broadcast %cst_28 : f32 to vector<16x8xf32>
    %cst_29 = arith.constant 0.000000e+00 : f32
    %40 = vector.broadcast %cst_29 : f32 to vector<16x8xf32>
    %41 = vector.extract_strided_slice %35 {offsets = [0, 0], sizes = [16, 8], strides = [1, 1]} : vector<128x8xf32> to vector<16x8xf32>
    %42 = vector.extract_strided_slice %36 {offsets = [0, 0], sizes = [1, 1], strides = [1, 1]} : vector<8x1xf32> to vector<1x1xf32>
    %43 = vector.broadcast %42 : vector<1x1xf32> to vector<16x8xf32>
    %44 = arith.mulf %43, %41 : vector<16x8xf32>
    %45 = arith.addf %39, %44 : vector<16x8xf32>
    %46 = vector.broadcast %37 : vector<1x8xf32> to vector<16x8xf32>
    %47 = arith.mulf %41, %46 : vector<16x8xf32>
    %cst_30 = arith.constant dense<0.000000e+00> : vector<16xf32>
    %48 = vector.multi_reduction <add>, %47, %cst_30 [1] : vector<16x8xf32> to vector<16xf32>
    %49 = vector.shape_cast %48 : vector<16xf32> to vector<16x1xf32>
    %c0_i32 = arith.constant 0 : i32
    %50 = vector.broadcast %c0_i32 : i32 to vector<16x8xi32>
    %51 = arith.cmpi eq, %38, %50 : vector<16x8xi32>
    %cst_31 = arith.constant 0.000000e+00 : f32
    %52 = vector.shape_cast %49 : vector<16x1xf32> to vector<16x1xf32>
    %53 = vector.broadcast %52 : vector<16x1xf32> to vector<16x8xf32>
    %54 = vector.broadcast %cst_31 : f32 to vector<16x8xf32>
    %55 = arith.select %51, %53, %54 : vector<16x8xi1>, vector<16x8xf32>
    %56 = arith.addf %40, %55 : vector<16x8xf32>
    %57 = vector.extract_strided_slice %35 {offsets = [16, 0], sizes = [16, 8], strides = [1, 1]} : vector<128x8xf32> to vector<16x8xf32>
    %58 = vector.extract_strided_slice %36 {offsets = [1, 0], sizes = [1, 1], strides = [1, 1]} : vector<8x1xf32> to vector<1x1xf32>
    %59 = vector.broadcast %58 : vector<1x1xf32> to vector<16x8xf32>
    %60 = arith.mulf %59, %57 : vector<16x8xf32>
    %61 = arith.addf %45, %60 : vector<16x8xf32>
    %62 = vector.broadcast %37 : vector<1x8xf32> to vector<16x8xf32>
    %63 = arith.mulf %57, %62 : vector<16x8xf32>
    %cst_32 = arith.constant dense<0.000000e+00> : vector<16xf32>
    %64 = vector.multi_reduction <add>, %63, %cst_32 [1] : vector<16x8xf32> to vector<16xf32>
    %65 = vector.shape_cast %64 : vector<16xf32> to vector<16x1xf32>
    %c1_i32 = arith.constant 1 : i32
    %66 = vector.broadcast %c1_i32 : i32 to vector<16x8xi32>
    %67 = arith.cmpi eq, %38, %66 : vector<16x8xi32>
    %cst_33 = arith.constant 0.000000e+00 : f32
    %68 = vector.shape_cast %65 : vector<16x1xf32> to vector<16x1xf32>
    %69 = vector.broadcast %68 : vector<16x1xf32> to vector<16x8xf32>
    %70 = vector.broadcast %cst_33 : f32 to vector<16x8xf32>
    %71 = arith.select %67, %69, %70 : vector<16x8xi1>, vector<16x8xf32>
    %72 = arith.addf %56, %71 : vector<16x8xf32>
    %73 = vector.extract_strided_slice %35 {offsets = [32, 0], sizes = [16, 8], strides = [1, 1]} : vector<128x8xf32> to vector<16x8xf32>
    %74 = vector.extract_strided_slice %36 {offsets = [2, 0], sizes = [1, 1], strides = [1, 1]} : vector<8x1xf32> to vector<1x1xf32>
    %75 = vector.broadcast %74 : vector<1x1xf32> to vector<16x8xf32>
    %76 = arith.mulf %75, %73 : vector<16x8xf32>
    %77 = arith.addf %61, %76 : vector<16x8xf32>
    %78 = vector.broadcast %37 : vector<1x8xf32> to vector<16x8xf32>
    %79 = arith.mulf %73, %78 : vector<16x8xf32>
    %cst_34 = arith.constant dense<0.000000e+00> : vector<16xf32>
    %80 = vector.multi_reduction <add>, %79, %cst_34 [1] : vector<16x8xf32> to vector<16xf32>
    %81 = vector.shape_cast %80 : vector<16xf32> to vector<16x1xf32>
    %c2_i32 = arith.constant 2 : i32
    %82 = vector.broadcast %c2_i32 : i32 to vector<16x8xi32>
    %83 = arith.cmpi eq, %38, %82 : vector<16x8xi32>
    %cst_35 = arith.constant 0.000000e+00 : f32
    %84 = vector.shape_cast %81 : vector<16x1xf32> to vector<16x1xf32>
    %85 = vector.broadcast %84 : vector<16x1xf32> to vector<16x8xf32>
    %86 = vector.broadcast %cst_35 : f32 to vector<16x8xf32>
    %87 = arith.select %83, %85, %86 : vector<16x8xi1>, vector<16x8xf32>
    %88 = arith.addf %72, %87 : vector<16x8xf32>
    %89 = vector.extract_strided_slice %35 {offsets = [48, 0], sizes = [16, 8], strides = [1, 1]} : vector<128x8xf32> to vector<16x8xf32>
    %90 = vector.extract_strided_slice %36 {offsets = [3, 0], sizes = [1, 1], strides = [1, 1]} : vector<8x1xf32> to vector<1x1xf32>
    %91 = vector.broadcast %90 : vector<1x1xf32> to vector<16x8xf32>
    %92 = arith.mulf %91, %89 : vector<16x8xf32>
    %93 = arith.addf %77, %92 : vector<16x8xf32>
    %94 = vector.broadcast %37 : vector<1x8xf32> to vector<16x8xf32>
    %95 = arith.mulf %89, %94 : vector<16x8xf32>
    %cst_36 = arith.constant dense<0.000000e+00> : vector<16xf32>
    %96 = vector.multi_reduction <add>, %95, %cst_36 [1] : vector<16x8xf32> to vector<16xf32>
    %97 = vector.shape_cast %96 : vector<16xf32> to vector<16x1xf32>
    %c3_i32 = arith.constant 3 : i32
    %98 = vector.broadcast %c3_i32 : i32 to vector<16x8xi32>
    %99 = arith.cmpi eq, %38, %98 : vector<16x8xi32>
    %cst_37 = arith.constant 0.000000e+00 : f32
    %100 = vector.shape_cast %97 : vector<16x1xf32> to vector<16x1xf32>
    %101 = vector.broadcast %100 : vector<16x1xf32> to vector<16x8xf32>
    %102 = vector.broadcast %cst_37 : f32 to vector<16x8xf32>
    %103 = arith.select %99, %101, %102 : vector<16x8xi1>, vector<16x8xf32>
    %104 = arith.addf %88, %103 : vector<16x8xf32>
    %105 = vector.extract_strided_slice %35 {offsets = [64, 0], sizes = [16, 8], strides = [1, 1]} : vector<128x8xf32> to vector<16x8xf32>
    %106 = vector.extract_strided_slice %36 {offsets = [4, 0], sizes = [1, 1], strides = [1, 1]} : vector<8x1xf32> to vector<1x1xf32>
    %107 = vector.broadcast %106 : vector<1x1xf32> to vector<16x8xf32>
    %108 = arith.mulf %107, %105 : vector<16x8xf32>
    %109 = arith.addf %93, %108 : vector<16x8xf32>
    %110 = vector.broadcast %37 : vector<1x8xf32> to vector<16x8xf32>
    %111 = arith.mulf %105, %110 : vector<16x8xf32>
    %cst_38 = arith.constant dense<0.000000e+00> : vector<16xf32>
    %112 = vector.multi_reduction <add>, %111, %cst_38 [1] : vector<16x8xf32> to vector<16xf32>
    %113 = vector.shape_cast %112 : vector<16xf32> to vector<16x1xf32>
    %c4_i32 = arith.constant 4 : i32
    %114 = vector.broadcast %c4_i32 : i32 to vector<16x8xi32>
    %115 = arith.cmpi eq, %38, %114 : vector<16x8xi32>
    %cst_39 = arith.constant 0.000000e+00 : f32
    %116 = vector.shape_cast %113 : vector<16x1xf32> to vector<16x1xf32>
    %117 = vector.broadcast %116 : vector<16x1xf32> to vector<16x8xf32>
    %118 = vector.broadcast %cst_39 : f32 to vector<16x8xf32>
    %119 = arith.select %115, %117, %118 : vector<16x8xi1>, vector<16x8xf32>
    %120 = arith.addf %104, %119 : vector<16x8xf32>
    %121 = vector.extract_strided_slice %35 {offsets = [80, 0], sizes = [16, 8], strides = [1, 1]} : vector<128x8xf32> to vector<16x8xf32>
    %122 = vector.extract_strided_slice %36 {offsets = [5, 0], sizes = [1, 1], strides = [1, 1]} : vector<8x1xf32> to vector<1x1xf32>
    %123 = vector.broadcast %122 : vector<1x1xf32> to vector<16x8xf32>
    %124 = arith.mulf %123, %121 : vector<16x8xf32>
    %125 = arith.addf %109, %124 : vector<16x8xf32>
    %126 = vector.broadcast %37 : vector<1x8xf32> to vector<16x8xf32>
    %127 = arith.mulf %121, %126 : vector<16x8xf32>
    %cst_40 = arith.constant dense<0.000000e+00> : vector<16xf32>
    %128 = vector.multi_reduction <add>, %127, %cst_40 [1] : vector<16x8xf32> to vector<16xf32>
    %129 = vector.shape_cast %128 : vector<16xf32> to vector<16x1xf32>
    %c5_i32 = arith.constant 5 : i32
    %130 = vector.broadcast %c5_i32 : i32 to vector<16x8xi32>
    %131 = arith.cmpi eq, %38, %130 : vector<16x8xi32>
    %cst_41 = arith.constant 0.000000e+00 : f32
    %132 = vector.shape_cast %129 : vector<16x1xf32> to vector<16x1xf32>
    %133 = vector.broadcast %132 : vector<16x1xf32> to vector<16x8xf32>
    %134 = vector.broadcast %cst_41 : f32 to vector<16x8xf32>
    %135 = arith.select %131, %133, %134 : vector<16x8xi1>, vector<16x8xf32>
    %136 = arith.addf %120, %135 : vector<16x8xf32>
    %137 = vector.extract_strided_slice %35 {offsets = [96, 0], sizes = [16, 8], strides = [1, 1]} : vector<128x8xf32> to vector<16x8xf32>
    %138 = vector.extract_strided_slice %36 {offsets = [6, 0], sizes = [1, 1], strides = [1, 1]} : vector<8x1xf32> to vector<1x1xf32>
    %139 = vector.broadcast %138 : vector<1x1xf32> to vector<16x8xf32>
    %140 = arith.mulf %139, %137 : vector<16x8xf32>
    %141 = arith.addf %125, %140 : vector<16x8xf32>
    %142 = vector.broadcast %37 : vector<1x8xf32> to vector<16x8xf32>
    %143 = arith.mulf %137, %142 : vector<16x8xf32>
    %cst_42 = arith.constant dense<0.000000e+00> : vector<16xf32>
    %144 = vector.multi_reduction <add>, %143, %cst_42 [1] : vector<16x8xf32> to vector<16xf32>
    %145 = vector.shape_cast %144 : vector<16xf32> to vector<16x1xf32>
    %c6_i32 = arith.constant 6 : i32
    %146 = vector.broadcast %c6_i32 : i32 to vector<16x8xi32>
    %147 = arith.cmpi eq, %38, %146 : vector<16x8xi32>
    %cst_43 = arith.constant 0.000000e+00 : f32
    %148 = vector.shape_cast %145 : vector<16x1xf32> to vector<16x1xf32>
    %149 = vector.broadcast %148 : vector<16x1xf32> to vector<16x8xf32>
    %150 = vector.broadcast %cst_43 : f32 to vector<16x8xf32>
    %151 = arith.select %147, %149, %150 : vector<16x8xi1>, vector<16x8xf32>
    %152 = arith.addf %136, %151 : vector<16x8xf32>
    %153 = vector.extract_strided_slice %35 {offsets = [112, 0], sizes = [16, 8], strides = [1, 1]} : vector<128x8xf32> to vector<16x8xf32>
    %154 = vector.extract_strided_slice %36 {offsets = [7, 0], sizes = [1, 1], strides = [1, 1]} : vector<8x1xf32> to vector<1x1xf32>
    %155 = vector.broadcast %154 : vector<1x1xf32> to vector<16x8xf32>
    %156 = arith.mulf %155, %153 : vector<16x8xf32>
    %157 = arith.addf %141, %156 : vector<16x8xf32>
    %158 = vector.broadcast %37 : vector<1x8xf32> to vector<16x8xf32>
    %159 = arith.mulf %153, %158 : vector<16x8xf32>
    %cst_44 = arith.constant dense<0.000000e+00> : vector<16xf32>
    %160 = vector.multi_reduction <add>, %159, %cst_44 [1] : vector<16x8xf32> to vector<16xf32>
    %161 = vector.shape_cast %160 : vector<16xf32> to vector<16x1xf32>
    %c7_i32 = arith.constant 7 : i32
    %162 = vector.broadcast %c7_i32 : i32 to vector<16x8xi32>
    %163 = arith.cmpi eq, %38, %162 : vector<16x8xi32>
    %cst_45 = arith.constant 0.000000e+00 : f32
    %164 = vector.shape_cast %161 : vector<16x1xf32> to vector<16x1xf32>
    %165 = vector.broadcast %164 : vector<16x1xf32> to vector<16x8xf32>
    %166 = vector.broadcast %cst_45 : f32 to vector<16x8xf32>
    %167 = arith.select %163, %165, %166 : vector<16x8xi1>, vector<16x8xf32>
    %168 = arith.addf %152, %167 : vector<16x8xf32>
    %c0_46 = arith.constant 0 : index
    %c0_47 = arith.constant 0 : index
    %169 = vector.load %arg9[%c0_46, %c0_47] : memref<8x8xf32, #tpu.memory_space<vmem>>, vector<8x8xf32>
    %cst_48 = arith.constant dense<0.000000e+00> : vector<16x8xf32>
    %170 = tpu.matmul %157, %169, %cst_48 {dimension_numbers = #tpu.dot_dimension_numbers<[1], [0], [0], [1], [0, 0, 1, 1], [], []>} : vector<16x8xf32>, vector<8x8xf32>, vector<16x8xf32> -> vector<16x8xf32>
    %cst_49 = arith.constant dense<0.000000e+00> : vector<16x16xf32>
    %171 = tpu.matmul %170, %168, %cst_49 {dimension_numbers = #tpu.dot_dimension_numbers<[1], [1], [0], [0], [0, 0, 1, 0], [], []>} : vector<16x8xf32>, vector<16x8xf32>, vector<16x16xf32> -> vector<16x16xf32>
    %c0_50 = arith.constant 0 : index
    %c0_51 = arith.constant 0 : index
    %172 = vector.load %arg11[%c0_50, %c0_51] : memref<16x16xf32, #tpu.memory_space<vmem>>, vector<16x16xf32>
    %173 = arith.addf %171, %172 : vector<16x16xf32>
    %174 = arith.negf %173 : vector<16x16xf32>
    %175 = math.exp %174 : vector<16x16xf32>
    %cst_52 = arith.constant 1.000000e+00 : f32
    %176 = vector.broadcast %cst_52 : f32 to vector<16x16xf32>
    %177 = arith.addf %176, %175 : vector<16x16xf32>
    %178 = arith.divf %176, %177 : vector<16x16xf32>
    %c0_53 = arith.constant 0 : index
    %c0_54 = arith.constant 0 : index
    %179 = vector.load %arg12[%c0_53, %c0_54] : memref<16x16xf32, #tpu.memory_space<vmem>>, vector<16x16xf32>
    %cst_55 = arith.constant dense<0.000000e+00> : vector<16x16xf32>
    %180 = tpu.matmul %178, %179, %cst_55 {dimension_numbers = #tpu.dot_dimension_numbers<[1], [1], [0], [0], [0, 0, 1, 0], [], []>} : vector<16x16xf32>, vector<16x16xf32>, vector<16x16xf32> -> vector<16x16xf32>
    %cst_56 = arith.constant dense<0xFF800000> : vector<16xf32>
    %181 = vector.multi_reduction <maximumf>, %180, %cst_56 [0] : vector<16x16xf32> to vector<16xf32>
    %182 = vector.shape_cast %181 : vector<16xf32> to vector<1x16xf32>
    %183 = vector.broadcast %182 : vector<1x16xf32> to vector<16x16xf32>
    %184 = arith.subf %180, %183 : vector<16x16xf32>
    %185 = math.exp %184 : vector<16x16xf32>
    %cst_57 = arith.constant dense<0.000000e+00> : vector<16xf32>
    %186 = vector.multi_reduction <add>, %185, %cst_57 [0] : vector<16x16xf32> to vector<16xf32>
    %187 = vector.shape_cast %186 : vector<16xf32> to vector<1x16xf32>
    %188 = vector.broadcast %187 : vector<1x16xf32> to vector<16x16xf32>
    %189 = arith.divf %185, %188 : vector<16x16xf32>
    %c0_58 = arith.constant 0 : index
    %c0_59 = arith.constant 0 : index
    %190 = vector.load %arg13[%c0_58, %c0_59] : memref<1x8xf32, #tpu.memory_space<vmem>>, vector<1x8xf32>
    %c0_60 = arith.constant 0 : index
    %c0_61 = arith.constant 0 : index
    %c0_62 = arith.constant 0 : index
    %191 = vector.load %arg16[%c0_60, %c0_61, %c0_62] : memref<3x16x16xf32, #tpu.memory_space<vmem>>, vector<1x16x16xf32>
    %192 = vector.shape_cast %191 : vector<1x16x16xf32> to vector<16x16xf32>
    %193 = arith.mulf %192, %189 : vector<16x16xf32>
    %c1 = arith.constant 1 : index
    %c0_63 = arith.constant 0 : index
    %c0_64 = arith.constant 0 : index
    %194 = vector.load %arg16[%c1, %c0_63, %c0_64] : memref<3x16x16xf32, #tpu.memory_space<vmem>>, vector<1x16x16xf32>
    %195 = vector.shape_cast %194 : vector<1x16x16xf32> to vector<16x16xf32>
    %196 = arith.mulf %195, %189 : vector<16x16xf32>
    %c2 = arith.constant 2 : index
    %c0_65 = arith.constant 0 : index
    %c0_66 = arith.constant 0 : index
    %197 = vector.load %arg16[%c2, %c0_65, %c0_66] : memref<3x16x16xf32, #tpu.memory_space<vmem>>, vector<1x16x16xf32>
    %198 = vector.shape_cast %197 : vector<1x16x16xf32> to vector<16x16xf32>
    %199 = arith.mulf %198, %189 : vector<16x16xf32>
    %c0_67 = arith.constant 0 : index
    %c0_68 = arith.constant 0 : index
    %c0_69 = arith.constant 0 : index
    %c0_70 = arith.constant 0 : index
    %200 = vector.load %arg1[%c0_67, %c0_68, %c0_69, %c0_70] : memref<1x8x16x8xf32, #tpu.memory_space<vmem>>, vector<1x1x16x8xf32>
    %201 = vector.shape_cast %200 : vector<1x1x16x8xf32> to vector<16x8xf32>
    %cst_71 = arith.constant 0.000000e+00 : f32
    %202 = vector.broadcast %cst_71 : f32 to vector<16x16xf32>
    %203 = vector.extract_strided_slice %201 {offsets = [0, 0], sizes = [16, 1], strides = [1, 1]} : vector<16x8xf32> to vector<16x1xf32>
    %204 = vector.shape_cast %203 : vector<16x1xf32> to vector<16x1xf32>
    %205 = vector.broadcast %204 : vector<16x1xf32> to vector<16x16xf32>
    %206 = vector.extract_strided_slice %190 {offsets = [0, 0], sizes = [1, 1], strides = [1, 1]} : vector<1x8xf32> to vector<1x1xf32>
    %207 = tpu.transpose %205, [1, 0] : vector<16x16xf32> -> vector<16x16xf32>
    %208 = arith.subf %205, %207 : vector<16x16xf32>
    %209 = math.absf %208 : vector<16x16xf32>
    %210 = vector.broadcast %206 : vector<1x1xf32> to vector<16x16xf32>
    %211 = arith.mulf %210, %209 : vector<16x16xf32>
    %212 = arith.addf %202, %211 : vector<16x16xf32>
    %213 = vector.extract_strided_slice %201 {offsets = [0, 1], sizes = [16, 1], strides = [1, 1]} : vector<16x8xf32> to vector<16x1xf32>
    %214 = vector.shape_cast %213 : vector<16x1xf32> to vector<16x1xf32>
    %215 = vector.broadcast %214 : vector<16x1xf32> to vector<16x16xf32>
    %216 = vector.extract_strided_slice %190 {offsets = [0, 1], sizes = [1, 1], strides = [1, 1]} : vector<1x8xf32> to vector<1x1xf32>
    %217 = tpu.transpose %215, [1, 0] : vector<16x16xf32> -> vector<16x16xf32>
    %218 = arith.subf %215, %217 : vector<16x16xf32>
    %219 = math.absf %218 : vector<16x16xf32>
    %220 = vector.broadcast %216 : vector<1x1xf32> to vector<16x16xf32>
    %221 = arith.mulf %220, %219 : vector<16x16xf32>
    %222 = arith.addf %212, %221 : vector<16x16xf32>
    %223 = vector.extract_strided_slice %201 {offsets = [0, 2], sizes = [16, 1], strides = [1, 1]} : vector<16x8xf32> to vector<16x1xf32>
    %224 = vector.shape_cast %223 : vector<16x1xf32> to vector<16x1xf32>
    %225 = vector.broadcast %224 : vector<16x1xf32> to vector<16x16xf32>
    %226 = vector.extract_strided_slice %190 {offsets = [0, 2], sizes = [1, 1], strides = [1, 1]} : vector<1x8xf32> to vector<1x1xf32>
    %227 = tpu.transpose %225, [1, 0] : vector<16x16xf32> -> vector<16x16xf32>
    %228 = arith.subf %225, %227 : vector<16x16xf32>
    %229 = math.absf %228 : vector<16x16xf32>
    %230 = vector.broadcast %226 : vector<1x1xf32> to vector<16x16xf32>
    %231 = arith.mulf %230, %229 : vector<16x16xf32>
    %232 = arith.addf %222, %231 : vector<16x16xf32>
    %233 = vector.extract_strided_slice %201 {offsets = [0, 3], sizes = [16, 1], strides = [1, 1]} : vector<16x8xf32> to vector<16x1xf32>
    %234 = vector.shape_cast %233 : vector<16x1xf32> to vector<16x1xf32>
    %235 = vector.broadcast %234 : vector<16x1xf32> to vector<16x16xf32>
    %236 = vector.extract_strided_slice %190 {offsets = [0, 3], sizes = [1, 1], strides = [1, 1]} : vector<1x8xf32> to vector<1x1xf32>
    %237 = tpu.transpose %235, [1, 0] : vector<16x16xf32> -> vector<16x16xf32>
    %238 = arith.subf %235, %237 : vector<16x16xf32>
    %239 = math.absf %238 : vector<16x16xf32>
    %240 = vector.broadcast %236 : vector<1x1xf32> to vector<16x16xf32>
    %241 = arith.mulf %240, %239 : vector<16x16xf32>
    %242 = arith.addf %232, %241 : vector<16x16xf32>
    %243 = vector.extract_strided_slice %201 {offsets = [0, 4], sizes = [16, 1], strides = [1, 1]} : vector<16x8xf32> to vector<16x1xf32>
    %244 = vector.shape_cast %243 : vector<16x1xf32> to vector<16x1xf32>
    %245 = vector.broadcast %244 : vector<16x1xf32> to vector<16x16xf32>
    %246 = vector.extract_strided_slice %190 {offsets = [0, 4], sizes = [1, 1], strides = [1, 1]} : vector<1x8xf32> to vector<1x1xf32>
    %247 = tpu.transpose %245, [1, 0] : vector<16x16xf32> -> vector<16x16xf32>
    %248 = arith.subf %245, %247 : vector<16x16xf32>
    %249 = math.absf %248 : vector<16x16xf32>
    %250 = vector.broadcast %246 : vector<1x1xf32> to vector<16x16xf32>
    %251 = arith.mulf %250, %249 : vector<16x16xf32>
    %252 = arith.addf %242, %251 : vector<16x16xf32>
    %253 = vector.extract_strided_slice %201 {offsets = [0, 5], sizes = [16, 1], strides = [1, 1]} : vector<16x8xf32> to vector<16x1xf32>
    %254 = vector.shape_cast %253 : vector<16x1xf32> to vector<16x1xf32>
    %255 = vector.broadcast %254 : vector<16x1xf32> to vector<16x16xf32>
    %256 = vector.extract_strided_slice %190 {offsets = [0, 5], sizes = [1, 1], strides = [1, 1]} : vector<1x8xf32> to vector<1x1xf32>
    %257 = tpu.transpose %255, [1, 0] : vector<16x16xf32> -> vector<16x16xf32>
    %258 = arith.subf %255, %257 : vector<16x16xf32>
    %259 = math.absf %258 : vector<16x16xf32>
    %260 = vector.broadcast %256 : vector<1x1xf32> to vector<16x16xf32>
    %261 = arith.mulf %260, %259 : vector<16x16xf32>
    %262 = arith.addf %252, %261 : vector<16x16xf32>
    %263 = vector.extract_strided_slice %201 {offsets = [0, 6], sizes = [16, 1], strides = [1, 1]} : vector<16x8xf32> to vector<16x1xf32>
    %264 = vector.shape_cast %263 : vector<16x1xf32> to vector<16x1xf32>
    %265 = vector.broadcast %264 : vector<16x1xf32> to vector<16x16xf32>
    %266 = vector.extract_strided_slice %190 {offsets = [0, 6], sizes = [1, 1], strides = [1, 1]} : vector<1x8xf32> to vector<1x1xf32>
    %267 = tpu.transpose %265, [1, 0] : vector<16x16xf32> -> vector<16x16xf32>
    %268 = arith.subf %265, %267 : vector<16x16xf32>
    %269 = math.absf %268 : vector<16x16xf32>
    %270 = vector.broadcast %266 : vector<1x1xf32> to vector<16x16xf32>
    %271 = arith.mulf %270, %269 : vector<16x16xf32>
    %272 = arith.addf %262, %271 : vector<16x16xf32>
    %273 = vector.extract_strided_slice %201 {offsets = [0, 7], sizes = [16, 1], strides = [1, 1]} : vector<16x8xf32> to vector<16x1xf32>
    %274 = vector.shape_cast %273 : vector<16x1xf32> to vector<16x1xf32>
    %275 = vector.broadcast %274 : vector<16x1xf32> to vector<16x16xf32>
    %276 = vector.extract_strided_slice %190 {offsets = [0, 7], sizes = [1, 1], strides = [1, 1]} : vector<1x8xf32> to vector<1x1xf32>
    %277 = tpu.transpose %275, [1, 0] : vector<16x16xf32> -> vector<16x16xf32>
    %278 = arith.subf %275, %277 : vector<16x16xf32>
    %279 = math.absf %278 : vector<16x16xf32>
    %280 = vector.broadcast %276 : vector<1x1xf32> to vector<16x16xf32>
    %281 = arith.mulf %280, %279 : vector<16x16xf32>
    %282 = arith.addf %272, %281 : vector<16x16xf32>
    %cst_72 = arith.constant 0.000000e+00 : f32
    %283 = vector.broadcast %cst_72 : f32 to vector<16x16xf32>
    %284 = arith.subf %283, %282 : vector<16x16xf32>
    %285 = math.exp %284 : vector<16x16xf32>
    %cst_73 = arith.constant dense<0.000000e+00> : vector<16xf32>
    %286 = vector.multi_reduction <add>, %285, %cst_73 [1] : vector<16x16xf32> to vector<16xf32>
    %287 = vector.shape_cast %286 : vector<16xf32> to vector<16x1xf32>
    %288 = vector.broadcast %287 : vector<16x1xf32> to vector<16x16xf32>
    %289 = arith.divf %285, %288 : vector<16x16xf32>
    %290 = tpu.transpose %289, [1, 0] : vector<16x16xf32> -> vector<16x16xf32>
    %291 = arith.minimumf %289, %290 : vector<16x16xf32>
    %cst_74 = arith.constant dense<0.000000e+00> : vector<16x8xf32>
    %292 = tpu.matmul %291, %201, %cst_74 {dimension_numbers = #tpu.dot_dimension_numbers<[1], [0], [0], [1], [0, 0, 1, 1], [], []>} : vector<16x16xf32>, vector<16x8xf32>, vector<16x8xf32> -> vector<16x8xf32>
    %c0_75 = arith.constant 0 : index
    %c0_76 = arith.constant 0 : index
    %c0_77 = arith.constant 0 : index
    %293 = vector.load %arg27[%c0_75, %c0_76, %c0_77] : memref<5x128x8xf32, #tpu.memory_space<vmem>>, vector<1x16x8xf32>
    %294 = vector.shape_cast %293 : vector<1x16x8xf32> to vector<16x8xf32>
    %295 = vector.shape_cast %292 : vector<16x8xf32> to vector<1x16x8xf32>
    tpu.vector_store %arg27[%c0_75, %c0_76, %c0_77], %295 {strides = array<i32>} : memref<5x128x8xf32, #tpu.memory_space<vmem>>, vector<1x16x8xf32>,
    %cst_78 = arith.constant dense<0.000000e+00> : vector<16x8xf32>
    %296 = tpu.matmul %291, %292, %cst_78 {dimension_numbers = #tpu.dot_dimension_numbers<[1], [0], [0], [1], [0, 0, 1, 1], [], []>} : vector<16x16xf32>, vector<16x8xf32>, vector<16x8xf32> -> vector<16x8xf32>
    %cst_79 = arith.constant 2.000000e+00 : f32
    %297 = vector.broadcast %cst_79 : f32 to vector<16x8xf32>
    %298 = arith.mulf %297, %296 : vector<16x8xf32>
    %299 = arith.subf %298, %201 : vector<16x8xf32>
    %c1_80 = arith.constant 1 : index
    %c0_81 = arith.constant 0 : index
    %c0_82 = arith.constant 0 : index
    %300 = vector.load %arg27[%c1_80, %c0_81, %c0_82] : memref<5x128x8xf32, #tpu.memory_space<vmem>>, vector<1x16x8xf32>
    %301 = vector.shape_cast %300 : vector<1x16x8xf32> to vector<16x8xf32>
    %302 = vector.shape_cast %299 : vector<16x8xf32> to vector<1x16x8xf32>
    tpu.vector_store %arg27[%c1_80, %c0_81, %c0_82], %302 {strides = array<i32>} : memref<5x128x8xf32, #tpu.memory_space<vmem>>, vector<1x16x8xf32>,
    %cst_83 = arith.constant dense<0.000000e+00> : vector<16x8xf32>
    %303 = tpu.matmul %193, %201, %cst_83 {dimension_numbers = #tpu.dot_dimension_numbers<[1], [0], [0], [1], [0, 0, 1, 1], [], []>} : vector<16x16xf32>, vector<16x8xf32>, vector<16x8xf32> -> vector<16x8xf32>
    %c2_84 = arith.constant 2 : index
    %c0_85 = arith.constant 0 : index
    %c0_86 = arith.constant 0 : index
    %304 = vector.load %arg27[%c2_84, %c0_85, %c0_86] : memref<5x128x8xf32, #tpu.memory_space<vmem>>, vector<1x16x8xf32>
    %305 = vector.shape_cast %304 : vector<1x16x8xf32> to vector<16x8xf32>
    %306 = vector.shape_cast %303 : vector<16x8xf32> to vector<1x16x8xf32>
    tpu.vector_store %arg27[%c2_84, %c0_85, %c0_86], %306 {strides = array<i32>} : memref<5x128x8xf32, #tpu.memory_space<vmem>>, vector<1x16x8xf32>,
    %cst_87 = arith.constant dense<0.000000e+00> : vector<16x8xf32>
    %307 = tpu.matmul %196, %201, %cst_87 {dimension_numbers = #tpu.dot_dimension_numbers<[1], [0], [0], [1], [0, 0, 1, 1], [], []>} : vector<16x16xf32>, vector<16x8xf32>, vector<16x8xf32> -> vector<16x8xf32>
    %c3 = arith.constant 3 : index
    %c0_88 = arith.constant 0 : index
    %c0_89 = arith.constant 0 : index
    %308 = vector.load %arg27[%c3, %c0_88, %c0_89] : memref<5x128x8xf32, #tpu.memory_space<vmem>>, vector<1x16x8xf32>
    %309 = vector.shape_cast %308 : vector<1x16x8xf32> to vector<16x8xf32>
    %310 = vector.shape_cast %307 : vector<16x8xf32> to vector<1x16x8xf32>
    tpu.vector_store %arg27[%c3, %c0_88, %c0_89], %310 {strides = array<i32>} : memref<5x128x8xf32, #tpu.memory_space<vmem>>, vector<1x16x8xf32>,
    %cst_90 = arith.constant dense<0.000000e+00> : vector<16x8xf32>
    %311 = tpu.matmul %199, %201, %cst_90 {dimension_numbers = #tpu.dot_dimension_numbers<[1], [0], [0], [1], [0, 0, 1, 1], [], []>} : vector<16x16xf32>, vector<16x8xf32>, vector<16x8xf32> -> vector<16x8xf32>
    %c4 = arith.constant 4 : index
    %c0_91 = arith.constant 0 : index
    %c0_92 = arith.constant 0 : index
    %312 = vector.load %arg27[%c4, %c0_91, %c0_92] : memref<5x128x8xf32, #tpu.memory_space<vmem>>, vector<1x16x8xf32>
    %313 = vector.shape_cast %312 : vector<1x16x8xf32> to vector<16x8xf32>
    %314 = vector.shape_cast %311 : vector<16x8xf32> to vector<1x16x8xf32>
    tpu.vector_store %arg27[%c4, %c0_91, %c0_92], %314 {strides = array<i32>} : memref<5x128x8xf32, #tpu.memory_space<vmem>>, vector<1x16x8xf32>,
    %c0_93 = arith.constant 0 : index
    %c1_94 = arith.constant 1 : index
    %c0_95 = arith.constant 0 : index
    %c0_96 = arith.constant 0 : index
    %315 = vector.load %arg1[%c0_93, %c1_94, %c0_95, %c0_96] : memref<1x8x16x8xf32, #tpu.memory_space<vmem>>, vector<1x1x16x8xf32>
    %316 = vector.shape_cast %315 : vector<1x1x16x8xf32> to vector<16x8xf32>
    %cst_97 = arith.constant 0.000000e+00 : f32
    %317 = vector.broadcast %cst_97 : f32 to vector<16x16xf32>
    %318 = vector.extract_strided_slice %316 {offsets = [0, 0], sizes = [16, 1], strides = [1, 1]} : vector<16x8xf32> to vector<16x1xf32>
    %319 = vector.shape_cast %318 : vector<16x1xf32> to vector<16x1xf32>
    %320 = vector.broadcast %319 : vector<16x1xf32> to vector<16x16xf32>
    %321 = vector.extract_strided_slice %190 {offsets = [0, 0], sizes = [1, 1], strides = [1, 1]} : vector<1x8xf32> to vector<1x1xf32>
    %322 = tpu.transpose %320, [1, 0] : vector<16x16xf32> -> vector<16x16xf32>
    %323 = arith.subf %320, %322 : vector<16x16xf32>
    %324 = math.absf %323 : vector<16x16xf32>
    %325 = vector.broadcast %321 : vector<1x1xf32> to vector<16x16xf32>
    %326 = arith.mulf %325, %324 : vector<16x16xf32>
    %327 = arith.addf %317, %326 : vector<16x16xf32>
    %328 = vector.extract_strided_slice %316 {offsets = [0, 1], sizes = [16, 1], strides = [1, 1]} : vector<16x8xf32> to vector<16x1xf32>
    %329 = vector.shape_cast %328 : vector<16x1xf32> to vector<16x1xf32>
    %330 = vector.broadcast %329 : vector<16x1xf32> to vector<16x16xf32>
    %331 = vector.extract_strided_slice %190 {offsets = [0, 1], sizes = [1, 1], strides = [1, 1]} : vector<1x8xf32> to vector<1x1xf32>
    %332 = tpu.transpose %330, [1, 0] : vector<16x16xf32> -> vector<16x16xf32>
    %333 = arith.subf %330, %332 : vector<16x16xf32>
    %334 = math.absf %333 : vector<16x16xf32>
    %335 = vector.broadcast %331 : vector<1x1xf32> to vector<16x16xf32>
    %336 = arith.mulf %335, %334 : vector<16x16xf32>
    %337 = arith.addf %327, %336 : vector<16x16xf32>
    %338 = vector.extract_strided_slice %316 {offsets = [0, 2], sizes = [16, 1], strides = [1, 1]} : vector<16x8xf32> to vector<16x1xf32>
    %339 = vector.shape_cast %338 : vector<16x1xf32> to vector<16x1xf32>
    %340 = vector.broadcast %339 : vector<16x1xf32> to vector<16x16xf32>
    %341 = vector.extract_strided_slice %190 {offsets = [0, 2], sizes = [1, 1], strides = [1, 1]} : vector<1x8xf32> to vector<1x1xf32>
    %342 = tpu.transpose %340, [1, 0] : vector<16x16xf32> -> vector<16x16xf32>
    %343 = arith.subf %340, %342 : vector<16x16xf32>
    %344 = math.absf %343 : vector<16x16xf32>
    %345 = vector.broadcast %341 : vector<1x1xf32> to vector<16x16xf32>
    %346 = arith.mulf %345, %344 : vector<16x16xf32>
    %347 = arith.addf %337, %346 : vector<16x16xf32>
    %348 = vector.extract_strided_slice %316 {offsets = [0, 3], sizes = [16, 1], strides = [1, 1]} : vector<16x8xf32> to vector<16x1xf32>
    %349 = vector.shape_cast %348 : vector<16x1xf32> to vector<16x1xf32>
    %350 = vector.broadcast %349 : vector<16x1xf32> to vector<16x16xf32>
    %351 = vector.extract_strided_slice %190 {offsets = [0, 3], sizes = [1, 1], strides = [1, 1]} : vector<1x8xf32> to vector<1x1xf32>
    %352 = tpu.transpose %350, [1, 0] : vector<16x16xf32> -> vector<16x16xf32>
    %353 = arith.subf %350, %352 : vector<16x16xf32>
    %354 = math.absf %353 : vector<16x16xf32>
    %355 = vector.broadcast %351 : vector<1x1xf32> to vector<16x16xf32>
    %356 = arith.mulf %355, %354 : vector<16x16xf32>
    %357 = arith.addf %347, %356 : vector<16x16xf32>
    %358 = vector.extract_strided_slice %316 {offsets = [0, 4], sizes = [16, 1], strides = [1, 1]} : vector<16x8xf32> to vector<16x1xf32>
    %359 = vector.shape_cast %358 : vector<16x1xf32> to vector<16x1xf32>
    %360 = vector.broadcast %359 : vector<16x1xf32> to vector<16x16xf32>
    %361 = vector.extract_strided_slice %190 {offsets = [0, 4], sizes = [1, 1], strides = [1, 1]} : vector<1x8xf32> to vector<1x1xf32>
    %362 = tpu.transpose %360, [1, 0] : vector<16x16xf32> -> vector<16x16xf32>
    %363 = arith.subf %360, %362 : vector<16x16xf32>
    %364 = math.absf %363 : vector<16x16xf32>
    %365 = vector.broadcast %361 : vector<1x1xf32> to vector<16x16xf32>
    %366 = arith.mulf %365, %364 : vector<16x16xf32>
    %367 = arith.addf %357, %366 : vector<16x16xf32>
    %368 = vector.extract_strided_slice %316 {offsets = [0, 5], sizes = [16, 1], strides = [1, 1]} : vector<16x8xf32> to vector<16x1xf32>
    %369 = vector.shape_cast %368 : vector<16x1xf32> to vector<16x1xf32>
    %370 = vector.broadcast %369 : vector<16x1xf32> to vector<16x16xf32>
    %371 = vector.extract_strided_slice %190 {offsets = [0, 5], sizes = [1, 1], strides = [1, 1]} : vector<1x8xf32> to vector<1x1xf32>
    %372 = tpu.transpose %370, [1, 0] : vector<16x16xf32> -> vector<16x16xf32>
    %373 = arith.subf %370, %372 : vector<16x16xf32>
    %374 = math.absf %373 : vector<16x16xf32>
    %375 = vector.broadcast %371 : vector<1x1xf32> to vector<16x16xf32>
    %376 = arith.mulf %375, %374 : vector<16x16xf32>
    %377 = arith.addf %367, %376 : vector<16x16xf32>
    %378 = vector.extract_strided_slice %316 {offsets = [0, 6], sizes = [16, 1], strides = [1, 1]} : vector<16x8xf32> to vector<16x1xf32>
    %379 = vector.shape_cast %378 : vector<16x1xf32> to vector<16x1xf32>
    %380 = vector.broadcast %379 : vector<16x1xf32> to vector<16x16xf32>
    %381 = vector.extract_strided_slice %190 {offsets = [0, 6], sizes = [1, 1], strides = [1, 1]} : vector<1x8xf32> to vector<1x1xf32>
    %382 = tpu.transpose %380, [1, 0] : vector<16x16xf32> -> vector<16x16xf32>
    %383 = arith.subf %380, %382 : vector<16x16xf32>
    %384 = math.absf %383 : vector<16x16xf32>
    %385 = vector.broadcast %381 : vector<1x1xf32> to vector<16x16xf32>
    %386 = arith.mulf %385, %384 : vector<16x16xf32>
    %387 = arith.addf %377, %386 : vector<16x16xf32>
    %388 = vector.extract_strided_slice %316 {offsets = [0, 7], sizes = [16, 1], strides = [1, 1]} : vector<16x8xf32> to vector<16x1xf32>
    %389 = vector.shape_cast %388 : vector<16x1xf32> to vector<16x1xf32>
    %390 = vector.broadcast %389 : vector<16x1xf32> to vector<16x16xf32>
    %391 = vector.extract_strided_slice %190 {offsets = [0, 7], sizes = [1, 1], strides = [1, 1]} : vector<1x8xf32> to vector<1x1xf32>
    %392 = tpu.transpose %390, [1, 0] : vector<16x16xf32> -> vector<16x16xf32>
    %393 = arith.subf %390, %392 : vector<16x16xf32>
    %394 = math.absf %393 : vector<16x16xf32>
    %395 = vector.broadcast %391 : vector<1x1xf32> to vector<16x16xf32>
    %396 = arith.mulf %395, %394 : vector<16x16xf32>
    %397 = arith.addf %387, %396 : vector<16x16xf32>
    %cst_98 = arith.constant 0.000000e+00 : f32
    %398 = vector.broadcast %cst_98 : f32 to vector<16x16xf32>
    %399 = arith.subf %398, %397 : vector<16x16xf32>
    %400 = math.exp %399 : vector<16x16xf32>
    %cst_99 = arith.constant dense<0.000000e+00> : vector<16xf32>
    %401 = vector.multi_reduction <add>, %400, %cst_99 [1] : vector<16x16xf32> to vector<16xf32>
    %402 = vector.shape_cast %401 : vector<16xf32> to vector<16x1xf32>
    %403 = vector.broadcast %402 : vector<16x1xf32> to vector<16x16xf32>
    %404 = arith.divf %400, %403 : vector<16x16xf32>
    %405 = tpu.transpose %404, [1, 0] : vector<16x16xf32> -> vector<16x16xf32>
    %406 = arith.minimumf %404, %405 : vector<16x16xf32>
    %cst_100 = arith.constant dense<0.000000e+00> : vector<16x8xf32>
    %407 = tpu.matmul %406, %316, %cst_100 {dimension_numbers = #tpu.dot_dimension_numbers<[1], [0], [0], [1], [0, 0, 1, 1], [], []>} : vector<16x16xf32>, vector<16x8xf32>, vector<16x8xf32> -> vector<16x8xf32>
    %c0_101 = arith.constant 0 : index
    %c16 = arith.constant 16 : index
    %c0_102 = arith.constant 0 : index
    %408 = vector.load %arg27[%c0_101, %c16, %c0_102] : memref<5x128x8xf32, #tpu.memory_space<vmem>>, vector<1x16x8xf32>
    %409 = vector.shape_cast %408 : vector<1x16x8xf32> to vector<16x8xf32>
    %410 = vector.shape_cast %407 : vector<16x8xf32> to vector<1x16x8xf32>
    tpu.vector_store %arg27[%c0_101, %c16, %c0_102], %410 {strides = array<i32>} : memref<5x128x8xf32, #tpu.memory_space<vmem>>, vector<1x16x8xf32>,
    %cst_103 = arith.constant dense<0.000000e+00> : vector<16x8xf32>
    %411 = tpu.matmul %406, %407, %cst_103 {dimension_numbers = #tpu.dot_dimension_numbers<[1], [0], [0], [1], [0, 0, 1, 1], [], []>} : vector<16x16xf32>, vector<16x8xf32>, vector<16x8xf32> -> vector<16x8xf32>
    %cst_104 = arith.constant 2.000000e+00 : f32
    %412 = vector.broadcast %cst_104 : f32 to vector<16x8xf32>
    %413 = arith.mulf %412, %411 : vector<16x8xf32>
    %414 = arith.subf %413, %316 : vector<16x8xf32>
    %c1_105 = arith.constant 1 : index
    %c16_106 = arith.constant 16 : index
    %c0_107 = arith.constant 0 : index
    %415 = vector.load %arg27[%c1_105, %c16_106, %c0_107] : memref<5x128x8xf32, #tpu.memory_space<vmem>>, vector<1x16x8xf32>
    %416 = vector.shape_cast %415 : vector<1x16x8xf32> to vector<16x8xf32>
    %417 = vector.shape_cast %414 : vector<16x8xf32> to vector<1x16x8xf32>
    tpu.vector_store %arg27[%c1_105, %c16_106, %c0_107], %417 {strides = array<i32>} : memref<5x128x8xf32, #tpu.memory_space<vmem>>, vector<1x16x8xf32>,
    %cst_108 = arith.constant dense<0.000000e+00> : vector<16x8xf32>
    %418 = tpu.matmul %193, %316, %cst_108 {dimension_numbers = #tpu.dot_dimension_numbers<[1], [0], [0], [1], [0, 0, 1, 1], [], []>} : vector<16x16xf32>, vector<16x8xf32>, vector<16x8xf32> -> vector<16x8xf32>
    %c2_109 = arith.constant 2 : index
    %c16_110 = arith.constant 16 : index
    %c0_111 = arith.constant 0 : index
    %419 = vector.load %arg27[%c2_109, %c16_110, %c0_111] : memref<5x128x8xf32, #tpu.memory_space<vmem>>, vector<1x16x8xf32>
    %420 = vector.shape_cast %419 : vector<1x16x8xf32> to vector<16x8xf32>
    %421 = vector.shape_cast %418 : vector<16x8xf32> to vector<1x16x8xf32>
    tpu.vector_store %arg27[%c2_109, %c16_110, %c0_111], %421 {strides = array<i32>} : memref<5x128x8xf32, #tpu.memory_space<vmem>>, vector<1x16x8xf32>,
    %cst_112 = arith.constant dense<0.000000e+00> : vector<16x8xf32>
    %422 = tpu.matmul %196, %316, %cst_112 {dimension_numbers = #tpu.dot_dimension_numbers<[1], [0], [0], [1], [0, 0, 1, 1], [], []>} : vector<16x16xf32>, vector<16x8xf32>, vector<16x8xf32> -> vector<16x8xf32>
    %c3_113 = arith.constant 3 : index
    %c16_114 = arith.constant 16 : index
    %c0_115 = arith.constant 0 : index
    %423 = vector.load %arg27[%c3_113, %c16_114, %c0_115] : memref<5x128x8xf32, #tpu.memory_space<vmem>>, vector<1x16x8xf32>
    %424 = vector.shape_cast %423 : vector<1x16x8xf32> to vector<16x8xf32>
    %425 = vector.shape_cast %422 : vector<16x8xf32> to vector<1x16x8xf32>
    tpu.vector_store %arg27[%c3_113, %c16_114, %c0_115], %425 {strides = array<i32>} : memref<5x128x8xf32, #tpu.memory_space<vmem>>, vector<1x16x8xf32>,
    %cst_116 = arith.constant dense<0.000000e+00> : vector<16x8xf32>
    %426 = tpu.matmul %199, %316, %cst_116 {dimension_numbers = #tpu.dot_dimension_numbers<[1], [0], [0], [1], [0, 0, 1, 1], [], []>} : vector<16x16xf32>, vector<16x8xf32>, vector<16x8xf32> -> vector<16x8xf32>
    %c4_117 = arith.constant 4 : index
    %c16_118 = arith.constant 16 : index
    %c0_119 = arith.constant 0 : index
    %427 = vector.load %arg27[%c4_117, %c16_118, %c0_119] : memref<5x128x8xf32, #tpu.memory_space<vmem>>, vector<1x16x8xf32>
    %428 = vector.shape_cast %427 : vector<1x16x8xf32> to vector<16x8xf32>
    %429 = vector.shape_cast %426 : vector<16x8xf32> to vector<1x16x8xf32>
    tpu.vector_store %arg27[%c4_117, %c16_118, %c0_119], %429 {strides = array<i32>} : memref<5x128x8xf32, #tpu.memory_space<vmem>>, vector<1x16x8xf32>,
    %c0_120 = arith.constant 0 : index
    %c2_121 = arith.constant 2 : index
    %c0_122 = arith.constant 0 : index
    %c0_123 = arith.constant 0 : index
    %430 = vector.load %arg1[%c0_120, %c2_121, %c0_122, %c0_123] : memref<1x8x16x8xf32, #tpu.memory_space<vmem>>, vector<1x1x16x8xf32>
    %431 = vector.shape_cast %430 : vector<1x1x16x8xf32> to vector<16x8xf32>
    %cst_124 = arith.constant 0.000000e+00 : f32
    %432 = vector.broadcast %cst_124 : f32 to vector<16x16xf32>
    %433 = vector.extract_strided_slice %431 {offsets = [0, 0], sizes = [16, 1], strides = [1, 1]} : vector<16x8xf32> to vector<16x1xf32>
    %434 = vector.shape_cast %433 : vector<16x1xf32> to vector<16x1xf32>
    %435 = vector.broadcast %434 : vector<16x1xf32> to vector<16x16xf32>
    %436 = vector.extract_strided_slice %190 {offsets = [0, 0], sizes = [1, 1], strides = [1, 1]} : vector<1x8xf32> to vector<1x1xf32>
    %437 = tpu.transpose %435, [1, 0] : vector<16x16xf32> -> vector<16x16xf32>
    %438 = arith.subf %435, %437 : vector<16x16xf32>
    %439 = math.absf %438 : vector<16x16xf32>
    %440 = vector.broadcast %436 : vector<1x1xf32> to vector<16x16xf32>
    %441 = arith.mulf %440, %439 : vector<16x16xf32>
    %442 = arith.addf %432, %441 : vector<16x16xf32>
    %443 = vector.extract_strided_slice %431 {offsets = [0, 1], sizes = [16, 1], strides = [1, 1]} : vector<16x8xf32> to vector<16x1xf32>
    %444 = vector.shape_cast %443 : vector<16x1xf32> to vector<16x1xf32>
    %445 = vector.broadcast %444 : vector<16x1xf32> to vector<16x16xf32>
    %446 = vector.extract_strided_slice %190 {offsets = [0, 1], sizes = [1, 1], strides = [1, 1]} : vector<1x8xf32> to vector<1x1xf32>
    %447 = tpu.transpose %445, [1, 0] : vector<16x16xf32> -> vector<16x16xf32>
    %448 = arith.subf %445, %447 : vector<16x16xf32>
    %449 = math.absf %448 : vector<16x16xf32>
    %450 = vector.broadcast %446 : vector<1x1xf32> to vector<16x16xf32>
    %451 = arith.mulf %450, %449 : vector<16x16xf32>
    %452 = arith.addf %442, %451 : vector<16x16xf32>
    %453 = vector.extract_strided_slice %431 {offsets = [0, 2], sizes = [16, 1], strides = [1, 1]} : vector<16x8xf32> to vector<16x1xf32>
    %454 = vector.shape_cast %453 : vector<16x1xf32> to vector<16x1xf32>
    %455 = vector.broadcast %454 : vector<16x1xf32> to vector<16x16xf32>
    %456 = vector.extract_strided_slice %190 {offsets = [0, 2], sizes = [1, 1], strides = [1, 1]} : vector<1x8xf32> to vector<1x1xf32>
    %457 = tpu.transpose %455, [1, 0] : vector<16x16xf32> -> vector<16x16xf32>
    %458 = arith.subf %455, %457 : vector<16x16xf32>
    %459 = math.absf %458 : vector<16x16xf32>
    %460 = vector.broadcast %456 : vector<1x1xf32> to vector<16x16xf32>
    %461 = arith.mulf %460, %459 : vector<16x16xf32>
    %462 = arith.addf %452, %461 : vector<16x16xf32>
    %463 = vector.extract_strided_slice %431 {offsets = [0, 3], sizes = [16, 1], strides = [1, 1]} : vector<16x8xf32> to vector<16x1xf32>
    %464 = vector.shape_cast %463 : vector<16x1xf32> to vector<16x1xf32>
    %465 = vector.broadcast %464 : vector<16x1xf32> to vector<16x16xf32>
    %466 = vector.extract_strided_slice %190 {offsets = [0, 3], sizes = [1, 1], strides = [1, 1]} : vector<1x8xf32> to vector<1x1xf32>
    %467 = tpu.transpose %465, [1, 0] : vector<16x16xf32> -> vector<16x16xf32>
    %468 = arith.subf %465, %467 : vector<16x16xf32>
    %469 = math.absf %468 : vector<16x16xf32>
    %470 = vector.broadcast %466 : vector<1x1xf32> to vector<16x16xf32>
    %471 = arith.mulf %470, %469 : vector<16x16xf32>
    %472 = arith.addf %462, %471 : vector<16x16xf32>
    %473 = vector.extract_strided_slice %431 {offsets = [0, 4], sizes = [16, 1], strides = [1, 1]} : vector<16x8xf32> to vector<16x1xf32>
    %474 = vector.shape_cast %473 : vector<16x1xf32> to vector<16x1xf32>
    %475 = vector.broadcast %474 : vector<16x1xf32> to vector<16x16xf32>
    %476 = vector.extract_strided_slice %190 {offsets = [0, 4], sizes = [1, 1], strides = [1, 1]} : vector<1x8xf32> to vector<1x1xf32>
    %477 = tpu.transpose %475, [1, 0] : vector<16x16xf32> -> vector<16x16xf32>
    %478 = arith.subf %475, %477 : vector<16x16xf32>
    %479 = math.absf %478 : vector<16x16xf32>
    %480 = vector.broadcast %476 : vector<1x1xf32> to vector<16x16xf32>
    %481 = arith.mulf %480, %479 : vector<16x16xf32>
    %482 = arith.addf %472, %481 : vector<16x16xf32>
    %483 = vector.extract_strided_slice %431 {offsets = [0, 5], sizes = [16, 1], strides = [1, 1]} : vector<16x8xf32> to vector<16x1xf32>
    %484 = vector.shape_cast %483 : vector<16x1xf32> to vector<16x1xf32>
    %485 = vector.broadcast %484 : vector<16x1xf32> to vector<16x16xf32>
    %486 = vector.extract_strided_slice %190 {offsets = [0, 5], sizes = [1, 1], strides = [1, 1]} : vector<1x8xf32> to vector<1x1xf32>
    %487 = tpu.transpose %485, [1, 0] : vector<16x16xf32> -> vector<16x16xf32>
    %488 = arith.subf %485, %487 : vector<16x16xf32>
    %489 = math.absf %488 : vector<16x16xf32>
    %490 = vector.broadcast %486 : vector<1x1xf32> to vector<16x16xf32>
    %491 = arith.mulf %490, %489 : vector<16x16xf32>
    %492 = arith.addf %482, %491 : vector<16x16xf32>
    %493 = vector.extract_strided_slice %431 {offsets = [0, 6], sizes = [16, 1], strides = [1, 1]} : vector<16x8xf32> to vector<16x1xf32>
    %494 = vector.shape_cast %493 : vector<16x1xf32> to vector<16x1xf32>
    %495 = vector.broadcast %494 : vector<16x1xf32> to vector<16x16xf32>
    %496 = vector.extract_strided_slice %190 {offsets = [0, 6], sizes = [1, 1], strides = [1, 1]} : vector<1x8xf32> to vector<1x1xf32>
    %497 = tpu.transpose %495, [1, 0] : vector<16x16xf32> -> vector<16x16xf32>
    %498 = arith.subf %495, %497 : vector<16x16xf32>
    %499 = math.absf %498 : vector<16x16xf32>
    %500 = vector.broadcast %496 : vector<1x1xf32> to vector<16x16xf32>
    %501 = arith.mulf %500, %499 : vector<16x16xf32>
    %502 = arith.addf %492, %501 : vector<16x16xf32>
    %503 = vector.extract_strided_slice %431 {offsets = [0, 7], sizes = [16, 1], strides = [1, 1]} : vector<16x8xf32> to vector<16x1xf32>
    %504 = vector.shape_cast %503 : vector<16x1xf32> to vector<16x1xf32>
    %505 = vector.broadcast %504 : vector<16x1xf32> to vector<16x16xf32>
    %506 = vector.extract_strided_slice %190 {offsets = [0, 7], sizes = [1, 1], strides = [1, 1]} : vector<1x8xf32> to vector<1x1xf32>
    %507 = tpu.transpose %505, [1, 0] : vector<16x16xf32> -> vector<16x16xf32>
    %508 = arith.subf %505, %507 : vector<16x16xf32>
    %509 = math.absf %508 : vector<16x16xf32>
    %510 = vector.broadcast %506 : vector<1x1xf32> to vector<16x16xf32>
    %511 = arith.mulf %510, %509 : vector<16x16xf32>
    %512 = arith.addf %502, %511 : vector<16x16xf32>
    %cst_125 = arith.constant 0.000000e+00 : f32
    %513 = vector.broadcast %cst_125 : f32 to vector<16x16xf32>
    %514 = arith.subf %513, %512 : vector<16x16xf32>
    %515 = math.exp %514 : vector<16x16xf32>
    %cst_126 = arith.constant dense<0.000000e+00> : vector<16xf32>
    %516 = vector.multi_reduction <add>, %515, %cst_126 [1] : vector<16x16xf32> to vector<16xf32>
    %517 = vector.shape_cast %516 : vector<16xf32> to vector<16x1xf32>
    %518 = vector.broadcast %517 : vector<16x1xf32> to vector<16x16xf32>
    %519 = arith.divf %515, %518 : vector<16x16xf32>
    %520 = tpu.transpose %519, [1, 0] : vector<16x16xf32> -> vector<16x16xf32>
    %521 = arith.minimumf %519, %520 : vector<16x16xf32>
    %cst_127 = arith.constant dense<0.000000e+00> : vector<16x8xf32>
    %522 = tpu.matmul %521, %431, %cst_127 {dimension_numbers = #tpu.dot_dimension_numbers<[1], [0], [0], [1], [0, 0, 1, 1], [], []>} : vector<16x16xf32>, vector<16x8xf32>, vector<16x8xf32> -> vector<16x8xf32>
    %c0_128 = arith.constant 0 : index
    %c32 = arith.constant 32 : index
    %c0_129 = arith.constant 0 : index
    %523 = vector.load %arg27[%c0_128, %c32, %c0_129] : memref<5x128x8xf32, #tpu.memory_space<vmem>>, vector<1x16x8xf32>
    %524 = vector.shape_cast %523 : vector<1x16x8xf32> to vector<16x8xf32>
    %525 = vector.shape_cast %522 : vector<16x8xf32> to vector<1x16x8xf32>
    tpu.vector_store %arg27[%c0_128, %c32, %c0_129], %525 {strides = array<i32>} : memref<5x128x8xf32, #tpu.memory_space<vmem>>, vector<1x16x8xf32>,
    %cst_130 = arith.constant dense<0.000000e+00> : vector<16x8xf32>
    %526 = tpu.matmul %521, %522, %cst_130 {dimension_numbers = #tpu.dot_dimension_numbers<[1], [0], [0], [1], [0, 0, 1, 1], [], []>} : vector<16x16xf32>, vector<16x8xf32>, vector<16x8xf32> -> vector<16x8xf32>
    %cst_131 = arith.constant 2.000000e+00 : f32
    %527 = vector.broadcast %cst_131 : f32 to vector<16x8xf32>
    %528 = arith.mulf %527, %526 : vector<16x8xf32>
    %529 = arith.subf %528, %431 : vector<16x8xf32>
    %c1_132 = arith.constant 1 : index
    %c32_133 = arith.constant 32 : index
    %c0_134 = arith.constant 0 : index
    %530 = vector.load %arg27[%c1_132, %c32_133, %c0_134] : memref<5x128x8xf32, #tpu.memory_space<vmem>>, vector<1x16x8xf32>
    %531 = vector.shape_cast %530 : vector<1x16x8xf32> to vector<16x8xf32>
    %532 = vector.shape_cast %529 : vector<16x8xf32> to vector<1x16x8xf32>
    tpu.vector_store %arg27[%c1_132, %c32_133, %c0_134], %532 {strides = array<i32>} : memref<5x128x8xf32, #tpu.memory_space<vmem>>, vector<1x16x8xf32>,
    %cst_135 = arith.constant dense<0.000000e+00> : vector<16x8xf32>
    %533 = tpu.matmul %193, %431, %cst_135 {dimension_numbers = #tpu.dot_dimension_numbers<[1], [0], [0], [1], [0, 0, 1, 1], [], []>} : vector<16x16xf32>, vector<16x8xf32>, vector<16x8xf32> -> vector<16x8xf32>
    %c2_136 = arith.constant 2 : index
    %c32_137 = arith.constant 32 : index
    %c0_138 = arith.constant 0 : index
    %534 = vector.load %arg27[%c2_136, %c32_137, %c0_138] : memref<5x128x8xf32, #tpu.memory_space<vmem>>, vector<1x16x8xf32>
    %535 = vector.shape_cast %534 : vector<1x16x8xf32> to vector<16x8xf32>
    %536 = vector.shape_cast %533 : vector<16x8xf32> to vector<1x16x8xf32>
    tpu.vector_store %arg27[%c2_136, %c32_137, %c0_138], %536 {strides = array<i32>} : memref<5x128x8xf32, #tpu.memory_space<vmem>>, vector<1x16x8xf32>,
    %cst_139 = arith.constant dense<0.000000e+00> : vector<16x8xf32>
    %537 = tpu.matmul %196, %431, %cst_139 {dimension_numbers = #tpu.dot_dimension_numbers<[1], [0], [0], [1], [0, 0, 1, 1], [], []>} : vector<16x16xf32>, vector<16x8xf32>, vector<16x8xf32> -> vector<16x8xf32>
    %c3_140 = arith.constant 3 : index
    %c32_141 = arith.constant 32 : index
    %c0_142 = arith.constant 0 : index
    %538 = vector.load %arg27[%c3_140, %c32_141, %c0_142] : memref<5x128x8xf32, #tpu.memory_space<vmem>>, vector<1x16x8xf32>
    %539 = vector.shape_cast %538 : vector<1x16x8xf32> to vector<16x8xf32>
    %540 = vector.shape_cast %537 : vector<16x8xf32> to vector<1x16x8xf32>
    tpu.vector_store %arg27[%c3_140, %c32_141, %c0_142], %540 {strides = array<i32>} : memref<5x128x8xf32, #tpu.memory_space<vmem>>, vector<1x16x8xf32>,
    %cst_143 = arith.constant dense<0.000000e+00> : vector<16x8xf32>
    %541 = tpu.matmul %199, %431, %cst_143 {dimension_numbers = #tpu.dot_dimension_numbers<[1], [0], [0], [1], [0, 0, 1, 1], [], []>} : vector<16x16xf32>, vector<16x8xf32>, vector<16x8xf32> -> vector<16x8xf32>
    %c4_144 = arith.constant 4 : index
    %c32_145 = arith.constant 32 : index
    %c0_146 = arith.constant 0 : index
    %542 = vector.load %arg27[%c4_144, %c32_145, %c0_146] : memref<5x128x8xf32, #tpu.memory_space<vmem>>, vector<1x16x8xf32>
    %543 = vector.shape_cast %542 : vector<1x16x8xf32> to vector<16x8xf32>
    %544 = vector.shape_cast %541 : vector<16x8xf32> to vector<1x16x8xf32>
    tpu.vector_store %arg27[%c4_144, %c32_145, %c0_146], %544 {strides = array<i32>} : memref<5x128x8xf32, #tpu.memory_space<vmem>>, vector<1x16x8xf32>,
    %c0_147 = arith.constant 0 : index
    %c3_148 = arith.constant 3 : index
    %c0_149 = arith.constant 0 : index
    %c0_150 = arith.constant 0 : index
    %545 = vector.load %arg1[%c0_147, %c3_148, %c0_149, %c0_150] : memref<1x8x16x8xf32, #tpu.memory_space<vmem>>, vector<1x1x16x8xf32>
    %546 = vector.shape_cast %545 : vector<1x1x16x8xf32> to vector<16x8xf32>
    %cst_151 = arith.constant 0.000000e+00 : f32
    %547 = vector.broadcast %cst_151 : f32 to vector<16x16xf32>
    %548 = vector.extract_strided_slice %546 {offsets = [0, 0], sizes = [16, 1], strides = [1, 1]} : vector<16x8xf32> to vector<16x1xf32>
    %549 = vector.shape_cast %548 : vector<16x1xf32> to vector<16x1xf32>
    %550 = vector.broadcast %549 : vector<16x1xf32> to vector<16x16xf32>
    %551 = vector.extract_strided_slice %190 {offsets = [0, 0], sizes = [1, 1], strides = [1, 1]} : vector<1x8xf32> to vector<1x1xf32>
    %552 = tpu.transpose %550, [1, 0] : vector<16x16xf32> -> vector<16x16xf32>
    %553 = arith.subf %550, %552 : vector<16x16xf32>
    %554 = math.absf %553 : vector<16x16xf32>
    %555 = vector.broadcast %551 : vector<1x1xf32> to vector<16x16xf32>
    %556 = arith.mulf %555, %554 : vector<16x16xf32>
    %557 = arith.addf %547, %556 : vector<16x16xf32>
    %558 = vector.extract_strided_slice %546 {offsets = [0, 1], sizes = [16, 1], strides = [1, 1]} : vector<16x8xf32> to vector<16x1xf32>
    %559 = vector.shape_cast %558 : vector<16x1xf32> to vector<16x1xf32>
    %560 = vector.broadcast %559 : vector<16x1xf32> to vector<16x16xf32>
    %561 = vector.extract_strided_slice %190 {offsets = [0, 1], sizes = [1, 1], strides = [1, 1]} : vector<1x8xf32> to vector<1x1xf32>
    %562 = tpu.transpose %560, [1, 0] : vector<16x16xf32> -> vector<16x16xf32>
    %563 = arith.subf %560, %562 : vector<16x16xf32>
    %564 = math.absf %563 : vector<16x16xf32>
    %565 = vector.broadcast %561 : vector<1x1xf32> to vector<16x16xf32>
    %566 = arith.mulf %565, %564 : vector<16x16xf32>
    %567 = arith.addf %557, %566 : vector<16x16xf32>
    %568 = vector.extract_strided_slice %546 {offsets = [0, 2], sizes = [16, 1], strides = [1, 1]} : vector<16x8xf32> to vector<16x1xf32>
    %569 = vector.shape_cast %568 : vector<16x1xf32> to vector<16x1xf32>
    %570 = vector.broadcast %569 : vector<16x1xf32> to vector<16x16xf32>
    %571 = vector.extract_strided_slice %190 {offsets = [0, 2], sizes = [1, 1], strides = [1, 1]} : vector<1x8xf32> to vector<1x1xf32>
    %572 = tpu.transpose %570, [1, 0] : vector<16x16xf32> -> vector<16x16xf32>
    %573 = arith.subf %570, %572 : vector<16x16xf32>
    %574 = math.absf %573 : vector<16x16xf32>
    %575 = vector.broadcast %571 : vector<1x1xf32> to vector<16x16xf32>
    %576 = arith.mulf %575, %574 : vector<16x16xf32>
    %577 = arith.addf %567, %576 : vector<16x16xf32>
    %578 = vector.extract_strided_slice %546 {offsets = [0, 3], sizes = [16, 1], strides = [1, 1]} : vector<16x8xf32> to vector<16x1xf32>
    %579 = vector.shape_cast %578 : vector<16x1xf32> to vector<16x1xf32>
    %580 = vector.broadcast %579 : vector<16x1xf32> to vector<16x16xf32>
    %581 = vector.extract_strided_slice %190 {offsets = [0, 3], sizes = [1, 1], strides = [1, 1]} : vector<1x8xf32> to vector<1x1xf32>
    %582 = tpu.transpose %580, [1, 0] : vector<16x16xf32> -> vector<16x16xf32>
    %583 = arith.subf %580, %582 : vector<16x16xf32>
    %584 = math.absf %583 : vector<16x16xf32>
    %585 = vector.broadcast %581 : vector<1x1xf32> to vector<16x16xf32>
    %586 = arith.mulf %585, %584 : vector<16x16xf32>
    %587 = arith.addf %577, %586 : vector<16x16xf32>
    %588 = vector.extract_strided_slice %546 {offsets = [0, 4], sizes = [16, 1], strides = [1, 1]} : vector<16x8xf32> to vector<16x1xf32>
    %589 = vector.shape_cast %588 : vector<16x1xf32> to vector<16x1xf32>
    %590 = vector.broadcast %589 : vector<16x1xf32> to vector<16x16xf32>
    %591 = vector.extract_strided_slice %190 {offsets = [0, 4], sizes = [1, 1], strides = [1, 1]} : vector<1x8xf32> to vector<1x1xf32>
    %592 = tpu.transpose %590, [1, 0] : vector<16x16xf32> -> vector<16x16xf32>
    %593 = arith.subf %590, %592 : vector<16x16xf32>
    %594 = math.absf %593 : vector<16x16xf32>
    %595 = vector.broadcast %591 : vector<1x1xf32> to vector<16x16xf32>
    %596 = arith.mulf %595, %594 : vector<16x16xf32>
    %597 = arith.addf %587, %596 : vector<16x16xf32>
    %598 = vector.extract_strided_slice %546 {offsets = [0, 5], sizes = [16, 1], strides = [1, 1]} : vector<16x8xf32> to vector<16x1xf32>
    %599 = vector.shape_cast %598 : vector<16x1xf32> to vector<16x1xf32>
    %600 = vector.broadcast %599 : vector<16x1xf32> to vector<16x16xf32>
    %601 = vector.extract_strided_slice %190 {offsets = [0, 5], sizes = [1, 1], strides = [1, 1]} : vector<1x8xf32> to vector<1x1xf32>
    %602 = tpu.transpose %600, [1, 0] : vector<16x16xf32> -> vector<16x16xf32>
    %603 = arith.subf %600, %602 : vector<16x16xf32>
    %604 = math.absf %603 : vector<16x16xf32>
    %605 = vector.broadcast %601 : vector<1x1xf32> to vector<16x16xf32>
    %606 = arith.mulf %605, %604 : vector<16x16xf32>
    %607 = arith.addf %597, %606 : vector<16x16xf32>
    %608 = vector.extract_strided_slice %546 {offsets = [0, 6], sizes = [16, 1], strides = [1, 1]} : vector<16x8xf32> to vector<16x1xf32>
    %609 = vector.shape_cast %608 : vector<16x1xf32> to vector<16x1xf32>
    %610 = vector.broadcast %609 : vector<16x1xf32> to vector<16x16xf32>
    %611 = vector.extract_strided_slice %190 {offsets = [0, 6], sizes = [1, 1], strides = [1, 1]} : vector<1x8xf32> to vector<1x1xf32>
    %612 = tpu.transpose %610, [1, 0] : vector<16x16xf32> -> vector<16x16xf32>
    %613 = arith.subf %610, %612 : vector<16x16xf32>
    %614 = math.absf %613 : vector<16x16xf32>
    %615 = vector.broadcast %611 : vector<1x1xf32> to vector<16x16xf32>
    %616 = arith.mulf %615, %614 : vector<16x16xf32>
    %617 = arith.addf %607, %616 : vector<16x16xf32>
    %618 = vector.extract_strided_slice %546 {offsets = [0, 7], sizes = [16, 1], strides = [1, 1]} : vector<16x8xf32> to vector<16x1xf32>
    %619 = vector.shape_cast %618 : vector<16x1xf32> to vector<16x1xf32>
    %620 = vector.broadcast %619 : vector<16x1xf32> to vector<16x16xf32>
    %621 = vector.extract_strided_slice %190 {offsets = [0, 7], sizes = [1, 1], strides = [1, 1]} : vector<1x8xf32> to vector<1x1xf32>
    %622 = tpu.transpose %620, [1, 0] : vector<16x16xf32> -> vector<16x16xf32>
    %623 = arith.subf %620, %622 : vector<16x16xf32>
    %624 = math.absf %623 : vector<16x16xf32>
    %625 = vector.broadcast %621 : vector<1x1xf32> to vector<16x16xf32>
    %626 = arith.mulf %625, %624 : vector<16x16xf32>
    %627 = arith.addf %617, %626 : vector<16x16xf32>
    %cst_152 = arith.constant 0.000000e+00 : f32
    %628 = vector.broadcast %cst_152 : f32 to vector<16x16xf32>
    %629 = arith.subf %628, %627 : vector<16x16xf32>
    %630 = math.exp %629 : vector<16x16xf32>
    %cst_153 = arith.constant dense<0.000000e+00> : vector<16xf32>
    %631 = vector.multi_reduction <add>, %630, %cst_153 [1] : vector<16x16xf32> to vector<16xf32>
    %632 = vector.shape_cast %631 : vector<16xf32> to vector<16x1xf32>
    %633 = vector.broadcast %632 : vector<16x1xf32> to vector<16x16xf32>
    %634 = arith.divf %630, %633 : vector<16x16xf32>
    %635 = tpu.transpose %634, [1, 0] : vector<16x16xf32> -> vector<16x16xf32>
    %636 = arith.minimumf %634, %635 : vector<16x16xf32>
    %cst_154 = arith.constant dense<0.000000e+00> : vector<16x8xf32>
    %637 = tpu.matmul %636, %546, %cst_154 {dimension_numbers = #tpu.dot_dimension_numbers<[1], [0], [0], [1], [0, 0, 1, 1], [], []>} : vector<16x16xf32>, vector<16x8xf32>, vector<16x8xf32> -> vector<16x8xf32>
    %c0_155 = arith.constant 0 : index
    %c48 = arith.constant 48 : index
    %c0_156 = arith.constant 0 : index
    %638 = vector.load %arg27[%c0_155, %c48, %c0_156] : memref<5x128x8xf32, #tpu.memory_space<vmem>>, vector<1x16x8xf32>
    %639 = vector.shape_cast %638 : vector<1x16x8xf32> to vector<16x8xf32>
    %640 = vector.shape_cast %637 : vector<16x8xf32> to vector<1x16x8xf32>
    tpu.vector_store %arg27[%c0_155, %c48, %c0_156], %640 {strides = array<i32>} : memref<5x128x8xf32, #tpu.memory_space<vmem>>, vector<1x16x8xf32>,
    %cst_157 = arith.constant dense<0.000000e+00> : vector<16x8xf32>
    %641 = tpu.matmul %636, %637, %cst_157 {dimension_numbers = #tpu.dot_dimension_numbers<[1], [0], [0], [1], [0, 0, 1, 1], [], []>} : vector<16x16xf32>, vector<16x8xf32>, vector<16x8xf32> -> vector<16x8xf32>
    %cst_158 = arith.constant 2.000000e+00 : f32
    %642 = vector.broadcast %cst_158 : f32 to vector<16x8xf32>
    %643 = arith.mulf %642, %641 : vector<16x8xf32>
    %644 = arith.subf %643, %546 : vector<16x8xf32>
    %c1_159 = arith.constant 1 : index
    %c48_160 = arith.constant 48 : index
    %c0_161 = arith.constant 0 : index
    %645 = vector.load %arg27[%c1_159, %c48_160, %c0_161] : memref<5x128x8xf32, #tpu.memory_space<vmem>>, vector<1x16x8xf32>
    %646 = vector.shape_cast %645 : vector<1x16x8xf32> to vector<16x8xf32>
    %647 = vector.shape_cast %644 : vector<16x8xf32> to vector<1x16x8xf32>
    tpu.vector_store %arg27[%c1_159, %c48_160, %c0_161], %647 {strides = array<i32>} : memref<5x128x8xf32, #tpu.memory_space<vmem>>, vector<1x16x8xf32>,
    %cst_162 = arith.constant dense<0.000000e+00> : vector<16x8xf32>
    %648 = tpu.matmul %193, %546, %cst_162 {dimension_numbers = #tpu.dot_dimension_numbers<[1], [0], [0], [1], [0, 0, 1, 1], [], []>} : vector<16x16xf32>, vector<16x8xf32>, vector<16x8xf32> -> vector<16x8xf32>
    %c2_163 = arith.constant 2 : index
    %c48_164 = arith.constant 48 : index
    %c0_165 = arith.constant 0 : index
    %649 = vector.load %arg27[%c2_163, %c48_164, %c0_165] : memref<5x128x8xf32, #tpu.memory_space<vmem>>, vector<1x16x8xf32>
    %650 = vector.shape_cast %649 : vector<1x16x8xf32> to vector<16x8xf32>
    %651 = vector.shape_cast %648 : vector<16x8xf32> to vector<1x16x8xf32>
    tpu.vector_store %arg27[%c2_163, %c48_164, %c0_165], %651 {strides = array<i32>} : memref<5x128x8xf32, #tpu.memory_space<vmem>>, vector<1x16x8xf32>,
    %cst_166 = arith.constant dense<0.000000e+00> : vector<16x8xf32>
    %652 = tpu.matmul %196, %546, %cst_166 {dimension_numbers = #tpu.dot_dimension_numbers<[1], [0], [0], [1], [0, 0, 1, 1], [], []>} : vector<16x16xf32>, vector<16x8xf32>, vector<16x8xf32> -> vector<16x8xf32>
    %c3_167 = arith.constant 3 : index
    %c48_168 = arith.constant 48 : index
    %c0_169 = arith.constant 0 : index
    %653 = vector.load %arg27[%c3_167, %c48_168, %c0_169] : memref<5x128x8xf32, #tpu.memory_space<vmem>>, vector<1x16x8xf32>
    %654 = vector.shape_cast %653 : vector<1x16x8xf32> to vector<16x8xf32>
    %655 = vector.shape_cast %652 : vector<16x8xf32> to vector<1x16x8xf32>
    tpu.vector_store %arg27[%c3_167, %c48_168, %c0_169], %655 {strides = array<i32>} : memref<5x128x8xf32, #tpu.memory_space<vmem>>, vector<1x16x8xf32>,
    %cst_170 = arith.constant dense<0.000000e+00> : vector<16x8xf32>
    %656 = tpu.matmul %199, %546, %cst_170 {dimension_numbers = #tpu.dot_dimension_numbers<[1], [0], [0], [1], [0, 0, 1, 1], [], []>} : vector<16x16xf32>, vector<16x8xf32>, vector<16x8xf32> -> vector<16x8xf32>
    %c4_171 = arith.constant 4 : index
    %c48_172 = arith.constant 48 : index
    %c0_173 = arith.constant 0 : index
    %657 = vector.load %arg27[%c4_171, %c48_172, %c0_173] : memref<5x128x8xf32, #tpu.memory_space<vmem>>, vector<1x16x8xf32>
    %658 = vector.shape_cast %657 : vector<1x16x8xf32> to vector<16x8xf32>
    %659 = vector.shape_cast %656 : vector<16x8xf32> to vector<1x16x8xf32>
    tpu.vector_store %arg27[%c4_171, %c48_172, %c0_173], %659 {strides = array<i32>} : memref<5x128x8xf32, #tpu.memory_space<vmem>>, vector<1x16x8xf32>,
    %c0_174 = arith.constant 0 : index
    %c4_175 = arith.constant 4 : index
    %c0_176 = arith.constant 0 : index
    %c0_177 = arith.constant 0 : index
    %660 = vector.load %arg1[%c0_174, %c4_175, %c0_176, %c0_177] : memref<1x8x16x8xf32, #tpu.memory_space<vmem>>, vector<1x1x16x8xf32>
    %661 = vector.shape_cast %660 : vector<1x1x16x8xf32> to vector<16x8xf32>
    %cst_178 = arith.constant 0.000000e+00 : f32
    %662 = vector.broadcast %cst_178 : f32 to vector<16x16xf32>
    %663 = vector.extract_strided_slice %661 {offsets = [0, 0], sizes = [16, 1], strides = [1, 1]} : vector<16x8xf32> to vector<16x1xf32>
    %664 = vector.shape_cast %663 : vector<16x1xf32> to vector<16x1xf32>
    %665 = vector.broadcast %664 : vector<16x1xf32> to vector<16x16xf32>
    %666 = vector.extract_strided_slice %190 {offsets = [0, 0], sizes = [1, 1], strides = [1, 1]} : vector<1x8xf32> to vector<1x1xf32>
    %667 = tpu.transpose %665, [1, 0] : vector<16x16xf32> -> vector<16x16xf32>
    %668 = arith.subf %665, %667 : vector<16x16xf32>
    %669 = math.absf %668 : vector<16x16xf32>
    %670 = vector.broadcast %666 : vector<1x1xf32> to vector<16x16xf32>
    %671 = arith.mulf %670, %669 : vector<16x16xf32>
    %672 = arith.addf %662, %671 : vector<16x16xf32>
    %673 = vector.extract_strided_slice %661 {offsets = [0, 1], sizes = [16, 1], strides = [1, 1]} : vector<16x8xf32> to vector<16x1xf32>
    %674 = vector.shape_cast %673 : vector<16x1xf32> to vector<16x1xf32>
    %675 = vector.broadcast %674 : vector<16x1xf32> to vector<16x16xf32>
    %676 = vector.extract_strided_slice %190 {offsets = [0, 1], sizes = [1, 1], strides = [1, 1]} : vector<1x8xf32> to vector<1x1xf32>
    %677 = tpu.transpose %675, [1, 0] : vector<16x16xf32> -> vector<16x16xf32>
    %678 = arith.subf %675, %677 : vector<16x16xf32>
    %679 = math.absf %678 : vector<16x16xf32>
    %680 = vector.broadcast %676 : vector<1x1xf32> to vector<16x16xf32>
    %681 = arith.mulf %680, %679 : vector<16x16xf32>
    %682 = arith.addf %672, %681 : vector<16x16xf32>
    %683 = vector.extract_strided_slice %661 {offsets = [0, 2], sizes = [16, 1], strides = [1, 1]} : vector<16x8xf32> to vector<16x1xf32>
    %684 = vector.shape_cast %683 : vector<16x1xf32> to vector<16x1xf32>
    %685 = vector.broadcast %684 : vector<16x1xf32> to vector<16x16xf32>
    %686 = vector.extract_strided_slice %190 {offsets = [0, 2], sizes = [1, 1], strides = [1, 1]} : vector<1x8xf32> to vector<1x1xf32>
    %687 = tpu.transpose %685, [1, 0] : vector<16x16xf32> -> vector<16x16xf32>
    %688 = arith.subf %685, %687 : vector<16x16xf32>
    %689 = math.absf %688 : vector<16x16xf32>
    %690 = vector.broadcast %686 : vector<1x1xf32> to vector<16x16xf32>
    %691 = arith.mulf %690, %689 : vector<16x16xf32>
    %692 = arith.addf %682, %691 : vector<16x16xf32>
    %693 = vector.extract_strided_slice %661 {offsets = [0, 3], sizes = [16, 1], strides = [1, 1]} : vector<16x8xf32> to vector<16x1xf32>
    %694 = vector.shape_cast %693 : vector<16x1xf32> to vector<16x1xf32>
    %695 = vector.broadcast %694 : vector<16x1xf32> to vector<16x16xf32>
    %696 = vector.extract_strided_slice %190 {offsets = [0, 3], sizes = [1, 1], strides = [1, 1]} : vector<1x8xf32> to vector<1x1xf32>
    %697 = tpu.transpose %695, [1, 0] : vector<16x16xf32> -> vector<16x16xf32>
    %698 = arith.subf %695, %697 : vector<16x16xf32>
    %699 = math.absf %698 : vector<16x16xf32>
    %700 = vector.broadcast %696 : vector<1x1xf32> to vector<16x16xf32>
    %701 = arith.mulf %700, %699 : vector<16x16xf32>
    %702 = arith.addf %692, %701 : vector<16x16xf32>
    %703 = vector.extract_strided_slice %661 {offsets = [0, 4], sizes = [16, 1], strides = [1, 1]} : vector<16x8xf32> to vector<16x1xf32>
    %704 = vector.shape_cast %703 : vector<16x1xf32> to vector<16x1xf32>
    %705 = vector.broadcast %704 : vector<16x1xf32> to vector<16x16xf32>
    %706 = vector.extract_strided_slice %190 {offsets = [0, 4], sizes = [1, 1], strides = [1, 1]} : vector<1x8xf32> to vector<1x1xf32>
    %707 = tpu.transpose %705, [1, 0] : vector<16x16xf32> -> vector<16x16xf32>
    %708 = arith.subf %705, %707 : vector<16x16xf32>
    %709 = math.absf %708 : vector<16x16xf32>
    %710 = vector.broadcast %706 : vector<1x1xf32> to vector<16x16xf32>
    %711 = arith.mulf %710, %709 : vector<16x16xf32>
    %712 = arith.addf %702, %711 : vector<16x16xf32>
    %713 = vector.extract_strided_slice %661 {offsets = [0, 5], sizes = [16, 1], strides = [1, 1]} : vector<16x8xf32> to vector<16x1xf32>
    %714 = vector.shape_cast %713 : vector<16x1xf32> to vector<16x1xf32>
    %715 = vector.broadcast %714 : vector<16x1xf32> to vector<16x16xf32>
    %716 = vector.extract_strided_slice %190 {offsets = [0, 5], sizes = [1, 1], strides = [1, 1]} : vector<1x8xf32> to vector<1x1xf32>
    %717 = tpu.transpose %715, [1, 0] : vector<16x16xf32> -> vector<16x16xf32>
    %718 = arith.subf %715, %717 : vector<16x16xf32>
    %719 = math.absf %718 : vector<16x16xf32>
    %720 = vector.broadcast %716 : vector<1x1xf32> to vector<16x16xf32>
    %721 = arith.mulf %720, %719 : vector<16x16xf32>
    %722 = arith.addf %712, %721 : vector<16x16xf32>
    %723 = vector.extract_strided_slice %661 {offsets = [0, 6], sizes = [16, 1], strides = [1, 1]} : vector<16x8xf32> to vector<16x1xf32>
    %724 = vector.shape_cast %723 : vector<16x1xf32> to vector<16x1xf32>
    %725 = vector.broadcast %724 : vector<16x1xf32> to vector<16x16xf32>
    %726 = vector.extract_strided_slice %190 {offsets = [0, 6], sizes = [1, 1], strides = [1, 1]} : vector<1x8xf32> to vector<1x1xf32>
    %727 = tpu.transpose %725, [1, 0] : vector<16x16xf32> -> vector<16x16xf32>
    %728 = arith.subf %725, %727 : vector<16x16xf32>
    %729 = math.absf %728 : vector<16x16xf32>
    %730 = vector.broadcast %726 : vector<1x1xf32> to vector<16x16xf32>
    %731 = arith.mulf %730, %729 : vector<16x16xf32>
    %732 = arith.addf %722, %731 : vector<16x16xf32>
    %733 = vector.extract_strided_slice %661 {offsets = [0, 7], sizes = [16, 1], strides = [1, 1]} : vector<16x8xf32> to vector<16x1xf32>
    %734 = vector.shape_cast %733 : vector<16x1xf32> to vector<16x1xf32>
    %735 = vector.broadcast %734 : vector<16x1xf32> to vector<16x16xf32>
    %736 = vector.extract_strided_slice %190 {offsets = [0, 7], sizes = [1, 1], strides = [1, 1]} : vector<1x8xf32> to vector<1x1xf32>
    %737 = tpu.transpose %735, [1, 0] : vector<16x16xf32> -> vector<16x16xf32>
    %738 = arith.subf %735, %737 : vector<16x16xf32>
    %739 = math.absf %738 : vector<16x16xf32>
    %740 = vector.broadcast %736 : vector<1x1xf32> to vector<16x16xf32>
    %741 = arith.mulf %740, %739 : vector<16x16xf32>
    %742 = arith.addf %732, %741 : vector<16x16xf32>
    %cst_179 = arith.constant 0.000000e+00 : f32
    %743 = vector.broadcast %cst_179 : f32 to vector<16x16xf32>
    %744 = arith.subf %743, %742 : vector<16x16xf32>
    %745 = math.exp %744 : vector<16x16xf32>
    %cst_180 = arith.constant dense<0.000000e+00> : vector<16xf32>
    %746 = vector.multi_reduction <add>, %745, %cst_180 [1] : vector<16x16xf32> to vector<16xf32>
    %747 = vector.shape_cast %746 : vector<16xf32> to vector<16x1xf32>
    %748 = vector.broadcast %747 : vector<16x1xf32> to vector<16x16xf32>
    %749 = arith.divf %745, %748 : vector<16x16xf32>
    %750 = tpu.transpose %749, [1, 0] : vector<16x16xf32> -> vector<16x16xf32>
    %751 = arith.minimumf %749, %750 : vector<16x16xf32>
    %cst_181 = arith.constant dense<0.000000e+00> : vector<16x8xf32>
    %752 = tpu.matmul %751, %661, %cst_181 {dimension_numbers = #tpu.dot_dimension_numbers<[1], [0], [0], [1], [0, 0, 1, 1], [], []>} : vector<16x16xf32>, vector<16x8xf32>, vector<16x8xf32> -> vector<16x8xf32>
    %c0_182 = arith.constant 0 : index
    %c64 = arith.constant 64 : index
    %c0_183 = arith.constant 0 : index
    %753 = vector.load %arg27[%c0_182, %c64, %c0_183] : memref<5x128x8xf32, #tpu.memory_space<vmem>>, vector<1x16x8xf32>
    %754 = vector.shape_cast %753 : vector<1x16x8xf32> to vector<16x8xf32>
    %755 = vector.shape_cast %752 : vector<16x8xf32> to vector<1x16x8xf32>
    tpu.vector_store %arg27[%c0_182, %c64, %c0_183], %755 {strides = array<i32>} : memref<5x128x8xf32, #tpu.memory_space<vmem>>, vector<1x16x8xf32>,
    %cst_184 = arith.constant dense<0.000000e+00> : vector<16x8xf32>
    %756 = tpu.matmul %751, %752, %cst_184 {dimension_numbers = #tpu.dot_dimension_numbers<[1], [0], [0], [1], [0, 0, 1, 1], [], []>} : vector<16x16xf32>, vector<16x8xf32>, vector<16x8xf32> -> vector<16x8xf32>
    %cst_185 = arith.constant 2.000000e+00 : f32
    %757 = vector.broadcast %cst_185 : f32 to vector<16x8xf32>
    %758 = arith.mulf %757, %756 : vector<16x8xf32>
    %759 = arith.subf %758, %661 : vector<16x8xf32>
    %c1_186 = arith.constant 1 : index
    %c64_187 = arith.constant 64 : index
    %c0_188 = arith.constant 0 : index
    %760 = vector.load %arg27[%c1_186, %c64_187, %c0_188] : memref<5x128x8xf32, #tpu.memory_space<vmem>>, vector<1x16x8xf32>
    %761 = vector.shape_cast %760 : vector<1x16x8xf32> to vector<16x8xf32>
    %762 = vector.shape_cast %759 : vector<16x8xf32> to vector<1x16x8xf32>
    tpu.vector_store %arg27[%c1_186, %c64_187, %c0_188], %762 {strides = array<i32>} : memref<5x128x8xf32, #tpu.memory_space<vmem>>, vector<1x16x8xf32>,
    %cst_189 = arith.constant dense<0.000000e+00> : vector<16x8xf32>
    %763 = tpu.matmul %193, %661, %cst_189 {dimension_numbers = #tpu.dot_dimension_numbers<[1], [0], [0], [1], [0, 0, 1, 1], [], []>} : vector<16x16xf32>, vector<16x8xf32>, vector<16x8xf32> -> vector<16x8xf32>
    %c2_190 = arith.constant 2 : index
    %c64_191 = arith.constant 64 : index
    %c0_192 = arith.constant 0 : index
    %764 = vector.load %arg27[%c2_190, %c64_191, %c0_192] : memref<5x128x8xf32, #tpu.memory_space<vmem>>, vector<1x16x8xf32>
    %765 = vector.shape_cast %764 : vector<1x16x8xf32> to vector<16x8xf32>
    %766 = vector.shape_cast %763 : vector<16x8xf32> to vector<1x16x8xf32>
    tpu.vector_store %arg27[%c2_190, %c64_191, %c0_192], %766 {strides = array<i32>} : memref<5x128x8xf32, #tpu.memory_space<vmem>>, vector<1x16x8xf32>,
    %cst_193 = arith.constant dense<0.000000e+00> : vector<16x8xf32>
    %767 = tpu.matmul %196, %661, %cst_193 {dimension_numbers = #tpu.dot_dimension_numbers<[1], [0], [0], [1], [0, 0, 1, 1], [], []>} : vector<16x16xf32>, vector<16x8xf32>, vector<16x8xf32> -> vector<16x8xf32>
    %c3_194 = arith.constant 3 : index
    %c64_195 = arith.constant 64 : index
    %c0_196 = arith.constant 0 : index
    %768 = vector.load %arg27[%c3_194, %c64_195, %c0_196] : memref<5x128x8xf32, #tpu.memory_space<vmem>>, vector<1x16x8xf32>
    %769 = vector.shape_cast %768 : vector<1x16x8xf32> to vector<16x8xf32>
    %770 = vector.shape_cast %767 : vector<16x8xf32> to vector<1x16x8xf32>
    tpu.vector_store %arg27[%c3_194, %c64_195, %c0_196], %770 {strides = array<i32>} : memref<5x128x8xf32, #tpu.memory_space<vmem>>, vector<1x16x8xf32>,
    %cst_197 = arith.constant dense<0.000000e+00> : vector<16x8xf32>
    %771 = tpu.matmul %199, %661, %cst_197 {dimension_numbers = #tpu.dot_dimension_numbers<[1], [0], [0], [1], [0, 0, 1, 1], [], []>} : vector<16x16xf32>, vector<16x8xf32>, vector<16x8xf32> -> vector<16x8xf32>
    %c4_198 = arith.constant 4 : index
    %c64_199 = arith.constant 64 : index
    %c0_200 = arith.constant 0 : index
    %772 = vector.load %arg27[%c4_198, %c64_199, %c0_200] : memref<5x128x8xf32, #tpu.memory_space<vmem>>, vector<1x16x8xf32>
    %773 = vector.shape_cast %772 : vector<1x16x8xf32> to vector<16x8xf32>
    %774 = vector.shape_cast %771 : vector<16x8xf32> to vector<1x16x8xf32>
    tpu.vector_store %arg27[%c4_198, %c64_199, %c0_200], %774 {strides = array<i32>} : memref<5x128x8xf32, #tpu.memory_space<vmem>>, vector<1x16x8xf32>,
    %c0_201 = arith.constant 0 : index
    %c5 = arith.constant 5 : index
    %c0_202 = arith.constant 0 : index
    %c0_203 = arith.constant 0 : index
    %775 = vector.load %arg1[%c0_201, %c5, %c0_202, %c0_203] : memref<1x8x16x8xf32, #tpu.memory_space<vmem>>, vector<1x1x16x8xf32>
    %776 = vector.shape_cast %775 : vector<1x1x16x8xf32> to vector<16x8xf32>
    %cst_204 = arith.constant 0.000000e+00 : f32
    %777 = vector.broadcast %cst_204 : f32 to vector<16x16xf32>
    %778 = vector.extract_strided_slice %776 {offsets = [0, 0], sizes = [16, 1], strides = [1, 1]} : vector<16x8xf32> to vector<16x1xf32>
    %779 = vector.shape_cast %778 : vector<16x1xf32> to vector<16x1xf32>
    %780 = vector.broadcast %779 : vector<16x1xf32> to vector<16x16xf32>
    %781 = vector.extract_strided_slice %190 {offsets = [0, 0], sizes = [1, 1], strides = [1, 1]} : vector<1x8xf32> to vector<1x1xf32>
    %782 = tpu.transpose %780, [1, 0] : vector<16x16xf32> -> vector<16x16xf32>
    %783 = arith.subf %780, %782 : vector<16x16xf32>
    %784 = math.absf %783 : vector<16x16xf32>
    %785 = vector.broadcast %781 : vector<1x1xf32> to vector<16x16xf32>
    %786 = arith.mulf %785, %784 : vector<16x16xf32>
    %787 = arith.addf %777, %786 : vector<16x16xf32>
    %788 = vector.extract_strided_slice %776 {offsets = [0, 1], sizes = [16, 1], strides = [1, 1]} : vector<16x8xf32> to vector<16x1xf32>
    %789 = vector.shape_cast %788 : vector<16x1xf32> to vector<16x1xf32>
    %790 = vector.broadcast %789 : vector<16x1xf32> to vector<16x16xf32>
    %791 = vector.extract_strided_slice %190 {offsets = [0, 1], sizes = [1, 1], strides = [1, 1]} : vector<1x8xf32> to vector<1x1xf32>
    %792 = tpu.transpose %790, [1, 0] : vector<16x16xf32> -> vector<16x16xf32>
    %793 = arith.subf %790, %792 : vector<16x16xf32>
    %794 = math.absf %793 : vector<16x16xf32>
    %795 = vector.broadcast %791 : vector<1x1xf32> to vector<16x16xf32>
    %796 = arith.mulf %795, %794 : vector<16x16xf32>
    %797 = arith.addf %787, %796 : vector<16x16xf32>
    %798 = vector.extract_strided_slice %776 {offsets = [0, 2], sizes = [16, 1], strides = [1, 1]} : vector<16x8xf32> to vector<16x1xf32>
    %799 = vector.shape_cast %798 : vector<16x1xf32> to vector<16x1xf32>
    %800 = vector.broadcast %799 : vector<16x1xf32> to vector<16x16xf32>
    %801 = vector.extract_strided_slice %190 {offsets = [0, 2], sizes = [1, 1], strides = [1, 1]} : vector<1x8xf32> to vector<1x1xf32>
    %802 = tpu.transpose %800, [1, 0] : vector<16x16xf32> -> vector<16x16xf32>
    %803 = arith.subf %800, %802 : vector<16x16xf32>
    %804 = math.absf %803 : vector<16x16xf32>
    %805 = vector.broadcast %801 : vector<1x1xf32> to vector<16x16xf32>
    %806 = arith.mulf %805, %804 : vector<16x16xf32>
    %807 = arith.addf %797, %806 : vector<16x16xf32>
    %808 = vector.extract_strided_slice %776 {offsets = [0, 3], sizes = [16, 1], strides = [1, 1]} : vector<16x8xf32> to vector<16x1xf32>
    %809 = vector.shape_cast %808 : vector<16x1xf32> to vector<16x1xf32>
    %810 = vector.broadcast %809 : vector<16x1xf32> to vector<16x16xf32>
    %811 = vector.extract_strided_slice %190 {offsets = [0, 3], sizes = [1, 1], strides = [1, 1]} : vector<1x8xf32> to vector<1x1xf32>
    %812 = tpu.transpose %810, [1, 0] : vector<16x16xf32> -> vector<16x16xf32>
    %813 = arith.subf %810, %812 : vector<16x16xf32>
    %814 = math.absf %813 : vector<16x16xf32>
    %815 = vector.broadcast %811 : vector<1x1xf32> to vector<16x16xf32>
    %816 = arith.mulf %815, %814 : vector<16x16xf32>
    %817 = arith.addf %807, %816 : vector<16x16xf32>
    %818 = vector.extract_strided_slice %776 {offsets = [0, 4], sizes = [16, 1], strides = [1, 1]} : vector<16x8xf32> to vector<16x1xf32>
    %819 = vector.shape_cast %818 : vector<16x1xf32> to vector<16x1xf32>
    %820 = vector.broadcast %819 : vector<16x1xf32> to vector<16x16xf32>
    %821 = vector.extract_strided_slice %190 {offsets = [0, 4], sizes = [1, 1], strides = [1, 1]} : vector<1x8xf32> to vector<1x1xf32>
    %822 = tpu.transpose %820, [1, 0] : vector<16x16xf32> -> vector<16x16xf32>
    %823 = arith.subf %820, %822 : vector<16x16xf32>
    %824 = math.absf %823 : vector<16x16xf32>
    %825 = vector.broadcast %821 : vector<1x1xf32> to vector<16x16xf32>
    %826 = arith.mulf %825, %824 : vector<16x16xf32>
    %827 = arith.addf %817, %826 : vector<16x16xf32>
    %828 = vector.extract_strided_slice %776 {offsets = [0, 5], sizes = [16, 1], strides = [1, 1]} : vector<16x8xf32> to vector<16x1xf32>
    %829 = vector.shape_cast %828 : vector<16x1xf32> to vector<16x1xf32>
    %830 = vector.broadcast %829 : vector<16x1xf32> to vector<16x16xf32>
    %831 = vector.extract_strided_slice %190 {offsets = [0, 5], sizes = [1, 1], strides = [1, 1]} : vector<1x8xf32> to vector<1x1xf32>
    %832 = tpu.transpose %830, [1, 0] : vector<16x16xf32> -> vector<16x16xf32>
    %833 = arith.subf %830, %832 : vector<16x16xf32>
    %834 = math.absf %833 : vector<16x16xf32>
    %835 = vector.broadcast %831 : vector<1x1xf32> to vector<16x16xf32>
    %836 = arith.mulf %835, %834 : vector<16x16xf32>
    %837 = arith.addf %827, %836 : vector<16x16xf32>
    %838 = vector.extract_strided_slice %776 {offsets = [0, 6], sizes = [16, 1], strides = [1, 1]} : vector<16x8xf32> to vector<16x1xf32>
    %839 = vector.shape_cast %838 : vector<16x1xf32> to vector<16x1xf32>
    %840 = vector.broadcast %839 : vector<16x1xf32> to vector<16x16xf32>
    %841 = vector.extract_strided_slice %190 {offsets = [0, 6], sizes = [1, 1], strides = [1, 1]} : vector<1x8xf32> to vector<1x1xf32>
    %842 = tpu.transpose %840, [1, 0] : vector<16x16xf32> -> vector<16x16xf32>
    %843 = arith.subf %840, %842 : vector<16x16xf32>
    %844 = math.absf %843 : vector<16x16xf32>
    %845 = vector.broadcast %841 : vector<1x1xf32> to vector<16x16xf32>
    %846 = arith.mulf %845, %844 : vector<16x16xf32>
    %847 = arith.addf %837, %846 : vector<16x16xf32>
    %848 = vector.extract_strided_slice %776 {offsets = [0, 7], sizes = [16, 1], strides = [1, 1]} : vector<16x8xf32> to vector<16x1xf32>
    %849 = vector.shape_cast %848 : vector<16x1xf32> to vector<16x1xf32>
    %850 = vector.broadcast %849 : vector<16x1xf32> to vector<16x16xf32>
    %851 = vector.extract_strided_slice %190 {offsets = [0, 7], sizes = [1, 1], strides = [1, 1]} : vector<1x8xf32> to vector<1x1xf32>
    %852 = tpu.transpose %850, [1, 0] : vector<16x16xf32> -> vector<16x16xf32>
    %853 = arith.subf %850, %852 : vector<16x16xf32>
    %854 = math.absf %853 : vector<16x16xf32>
    %855 = vector.broadcast %851 : vector<1x1xf32> to vector<16x16xf32>
    %856 = arith.mulf %855, %854 : vector<16x16xf32>
    %857 = arith.addf %847, %856 : vector<16x16xf32>
    %cst_205 = arith.constant 0.000000e+00 : f32
    %858 = vector.broadcast %cst_205 : f32 to vector<16x16xf32>
    %859 = arith.subf %858, %857 : vector<16x16xf32>
    %860 = math.exp %859 : vector<16x16xf32>
    %cst_206 = arith.constant dense<0.000000e+00> : vector<16xf32>
    %861 = vector.multi_reduction <add>, %860, %cst_206 [1] : vector<16x16xf32> to vector<16xf32>
    %862 = vector.shape_cast %861 : vector<16xf32> to vector<16x1xf32>
    %863 = vector.broadcast %862 : vector<16x1xf32> to vector<16x16xf32>
    %864 = arith.divf %860, %863 : vector<16x16xf32>
    %865 = tpu.transpose %864, [1, 0] : vector<16x16xf32> -> vector<16x16xf32>
    %866 = arith.minimumf %864, %865 : vector<16x16xf32>
    %cst_207 = arith.constant dense<0.000000e+00> : vector<16x8xf32>
    %867 = tpu.matmul %866, %776, %cst_207 {dimension_numbers = #tpu.dot_dimension_numbers<[1], [0], [0], [1], [0, 0, 1, 1], [], []>} : vector<16x16xf32>, vector<16x8xf32>, vector<16x8xf32> -> vector<16x8xf32>
    %c0_208 = arith.constant 0 : index
    %c80 = arith.constant 80 : index
    %c0_209 = arith.constant 0 : index
    %868 = vector.load %arg27[%c0_208, %c80, %c0_209] : memref<5x128x8xf32, #tpu.memory_space<vmem>>, vector<1x16x8xf32>
    %869 = vector.shape_cast %868 : vector<1x16x8xf32> to vector<16x8xf32>
    %870 = vector.shape_cast %867 : vector<16x8xf32> to vector<1x16x8xf32>
    tpu.vector_store %arg27[%c0_208, %c80, %c0_209], %870 {strides = array<i32>} : memref<5x128x8xf32, #tpu.memory_space<vmem>>, vector<1x16x8xf32>,
    %cst_210 = arith.constant dense<0.000000e+00> : vector<16x8xf32>
    %871 = tpu.matmul %866, %867, %cst_210 {dimension_numbers = #tpu.dot_dimension_numbers<[1], [0], [0], [1], [0, 0, 1, 1], [], []>} : vector<16x16xf32>, vector<16x8xf32>, vector<16x8xf32> -> vector<16x8xf32>
    %cst_211 = arith.constant 2.000000e+00 : f32
    %872 = vector.broadcast %cst_211 : f32 to vector<16x8xf32>
    %873 = arith.mulf %872, %871 : vector<16x8xf32>
    %874 = arith.subf %873, %776 : vector<16x8xf32>
    %c1_212 = arith.constant 1 : index
    %c80_213 = arith.constant 80 : index
    %c0_214 = arith.constant 0 : index
    %875 = vector.load %arg27[%c1_212, %c80_213, %c0_214] : memref<5x128x8xf32, #tpu.memory_space<vmem>>, vector<1x16x8xf32>
    %876 = vector.shape_cast %875 : vector<1x16x8xf32> to vector<16x8xf32>
    %877 = vector.shape_cast %874 : vector<16x8xf32> to vector<1x16x8xf32>
    tpu.vector_store %arg27[%c1_212, %c80_213, %c0_214], %877 {strides = array<i32>} : memref<5x128x8xf32, #tpu.memory_space<vmem>>, vector<1x16x8xf32>,
    %cst_215 = arith.constant dense<0.000000e+00> : vector<16x8xf32>
    %878 = tpu.matmul %193, %776, %cst_215 {dimension_numbers = #tpu.dot_dimension_numbers<[1], [0], [0], [1], [0, 0, 1, 1], [], []>} : vector<16x16xf32>, vector<16x8xf32>, vector<16x8xf32> -> vector<16x8xf32>
    %c2_216 = arith.constant 2 : index
    %c80_217 = arith.constant 80 : index
    %c0_218 = arith.constant 0 : index
    %879 = vector.load %arg27[%c2_216, %c80_217, %c0_218] : memref<5x128x8xf32, #tpu.memory_space<vmem>>, vector<1x16x8xf32>
    %880 = vector.shape_cast %879 : vector<1x16x8xf32> to vector<16x8xf32>
    %881 = vector.shape_cast %878 : vector<16x8xf32> to vector<1x16x8xf32>
    tpu.vector_store %arg27[%c2_216, %c80_217, %c0_218], %881 {strides = array<i32>} : memref<5x128x8xf32, #tpu.memory_space<vmem>>, vector<1x16x8xf32>,
    %cst_219 = arith.constant dense<0.000000e+00> : vector<16x8xf32>
    %882 = tpu.matmul %196, %776, %cst_219 {dimension_numbers = #tpu.dot_dimension_numbers<[1], [0], [0], [1], [0, 0, 1, 1], [], []>} : vector<16x16xf32>, vector<16x8xf32>, vector<16x8xf32> -> vector<16x8xf32>
    %c3_220 = arith.constant 3 : index
    %c80_221 = arith.constant 80 : index
    %c0_222 = arith.constant 0 : index
    %883 = vector.load %arg27[%c3_220, %c80_221, %c0_222] : memref<5x128x8xf32, #tpu.memory_space<vmem>>, vector<1x16x8xf32>
    %884 = vector.shape_cast %883 : vector<1x16x8xf32> to vector<16x8xf32>
    %885 = vector.shape_cast %882 : vector<16x8xf32> to vector<1x16x8xf32>
    tpu.vector_store %arg27[%c3_220, %c80_221, %c0_222], %885 {strides = array<i32>} : memref<5x128x8xf32, #tpu.memory_space<vmem>>, vector<1x16x8xf32>,
    %cst_223 = arith.constant dense<0.000000e+00> : vector<16x8xf32>
    %886 = tpu.matmul %199, %776, %cst_223 {dimension_numbers = #tpu.dot_dimension_numbers<[1], [0], [0], [1], [0, 0, 1, 1], [], []>} : vector<16x16xf32>, vector<16x8xf32>, vector<16x8xf32> -> vector<16x8xf32>
    %c4_224 = arith.constant 4 : index
    %c80_225 = arith.constant 80 : index
    %c0_226 = arith.constant 0 : index
    %887 = vector.load %arg27[%c4_224, %c80_225, %c0_226] : memref<5x128x8xf32, #tpu.memory_space<vmem>>, vector<1x16x8xf32>
    %888 = vector.shape_cast %887 : vector<1x16x8xf32> to vector<16x8xf32>
    %889 = vector.shape_cast %886 : vector<16x8xf32> to vector<1x16x8xf32>
    tpu.vector_store %arg27[%c4_224, %c80_225, %c0_226], %889 {strides = array<i32>} : memref<5x128x8xf32, #tpu.memory_space<vmem>>, vector<1x16x8xf32>,
    %c0_227 = arith.constant 0 : index
    %c6 = arith.constant 6 : index
    %c0_228 = arith.constant 0 : index
    %c0_229 = arith.constant 0 : index
    %890 = vector.load %arg1[%c0_227, %c6, %c0_228, %c0_229] : memref<1x8x16x8xf32, #tpu.memory_space<vmem>>, vector<1x1x16x8xf32>
    %891 = vector.shape_cast %890 : vector<1x1x16x8xf32> to vector<16x8xf32>
    %cst_230 = arith.constant 0.000000e+00 : f32
    %892 = vector.broadcast %cst_230 : f32 to vector<16x16xf32>
    %893 = vector.extract_strided_slice %891 {offsets = [0, 0], sizes = [16, 1], strides = [1, 1]} : vector<16x8xf32> to vector<16x1xf32>
    %894 = vector.shape_cast %893 : vector<16x1xf32> to vector<16x1xf32>
    %895 = vector.broadcast %894 : vector<16x1xf32> to vector<16x16xf32>
    %896 = vector.extract_strided_slice %190 {offsets = [0, 0], sizes = [1, 1], strides = [1, 1]} : vector<1x8xf32> to vector<1x1xf32>
    %897 = tpu.transpose %895, [1, 0] : vector<16x16xf32> -> vector<16x16xf32>
    %898 = arith.subf %895, %897 : vector<16x16xf32>
    %899 = math.absf %898 : vector<16x16xf32>
    %900 = vector.broadcast %896 : vector<1x1xf32> to vector<16x16xf32>
    %901 = arith.mulf %900, %899 : vector<16x16xf32>
    %902 = arith.addf %892, %901 : vector<16x16xf32>
    %903 = vector.extract_strided_slice %891 {offsets = [0, 1], sizes = [16, 1], strides = [1, 1]} : vector<16x8xf32> to vector<16x1xf32>
    %904 = vector.shape_cast %903 : vector<16x1xf32> to vector<16x1xf32>
    %905 = vector.broadcast %904 : vector<16x1xf32> to vector<16x16xf32>
    %906 = vector.extract_strided_slice %190 {offsets = [0, 1], sizes = [1, 1], strides = [1, 1]} : vector<1x8xf32> to vector<1x1xf32>
    %907 = tpu.transpose %905, [1, 0] : vector<16x16xf32> -> vector<16x16xf32>
    %908 = arith.subf %905, %907 : vector<16x16xf32>
    %909 = math.absf %908 : vector<16x16xf32>
    %910 = vector.broadcast %906 : vector<1x1xf32> to vector<16x16xf32>
    %911 = arith.mulf %910, %909 : vector<16x16xf32>
    %912 = arith.addf %902, %911 : vector<16x16xf32>
    %913 = vector.extract_strided_slice %891 {offsets = [0, 2], sizes = [16, 1], strides = [1, 1]} : vector<16x8xf32> to vector<16x1xf32>
    %914 = vector.shape_cast %913 : vector<16x1xf32> to vector<16x1xf32>
    %915 = vector.broadcast %914 : vector<16x1xf32> to vector<16x16xf32>
    %916 = vector.extract_strided_slice %190 {offsets = [0, 2], sizes = [1, 1], strides = [1, 1]} : vector<1x8xf32> to vector<1x1xf32>
    %917 = tpu.transpose %915, [1, 0] : vector<16x16xf32> -> vector<16x16xf32>
    %918 = arith.subf %915, %917 : vector<16x16xf32>
    %919 = math.absf %918 : vector<16x16xf32>
    %920 = vector.broadcast %916 : vector<1x1xf32> to vector<16x16xf32>
    %921 = arith.mulf %920, %919 : vector<16x16xf32>
    %922 = arith.addf %912, %921 : vector<16x16xf32>
    %923 = vector.extract_strided_slice %891 {offsets = [0, 3], sizes = [16, 1], strides = [1, 1]} : vector<16x8xf32> to vector<16x1xf32>
    %924 = vector.shape_cast %923 : vector<16x1xf32> to vector<16x1xf32>
    %925 = vector.broadcast %924 : vector<16x1xf32> to vector<16x16xf32>
    %926 = vector.extract_strided_slice %190 {offsets = [0, 3], sizes = [1, 1], strides = [1, 1]} : vector<1x8xf32> to vector<1x1xf32>
    %927 = tpu.transpose %925, [1, 0] : vector<16x16xf32> -> vector<16x16xf32>
    %928 = arith.subf %925, %927 : vector<16x16xf32>
    %929 = math.absf %928 : vector<16x16xf32>
    %930 = vector.broadcast %926 : vector<1x1xf32> to vector<16x16xf32>
    %931 = arith.mulf %930, %929 : vector<16x16xf32>
    %932 = arith.addf %922, %931 : vector<16x16xf32>
    %933 = vector.extract_strided_slice %891 {offsets = [0, 4], sizes = [16, 1], strides = [1, 1]} : vector<16x8xf32> to vector<16x1xf32>
    %934 = vector.shape_cast %933 : vector<16x1xf32> to vector<16x1xf32>
    %935 = vector.broadcast %934 : vector<16x1xf32> to vector<16x16xf32>
    %936 = vector.extract_strided_slice %190 {offsets = [0, 4], sizes = [1, 1], strides = [1, 1]} : vector<1x8xf32> to vector<1x1xf32>
    %937 = tpu.transpose %935, [1, 0] : vector<16x16xf32> -> vector<16x16xf32>
    %938 = arith.subf %935, %937 : vector<16x16xf32>
    %939 = math.absf %938 : vector<16x16xf32>
    %940 = vector.broadcast %936 : vector<1x1xf32> to vector<16x16xf32>
    %941 = arith.mulf %940, %939 : vector<16x16xf32>
    %942 = arith.addf %932, %941 : vector<16x16xf32>
    %943 = vector.extract_strided_slice %891 {offsets = [0, 5], sizes = [16, 1], strides = [1, 1]} : vector<16x8xf32> to vector<16x1xf32>
    %944 = vector.shape_cast %943 : vector<16x1xf32> to vector<16x1xf32>
    %945 = vector.broadcast %944 : vector<16x1xf32> to vector<16x16xf32>
    %946 = vector.extract_strided_slice %190 {offsets = [0, 5], sizes = [1, 1], strides = [1, 1]} : vector<1x8xf32> to vector<1x1xf32>
    %947 = tpu.transpose %945, [1, 0] : vector<16x16xf32> -> vector<16x16xf32>
    %948 = arith.subf %945, %947 : vector<16x16xf32>
    %949 = math.absf %948 : vector<16x16xf32>
    %950 = vector.broadcast %946 : vector<1x1xf32> to vector<16x16xf32>
    %951 = arith.mulf %950, %949 : vector<16x16xf32>
    %952 = arith.addf %942, %951 : vector<16x16xf32>
    %953 = vector.extract_strided_slice %891 {offsets = [0, 6], sizes = [16, 1], strides = [1, 1]} : vector<16x8xf32> to vector<16x1xf32>
    %954 = vector.shape_cast %953 : vector<16x1xf32> to vector<16x1xf32>
    %955 = vector.broadcast %954 : vector<16x1xf32> to vector<16x16xf32>
    %956 = vector.extract_strided_slice %190 {offsets = [0, 6], sizes = [1, 1], strides = [1, 1]} : vector<1x8xf32> to vector<1x1xf32>
    %957 = tpu.transpose %955, [1, 0] : vector<16x16xf32> -> vector<16x16xf32>
    %958 = arith.subf %955, %957 : vector<16x16xf32>
    %959 = math.absf %958 : vector<16x16xf32>
    %960 = vector.broadcast %956 : vector<1x1xf32> to vector<16x16xf32>
    %961 = arith.mulf %960, %959 : vector<16x16xf32>
    %962 = arith.addf %952, %961 : vector<16x16xf32>
    %963 = vector.extract_strided_slice %891 {offsets = [0, 7], sizes = [16, 1], strides = [1, 1]} : vector<16x8xf32> to vector<16x1xf32>
    %964 = vector.shape_cast %963 : vector<16x1xf32> to vector<16x1xf32>
    %965 = vector.broadcast %964 : vector<16x1xf32> to vector<16x16xf32>
    %966 = vector.extract_strided_slice %190 {offsets = [0, 7], sizes = [1, 1], strides = [1, 1]} : vector<1x8xf32> to vector<1x1xf32>
    %967 = tpu.transpose %965, [1, 0] : vector<16x16xf32> -> vector<16x16xf32>
    %968 = arith.subf %965, %967 : vector<16x16xf32>
    %969 = math.absf %968 : vector<16x16xf32>
    %970 = vector.broadcast %966 : vector<1x1xf32> to vector<16x16xf32>
    %971 = arith.mulf %970, %969 : vector<16x16xf32>
    %972 = arith.addf %962, %971 : vector<16x16xf32>
    %cst_231 = arith.constant 0.000000e+00 : f32
    %973 = vector.broadcast %cst_231 : f32 to vector<16x16xf32>
    %974 = arith.subf %973, %972 : vector<16x16xf32>
    %975 = math.exp %974 : vector<16x16xf32>
    %cst_232 = arith.constant dense<0.000000e+00> : vector<16xf32>
    %976 = vector.multi_reduction <add>, %975, %cst_232 [1] : vector<16x16xf32> to vector<16xf32>
    %977 = vector.shape_cast %976 : vector<16xf32> to vector<16x1xf32>
    %978 = vector.broadcast %977 : vector<16x1xf32> to vector<16x16xf32>
    %979 = arith.divf %975, %978 : vector<16x16xf32>
    %980 = tpu.transpose %979, [1, 0] : vector<16x16xf32> -> vector<16x16xf32>
    %981 = arith.minimumf %979, %980 : vector<16x16xf32>
    %cst_233 = arith.constant dense<0.000000e+00> : vector<16x8xf32>
    %982 = tpu.matmul %981, %891, %cst_233 {dimension_numbers = #tpu.dot_dimension_numbers<[1], [0], [0], [1], [0, 0, 1, 1], [], []>} : vector<16x16xf32>, vector<16x8xf32>, vector<16x8xf32> -> vector<16x8xf32>
    %c0_234 = arith.constant 0 : index
    %c96 = arith.constant 96 : index
    %c0_235 = arith.constant 0 : index
    %983 = vector.load %arg27[%c0_234, %c96, %c0_235] : memref<5x128x8xf32, #tpu.memory_space<vmem>>, vector<1x16x8xf32>
    %984 = vector.shape_cast %983 : vector<1x16x8xf32> to vector<16x8xf32>
    %985 = vector.shape_cast %982 : vector<16x8xf32> to vector<1x16x8xf32>
    tpu.vector_store %arg27[%c0_234, %c96, %c0_235], %985 {strides = array<i32>} : memref<5x128x8xf32, #tpu.memory_space<vmem>>, vector<1x16x8xf32>,
    %cst_236 = arith.constant dense<0.000000e+00> : vector<16x8xf32>
    %986 = tpu.matmul %981, %982, %cst_236 {dimension_numbers = #tpu.dot_dimension_numbers<[1], [0], [0], [1], [0, 0, 1, 1], [], []>} : vector<16x16xf32>, vector<16x8xf32>, vector<16x8xf32> -> vector<16x8xf32>
    %cst_237 = arith.constant 2.000000e+00 : f32
    %987 = vector.broadcast %cst_237 : f32 to vector<16x8xf32>
    %988 = arith.mulf %987, %986 : vector<16x8xf32>
    %989 = arith.subf %988, %891 : vector<16x8xf32>
    %c1_238 = arith.constant 1 : index
    %c96_239 = arith.constant 96 : index
    %c0_240 = arith.constant 0 : index
    %990 = vector.load %arg27[%c1_238, %c96_239, %c0_240] : memref<5x128x8xf32, #tpu.memory_space<vmem>>, vector<1x16x8xf32>
    %991 = vector.shape_cast %990 : vector<1x16x8xf32> to vector<16x8xf32>
    %992 = vector.shape_cast %989 : vector<16x8xf32> to vector<1x16x8xf32>
    tpu.vector_store %arg27[%c1_238, %c96_239, %c0_240], %992 {strides = array<i32>} : memref<5x128x8xf32, #tpu.memory_space<vmem>>, vector<1x16x8xf32>,
    %cst_241 = arith.constant dense<0.000000e+00> : vector<16x8xf32>
    %993 = tpu.matmul %193, %891, %cst_241 {dimension_numbers = #tpu.dot_dimension_numbers<[1], [0], [0], [1], [0, 0, 1, 1], [], []>} : vector<16x16xf32>, vector<16x8xf32>, vector<16x8xf32> -> vector<16x8xf32>
    %c2_242 = arith.constant 2 : index
    %c96_243 = arith.constant 96 : index
    %c0_244 = arith.constant 0 : index
    %994 = vector.load %arg27[%c2_242, %c96_243, %c0_244] : memref<5x128x8xf32, #tpu.memory_space<vmem>>, vector<1x16x8xf32>
    %995 = vector.shape_cast %994 : vector<1x16x8xf32> to vector<16x8xf32>
    %996 = vector.shape_cast %993 : vector<16x8xf32> to vector<1x16x8xf32>
    tpu.vector_store %arg27[%c2_242, %c96_243, %c0_244], %996 {strides = array<i32>} : memref<5x128x8xf32, #tpu.memory_space<vmem>>, vector<1x16x8xf32>,
    %cst_245 = arith.constant dense<0.000000e+00> : vector<16x8xf32>
    %997 = tpu.matmul %196, %891, %cst_245 {dimension_numbers = #tpu.dot_dimension_numbers<[1], [0], [0], [1], [0, 0, 1, 1], [], []>} : vector<16x16xf32>, vector<16x8xf32>, vector<16x8xf32> -> vector<16x8xf32>
    %c3_246 = arith.constant 3 : index
    %c96_247 = arith.constant 96 : index
    %c0_248 = arith.constant 0 : index
    %998 = vector.load %arg27[%c3_246, %c96_247, %c0_248] : memref<5x128x8xf32, #tpu.memory_space<vmem>>, vector<1x16x8xf32>
    %999 = vector.shape_cast %998 : vector<1x16x8xf32> to vector<16x8xf32>
    %1000 = vector.shape_cast %997 : vector<16x8xf32> to vector<1x16x8xf32>
    tpu.vector_store %arg27[%c3_246, %c96_247, %c0_248], %1000 {strides = array<i32>} : memref<5x128x8xf32, #tpu.memory_space<vmem>>, vector<1x16x8xf32>,
    %cst_249 = arith.constant dense<0.000000e+00> : vector<16x8xf32>
    %1001 = tpu.matmul %199, %891, %cst_249 {dimension_numbers = #tpu.dot_dimension_numbers<[1], [0], [0], [1], [0, 0, 1, 1], [], []>} : vector<16x16xf32>, vector<16x8xf32>, vector<16x8xf32> -> vector<16x8xf32>
    %c4_250 = arith.constant 4 : index
    %c96_251 = arith.constant 96 : index
    %c0_252 = arith.constant 0 : index
    %1002 = vector.load %arg27[%c4_250, %c96_251, %c0_252] : memref<5x128x8xf32, #tpu.memory_space<vmem>>, vector<1x16x8xf32>
    %1003 = vector.shape_cast %1002 : vector<1x16x8xf32> to vector<16x8xf32>
    %1004 = vector.shape_cast %1001 : vector<16x8xf32> to vector<1x16x8xf32>
    tpu.vector_store %arg27[%c4_250, %c96_251, %c0_252], %1004 {strides = array<i32>} : memref<5x128x8xf32, #tpu.memory_space<vmem>>, vector<1x16x8xf32>,
    %c0_253 = arith.constant 0 : index
    %c7 = arith.constant 7 : index
    %c0_254 = arith.constant 0 : index
    %c0_255 = arith.constant 0 : index
    %1005 = vector.load %arg1[%c0_253, %c7, %c0_254, %c0_255] : memref<1x8x16x8xf32, #tpu.memory_space<vmem>>, vector<1x1x16x8xf32>
    %1006 = vector.shape_cast %1005 : vector<1x1x16x8xf32> to vector<16x8xf32>
    %cst_256 = arith.constant 0.000000e+00 : f32
    %1007 = vector.broadcast %cst_256 : f32 to vector<16x16xf32>
    %1008 = vector.extract_strided_slice %1006 {offsets = [0, 0], sizes = [16, 1], strides = [1, 1]} : vector<16x8xf32> to vector<16x1xf32>
    %1009 = vector.shape_cast %1008 : vector<16x1xf32> to vector<16x1xf32>
    %1010 = vector.broadcast %1009 : vector<16x1xf32> to vector<16x16xf32>
    %1011 = vector.extract_strided_slice %190 {offsets = [0, 0], sizes = [1, 1], strides = [1, 1]} : vector<1x8xf32> to vector<1x1xf32>
    %1012 = tpu.transpose %1010, [1, 0] : vector<16x16xf32> -> vector<16x16xf32>
    %1013 = arith.subf %1010, %1012 : vector<16x16xf32>
    %1014 = math.absf %1013 : vector<16x16xf32>
    %1015 = vector.broadcast %1011 : vector<1x1xf32> to vector<16x16xf32>
    %1016 = arith.mulf %1015, %1014 : vector<16x16xf32>
    %1017 = arith.addf %1007, %1016 : vector<16x16xf32>
    %1018 = vector.extract_strided_slice %1006 {offsets = [0, 1], sizes = [16, 1], strides = [1, 1]} : vector<16x8xf32> to vector<16x1xf32>
    %1019 = vector.shape_cast %1018 : vector<16x1xf32> to vector<16x1xf32>
    %1020 = vector.broadcast %1019 : vector<16x1xf32> to vector<16x16xf32>
    %1021 = vector.extract_strided_slice %190 {offsets = [0, 1], sizes = [1, 1], strides = [1, 1]} : vector<1x8xf32> to vector<1x1xf32>
    %1022 = tpu.transpose %1020, [1, 0] : vector<16x16xf32> -> vector<16x16xf32>
    %1023 = arith.subf %1020, %1022 : vector<16x16xf32>
    %1024 = math.absf %1023 : vector<16x16xf32>
    %1025 = vector.broadcast %1021 : vector<1x1xf32> to vector<16x16xf32>
    %1026 = arith.mulf %1025, %1024 : vector<16x16xf32>
    %1027 = arith.addf %1017, %1026 : vector<16x16xf32>
    %1028 = vector.extract_strided_slice %1006 {offsets = [0, 2], sizes = [16, 1], strides = [1, 1]} : vector<16x8xf32> to vector<16x1xf32>
    %1029 = vector.shape_cast %1028 : vector<16x1xf32> to vector<16x1xf32>
    %1030 = vector.broadcast %1029 : vector<16x1xf32> to vector<16x16xf32>
    %1031 = vector.extract_strided_slice %190 {offsets = [0, 2], sizes = [1, 1], strides = [1, 1]} : vector<1x8xf32> to vector<1x1xf32>
    %1032 = tpu.transpose %1030, [1, 0] : vector<16x16xf32> -> vector<16x16xf32>
    %1033 = arith.subf %1030, %1032 : vector<16x16xf32>
    %1034 = math.absf %1033 : vector<16x16xf32>
    %1035 = vector.broadcast %1031 : vector<1x1xf32> to vector<16x16xf32>
    %1036 = arith.mulf %1035, %1034 : vector<16x16xf32>
    %1037 = arith.addf %1027, %1036 : vector<16x16xf32>
    %1038 = vector.extract_strided_slice %1006 {offsets = [0, 3], sizes = [16, 1], strides = [1, 1]} : vector<16x8xf32> to vector<16x1xf32>
    %1039 = vector.shape_cast %1038 : vector<16x1xf32> to vector<16x1xf32>
    %1040 = vector.broadcast %1039 : vector<16x1xf32> to vector<16x16xf32>
    %1041 = vector.extract_strided_slice %190 {offsets = [0, 3], sizes = [1, 1], strides = [1, 1]} : vector<1x8xf32> to vector<1x1xf32>
    %1042 = tpu.transpose %1040, [1, 0] : vector<16x16xf32> -> vector<16x16xf32>
    %1043 = arith.subf %1040, %1042 : vector<16x16xf32>
    %1044 = math.absf %1043 : vector<16x16xf32>
    %1045 = vector.broadcast %1041 : vector<1x1xf32> to vector<16x16xf32>
    %1046 = arith.mulf %1045, %1044 : vector<16x16xf32>
    %1047 = arith.addf %1037, %1046 : vector<16x16xf32>
    %1048 = vector.extract_strided_slice %1006 {offsets = [0, 4], sizes = [16, 1], strides = [1, 1]} : vector<16x8xf32> to vector<16x1xf32>
    %1049 = vector.shape_cast %1048 : vector<16x1xf32> to vector<16x1xf32>
    %1050 = vector.broadcast %1049 : vector<16x1xf32> to vector<16x16xf32>
    %1051 = vector.extract_strided_slice %190 {offsets = [0, 4], sizes = [1, 1], strides = [1, 1]} : vector<1x8xf32> to vector<1x1xf32>
    %1052 = tpu.transpose %1050, [1, 0] : vector<16x16xf32> -> vector<16x16xf32>
    %1053 = arith.subf %1050, %1052 : vector<16x16xf32>
    %1054 = math.absf %1053 : vector<16x16xf32>
    %1055 = vector.broadcast %1051 : vector<1x1xf32> to vector<16x16xf32>
    %1056 = arith.mulf %1055, %1054 : vector<16x16xf32>
    %1057 = arith.addf %1047, %1056 : vector<16x16xf32>
    %1058 = vector.extract_strided_slice %1006 {offsets = [0, 5], sizes = [16, 1], strides = [1, 1]} : vector<16x8xf32> to vector<16x1xf32>
    %1059 = vector.shape_cast %1058 : vector<16x1xf32> to vector<16x1xf32>
    %1060 = vector.broadcast %1059 : vector<16x1xf32> to vector<16x16xf32>
    %1061 = vector.extract_strided_slice %190 {offsets = [0, 5], sizes = [1, 1], strides = [1, 1]} : vector<1x8xf32> to vector<1x1xf32>
    %1062 = tpu.transpose %1060, [1, 0] : vector<16x16xf32> -> vector<16x16xf32>
    %1063 = arith.subf %1060, %1062 : vector<16x16xf32>
    %1064 = math.absf %1063 : vector<16x16xf32>
    %1065 = vector.broadcast %1061 : vector<1x1xf32> to vector<16x16xf32>
    %1066 = arith.mulf %1065, %1064 : vector<16x16xf32>
    %1067 = arith.addf %1057, %1066 : vector<16x16xf32>
    %1068 = vector.extract_strided_slice %1006 {offsets = [0, 6], sizes = [16, 1], strides = [1, 1]} : vector<16x8xf32> to vector<16x1xf32>
    %1069 = vector.shape_cast %1068 : vector<16x1xf32> to vector<16x1xf32>
    %1070 = vector.broadcast %1069 : vector<16x1xf32> to vector<16x16xf32>
    %1071 = vector.extract_strided_slice %190 {offsets = [0, 6], sizes = [1, 1], strides = [1, 1]} : vector<1x8xf32> to vector<1x1xf32>
    %1072 = tpu.transpose %1070, [1, 0] : vector<16x16xf32> -> vector<16x16xf32>
    %1073 = arith.subf %1070, %1072 : vector<16x16xf32>
    %1074 = math.absf %1073 : vector<16x16xf32>
    %1075 = vector.broadcast %1071 : vector<1x1xf32> to vector<16x16xf32>
    %1076 = arith.mulf %1075, %1074 : vector<16x16xf32>
    %1077 = arith.addf %1067, %1076 : vector<16x16xf32>
    %1078 = vector.extract_strided_slice %1006 {offsets = [0, 7], sizes = [16, 1], strides = [1, 1]} : vector<16x8xf32> to vector<16x1xf32>
    %1079 = vector.shape_cast %1078 : vector<16x1xf32> to vector<16x1xf32>
    %1080 = vector.broadcast %1079 : vector<16x1xf32> to vector<16x16xf32>
    %1081 = vector.extract_strided_slice %190 {offsets = [0, 7], sizes = [1, 1], strides = [1, 1]} : vector<1x8xf32> to vector<1x1xf32>
    %1082 = tpu.transpose %1080, [1, 0] : vector<16x16xf32> -> vector<16x16xf32>
    %1083 = arith.subf %1080, %1082 : vector<16x16xf32>
    %1084 = math.absf %1083 : vector<16x16xf32>
    %1085 = vector.broadcast %1081 : vector<1x1xf32> to vector<16x16xf32>
    %1086 = arith.mulf %1085, %1084 : vector<16x16xf32>
    %1087 = arith.addf %1077, %1086 : vector<16x16xf32>
    %cst_257 = arith.constant 0.000000e+00 : f32
    %1088 = vector.broadcast %cst_257 : f32 to vector<16x16xf32>
    %1089 = arith.subf %1088, %1087 : vector<16x16xf32>
    %1090 = math.exp %1089 : vector<16x16xf32>
    %cst_258 = arith.constant dense<0.000000e+00> : vector<16xf32>
    %1091 = vector.multi_reduction <add>, %1090, %cst_258 [1] : vector<16x16xf32> to vector<16xf32>
    %1092 = vector.shape_cast %1091 : vector<16xf32> to vector<16x1xf32>
    %1093 = vector.broadcast %1092 : vector<16x1xf32> to vector<16x16xf32>
    %1094 = arith.divf %1090, %1093 : vector<16x16xf32>
    %1095 = tpu.transpose %1094, [1, 0] : vector<16x16xf32> -> vector<16x16xf32>
    %1096 = arith.minimumf %1094, %1095 : vector<16x16xf32>
    %cst_259 = arith.constant dense<0.000000e+00> : vector<16x8xf32>
    %1097 = tpu.matmul %1096, %1006, %cst_259 {dimension_numbers = #tpu.dot_dimension_numbers<[1], [0], [0], [1], [0, 0, 1, 1], [], []>} : vector<16x16xf32>, vector<16x8xf32>, vector<16x8xf32> -> vector<16x8xf32>
    %c0_260 = arith.constant 0 : index
    %c112 = arith.constant 112 : index
    %c0_261 = arith.constant 0 : index
    %1098 = vector.load %arg27[%c0_260, %c112, %c0_261] : memref<5x128x8xf32, #tpu.memory_space<vmem>>, vector<1x16x8xf32>
    %1099 = vector.shape_cast %1098 : vector<1x16x8xf32> to vector<16x8xf32>
    %1100 = vector.shape_cast %1097 : vector<16x8xf32> to vector<1x16x8xf32>
    tpu.vector_store %arg27[%c0_260, %c112, %c0_261], %1100 {strides = array<i32>} : memref<5x128x8xf32, #tpu.memory_space<vmem>>, vector<1x16x8xf32>,
    %cst_262 = arith.constant dense<0.000000e+00> : vector<16x8xf32>
    %1101 = tpu.matmul %1096, %1097, %cst_262 {dimension_numbers = #tpu.dot_dimension_numbers<[1], [0], [0], [1], [0, 0, 1, 1], [], []>} : vector<16x16xf32>, vector<16x8xf32>, vector<16x8xf32> -> vector<16x8xf32>
    %cst_263 = arith.constant 2.000000e+00 : f32
    %1102 = vector.broadcast %cst_263 : f32 to vector<16x8xf32>
    %1103 = arith.mulf %1102, %1101 : vector<16x8xf32>
    %1104 = arith.subf %1103, %1006 : vector<16x8xf32>
    %c1_264 = arith.constant 1 : index
    %c112_265 = arith.constant 112 : index
    %c0_266 = arith.constant 0 : index
    %1105 = vector.load %arg27[%c1_264, %c112_265, %c0_266] : memref<5x128x8xf32, #tpu.memory_space<vmem>>, vector<1x16x8xf32>
    %1106 = vector.shape_cast %1105 : vector<1x16x8xf32> to vector<16x8xf32>
    %1107 = vector.shape_cast %1104 : vector<16x8xf32> to vector<1x16x8xf32>
    tpu.vector_store %arg27[%c1_264, %c112_265, %c0_266], %1107 {strides = array<i32>} : memref<5x128x8xf32, #tpu.memory_space<vmem>>, vector<1x16x8xf32>,
    %cst_267 = arith.constant dense<0.000000e+00> : vector<16x8xf32>
    %1108 = tpu.matmul %193, %1006, %cst_267 {dimension_numbers = #tpu.dot_dimension_numbers<[1], [0], [0], [1], [0, 0, 1, 1], [], []>} : vector<16x16xf32>, vector<16x8xf32>, vector<16x8xf32> -> vector<16x8xf32>
    %c2_268 = arith.constant 2 : index
    %c112_269 = arith.constant 112 : index
    %c0_270 = arith.constant 0 : index
    %1109 = vector.load %arg27[%c2_268, %c112_269, %c0_270] : memref<5x128x8xf32, #tpu.memory_space<vmem>>, vector<1x16x8xf32>
    %1110 = vector.shape_cast %1109 : vector<1x16x8xf32> to vector<16x8xf32>
    %1111 = vector.shape_cast %1108 : vector<16x8xf32> to vector<1x16x8xf32>
    tpu.vector_store %arg27[%c2_268, %c112_269, %c0_270], %1111 {strides = array<i32>} : memref<5x128x8xf32, #tpu.memory_space<vmem>>, vector<1x16x8xf32>,
    %cst_271 = arith.constant dense<0.000000e+00> : vector<16x8xf32>
    %1112 = tpu.matmul %196, %1006, %cst_271 {dimension_numbers = #tpu.dot_dimension_numbers<[1], [0], [0], [1], [0, 0, 1, 1], [], []>} : vector<16x16xf32>, vector<16x8xf32>, vector<16x8xf32> -> vector<16x8xf32>
    %c3_272 = arith.constant 3 : index
    %c112_273 = arith.constant 112 : index
    %c0_274 = arith.constant 0 : index
    %1113 = vector.load %arg27[%c3_272, %c112_273, %c0_274] : memref<5x128x8xf32, #tpu.memory_space<vmem>>, vector<1x16x8xf32>
    %1114 = vector.shape_cast %1113 : vector<1x16x8xf32> to vector<16x8xf32>
    %1115 = vector.shape_cast %1112 : vector<16x8xf32> to vector<1x16x8xf32>
    tpu.vector_store %arg27[%c3_272, %c112_273, %c0_274], %1115 {strides = array<i32>} : memref<5x128x8xf32, #tpu.memory_space<vmem>>, vector<1x16x8xf32>,
    %cst_275 = arith.constant dense<0.000000e+00> : vector<16x8xf32>
    %1116 = tpu.matmul %199, %1006, %cst_275 {dimension_numbers = #tpu.dot_dimension_numbers<[1], [0], [0], [1], [0, 0, 1, 1], [], []>} : vector<16x16xf32>, vector<16x8xf32>, vector<16x8xf32> -> vector<16x8xf32>
    %c4_276 = arith.constant 4 : index
    %c112_277 = arith.constant 112 : index
    %c0_278 = arith.constant 0 : index
    %1117 = vector.load %arg27[%c4_276, %c112_277, %c0_278] : memref<5x128x8xf32, #tpu.memory_space<vmem>>, vector<1x16x8xf32>
    %1118 = vector.shape_cast %1117 : vector<1x16x8xf32> to vector<16x8xf32>
    %1119 = vector.shape_cast %1116 : vector<16x8xf32> to vector<1x16x8xf32>
    tpu.vector_store %arg27[%c4_276, %c112_277, %c0_278], %1119 {strides = array<i32>} : memref<5x128x8xf32, #tpu.memory_space<vmem>>, vector<1x16x8xf32>,
    %c0_279 = arith.constant 0 : index
    %c0_280 = arith.constant 0 : index
    %c0_281 = arith.constant 0 : index
    %1120 = vector.load %arg27[%c0_279, %c0_280, %c0_281] : memref<5x128x8xf32, #tpu.memory_space<vmem>>, vector<1x128x8xf32>
    %1121 = vector.shape_cast %1120 : vector<1x128x8xf32> to vector<128x8xf32>
    %c0_282 = arith.constant 0 : index
    %c0_283 = arith.constant 0 : index
    %c0_284 = arith.constant 0 : index
    %1122 = vector.load %arg14[%c0_282, %c0_283, %c0_284] : memref<3x8x16xf32, #tpu.memory_space<vmem>>, vector<1x8x16xf32>
    %1123 = vector.shape_cast %1122 : vector<1x8x16xf32> to vector<8x16xf32>
    %cst_285 = arith.constant dense<0.000000e+00> : vector<128x16xf32>
    %1124 = tpu.matmul %1121, %1123, %cst_285 {dimension_numbers = #tpu.dot_dimension_numbers<[1], [0], [0], [1], [0, 0, 1, 1], [], []>} : vector<128x8xf32>, vector<8x16xf32>, vector<128x16xf32> -> vector<128x16xf32>
    %c1_286 = arith.constant 1 : index
    %c0_287 = arith.constant 0 : index
    %c0_288 = arith.constant 0 : index
    %1125 = vector.load %arg27[%c1_286, %c0_287, %c0_288] : memref<5x128x8xf32, #tpu.memory_space<vmem>>, vector<1x128x8xf32>
    %1126 = vector.shape_cast %1125 : vector<1x128x8xf32> to vector<128x8xf32>
    %c1_289 = arith.constant 1 : index
    %c0_290 = arith.constant 0 : index
    %c0_291 = arith.constant 0 : index
    %1127 = vector.load %arg14[%c1_289, %c0_290, %c0_291] : memref<3x8x16xf32, #tpu.memory_space<vmem>>, vector<1x8x16xf32>
    %1128 = vector.shape_cast %1127 : vector<1x8x16xf32> to vector<8x16xf32>
    %cst_292 = arith.constant dense<0.000000e+00> : vector<128x16xf32>
    %1129 = tpu.matmul %1126, %1128, %cst_292 {dimension_numbers = #tpu.dot_dimension_numbers<[1], [0], [0], [1], [0, 0, 1, 1], [], []>} : vector<128x8xf32>, vector<8x16xf32>, vector<128x16xf32> -> vector<128x16xf32>
    %1130 = arith.addf %1124, %1129 : vector<128x16xf32>
    %cst_293 = arith.constant 0.000000e+00 : f32
    %1131 = vector.broadcast %cst_293 : f32 to vector<128x16xf32>
    %1132 = arith.maximumf %1130, %1131 : vector<128x16xf32>
    %c2_294 = arith.constant 2 : index
    %c0_295 = arith.constant 0 : index
    %c0_296 = arith.constant 0 : index
    %1133 = vector.load %arg27[%c2_294, %c0_295, %c0_296] : memref<5x128x8xf32, #tpu.memory_space<vmem>>, vector<1x128x8xf32>
    %1134 = vector.shape_cast %1133 : vector<1x128x8xf32> to vector<128x8xf32>
    %c0_297 = arith.constant 0 : index
    %c0_298 = arith.constant 0 : index
    %c0_299 = arith.constant 0 : index
    %1135 = vector.load %arg15[%c0_297, %c0_298, %c0_299] : memref<3x8x16xf32, #tpu.memory_space<vmem>>, vector<1x8x16xf32>
    %1136 = vector.shape_cast %1135 : vector<1x8x16xf32> to vector<8x16xf32>
    %cst_300 = arith.constant dense<0.000000e+00> : vector<128x16xf32>
    %1137 = tpu.matmul %1134, %1136, %cst_300 {dimension_numbers = #tpu.dot_dimension_numbers<[1], [0], [0], [1], [0, 0, 1, 1], [], []>} : vector<128x8xf32>, vector<8x16xf32>, vector<128x16xf32> -> vector<128x16xf32>
    %c3_301 = arith.constant 3 : index
    %c0_302 = arith.constant 0 : index
    %c0_303 = arith.constant 0 : index
    %1138 = vector.load %arg27[%c3_301, %c0_302, %c0_303] : memref<5x128x8xf32, #tpu.memory_space<vmem>>, vector<1x128x8xf32>
    %1139 = vector.shape_cast %1138 : vector<1x128x8xf32> to vector<128x8xf32>
    %c1_304 = arith.constant 1 : index
    %c0_305 = arith.constant 0 : index
    %c0_306 = arith.constant 0 : index
    %1140 = vector.load %arg15[%c1_304, %c0_305, %c0_306] : memref<3x8x16xf32, #tpu.memory_space<vmem>>, vector<1x8x16xf32>
    %1141 = vector.shape_cast %1140 : vector<1x8x16xf32> to vector<8x16xf32>
    %cst_307 = arith.constant dense<0.000000e+00> : vector<128x16xf32>
    %1142 = tpu.matmul %1139, %1141, %cst_307 {dimension_numbers = #tpu.dot_dimension_numbers<[1], [0], [0], [1], [0, 0, 1, 1], [], []>} : vector<128x8xf32>, vector<8x16xf32>, vector<128x16xf32> -> vector<128x16xf32>
    %1143 = arith.addf %1137, %1142 : vector<128x16xf32>
    %c4_308 = arith.constant 4 : index
    %c0_309 = arith.constant 0 : index
    %c0_310 = arith.constant 0 : index
    %1144 = vector.load %arg27[%c4_308, %c0_309, %c0_310] : memref<5x128x8xf32, #tpu.memory_space<vmem>>, vector<1x128x8xf32>
    %1145 = vector.shape_cast %1144 : vector<1x128x8xf32> to vector<128x8xf32>
    %c2_311 = arith.constant 2 : index
    %c0_312 = arith.constant 0 : index
    %c0_313 = arith.constant 0 : index
    %1146 = vector.load %arg15[%c2_311, %c0_312, %c0_313] : memref<3x8x16xf32, #tpu.memory_space<vmem>>, vector<1x8x16xf32>
    %1147 = vector.shape_cast %1146 : vector<1x8x16xf32> to vector<8x16xf32>
    %cst_314 = arith.constant dense<0.000000e+00> : vector<128x16xf32>
    %1148 = tpu.matmul %1145, %1147, %cst_314 {dimension_numbers = #tpu.dot_dimension_numbers<[1], [0], [0], [1], [0, 0, 1, 1], [], []>} : vector<128x8xf32>, vector<8x16xf32>, vector<128x16xf32> -> vector<128x16xf32>
    %1149 = arith.addf %1143, %1148 : vector<128x16xf32>
    %cst_315 = arith.constant 0.000000e+00 : f32
    %1150 = vector.broadcast %cst_315 : f32 to vector<128x16xf32>
    %1151 = arith.maximumf %1149, %1150 : vector<128x16xf32>
    %c0_316 = arith.constant 0 : index
    %c0_317 = arith.constant 0 : index
    %1152 = vector.load %arg18[%c0_316, %c0_317] : memref<1x16xf32, #tpu.memory_space<vmem>>, vector<1x16xf32>
    %1153 = vector.shape_cast %1152 : vector<1x16xf32> to vector<1x16xf32>
    %1154 = vector.broadcast %1153 : vector<1x16xf32> to vector<128x16xf32>
    %c0_318 = arith.constant 0 : index
    %c0_319 = arith.constant 0 : index
    %1155 = vector.load %arg28[%c0_318, %c0_319] : memref<128x16xf32, #tpu.memory_space<vmem>>, vector<128x16xf32>
    tpu.vector_store %arg28[%c0_318, %c0_319], %1154 {strides = array<i32>} : memref<128x16xf32, #tpu.memory_space<vmem>>, vector<128x16xf32>,
    %c16_320 = arith.constant 16 : index
    %c0_321 = arith.constant 0 : index
    %1156 = vector.load %arg28[%c16_320, %c0_321] : memref<128x16xf32, #tpu.memory_space<vmem>>, vector<112x16xf32>
    %1157 = vector.extract_strided_slice %1132 {offsets = [0, 0], sizes = [112, 16], strides = [1, 1]} : vector<128x16xf32> to vector<112x16xf32>
    %c0_322 = arith.constant 0 : index
    %c0_323 = arith.constant 0 : index
    %c0_324 = arith.constant 0 : index
    %1158 = vector.load %arg17[%c0_322, %c0_323, %c0_324] : memref<3x16x16xf32, #tpu.memory_space<vmem>>, vector<1x16x16xf32>
    %1159 = vector.shape_cast %1158 : vector<1x16x16xf32> to vector<16x16xf32>
    %cst_325 = arith.constant dense<0.000000e+00> : vector<112x16xf32>
    %1160 = tpu.matmul %1157, %1159, %cst_325 {dimension_numbers = #tpu.dot_dimension_numbers<[1], [0], [0], [1], [0, 0, 1, 1], [], []>} : vector<112x16xf32>, vector<16x16xf32>, vector<112x16xf32> -> vector<112x16xf32>
    %1161 = arith.addf %1156, %1160 : vector<112x16xf32>
    %c16_326 = arith.constant 16 : index
    %c0_327 = arith.constant 0 : index
    %1162 = vector.load %arg28[%c16_326, %c0_327] : memref<128x16xf32, #tpu.memory_space<vmem>>, vector<112x16xf32>
    tpu.vector_store %arg28[%c16_326, %c0_327], %1161 {strides = array<i32>} : memref<128x16xf32, #tpu.memory_space<vmem>>, vector<112x16xf32>,
    %c0_328 = arith.constant 0 : index
    %c0_329 = arith.constant 0 : index
    %1163 = vector.load %arg28[%c0_328, %c0_329] : memref<128x16xf32, #tpu.memory_space<vmem>>, vector<128x16xf32>
    %c1_330 = arith.constant 1 : index
    %c0_331 = arith.constant 0 : index
    %c0_332 = arith.constant 0 : index
    %1164 = vector.load %arg17[%c1_330, %c0_331, %c0_332] : memref<3x16x16xf32, #tpu.memory_space<vmem>>, vector<1x16x16xf32>
    %1165 = vector.shape_cast %1164 : vector<1x16x16xf32> to vector<16x16xf32>
    %cst_333 = arith.constant dense<0.000000e+00> : vector<128x16xf32>
    %1166 = tpu.matmul %1132, %1165, %cst_333 {dimension_numbers = #tpu.dot_dimension_numbers<[1], [0], [0], [1], [0, 0, 1, 1], [], []>} : vector<128x16xf32>, vector<16x16xf32>, vector<128x16xf32> -> vector<128x16xf32>
    %1167 = arith.addf %1163, %1166 : vector<128x16xf32>
    %c0_334 = arith.constant 0 : index
    %c0_335 = arith.constant 0 : index
    %1168 = vector.load %arg28[%c0_334, %c0_335] : memref<128x16xf32, #tpu.memory_space<vmem>>, vector<128x16xf32>
    tpu.vector_store %arg28[%c0_334, %c0_335], %1167 {strides = array<i32>} : memref<128x16xf32, #tpu.memory_space<vmem>>, vector<128x16xf32>,
    %c0_336 = arith.constant 0 : index
    %c0_337 = arith.constant 0 : index
    %1169 = vector.load %arg28[%c0_336, %c0_337] : memref<128x16xf32, #tpu.memory_space<vmem>>, vector<112x16xf32>
    %1170 = vector.extract_strided_slice %1132 {offsets = [16, 0], sizes = [112, 16], strides = [1, 1]} : vector<128x16xf32> to vector<112x16xf32>
    %c2_338 = arith.constant 2 : index
    %c0_339 = arith.constant 0 : index
    %c0_340 = arith.constant 0 : index
    %1171 = vector.load %arg17[%c2_338, %c0_339, %c0_340] : memref<3x16x16xf32, #tpu.memory_space<vmem>>, vector<1x16x16xf32>
    %1172 = vector.shape_cast %1171 : vector<1x16x16xf32> to vector<16x16xf32>
    %cst_341 = arith.constant dense<0.000000e+00> : vector<112x16xf32>
    %1173 = tpu.matmul %1170, %1172, %cst_341 {dimension_numbers = #tpu.dot_dimension_numbers<[1], [0], [0], [1], [0, 0, 1, 1], [], []>} : vector<112x16xf32>, vector<16x16xf32>, vector<112x16xf32> -> vector<112x16xf32>
    %1174 = arith.addf %1169, %1173 : vector<112x16xf32>
    %c0_342 = arith.constant 0 : index
    %c0_343 = arith.constant 0 : index
    %1175 = vector.load %arg28[%c0_342, %c0_343] : memref<128x16xf32, #tpu.memory_space<vmem>>, vector<112x16xf32>
    tpu.vector_store %arg28[%c0_342, %c0_343], %1174 {strides = array<i32>} : memref<128x16xf32, #tpu.memory_space<vmem>>, vector<112x16xf32>,
    %c0_344 = arith.constant 0 : index
    %c0_345 = arith.constant 0 : index
    %1176 = vector.load %arg28[%c0_344, %c0_345] : memref<128x16xf32, #tpu.memory_space<vmem>>, vector<128x16xf32>
    %cst_346 = arith.constant dense<0.000000e+00> : vector<128xf32>
    %1177 = vector.multi_reduction <add>, %1176, %cst_346 [1] : vector<128x16xf32> to vector<128xf32>
    %1178 = vector.shape_cast %1177 : vector<128xf32> to vector<128x1xf32>
    %cst_347 = arith.constant 1.600000e+01 : f32
    %1179 = vector.broadcast %cst_347 : f32 to vector<128x1xf32>
    %1180 = arith.divf %1178, %1179 : vector<128x1xf32>
    %1181 = vector.broadcast %1180 : vector<128x1xf32> to vector<128x16xf32>
    %1182 = arith.subf %1176, %1181 : vector<128x16xf32>
    %1183 = arith.mulf %1182, %1182 : vector<128x16xf32>
    %cst_348 = arith.constant dense<0.000000e+00> : vector<128xf32>
    %1184 = vector.multi_reduction <add>, %1183, %cst_348 [1] : vector<128x16xf32> to vector<128xf32>
    %1185 = vector.shape_cast %1184 : vector<128xf32> to vector<128x1xf32>
    %cst_349 = arith.constant 1.600000e+01 : f32
    %1186 = vector.broadcast %cst_349 : f32 to vector<128x1xf32>
    %1187 = arith.divf %1185, %1186 : vector<128x1xf32>
    %1188 = vector.broadcast %1180 : vector<128x1xf32> to vector<128x16xf32>
    %1189 = arith.subf %1176, %1188 : vector<128x16xf32>
    %cst_350 = arith.constant 9.99999974E-6 : f32
    %1190 = vector.broadcast %cst_350 : f32 to vector<128x1xf32>
    %1191 = arith.addf %1187, %1190 : vector<128x1xf32>
    %1192 = math.rsqrt %1191 : vector<128x1xf32>
    %1193 = vector.broadcast %1192 : vector<128x1xf32> to vector<128x16xf32>
    %1194 = arith.mulf %1189, %1193 : vector<128x16xf32>
    %c0_351 = arith.constant 0 : index
    %c0_352 = arith.constant 0 : index
    %1195 = vector.load %arg19[%c0_351, %c0_352] : memref<1x16xf32, #tpu.memory_space<vmem>>, vector<1x16xf32>
    %1196 = vector.broadcast %1195 : vector<1x16xf32> to vector<128x16xf32>
    %1197 = arith.mulf %1194, %1196 : vector<128x16xf32>
    %c0_353 = arith.constant 0 : index
    %c0_354 = arith.constant 0 : index
    %1198 = vector.load %arg20[%c0_353, %c0_354] : memref<1x16xf32, #tpu.memory_space<vmem>>, vector<1x16xf32>
    %1199 = vector.broadcast %1198 : vector<1x16xf32> to vector<128x16xf32>
    %1200 = arith.addf %1197, %1199 : vector<128x16xf32>
    %c0_355 = arith.constant 0 : index
    %c0_356 = arith.constant 0 : index
    %c0_357 = arith.constant 0 : index
    %1201 = vector.load %arg25[%c0_355, %c0_356, %c0_357] : memref<1x128x16xf32, #tpu.memory_space<vmem>>, vector<1x128x16xf32>
    %1202 = vector.shape_cast %1201 : vector<1x128x16xf32> to vector<128x16xf32>
    %1203 = vector.shape_cast %1200 : vector<128x16xf32> to vector<1x128x16xf32>
    tpu.vector_store %arg25[%c0_355, %c0_356, %c0_357], %1203 {strides = array<i32>} : memref<1x128x16xf32, #tpu.memory_space<vmem>>, vector<1x128x16xf32>,
    %c0_358 = arith.constant 0 : index
    %c0_359 = arith.constant 0 : index
    %1204 = vector.load %arg22[%c0_358, %c0_359] : memref<1x16xf32, #tpu.memory_space<vmem>>, vector<1x16xf32>
    %1205 = vector.shape_cast %1204 : vector<1x16xf32> to vector<1x16xf32>
    %1206 = vector.broadcast %1205 : vector<1x16xf32> to vector<128x16xf32>
    %c0_360 = arith.constant 0 : index
    %c0_361 = arith.constant 0 : index
    %1207 = vector.load %arg28[%c0_360, %c0_361] : memref<128x16xf32, #tpu.memory_space<vmem>>, vector<128x16xf32>
    tpu.vector_store %arg28[%c0_360, %c0_361], %1206 {strides = array<i32>} : memref<128x16xf32, #tpu.memory_space<vmem>>, vector<128x16xf32>,
    %c16_362 = arith.constant 16 : index
    %c0_363 = arith.constant 0 : index
    %1208 = vector.load %arg28[%c16_362, %c0_363] : memref<128x16xf32, #tpu.memory_space<vmem>>, vector<112x16xf32>
    %1209 = vector.extract_strided_slice %1151 {offsets = [0, 0], sizes = [112, 16], strides = [1, 1]} : vector<128x16xf32> to vector<112x16xf32>
    %c0_364 = arith.constant 0 : index
    %c0_365 = arith.constant 0 : index
    %c0_366 = arith.constant 0 : index
    %1210 = vector.load %arg21[%c0_364, %c0_365, %c0_366] : memref<3x16x16xf32, #tpu.memory_space<vmem>>, vector<1x16x16xf32>
    %1211 = vector.shape_cast %1210 : vector<1x16x16xf32> to vector<16x16xf32>
    %cst_367 = arith.constant dense<0.000000e+00> : vector<112x16xf32>
    %1212 = tpu.matmul %1209, %1211, %cst_367 {dimension_numbers = #tpu.dot_dimension_numbers<[1], [0], [0], [1], [0, 0, 1, 1], [], []>} : vector<112x16xf32>, vector<16x16xf32>, vector<112x16xf32> -> vector<112x16xf32>
    %1213 = arith.addf %1208, %1212 : vector<112x16xf32>
    %c16_368 = arith.constant 16 : index
    %c0_369 = arith.constant 0 : index
    %1214 = vector.load %arg28[%c16_368, %c0_369] : memref<128x16xf32, #tpu.memory_space<vmem>>, vector<112x16xf32>
    tpu.vector_store %arg28[%c16_368, %c0_369], %1213 {strides = array<i32>} : memref<128x16xf32, #tpu.memory_space<vmem>>, vector<112x16xf32>,
    %c0_370 = arith.constant 0 : index
    %c0_371 = arith.constant 0 : index
    %1215 = vector.load %arg28[%c0_370, %c0_371] : memref<128x16xf32, #tpu.memory_space<vmem>>, vector<128x16xf32>
    %c1_372 = arith.constant 1 : index
    %c0_373 = arith.constant 0 : index
    %c0_374 = arith.constant 0 : index
    %1216 = vector.load %arg21[%c1_372, %c0_373, %c0_374] : memref<3x16x16xf32, #tpu.memory_space<vmem>>, vector<1x16x16xf32>
    %1217 = vector.shape_cast %1216 : vector<1x16x16xf32> to vector<16x16xf32>
    %cst_375 = arith.constant dense<0.000000e+00> : vector<128x16xf32>
    %1218 = tpu.matmul %1151, %1217, %cst_375 {dimension_numbers = #tpu.dot_dimension_numbers<[1], [0], [0], [1], [0, 0, 1, 1], [], []>} : vector<128x16xf32>, vector<16x16xf32>, vector<128x16xf32> -> vector<128x16xf32>
    %1219 = arith.addf %1215, %1218 : vector<128x16xf32>
    %c0_376 = arith.constant 0 : index
    %c0_377 = arith.constant 0 : index
    %1220 = vector.load %arg28[%c0_376, %c0_377] : memref<128x16xf32, #tpu.memory_space<vmem>>, vector<128x16xf32>
    tpu.vector_store %arg28[%c0_376, %c0_377], %1219 {strides = array<i32>} : memref<128x16xf32, #tpu.memory_space<vmem>>, vector<128x16xf32>,
    %c0_378 = arith.constant 0 : index
    %c0_379 = arith.constant 0 : index
    %1221 = vector.load %arg28[%c0_378, %c0_379] : memref<128x16xf32, #tpu.memory_space<vmem>>, vector<112x16xf32>
    %1222 = vector.extract_strided_slice %1151 {offsets = [16, 0], sizes = [112, 16], strides = [1, 1]} : vector<128x16xf32> to vector<112x16xf32>
    %c2_380 = arith.constant 2 : index
    %c0_381 = arith.constant 0 : index
    %c0_382 = arith.constant 0 : index
    %1223 = vector.load %arg21[%c2_380, %c0_381, %c0_382] : memref<3x16x16xf32, #tpu.memory_space<vmem>>, vector<1x16x16xf32>
    %1224 = vector.shape_cast %1223 : vector<1x16x16xf32> to vector<16x16xf32>
    %cst_383 = arith.constant dense<0.000000e+00> : vector<112x16xf32>
    %1225 = tpu.matmul %1222, %1224, %cst_383 {dimension_numbers = #tpu.dot_dimension_numbers<[1], [0], [0], [1], [0, 0, 1, 1], [], []>} : vector<112x16xf32>, vector<16x16xf32>, vector<112x16xf32> -> vector<112x16xf32>
    %1226 = arith.addf %1221, %1225 : vector<112x16xf32>
    %c0_384 = arith.constant 0 : index
    %c0_385 = arith.constant 0 : index
    %1227 = vector.load %arg28[%c0_384, %c0_385] : memref<128x16xf32, #tpu.memory_space<vmem>>, vector<112x16xf32>
    tpu.vector_store %arg28[%c0_384, %c0_385], %1226 {strides = array<i32>} : memref<128x16xf32, #tpu.memory_space<vmem>>, vector<112x16xf32>,
    %c0_386 = arith.constant 0 : index
    %c0_387 = arith.constant 0 : index
    %1228 = vector.load %arg28[%c0_386, %c0_387] : memref<128x16xf32, #tpu.memory_space<vmem>>, vector<128x16xf32>
    %cst_388 = arith.constant dense<0.000000e+00> : vector<128xf32>
    %1229 = vector.multi_reduction <add>, %1228, %cst_388 [1] : vector<128x16xf32> to vector<128xf32>
    %1230 = vector.shape_cast %1229 : vector<128xf32> to vector<128x1xf32>
    %cst_389 = arith.constant 1.600000e+01 : f32
    %1231 = vector.broadcast %cst_389 : f32 to vector<128x1xf32>
    %1232 = arith.divf %1230, %1231 : vector<128x1xf32>
    %1233 = vector.broadcast %1232 : vector<128x1xf32> to vector<128x16xf32>
    %1234 = arith.subf %1228, %1233 : vector<128x16xf32>
    %1235 = arith.mulf %1234, %1234 : vector<128x16xf32>
    %cst_390 = arith.constant dense<0.000000e+00> : vector<128xf32>
    %1236 = vector.multi_reduction <add>, %1235, %cst_390 [1] : vector<128x16xf32> to vector<128xf32>
    %1237 = vector.shape_cast %1236 : vector<128xf32> to vector<128x1xf32>
    %cst_391 = arith.constant 1.600000e+01 : f32
    %1238 = vector.broadcast %cst_391 : f32 to vector<128x1xf32>
    %1239 = arith.divf %1237, %1238 : vector<128x1xf32>
    %1240 = vector.broadcast %1232 : vector<128x1xf32> to vector<128x16xf32>
    %1241 = arith.subf %1228, %1240 : vector<128x16xf32>
    %cst_392 = arith.constant 9.99999974E-6 : f32
    %1242 = vector.broadcast %cst_392 : f32 to vector<128x1xf32>
    %1243 = arith.addf %1239, %1242 : vector<128x1xf32>
    %1244 = math.rsqrt %1243 : vector<128x1xf32>
    %1245 = vector.broadcast %1244 : vector<128x1xf32> to vector<128x16xf32>
    %1246 = arith.mulf %1241, %1245 : vector<128x16xf32>
    %c0_393 = arith.constant 0 : index
    %c0_394 = arith.constant 0 : index
    %1247 = vector.load %arg23[%c0_393, %c0_394] : memref<1x16xf32, #tpu.memory_space<vmem>>, vector<1x16xf32>
    %1248 = vector.broadcast %1247 : vector<1x16xf32> to vector<128x16xf32>
    %1249 = arith.mulf %1246, %1248 : vector<128x16xf32>
    %c0_395 = arith.constant 0 : index
    %c0_396 = arith.constant 0 : index
    %1250 = vector.load %arg24[%c0_395, %c0_396] : memref<1x16xf32, #tpu.memory_space<vmem>>, vector<1x16xf32>
    %1251 = vector.broadcast %1250 : vector<1x16xf32> to vector<128x16xf32>
    %1252 = arith.addf %1249, %1251 : vector<128x16xf32>
    %c0_397 = arith.constant 0 : index
    %c0_398 = arith.constant 0 : index
    %c0_399 = arith.constant 0 : index
    %1253 = vector.load %arg26[%c0_397, %c0_398, %c0_399] : memref<1x128x16xf32, #tpu.memory_space<vmem>>, vector<1x128x16xf32>
    %1254 = vector.shape_cast %1253 : vector<1x128x16xf32> to vector<128x16xf32>
    %1255 = vector.shape_cast %1252 : vector<128x16xf32> to vector<1x128x16xf32>
    tpu.vector_store %arg26[%c0_397, %c0_398, %c0_399], %1255 {strides = array<i32>} : memref<1x128x16xf32, #tpu.memory_space<vmem>>, vector<1x128x16xf32>,
    return
  }
  func.func @transform_0(%arg0: i32) -> (i32, i32, i32, i32) {
    %c0_i32 = arith.constant 0 : i32
    %c0_i32_0 = arith.constant 0 : i32
    %c0_i32_1 = arith.constant 0 : i32
    %c0_i32_2 = arith.constant 0 : i32
    return %arg0, %c0_i32, %c0_i32_0, %c0_i32_1 : i32, i32, i32, i32
  }
  func.func @transform_1(%arg0: i32) -> (i32, i32, i32) {
    %c0_i32 = arith.constant 0 : i32
    %c0_i32_0 = arith.constant 0 : i32
    %c0_i32_1 = arith.constant 0 : i32
    return %arg0, %c0_i32, %c0_i32_0 : i32, i32, i32
  }
  func.func @transform_2(%arg0: i32) -> (i32, i32) {
    %c0_i32 = arith.constant 0 : i32
    %c0_i32_0 = arith.constant 0 : i32
    %c0_i32_1 = arith.constant 0 : i32
    return %c0_i32, %c0_i32_0 : i32, i32
  }
  func.func @transform_3(%arg0: i32) -> (i32, i32) {
    %c0_i32 = arith.constant 0 : i32
    %c0_i32_0 = arith.constant 0 : i32
    %c0_i32_1 = arith.constant 0 : i32
    return %c0_i32, %c0_i32_0 : i32, i32
  }
  func.func @transform_4(%arg0: i32) -> (i32, i32) {
    %c0_i32 = arith.constant 0 : i32
    %c0_i32_0 = arith.constant 0 : i32
    %c0_i32_1 = arith.constant 0 : i32
    return %c0_i32, %c0_i32_0 : i32, i32
  }
  func.func @transform_5(%arg0: i32) -> (i32, i32) {
    %c0_i32 = arith.constant 0 : i32
    %c0_i32_0 = arith.constant 0 : i32
    %c0_i32_1 = arith.constant 0 : i32
    return %c0_i32, %c0_i32_0 : i32, i32
  }
  func.func @transform_6(%arg0: i32) -> (i32, i32) {
    %c0_i32 = arith.constant 0 : i32
    %c0_i32_0 = arith.constant 0 : i32
    %c0_i32_1 = arith.constant 0 : i32
    return %c0_i32, %c0_i32_0 : i32, i32
  }
  func.func @transform_7(%arg0: i32) -> (i32, i32) {
    %c0_i32 = arith.constant 0 : i32
    %c0_i32_0 = arith.constant 0 : i32
    %c0_i32_1 = arith.constant 0 : i32
    return %c0_i32, %c0_i32_0 : i32, i32
  }
  func.func @transform_8(%arg0: i32) -> (i32, i32) {
    %c0_i32 = arith.constant 0 : i32
    %c0_i32_0 = arith.constant 0 : i32
    %c0_i32_1 = arith.constant 0 : i32
    return %c0_i32, %c0_i32_0 : i32, i32
  }
  func.func @transform_9(%arg0: i32) -> (i32, i32) {
    %c0_i32 = arith.constant 0 : i32
    %c0_i32_0 = arith.constant 0 : i32
    %c0_i32_1 = arith.constant 0 : i32
    return %c0_i32, %c0_i32_0 : i32, i32
  }
  func.func @transform_10(%arg0: i32) -> (i32, i32) {
    %c0_i32 = arith.constant 0 : i32
    %c0_i32_0 = arith.constant 0 : i32
    %c0_i32_1 = arith.constant 0 : i32
    return %c0_i32, %c0_i32_0 : i32, i32
  }
  func.func @transform_11(%arg0: i32) -> (i32, i32) {
    %c0_i32 = arith.constant 0 : i32
    %c0_i32_0 = arith.constant 0 : i32
    %c0_i32_1 = arith.constant 0 : i32
    return %c0_i32, %c0_i32_0 : i32, i32
  }
  func.func @transform_12(%arg0: i32) -> (i32, i32) {
    %c0_i32 = arith.constant 0 : i32
    %c0_i32_0 = arith.constant 0 : i32
    %c0_i32_1 = arith.constant 0 : i32
    return %c0_i32, %c0_i32_0 : i32, i32
  }
  func.func @transform_13(%arg0: i32) -> (i32, i32, i32) {
    %c0_i32 = arith.constant 0 : i32
    %c0_i32_0 = arith.constant 0 : i32
    %c0_i32_1 = arith.constant 0 : i32
    %c0_i32_2 = arith.constant 0 : i32
    return %c0_i32, %c0_i32_0, %c0_i32_1 : i32, i32, i32
  }
  func.func @transform_14(%arg0: i32) -> (i32, i32, i32) {
    %c0_i32 = arith.constant 0 : i32
    %c0_i32_0 = arith.constant 0 : i32
    %c0_i32_1 = arith.constant 0 : i32
    %c0_i32_2 = arith.constant 0 : i32
    return %c0_i32, %c0_i32_0, %c0_i32_1 : i32, i32, i32
  }
  func.func @transform_15(%arg0: i32) -> (i32, i32, i32) {
    %c0_i32 = arith.constant 0 : i32
    %c0_i32_0 = arith.constant 0 : i32
    %c0_i32_1 = arith.constant 0 : i32
    %c0_i32_2 = arith.constant 0 : i32
    return %c0_i32, %c0_i32_0, %c0_i32_1 : i32, i32, i32
  }
  func.func @transform_16(%arg0: i32) -> (i32, i32, i32) {
    %c0_i32 = arith.constant 0 : i32
    %c0_i32_0 = arith.constant 0 : i32
    %c0_i32_1 = arith.constant 0 : i32
    %c0_i32_2 = arith.constant 0 : i32
    return %c0_i32, %c0_i32_0, %c0_i32_1 : i32, i32, i32
  }
  func.func @transform_17(%arg0: i32) -> (i32, i32) {
    %c0_i32 = arith.constant 0 : i32
    %c0_i32_0 = arith.constant 0 : i32
    %c0_i32_1 = arith.constant 0 : i32
    return %c0_i32, %c0_i32_0 : i32, i32
  }
  func.func @transform_18(%arg0: i32) -> (i32, i32) {
    %c0_i32 = arith.constant 0 : i32
    %c0_i32_0 = arith.constant 0 : i32
    %c0_i32_1 = arith.constant 0 : i32
    return %c0_i32, %c0_i32_0 : i32, i32
  }
  func.func @transform_19(%arg0: i32) -> (i32, i32) {
    %c0_i32 = arith.constant 0 : i32
    %c0_i32_0 = arith.constant 0 : i32
    %c0_i32_1 = arith.constant 0 : i32
    return %c0_i32, %c0_i32_0 : i32, i32
  }
  func.func @transform_20(%arg0: i32) -> (i32, i32, i32) {
    %c0_i32 = arith.constant 0 : i32
    %c0_i32_0 = arith.constant 0 : i32
    %c0_i32_1 = arith.constant 0 : i32
    %c0_i32_2 = arith.constant 0 : i32
    return %c0_i32, %c0_i32_0, %c0_i32_1 : i32, i32, i32
  }
  func.func @transform_21(%arg0: i32) -> (i32, i32) {
    %c0_i32 = arith.constant 0 : i32
    %c0_i32_0 = arith.constant 0 : i32
    %c0_i32_1 = arith.constant 0 : i32
    return %c0_i32, %c0_i32_0 : i32, i32
  }
  func.func @transform_22(%arg0: i32) -> (i32, i32) {
    %c0_i32 = arith.constant 0 : i32
    %c0_i32_0 = arith.constant 0 : i32
    %c0_i32_1 = arith.constant 0 : i32
    return %c0_i32, %c0_i32_0 : i32, i32
  }
  func.func @transform_23(%arg0: i32) -> (i32, i32) {
    %c0_i32 = arith.constant 0 : i32
    %c0_i32_0 = arith.constant 0 : i32
    %c0_i32_1 = arith.constant 0 : i32
    return %c0_i32, %c0_i32_0 : i32, i32
  }
  func.func @transform_24(%arg0: i32) -> (i32, i32, i32) {
    %c0_i32 = arith.constant 0 : i32
    %c0_i32_0 = arith.constant 0 : i32
    %c0_i32_1 = arith.constant 0 : i32
    return %arg0, %c0_i32, %c0_i32_0 : i32, i32, i32
  }
  func.func @transform_25(%arg0: i32) -> (i32, i32, i32) {
    %c0_i32 = arith.constant 0 : i32
    %c0_i32_0 = arith.constant 0 : i32
    %c0_i32_1 = arith.constant 0 : i32
    return %arg0, %c0_i32, %c0_i32_0 : i32, i32, i32
  }
}

</mosaic_0001>

<bundles_post_ra>
// kernel: mstgcn_forward.3
= control target key start
LH: loop header
LB: loop body
LE: loop exit
PB: predicated region body
PF: predicated region fallthrough
CT: control target
= control target key end

     0   :  { %14 = vsyncpa [#allocation4], 0  ;;  %s2264_s0 = inlined_call_operand.vmem [shape: f32[2,4096], index: 0, kind: input, shape index: {}]   ;;  %s2265_s1 = inlined_call_operand.hbm [shape: bf16[4096,256], index: 1, kind: input, shape index: {}]   ;;  %s2266_s2 = inlined_call_operand.hbm [shape: f32[1,256], index: 2, kind: input, shape index: {}]   ;;  %s2267_s3 = inlined_call_operand.vmem [shape: f32[128,5], index: 3, kind: input, shape index: {}]   ;;  %s2268_s4 = inlined_call_operand.hbm [shape: f32[1,5], index: 4, kind: input, shape index: {}]   ;;  %s2269_s5 = inlined_call_operand.vmem [shape: f32[128,3], index: 5, kind: input, shape index: {}]   ;;  %s2270_s6 = inlined_call_operand.hbm [shape: f32[1,3], index: 6, kind: input, shape index: {}]   ;;  %s2271_s7 = inlined_call_operand.hbm [shape: f32[2,5], index: 7, kind: output, shape index: {0}]   ;;  %s2272_s8 = inlined_call_operand.hbm [shape: f32[2,3], index: 8, kind: output, shape index: {1}]  }
   0x1   :  { %16 = vsyncpa [#allocation4 + $0x1], 0 }
   0x2   :  { %17 = vsyncpa [#allocation7], 0 }
   0x3   :  { %18 = vsyncpa [#allocation10], 0 }
   0x4   :  { %19 = vsyncpa [#allocation5], 0 }
   0x5   :  { %20 = vsyncpa [#allocation13], 0  ;;  %s1876_s27 = smov 0   ;;  %s1878_s28 = smov 0  }
   0x6   :  { %s1880_s29 = smov 0   ;;  %s1882_s30 = smov 0  }
   0x7 LB: > { %s1895_s9 = sadd.s32 4294967295, %s1818_s30   ;;  %p72_p0 = scmp.ne.s32.totalorder %s1810_s28, %s1806_s27  ;;  %s1818_s30 = sphi %s1882_s30, %s2290_s30   ;;  %s1814_s29 = sphi %s1880_s29, %s2289_s29   ;;  %s1810_s28 = sphi %s1878_s28, %s2288_s28   ;;  %s1806_s27 = sphi %s1876_s27, %s2287_s27  }
   0x8   : > { %p2273_p1 = scmp.eq.s32.totalorder %s1895_s9, 0  ;;  %p1231_p2 = scmp.ge.s32.totalorder %s1818_s30, 1 }
   0x9   : > { %p230_p3 = scmp.lt.s32.totalorder %s1818_s30, 9  ;;  %s1820_s12 = smov [#allocation6]  }
   0xa   : > { %p1904_p5 = por %p2273_p1, %p72_p0  ;;  %s243_s13 = sshll.u32 %s1820_s12, 4  ;;  %s244_s13 = int_to_ptr.vmem [resolvable:$true] %s243_s13 }
   0xb   : > { %p1908_p6 = pnand %p1231_p2, %p230_p3  ;;  %s1821_s14 = smov [#allocation8]  }
   0xc   : > { %s2276_s10 = scalar_select %p1904_p5, 1, 0 }
   0xd   : > { %s2277_s11 = scalar_select %p1908_p6, 1, 0 }
   0xe   : > { %p1450_p7 = pneg %p1908_p6  ;;  %s257_s15 = sshll.u32 %s1821_s14, 4  ;;  %s258_s15 = int_to_ptr.vmem [resolvable:$true] %s257_s15 }
   0xf   : > { %s1822_s17 = smov [#allocation9]   ;;  %s1625_s19 = scalar_lea.vmem %s244_s13, 32 }
  0x10   : > { %p1916_p8 = pnand %p1450_p7, %p2273_p1  ;;  %s271_s18 = sshll.u32 %s1822_s17, 4  ;;  %s1920_s18 = int_to_ptr.vmem [resolvable:$true] %s271_s18 }
  0x11   : > { %p1626_p10 = scmp.ne.s32.totalorder %s244_s13, %s1625_s19  ;;  %p1633_p13 = scmp.lt.s32.totalorder %s244_s13, %s244_s13 }
  0x12   : > { %p1616_p9 = pneg %p1916_p8  ;;  %p1634_p0 = scmp.lt.s32.totalorder %s1625_s19, %s1625_s19 }
  0x14   : > { %p1628_p11 = pnand %p1626_p10, %p1616_p9  ;;  %p1635_p2 = por %p1634_p0, %p1633_p13 }
  0x16   : > { %p1629_p12 = pneg %p1628_p11 }
  0x18   : > { %p1636_p3 = pnand %p1635_p2, %p1629_p12 }
  0x1a   : > { %1639 = shalt.err (!%p1636_p3)
}
  0x1b   : > { %1453 = dma.hbm_to_vmem [thread:$0]  (!%p1916_p8), %s2266_s2, 32, %s244_s13, [#allocation7]  }
  0x1c   : > { %s1651_s22 = scalar_lea.vmem %s258_s15, 16  ;;  %s1658_s23 = scalar_lea.vmem %s258_s15, 32 }
  0x1d   : > { %p1652_p7 = scmp.ne.s32.totalorder %s258_s15, %s1651_s22  ;;  %p1659_p10 = scmp.lt.s32.totalorder %s258_s15, %s258_s15 }
  0x1e   : > { %p1660_p11 = scmp.lt.s32.totalorder %s1658_s23, %s1651_s22 }
  0x1f   : > { %p1654_p4 = pnand %p1652_p7, %p1616_p9 }
  0x20   : > { %p1661_p5 = por %p1660_p11, %p1659_p10 }
  0x21   : > { %p1655_p1 = pneg %p1654_p4 }
  0x23   : > { %p1662_p13 = pnand %p1661_p5, %p1655_p1 }
  0x25   : > { %1665 = shalt.err (!%p1662_p13)
}
  0x26   : > { %1456 = dma.hbm_to_vmem [thread:$0]  (!%p1916_p8), %s2268_s4, 16, %s258_s15, [#allocation7]  }
  0x27   : > { %s1677_s26 = scalar_lea.vmem %s1920_s18, 16  ;;  %s1684_s27 = scalar_lea.vmem %s1920_s18, 32 }
  0x28   : > { %p1678_p12 = scmp.ne.s32.totalorder %s1920_s18, %s1677_s26  ;;  %p1685_p1 = scmp.lt.s32.totalorder %s1920_s18, %s1920_s18 }
  0x29   : > { %p1686_p5 = scmp.lt.s32.totalorder %s1684_s27, %s1677_s26 }
  0x2a   : > { %p1680_p4 = pnand %p1678_p12, %p1616_p9 }
  0x2b   : > { %p1687_p2 = por %p1686_p5, %p1685_p1 }
  0x2c   : > { %p1681_p0 = pneg %p1680_p4 }
  0x2e   : > { %p1688_p3 = pnand %p1687_p2, %p1681_p0 }
  0x30   : > { %1691 = shalt.err (!%p1688_p3)
}
  0x31   : > { %1459 = dma.hbm_to_vmem [thread:$0]  (!%p1916_p8), %s2270_s6, 16, %s1920_s18, [#allocation10]  }
  0x32   : > { %s1955_s14 = sadd.s32 1, %s1818_s30   ;;  %s59_s16 = sadd.s32 1, %s1814_s29 }
  0x33   : > { %s56_s15 = ssub.s32 %s1818_s30, %s1955_s14  ;;  %p66_p7 = scmp.ne.s32.totalorder %s1814_s29, %s1810_s28 }
  0x34   : > { %p57_p9 = scmp.eq.s32.totalorder %s56_s15, 0  ;;  %p67_p10 = scmp.eq.s32.totalorder %s1818_s30, 0 }
  0x35   : > { %p1467_p11 = scmp.lt.s32.totalorder %s1818_s30, 8  ;;  %s291_s19 = sand.u32 1, %s1814_s29  }
  0x36   : > { %s1965_s17 = scalar_select %p57_p9, %s1814_s29, %s59_s16  }
  0x37   : > { %p68_p13 = por %p67_p10, %p66_p7  ;;  %s1236_s20 = sshll.u32 %s291_s19, 9 }
  0x38   : > { %s1323_s21 = sshll.u32 %s1818_s30, 13  ;;  %s295_s18 = scalar_lea.vmem [#allocation3], %s1236_s20 }
  0x39   : > { %s1972_s24 = scalar_lea.hbm %s2265_s1, %s1323_s21  ;;  %s303_s25 = sshll.u32 %s295_s18, 4  ;;  %s1974_s25 = int_to_ptr.vmem [resolvable:$true] %s303_s25 }
  0x3a   : > { %p1976_p8 = pnand %p1467_p11, %p68_p13  ;;  %s1980_s27 = scalar_lea.sflag [#allocation4], %s291_s19 }
  0x3b   : > { %s1692_s30 = scalar_lea.hbm %s1972_s24, 8192  ;;  %s1697_s15 = scalar_lea.hbm %s2265_s1, 65536 }
  0x3c   : > { %p1693_p12 = scmp.ne.s32.totalorder %s1972_s24, %s1692_s30  ;;  %p1694_p4 = pneg %p1976_p8 }
  0x3d   : > { %p1698_p5 = scmp.lt.s32.totalorder %s1972_s24, %s2265_s1  ;;  %p1699_p2 = scmp.lt.s32.totalorder %s1697_s15, %s1692_s30 }
  0x3e   : > { %p1695_p0 = pnand %p1694_p4, %p1693_p12 }
  0x3f   : > { %p1700_p3 = por %p1699_p2, %p1698_p5 }
  0x40   : > { %p1696_p1 = pneg %p1695_p0 }
  0x42   : > { %p1701_p9 = pnand %p1700_p3, %p1696_p1 }
  0x44   : > { %1704 = shalt.err (!%p1701_p9)
}
  0x45   : > { %s1705_s19 = scalar_lea.vmem %s1974_s25, 8192  ;;  %s1823_s21 = smov [#allocation3]  }
  0x46   : > { %p1706_p7 = scmp.ne.s32.totalorder %s1974_s25, %s1705_s19  ;;  %s1710_s22 = sshll.u32 %s1823_s21, 4  ;;  %s1711_s22 = int_to_ptr.vmem [resolvable:$false] %s1710_s22 }
  0x47   : > { %s1712_s23 = scalar_lea.vmem %s1711_s22, 16384  ;;  %p1713_p13 = scmp.lt.s32.totalorder %s1974_s25, %s1711_s22 }
  0x48   : > { %p1708_p10 = pnand %p1706_p7, %p1694_p4  ;;  %p1714_p12 = scmp.lt.s32.totalorder %s1712_s23, %s1705_s19 }
  0x4a   : > { %p1709_p11 = pneg %p1708_p10  ;;  %p1715_p0 = por %p1714_p12, %p1713_p13 }
  0x4c   : > { %p1716_p6 = pnand %p1715_p0, %p1709_p11 }
  0x4e   : > { %1719 = shalt.err (!%p1716_p6)
}
  0x4f   : > { %s1824_s18 = smov 128   ;;  %s1825_s30 = smov 8  }
  0x50   : > { %1463 = dma.hbm_to_vmem [thread:$0]  (!%p1976_p8), %s1972_s24, 8192, %s1974_s25, %s1980_s27, %s1824_s18, %s1824_s18, %s1825_s30  }
  0x51   : > { %p2280_p4 = scmp.ne.s32.totalorder %s2277_s11, 0 }
  0x52   : > { %s317_s12 = sand.u32 (!%p2280_p4), 1, %s1810_s28   ;;  %p2281_p1 = scmp.ne.s32.totalorder (!%p2280_p4), %s2276_s10, 0 }
  0x53   : > { %315 = sbr.rel (%p2280_p4) target bundleno = 642 (0x282), region = 48  ;;  %s1241_s13 = sshll.u32 (!%p2280_p4), %s317_s12, 9 }
  0x54   : > { %s318_s15 = scalar_lea.sflag (!%p2280_p4), [#allocation4], %s317_s12  ;;  %s2004_s16 = scalar_lea.vmem (!%p2280_p4), [#allocation3], %s1241_s13 }
  0x58   : > { %1785 = dma.done.wait (%p2281_p1), %s318_s15, 8192  }
  0x59   : > { %1787 = vsyncadd (%p2281_p1), %s318_s15, 4294959104  ;;  %p2282_p6 = scmp.eq.s32.totalorder %s1895_s9, 0 }
  0x5b   : > { %1789 = dma.done.wait (%p2282_p6), [#allocation7], 48   ;;  %p2283_p8 = pmov %p2282_p6 }
  0x5c   : > { %p2284_p5 = pmov %p2282_p6 }
  0x5d   : > { %1791 = vsyncadd (%p2283_p8), [#allocation7], 4294967248 }
  0x5e   : > { %1793 = dma.done.wait (%p2284_p5), [#allocation10], 16   ;;  %p2285_p2 = pmov %p2284_p5 }
  0x5f   : > { %s1245_s11 = sshll.u32 %s1895_s9, 2  ;;  %p2286_p9 = scmp.ne.s32.totalorder %s1895_s9, 0 }
  0x60   : > { %1795 = vsyncadd (%p2285_p2), [#allocation10], 4294967280  ;;  %p367_p3 = scmp.lt.s32.totalorder %s1245_s11, 31 }
  0x61   : > { %376 = sbr.rel (%p2286_p9) target bundleno = 113 (0x71), region = 68 }
  0x62   : > { %s2292_s11 = smov (!%p367_p3, %s1245_s11), 31 }
  0x63   : > { %s1246_s24 = sshll.u32 %s2292_s11, 1 }
  0x64   : > { %s2022_s26 = scalar_lea.vmem %s2264_s0, %s1246_s24 }
  0x66   : > { %v379_v0 = vlaneseq  ;;  %v377_v2 = vld [vmem:[#allocation6] sm:$0x3] }
  0x68   : > { %v380_v1 = vshrl.u32 %v379_v0, 7 }
  0x6a   : > { %v381_v3 = vsub.s32 0, %v380_v1  ;;  %v385_v4 = vsub.s32 1, %v380_v1 }
  0x6c   : > { %v382_v5 = vrot.slane %v377_v2, %v381_v3  ;;  %v386_v6 = vrot.slane %v377_v2, %v385_v4 }
  0x6e   : > { %v387_v7 = vcombine.low %v382_v5, %v386_v6 }
  0x70   : > { %1248 = vst.sshfl [vmem:[#allocation2] sm:$0x33 pattern:$0x76325410] %v387_v7 }
  0x71 PF: > { %v1517_v8 = vld [vmem:[%s2004_s16 + $0x74] ss:$8 sps:$4 sm:$0xff]   ;;  %v1521_v10 = vld [vmem:[%s2004_s16 + $0x70] ss:$8 sps:$4 sm:$0xff]   ;;  %v1523_v12 = vld [vmem:[%s2004_s16 + $0x64] ss:$8 sps:$4 sm:$0xff]   ;;  %v404_v46 = vlaneseq }
  0x72   : > { %v1519_v9 = vld [vmem:[%s2004_s16 + $0x174] ss:$8 sps:$4 sm:$0xff]   ;;  %809 = vmatprep.subr.bf16.mxu0 %v1517_v8  ;;  %v1522_v11 = vld [vmem:[%s2004_s16 + $0x170] ss:$8 sps:$4 sm:$0xff]   ;;  %v1525_v13 = vld [vmem:[%s2004_s16 + $0x164] ss:$8 sps:$4 sm:$0xff]  }
  0x73   : > { %850 = vmatprep.subr.bf16.mxu1 %v1519_v9  ;;  %810 = vmatpush1.bf16.msra.mxu0 %v1521_v10  ;;  %v1527_v14 = vld [vmem:[%s2004_s16 + $0x60] ss:$8 sps:$4 sm:$0xff]   ;;  %v1529_v16 = vld [vmem:[%s2004_s16 + $0x54] ss:$8 sps:$4 sm:$0xff]   ;;  %v1533_v18 = vld [vmem:[%s2004_s16 + $0x50] ss:$8 sps:$4 sm:$0xff]  }
  0x74   : > { %851 = vmatpush1.bf16.msra.mxu1 %v1522_v11  ;;  %811 = vmatprep.subr.bf16.mxu0 %v1523_v12  ;;  %v1528_v15 = vld [vmem:[%s2004_s16 + $0x160] ss:$8 sps:$4 sm:$0xff]   ;;  %v1531_v17 = vld [vmem:[%s2004_s16 + $0x154] ss:$8 sps:$4 sm:$0xff]   ;;  %v1534_v19 = vld [vmem:[%s2004_s16 + $0x150] ss:$8 sps:$4 sm:$0xff]  }
  0x75   : > { %852 = vmatprep.subr.bf16.mxu1 %v1525_v13  ;;  %v1535_v20 = vld [vmem:[%s2004_s16 + $0x44] ss:$8 sps:$4 sm:$0xff]   ;;  %v1539_v22 = vld [vmem:[%s2004_s16 + $0x40] ss:$8 sps:$4 sm:$0xff]   ;;  %v1541_v24 = vld [vmem:[%s2004_s16 + $0x34] ss:$8 sps:$4 sm:$0xff]  }
  0x76   : > { %v1537_v21 = vld [vmem:[%s2004_s16 + $0x144] ss:$8 sps:$4 sm:$0xff]   ;;  %v1540_v23 = vld [vmem:[%s2004_s16 + $0x140] ss:$8 sps:$4 sm:$0xff]   ;;  %v1543_v25 = vld [vmem:[%s2004_s16 + $0x134] ss:$8 sps:$4 sm:$0xff]  }
  0x77   : > { %812 = vmatpush1.bf16.msra.mxu0 %v1527_v14  ;;  %v1545_v26 = vld [vmem:[%s2004_s16 + $0x30] ss:$8 sps:$4 sm:$0xff]   ;;  %v1547_v28 = vld [vmem:[%s2004_s16 + $0x24] ss:$8 sps:$4 sm:$0xff]   ;;  %v1551_v30 = vld [vmem:[%s2004_s16 + $0x20] ss:$8 sps:$4 sm:$0xff]  }
  0x78   : > { %853 = vmatpush1.bf16.msra.mxu1 %v1528_v15  ;;  %813 = vmatprep.subr.bf16.mxu0 %v1529_v16  ;;  %v1546_v27 = vld [vmem:[%s2004_s16 + $0x130] ss:$8 sps:$4 sm:$0xff]   ;;  %v1549_v29 = vld [vmem:[%s2004_s16 + $0x124] ss:$8 sps:$4 sm:$0xff]   ;;  %v1552_v31 = vld [vmem:[%s2004_s16 + $0x120] ss:$8 sps:$4 sm:$0xff]  }
  0x79   : > { %854 = vmatprep.subr.bf16.mxu1 %v1531_v17  ;;  %v1553_v32 = vld [vmem:[%s2004_s16 + $0x14] ss:$8 sps:$4 sm:$0xff]   ;;  %v1557_v34 = vld [vmem:[%s2004_s16 + $0x10] ss:$8 sps:$4 sm:$0xff]   ;;  %v1559_v36 = vld [vmem:[%s2004_s16 + $0x4] ss:$8 sps:$4 sm:$0xff]  }
  0x7a   : > { %v1555_v33 = vld [vmem:[%s2004_s16 + $0x114] ss:$8 sps:$4 sm:$0xff]   ;;  %v1558_v35 = vld [vmem:[%s2004_s16 + $0x110] ss:$8 sps:$4 sm:$0xff]   ;;  %v1561_v37 = vld [vmem:[%s2004_s16 + $0x104] ss:$8 sps:$4 sm:$0xff]  }
  0x7b   : > { %814 = vmatpush1.bf16.msra.mxu0 %v1533_v18  ;;  %v1563_v38 = vld [vmem:[%s2004_s16] ss:$8 sps:$4 sm:$0xff]   ;;  %v1565_v40 = vld [vmem:[%s2004_s16 + $0xf4] ss:$8 sps:$4 sm:$0xff]   ;;  %v1569_v42 = vld [vmem:[%s2004_s16 + $0xf0] ss:$8 sps:$4 sm:$0xff]  }
  0x7c   : > { %855 = vmatpush1.bf16.msra.mxu1 %v1534_v19  ;;  %815 = vmatprep.subr.bf16.mxu0 %v1535_v20  ;;  %v1564_v39 = vld [vmem:[%s2004_s16 + $0x100] ss:$8 sps:$4 sm:$0xff]   ;;  %v1567_v41 = vld [vmem:[%s2004_s16 + $0x1f4] ss:$8 sps:$4 sm:$0xff]   ;;  %v1570_v43 = vld [vmem:[%s2004_s16 + $0x1f0] ss:$8 sps:$4 sm:$0xff]  }
  0x7d   : > { %856 = vmatprep.subr.bf16.mxu1 %v1537_v21  ;;  %v1826_v44 = vmov 1983009808   ;;  %v1571_v47 = vld [vmem:[%s2004_s16 + $0xe4] ss:$8 sps:$4 sm:$0xff]   ;;  %v1575_v49 = vld [vmem:[%s2004_s16 + $0xe0] ss:$8 sps:$4 sm:$0xff]  }
  0x7e   : > { %v402_v45 = vunpack.c.l.s4 %v1826_v44  ;;  %v1573_v48 = vld [vmem:[%s2004_s16 + $0x1e4] ss:$8 sps:$4 sm:$0xff]   ;;  %v405_v51 = vshrl.u32 %v404_v46, 7  ;;  %v1576_v52 = vld [vmem:[%s2004_s16 + $0x1e0] ss:$8 sps:$4 sm:$0xff]   ;;  %p1313_p7 = scmp.ne.s32.totalorder %s1895_s9, 7 }
  0x7f   : > { %816 = vmatpush1.bf16.msra.mxu0 %v1539_v22  ;;  %v1577_v53 = vld [vmem:[%s2004_s16 + $0xd4] ss:$8 sps:$4 sm:$0xff]   ;;  %v1581_v55 = vld [vmem:[%s2004_s16 + $0xd0] ss:$8 sps:$4 sm:$0xff]   ;;  %v1583_v58 = vld [vmem:[%s2004_s16 + $0xc4] ss:$8 sps:$4 sm:$0xff]  }
  0x80   : > { %857 = vmatpush1.bf16.msra.mxu1 %v1540_v23  ;;  %817 = vmatprep.subr.bf16.mxu0 %v1541_v24  ;;  %v403_v50 = vunpack.c.0.s8 %v402_v45  ;;  %v1579_v54 = vld [vmem:[%s2004_s16 + $0x1d4] ss:$8 sps:$4 sm:$0xff]   ;;  %v1582_v56 = vld [vmem:[%s2004_s16 + $0x1d0] ss:$8 sps:$4 sm:$0xff]   ;;  %v1585_v59 = vld [vmem:[%s2004_s16 + $0x1c4] ss:$8 sps:$4 sm:$0xff]  }
  0x81   : > { %858 = vmatprep.subr.bf16.mxu1 %v1543_v25  ;;  %v398_v60 = vld [vmem:[%s2022_s26] sm:$0xff]  ;;  %v1593_v7 = vld [vmem:[%s2004_s16 + $0xb0] ss:$8 sps:$4 sm:$0xff]   ;;  %v1595_v9 = vld [vmem:[%s2004_s16 + $0xa4] ss:$8 sps:$4 sm:$0xff]  }
  0x82   : > { %v2070_v57 = vsub.s32 %v403_v50, %v405_v51  ;;  %v400_v62 = vcombine.high %v398_v60, %v398_v60  ;;  %v1587_v63 = vld [vmem:[%s2004_s16 + $0xc0] ss:$8 sps:$4 sm:$0xff]   ;;  %v1589_v1 = vld [vmem:[%s2004_s16 + $0xb4] ss:$8 sps:$4 sm:$0xff]   ;;  %v1594_v8 = vld [vmem:[%s2004_s16 + $0x1b0] ss:$8 sps:$4 sm:$0xff]  }
  0x83   : > { %818 = vmatpush1.bf16.msra.mxu0 %v1545_v26  ;;  %v1588_v0 = vld [vmem:[%s2004_s16 + $0x1c0] ss:$8 sps:$4 sm:$0xff]   ;;  %v1591_v2 = vld [vmem:[%s2004_s16 + $0x1b4] ss:$8 sps:$4 sm:$0xff]   ;;  %v1597_v10 = vld [vmem:[%s2004_s16 + $0x1a4] ss:$8 sps:$4 sm:$0xff]  }
  0x84   : > { %859 = vmatpush1.bf16.msra.mxu1 %v1546_v27  ;;  %819 = vmatprep.subr.bf16.mxu0 %v1547_v28  ;;  %v407_v61 = vrot.slane %v398_v60, %v2070_v57  ;;  %v414_v4 = vrot.slane %v400_v62, %v2070_v57  ;;  %v1599_v12 = vld [vmem:[%s2004_s16 + $0xa0] ss:$8 sps:$4 sm:$0xff]   ;;  %v1601_v14 = vld [vmem:[%s2004_s16 + $0x94] ss:$8 sps:$4 sm:$0xff]   ;;  %v1605_v16 = vld [vmem:[%s2004_s16 + $0x90] ss:$8 sps:$4 sm:$0xff]  }
  0x85   : > { %860 = vmatprep.subr.bf16.mxu1 %v1549_v29  ;;  %v1600_v13 = vld [vmem:[%s2004_s16 + $0x1a0] ss:$8 sps:$4 sm:$0xff]   ;;  %v1603_v15 = vld [vmem:[%s2004_s16 + $0x194] ss:$8 sps:$4 sm:$0xff]   ;;  %v1606_v17 = vld [vmem:[%s2004_s16 + $0x190] ss:$8 sps:$4 sm:$0xff]  }
  0x86   : > { %v415_v3 = vcombine.high %v407_v61, %v407_v61  ;;  %v416_v6 = vcombine.high %v414_v4, %v414_v4  ;;  %v1607_v18 = vld [vmem:[%s2004_s16 + $0x84] ss:$8 sps:$4 sm:$0xff]   ;;  %v1611_v20 = vld [vmem:[%s2004_s16 + $0x80] ss:$8 sps:$4 sm:$0xff]   ;;  %v421_v22 = vpack.c.bf16 %v407_v61, %v407_v61  ;;  %v423_v23 = vpack.c.bf16 %v414_v4, %v414_v4 }
  0x87   : > { %820 = vmatpush1.bf16.msra.mxu0 %v1551_v30  ;;  %v1609_v19 = vld [vmem:[%s2004_s16 + $0x184] ss:$8 sps:$4 sm:$0xff]   ;;  %v1612_v21 = vld [vmem:[%s2004_s16 + $0x180] ss:$8 sps:$4 sm:$0xff]  }
  0x88   : > { %861 = vmatpush1.bf16.msra.mxu1 %v1552_v31  ;;  %821 = vmatprep.subr.bf16.mxu0 %v1553_v32  ;;  %v422_v5 = vpack.c.bf16 %v415_v3, %v415_v3  ;;  %v424_v11 = vpack.c.bf16 %v416_v6, %v416_v6 }
  0x89   : > { %862 = vmatprep.subr.bf16.mxu1 %v1555_v33  ;;  %v397_v33 = vld [vmem:[#allocation2] sm:$0xf] }
  0x8a   : > { %841 = vmatprep.mubr.bf16.mxu0 %v422_v5  ;;  %882 = vmatprep.mubr.bf16.mxu1 %v424_v11 }
  0x8b   : > { %822 = vmatpush1.bf16.msra.mxu0 %v1557_v34 }
  0x8c   : > { %863 = vmatpush1.bf16.msra.mxu1 %v1558_v35  ;;  %823 = vmatprep.subr.bf16.mxu0 %v1559_v36 }
  0x8d   : > { %864 = vmatprep.subr.bf16.mxu1 %v1561_v37 }
  0x8f   : > { %824 = vmatpush1.bf16.msra.mxu0 %v1563_v38 }
  0x90   : > { %865 = vmatpush1.bf16.msra.mxu1 %v1564_v39  ;;  %825 = vmatprep.subr.bf16.mxu0 %v1565_v40 }
  0x91   : > { %866 = vmatprep.subr.bf16.mxu1 %v1567_v41 }
  0x93   : > { %826 = vmatpush2.bf16.msra.mxu0 %v1569_v42 }
  0x94   : > { %867 = vmatpush2.bf16.msra.mxu1 %v1570_v43  ;;  %827 = vmatprep.subr.bf16.mxu0 %v1571_v47 }
  0x95   : > { %868 = vmatprep.subr.bf16.mxu1 %v1573_v48 }
  0x97   : > { %828 = vmatpush2.bf16.msra.mxu0 %v1575_v49 }
  0x98   : > { %869 = vmatpush2.bf16.msra.mxu1 %v1576_v52  ;;  %829 = vmatprep.subr.bf16.mxu0 %v1577_v53 }
  0x99   : > { %870 = vmatprep.subr.bf16.mxu1 %v1579_v54 }
  0x9b   : > { %830 = vmatpush2.bf16.msra.mxu0 %v1581_v55 }
  0x9c   : > { %871 = vmatpush2.bf16.msra.mxu1 %v1582_v56  ;;  %831 = vmatprep.subr.bf16.mxu0 %v1583_v58 }
  0x9d   : > { %872 = vmatprep.subr.bf16.mxu1 %v1585_v59 }
  0x9f   : > { %832 = vmatpush2.bf16.msra.mxu0 %v1587_v63 }
  0xa0   : > { %873 = vmatpush2.bf16.msra.mxu1 %v1588_v0  ;;  %833 = vmatprep.subr.bf16.mxu0 %v1589_v1 }
  0xa1   : > { %874 = vmatprep.subr.bf16.mxu1 %v1591_v2 }
  0xa3   : > { %834 = vmatpush2.bf16.msra.mxu0 %v1593_v7 }
  0xa4   : > { %875 = vmatpush2.bf16.msra.mxu1 %v1594_v8  ;;  %835 = vmatprep.subr.bf16.mxu0 %v1595_v9 }
  0xa5   : > { %876 = vmatprep.subr.bf16.mxu1 %v1597_v10 }
  0xa7   : > { %836 = vmatpush2.bf16.msra.mxu0 %v1599_v12 }
  0xa8   : > { %877 = vmatpush2.bf16.msra.mxu1 %v1600_v13  ;;  %837 = vmatprep.subr.bf16.mxu0 %v1601_v14 }
  0xa9   : > { %878 = vmatprep.subr.bf16.mxu1 %v1603_v15 }
  0xab   : > { %838 = vmatpush2.bf16.msra.mxu0 %v1605_v16 }
  0xac   : > { %879 = vmatpush2.bf16.msra.mxu1 %v1606_v17  ;;  %839 = vmatprep.subr.bf16.mxu0 %v1607_v18 }
  0xad   : > { %880 = vmatprep.subr.bf16.mxu1 %v1609_v19 }
  0xaf   : > { %840 = vmatpush2.bf16.msra.mxu0 %v1611_v20 }
  0xb0   : > { %881 = vmatpush2.bf16.msra.mxu1 %v1612_v21 }
  0xb2   : > { %842 = vmatmul.mubr.bf16.vlgmr.msra.gmra.mxu0 %v421_v22 }
  0xb3   : > { %883 = vmatmul.mubr.bf16.vlgmr.msra.gmra.mxu1 %v423_v23 }
 0x172   : > { %v843_v24 = vpop.f32.mrf.mxu0 }
 0x173   : > { %v884_v25 = vpop.f32.mrf.mxu1 }
 0x174   : > { %v845_v26 = vpop.f32.mrf.mxu0  ;;  %v885_v28 = vadd.f32 %v884_v25, %v843_v24 }
 0x175   : > { %v886_v27 = vpop.f32.mrf.mxu1 }
 0x176   : > { %v887_v29 = vadd.f32 %v886_v27, %v845_v26  ;;  %v847_v30 = vpop.f32.mrf.mxu0 }
 0x177   : > { %v888_v31 = vpop.f32.mrf.mxu1 }
 0x178   : > { %v893_v32 = vcombine.low %v885_v28, %v887_v29  ;;  %v848_v34 = vpop.f32.mrf.mxu0 }
 0x179   : > { %v889_v35 = vpop.f32.mrf.mxu1 }
 0x17a   : > { %v900_v36 = vrot.slane %v893_v32, %v2070_v57  ;;  %907 = sbr.rel (%p1313_p7) target bundleno = 614 (0x266), region = 72 }
 0x17c   : > { %v902_v37 = vadd.f32 %v900_v36, %v397_v33 }
 0x17e   : > { %903 = vst [vmem:[#allocation2] sm:$0xf] %v902_v37 }
 0x17f   : > { %v925_v38 = vld [vmem:[%s2267_s3 + $0x78] sm:$0xff]  ;;  %v1827_v40 = vmov 0.0   ;;  %v924_v41 = vld [vmem:[%s2267_s3 + $0x70] sm:$0xff]  ;;  %v923_v43 = vld [vmem:[%s2267_s3 + $0x68] sm:$0xff]  ;;  %vm1828_vm0 = vmmov 0   ;;  %vm1003_vm1 = vcmask 33792  }
 0x180   : > { %v1020_v39 = vld [vmem:[%s2269_s5 + $0x78] sm:$0xff]  ;;  %1358 = vmatprep.subr.mxu0 %v1827_v40  ;;  %1393 = vmatprep.subr.mxu1 %v1827_v40  ;;  %v1019_v42 = vld [vmem:[%s2269_s5 + $0x70] sm:$0xff]  ;;  %v1018_v44 = vld [vmem:[%s2269_s5 + $0x68] sm:$0xff]  ;;  %vm1108_vm2 = vcmask 17408  }
 0x181   : > { %1359 = vmatpush3.msra.mxu0 %v925_v38  ;;  %1394 = vmatpush3.msra.mxu1 %v1020_v39  ;;  %v922_v45 = vld [vmem:[%s2267_s3 + $0x60] sm:$0xff]  ;;  %v921_v47 = vld [vmem:[%s2267_s3 + $0x58] sm:$0xff]  ;;  %v920_v49 = vld [vmem:[%s2267_s3 + $0x50] sm:$0xff] }
 0x182   : > { %1360 = vmatprep.subr.mxu0 %v1827_v40  ;;  %1395 = vmatprep.subr.mxu1 %v1827_v40  ;;  %v1017_v46 = vld [vmem:[%s2269_s5 + $0x60] sm:$0xff]  ;;  %v1016_v48 = vld [vmem:[%s2269_s5 + $0x58] sm:$0xff]  ;;  %v1015_v50 = vld [vmem:[%s2269_s5 + $0x50] sm:$0xff] }
 0x183   : > { %1361 = vmatpush3.msra.mxu0 %v924_v41  ;;  %1396 = vmatpush3.msra.mxu1 %v1019_v42  ;;  %v919_v51 = vld [vmem:[%s2267_s3 + $0x48] sm:$0xff]  ;;  %v918_v53 = vld [vmem:[%s2267_s3 + $0x40] sm:$0xff]  ;;  %v917_v55 = vld [vmem:[%s2267_s3 + $0x38] sm:$0xff] }
 0x184   : > { %1362 = vmatprep.subr.mxu0 %v1827_v40  ;;  %1397 = vmatprep.subr.mxu1 %v1827_v40  ;;  %v1014_v52 = vld [vmem:[%s2269_s5 + $0x48] sm:$0xff]  ;;  %v1013_v54 = vld [vmem:[%s2269_s5 + $0x40] sm:$0xff]  ;;  %v1012_v56 = vld [vmem:[%s2269_s5 + $0x38] sm:$0xff] }
 0x185   : > { %1363 = vmatpush3.msra.mxu0 %v923_v43  ;;  %1398 = vmatpush3.msra.mxu1 %v1018_v44  ;;  %v916_v58 = vld [vmem:[%s2267_s3 + $0x30] sm:$0xff]  ;;  %v915_v60 = vld [vmem:[%s2267_s3 + $0x28] sm:$0xff]  ;;  %v908_v62 = vld [vmem:[#allocation2] sm:$0xf] }
 0x186   : > { %1364 = vmatprep.subr.mxu0 %v1827_v40  ;;  %1399 = vmatprep.subr.mxu1 %v1827_v40  ;;  %v1011_v59 = vld [vmem:[%s2269_s5 + $0x30] sm:$0xff]  ;;  %v1010_v61 = vld [vmem:[%s2269_s5 + $0x28] sm:$0xff]  ;;  %v914_v63 = vld [vmem:[%s2267_s3 + $0x20] sm:$0xff]  ;;  %v909_v1 = vmax.f32 %v908_v62, 0.0 }
 0x187   : > { %1365 = vmatpush3.msra.mxu0 %v922_v45  ;;  %1400 = vmatpush3.msra.mxu1 %v1017_v46  ;;  %v1009_v0 = vld [vmem:[%s2269_s5 + $0x20] sm:$0xff]  ;;  %v913_v2 = vld [vmem:[%s2267_s3 + $0x18] sm:$0xff]  ;;  %v912_v4 = vld [vmem:[%s2267_s3 + $0x10] sm:$0xff] }
 0x188   : > { %1366 = vmatprep.subr.mxu0 %v1827_v40  ;;  %1401 = vmatprep.subr.mxu1 %v1827_v40  ;;  %v1008_v3 = vld [vmem:[%s2269_s5 + $0x18] sm:$0xff]  ;;  %v1007_v5 = vld [vmem:[%s2269_s5 + $0x10] sm:$0xff]  ;;  %v1035_v6 = vrot.slane %v909_v1, %v2070_v57  ;;  %v911_v7 = vld [vmem:[%s2267_s3 + $0x8] sm:$0xff] }
 0x189   : > { %1367 = vmatpush3.msra.mxu0 %v921_v47  ;;  %1402 = vmatpush3.msra.mxu1 %v1016_v48  ;;  %v1006_v8 = vld [vmem:[%s2269_s5 + $0x8] sm:$0xff]  ;;  %v910_v57 = vld [vmem:[%s2267_s3] sm:$0xff] }
 0x18a   : > { %1368 = vmatprep.subr.mxu0 %v1827_v40  ;;  %1403 = vmatprep.subr.mxu1 %v1827_v40  ;;  %v1005_v9 = vld [vmem:[%s2269_s5] sm:$0xff]  ;;  %v1036_v10 = vcombine.high %v1035_v6, %v1035_v6  ;;  %v1315_v12 = vld [vmem:[#allocation9] ss:$0 sm:$0xff] }
 0x18b   : > { %1369 = vmatpush3.msra.mxu0 %v920_v49  ;;  %1404 = vmatpush3.msra.mxu1 %v1015_v50  ;;  %v1314_v11 = vld [vmem:[#allocation8] ss:$0 sm:$0xff] }
 0x18c   : > { %1370 = vmatprep.subr.mxu0 %v1827_v40  ;;  %1405 = vmatprep.subr.mxu1 %v1827_v40 }
 0x18d   : > { %1371 = vmatpush3.msra.mxu0 %v919_v51  ;;  %1406 = vmatpush3.msra.mxu1 %v1014_v52 }
 0x18e   : > { %1372 = vmatprep.subr.mxu0 %v1827_v40  ;;  %1407 = vmatprep.subr.mxu1 %v1827_v40 }
 0x18f   : > { %1373 = vmatpush3.msra.mxu0 %v918_v53  ;;  %1408 = vmatpush3.msra.mxu1 %v1013_v54 }
 0x190   : > { %1374 = vmatprep.subr.mxu0 %v1827_v40  ;;  %1409 = vmatprep.subr.mxu1 %v1827_v40 }
 0x191   : > { %1375 = vmatpush3.msra.mxu0 %v917_v55  ;;  %1410 = vmatpush3.msra.mxu1 %v1012_v56 }
 0x192   : > { %1376 = vmatprep.subr.mxu0 %v1827_v40  ;;  %1411 = vmatprep.subr.mxu1 %v1827_v40 }
 0x193   : > { %1377 = vmatpush3.msra.mxu0 %v916_v58  ;;  %1412 = vmatpush3.msra.mxu1 %v1011_v59 }
 0x194   : > { %1378 = vmatprep.subr.mxu0 %v1827_v40  ;;  %1413 = vmatprep.subr.mxu1 %v1827_v40 }
 0x195   : > { %1379 = vmatpush3.msra.mxu0 %v915_v60  ;;  %1414 = vmatpush3.msra.mxu1 %v1010_v61 }
 0x196   : > { %1380 = vmatprep.subr.mxu0 %v1827_v40  ;;  %1415 = vmatprep.subr.mxu1 %v1827_v40 }
 0x197   : > { %1381 = vmatpush3.msra.mxu0 %v914_v63  ;;  %1416 = vmatpush3.msra.mxu1 %v1009_v0 }
 0x198   : > { %1382 = vmatprep.subr.mxu0 %v1827_v40  ;;  %1417 = vmatprep.subr.mxu1 %v1827_v40 }
 0x199   : > { %1383 = vmatpush3.msra.mxu0 %v913_v2  ;;  %1418 = vmatpush3.msra.mxu1 %v1008_v3 }
 0x19a   : > { %1384 = vmatprep.subr.mxu0 %v1827_v40  ;;  %1419 = vmatprep.subr.mxu1 %v1827_v40 }
 0x19b   : > { %1385 = vmatpush3.msra.mxu0 %v912_v4  ;;  %1420 = vmatpush3.msra.mxu1 %v1007_v5 }
 0x19c   : > { %1386 = vmatprep.subr.mxu0 %v1827_v40  ;;  %1421 = vmatprep.subr.mxu1 %v1827_v40 }
 0x19d   : > { %1387 = vmatpush3.msra.mxu0 %v911_v7  ;;  %1422 = vmatpush3.msra.mxu1 %v1006_v8 }
 0x19e   : > { %1388 = vmatprep.subr.mxu0 %v1827_v40  ;;  %1423 = vmatprep.subr.mxu1 %v1827_v40 }
 0x19f   : > { %1389 = vmatpush3.msra.mxu0 %v910_v57  ;;  %1390 = vmatprep.mubr.msk.f32.mxu0 %vm1828_vm0, %v1827_v40 }
 0x1a0   : > { %1424 = vmatpush3.msra.mxu1 %v1005_v9  ;;  %1425 = vmatprep.mubr.msk.f32.mxu1 %vm1828_vm0, %v1827_v40 }
 0x1a1   : > { %1391 = vmatmul.mubr.f32.vlgmr.msra.gmra.mxu0 %v909_v1  ;;  %1426 = vmatmul.mubr.f32.vlgmr.msra.gmra.mxu1 %v1036_v10 }
 0x261   : > { %v999_v13 = vpop.f32.mrf.mxu0  ;;  %v1104_v14 = vpop.f32.mrf.mxu1 }
 0x262   : > { %v1000_v15 = vadd.f32 %v1314_v11, %v999_v13  ;;  %v1105_v16 = vadd.f32 %v1315_v12, %v1104_v14 }
 0x263   : > { %v1392_v17 = vpop.f32.mrf.mxu0  ;;  %v1427_v18 = vpop.f32.mrf.mxu1 }
 0x264   : > { %1004 = vst.msk [vmem:[#allocation11] sm:$0x3] %vm1003_vm1, %v1000_v15 }
 0x265   : > { %1109 = vst.msk [vmem:[#allocation12] sm:$0x3] %vm1108_vm2, %v1105_v16 }
 0x266 PF: > { %p1471_p10 = scmp.eq.s32.totalorder %s1895_s9, 7  ;;  %s1829_s24 = smov [#allocation11]  }
 0x267   : > { %s1117_s25 = sshll.u32 %s1829_s24, 4  ;;  %s1830_s10 = smov [#allocation12]   ;;  %s1118_s25 = int_to_ptr.vmem [resolvable:$true] %s1117_s25 }
 0x268   : > { %s1128_s26 = sshll.u32 %s1830_s10, 4  ;;  %s1720_s27 = scalar_lea.vmem %s1118_s25, 32  ;;  %s1129_s26 = int_to_ptr.vmem [resolvable:$true] %s1128_s26 }
 0x269   : > { %p1721_p11 = scmp.ne.s32.totalorder %s1118_s25, %s1720_s27  ;;  %p1727_p0 = scmp.lt.s32.totalorder %s1118_s25, %s1118_s25 }
 0x26a   : > { %p1728_p4 = scmp.lt.s32.totalorder %s1720_s27, %s1720_s27 }
 0x26b   : > { %p1722_p13 = pnand %p1721_p11, %p1471_p10 }
 0x26c   : > { %p1729_p1 = por %p1728_p4, %p1727_p0 }
 0x26d   : > { %p1723_p12 = pneg %p1722_p13 }
 0x26f   : > { %p1730_p6 = pnand %p1729_p1, %p1723_p12 }
 0x271   : > { %1733 = shalt.err (!%p1730_p6)
}
 0x272   : > { %1443 = dma.vmem_to_hbm [thread:$0]  (%p1471_p10), %s1118_s25, 32, %s2271_s7, [#allocation5]  }
 0x273   : > { %s1744_s21 = scalar_lea.vmem %s1129_s26, 32  ;;  %p1751_p3 = scmp.lt.s32.totalorder %s1129_s26, %s1129_s26 }
 0x274   : > { %p1745_p8 = scmp.ne.s32.totalorder %s1129_s26, %s1744_s21  ;;  %p1752_p9 = scmp.lt.s32.totalorder %s1744_s21, %s1744_s21 }
 0x276   : > { %p1746_p5 = pnand %p1745_p8, %p1471_p10  ;;  %p1753_p7 = por %p1752_p9, %p1751_p3 }
 0x278   : > { %p1747_p2 = pneg %p1746_p5 }
 0x27a   : > { %p1754_p11 = pnand %p1753_p7, %p1747_p2 }
 0x27c   : > { %1757 = shalt.err (!%p1754_p11)
}
 0x27d   : > { %1445 = dma.vmem_to_hbm [thread:$0]  (%p1471_p10), %s1129_s26, 32, %s2272_s8, [#allocation13]  }
 0x27e   : > { %1797 = dma.done.wait (%p1471_p10), [#allocation5], 32  }
 0x27f   : > { %1799 = vsyncadd (%p1471_p10), [#allocation5], 4294967264 }
 0x280   : > { %1801 = dma.done.wait (%p1471_p10), [#allocation13], 32  }
 0x281   : > { %1803 = vsyncadd (%p1471_p10), [#allocation13], 4294967264 }
 0x282 PF: > { %p23_p13 = scmp.ge.s32.totalorder %s1955_s14, 10   ;;  %s2287_s27 = smov %s1810_s28 }
 0x283   : > { %s2288_s28 = smov %s1814_s29  ;;  %s2289_s29 = smov %s1965_s17 }
 0x284   : > { %s2290_s30 = smov %s1955_s14  ;;  %25 = sbr.rel (!%p23_p13) target bundleno = 7 (0x7), region = 116 }
 0x289   :  { %1145 = vsyncpa [#allocation4], 1 }
 0x28a   :  { %1147 = vsyncpa [#allocation4 + $0x1], 1 }
 0x28b   :  { %1148 = vsyncpa [#allocation7], 1 }
 0x28c   :  { %1149 = vsyncpa [#allocation10], 1 }
 0x28d   :  { %1150 = vsyncpa [#allocation5], 1 }
 0x28e   :  { %1152 = vsyncpa [#allocation5 + $0x1], 1 }
 0x28f   :  { %1153 = vsyncpa [#allocation13], 1 }

// kernel: mstgcn_forward.2
= control target key start
LH: loop header
LB: loop body
LE: loop exit
PB: predicated region body
PF: predicated region fallthrough
CT: control target
= control target key end

     0   :  { %s17699_s0 = inlined_call_operand.vmem [shape: f32[2,8,16,8], index: 0, kind: input, shape index: {}]   ;;  %s17700_s1 = inlined_call_operand.vmem [shape: f32[2,128,8], index: 1, kind: input, shape index: {}]   ;;  %s17701_s2 = inlined_call_operand.vmem [shape: f32[16,1], index: 2, kind: input, shape index: {}]   ;;  %s17702_s3 = inlined_call_operand.hbm [shape: f32[8,16], index: 3, kind: input, shape index: {}]   ;;  %s17703_s4 = inlined_call_operand.hbm [shape: f32[1,8], index: 4, kind: input, shape index: {}]   ;;  %s17704_s5 = inlined_call_operand.hbm [shape: f32[8,8], index: 5, kind: input, shape index: {}]   ;;  %s17705_s6 = inlined_call_operand.hbm [shape: f32[8,8], index: 6, kind: input, shape index: {}]   ;;  %s17706_s7 = inlined_call_operand.vmem [shape: f32[8,1], index: 7, kind: input, shape index: {}]   ;;  %s17707_s8 = inlined_call_operand.hbm [shape: f32[8,8], index: 8, kind: input, shape index: {}]   ;;  %s17708_s9 = inlined_call_operand.hbm [shape: f32[1,8], index: 9, kind: input, shape index: {}]   ;;  %s17709_s10 = inlined_call_operand.hbm [shape: f32[16,16], index: 10, kind: input, shape index: {}]   ;;  %s17710_s11 = inlined_call_operand.hbm [shape: f32[16,16], index: 11, kind: input, shape index: {}]   ;;  %s17711_s12 = inlined_call_operand.hbm [shape: f32[1,8], index: 12, kind: input, shape index: {}]   ;;  %s17712_s13 = inlined_call_operand.hbm [shape: f32[3,8,16], index: 13, kind: input, shape index: {}]   ;;  %s17713_s14 = inlined_call_operand.hbm [shape: f32[3,8,16], index: 14, kind: input, shape index: {}]   ;;  %s17714_s15 = inlined_call_operand.hbm [shape: f32[3,16,16], index: 15, kind: input, shape index: {}]   ;;  %s17715_s16 = inlined_call_operand.hbm [shape: f32[3,16,16], index: 16, kind: input, shape index: {}]   ;;  %s17716_s17 = inlined_call_operand.hbm [shape: f32[1,16], index: 17, kind: input, shape index: {}]   ;;  %s17717_s18 = inlined_call_operand.hbm [shape: f32[1,16], index: 18, kind: input, shape index: {}]   ;;  %s17718_s19 = inlined_call_operand.hbm [shape: f32[1,16], index: 19, kind: input, shape index: {}]   ;;  %s17719_s20 = inlined_call_operand.hbm [shape: f32[3,16,16], index: 20, kind: input, shape index: {}]   ;;  %s17720_s21 = inlined_call_operand.hbm [shape: f32[1,16], index: 21, kind: input, shape index: {}]   ;;  %s17721_s22 = inlined_call_operand.hbm [shape: f32[1,16], index: 22, kind: input, shape index: {}]   ;;  %s17722_s23 = inlined_call_operand.hbm [shape: f32[1,16], index: 23, kind: input, shape index: {}]   ;;  %s17723_s24 = inlined_call_operand.vmem [shape: f32[2,128,16], index: 24, kind: output, shape index: {0}]   ;;  %s17724_s25 = inlined_call_operand.vmem [shape: f32[2,128,16], index: 25, kind: output, shape index: {1}]  }
   0x1   :  { %17757 = sst [smem:[#allocation51_spill]] %s17699_s0 }
   0x2   :  { %17758 = sst [smem:[#allocation52_spill]] %s17700_s1 }
   0x3   :  { %17759 = sst [smem:[#allocation53_spill]] %s17701_s2 }
   0x4   :  { %17760 = sst [smem:[#allocation54_spill]] %s17702_s3 }
   0x5   :  { %17761 = sst [smem:[#allocation55_spill]] %s17703_s4 }
   0x6   :  { %17762 = sst [smem:[#allocation56_spill]] %s17704_s5 }
   0x7   :  { %17763 = sst [smem:[#allocation57_spill]] %s17705_s6 }
   0x8   :  { %17764 = sst [smem:[#allocation58_spill]] %s17706_s7 }
   0x9   :  { %17765 = sst [smem:[#allocation59_spill]] %s17707_s8 }
   0xa   :  { %17766 = sst [smem:[#allocation60_spill]] %s17708_s9 }
   0xb   :  { %31 = vsyncpa [#allocation5], 0 }
   0xc   :  { %32 = vsyncpa [#allocation7], 0 }
   0xd   :  { %33 = vsyncpa [#allocation10], 0 }
   0xe   :  { %34 = vsyncpa [#allocation13], 0 }
   0xf   :  { %35 = vsyncpa [#allocation16], 0 }
  0x10   :  { %36 = vsyncpa [#allocation19], 0 }
  0x11   :  { %37 = vsyncpa [#allocation22], 0 }
  0x12   :  { %38 = vsyncpa [#allocation25], 0 }
  0x13   :  { %39 = vsyncpa [#allocation28], 0 }
  0x14   :  { %40 = vsyncpa [#allocation31], 0 }
  0x15   :  { %41 = vsyncpa [#allocation34], 0  ;;  %s14860_s29 = smov 0  }
  0x16 LB: > { %17767 = sst [smem:[#allocation46_spill]] %s14696_s29  ;;  %s14698_s2 = smov [#allocation6]   ;;  %s14696_s29 = sphi %s14860_s29, %s47_s29  }
  0x17   : > { %s645_s6 = sshll.u32 %s14698_s2, 4  ;;  %s14866_s30 = sadd.s32 4294967295, %s14696_s29   ;;  %s646_s6 = int_to_ptr.vmem [resolvable:$true] %s645_s6 }
  0x18   : > { %p12274_p0 = scmp.ge.s32.totalorder %s14696_s29, 1  ;;  %p618_p1 = scmp.lt.s32.totalorder %s14696_s29, 3 }
  0x19   : > { %p17726_p2 = scmp.eq.s32.totalorder %s14866_s30, 0  ;;  %s14699_s3 = smov [#allocation9]  }
  0x1a   : > { %p14871_p3 = pnand %p12274_p0, %p618_p1  ;;  %s667_s26 = sshll.u32 %s14699_s3, 4  ;;  %s668_s26 = int_to_ptr.vmem [resolvable:$true] %s667_s26 }
  0x1b   : > { %s14700_s1 = smov [#allocation12]   ;;  %s14701_s4 = smov [#allocation15]  }
  0x1c   : > { %s17768_s7 = scalar_select %p14871_p3, 1, 0 }
  0x1d   : > { %p13737_p4 = pneg %p14871_p3  ;;  %s692_s8 = sshll.u32 %s14700_s1, 4  ;;  %s14883_s8 = int_to_ptr.vmem [resolvable:$true] %s692_s8 }
  0x1e   : > { %s14885_s28 = sshll.u32 %s14701_s4, 4  ;;  %s14137_s5 = scalar_lea.vmem %s646_s6, 16  ;;  %s716_s28 = int_to_ptr.vmem [resolvable:$true] %s14885_s28 }
  0x1f   : > { %p14879_p5 = pnand %p17726_p2, %p13737_p4  ;;  %p14138_p7 = scmp.ne.s32.totalorder %s646_s6, %s14137_s5 }
  0x20   : > { %s14144_s0 = scalar_lea.vmem %s646_s6, 32  ;;  %p14145_p10 = scmp.lt.s32.totalorder %s646_s6, %s646_s6 }
  0x21   : > { %p14889_p6 = pneg %p14879_p5  ;;  %p14146_p11 = scmp.lt.s32.totalorder %s14144_s0, %s14137_s5 }
  0x23   : > { %p14140_p8 = pnand %p14138_p7, %p14889_p6  ;;  %p14147_p12 = por %p14146_p11, %p14145_p10 }
  0x25   : > { %p14141_p9 = pneg %p14140_p8 }
  0x27   : > { %p14148_p13 = pnand %p14147_p12, %p14141_p9 }
  0x29   : > { %14151 = shalt.err (!%p14148_p13)
}
  0x2a   : > { %s17771_s1 = sld [smem:[#allocation55_spill]]  ;;  %s14163_s4 = scalar_lea.vmem %s668_s26, 128 }
  0x2b   : > { %p14164_p0 = scmp.ne.s32.totalorder %s668_s26, %s14163_s4  ;;  %p14171_p7 = scmp.lt.s32.totalorder %s668_s26, %s668_s26 }
  0x2c   : > { %p14172_p8 = scmp.lt.s32.totalorder %s14163_s4, %s14163_s4 }
  0x2d   : > { %p14166_p1 = pnand %p14164_p0, %p14889_p6 }
  0x2e   : > { %p14173_p2 = por %p14172_p8, %p14171_p7 }
  0x2f   : > { %p14167_p4 = pneg %p14166_p1 }
  0x30   : > { %13743 = dma.hbm_to_vmem [thread:$0]  (!%p14879_p5), %s17771_s1, 16, %s646_s6, [#allocation7]  }
  0x31   : > { %p14174_p3 = pnand %p14173_p2, %p14167_p4 }
  0x33   : > { %14177 = shalt.err (!%p14174_p3)
}
  0x34   : > { %s17772_s29 = sld [smem:[#allocation57_spill]]  ;;  %s14189_s6 = scalar_lea.vmem %s14883_s8, 16 }
  0x35   : > { %p14190_p9 = scmp.ne.s32.totalorder %s14883_s8, %s14189_s6  ;;  %s14196_s2 = scalar_lea.vmem %s14883_s8, 32 }
  0x36   : > { %p14197_p2 = scmp.lt.s32.totalorder %s14883_s8, %s14883_s8  ;;  %p14198_p3 = scmp.lt.s32.totalorder %s14196_s2, %s14189_s6 }
  0x37   : > { %p14192_p10 = pnand %p14190_p9, %p14889_p6 }
  0x38   : > { %p14199_p12 = por %p14198_p3, %p14197_p2 }
  0x39   : > { %p14193_p11 = pneg %p14192_p10 }
  0x3a   : > { %13749 = dma.hbm_to_vmem [thread:$0]  (!%p14879_p5), %s17772_s29, 128, %s668_s26, [#allocation10]  }
  0x3b   : > { %p14200_p13 = pnand %p14199_p12, %p14193_p11 }
  0x3d   : > { %14203 = shalt.err (!%p14200_p13)
}
  0x3e   : > { %s17773_s4 = sld [smem:[#allocation60_spill]]  ;;  %s14215_s29 = scalar_lea.vmem %s716_s28, 256 }
  0x3f   : > { %p14216_p0 = scmp.ne.s32.totalorder %s716_s28, %s14215_s29  ;;  %p14223_p7 = scmp.lt.s32.totalorder %s716_s28, %s716_s28 }
  0x40   : > { %p14224_p8 = scmp.lt.s32.totalorder %s14215_s29, %s14215_s29 }
  0x41   : > { %p14218_p1 = pnand %p14216_p0, %p14889_p6 }
  0x42   : > { %p14225_p9 = por %p14224_p8, %p14223_p7 }
  0x43   : > { %p14219_p4 = pneg %p14218_p1 }
  0x44   : > { %13755 = dma.hbm_to_vmem [thread:$0]  (!%p14879_p5), %s17773_s4, 16, %s14883_s8, [#allocation13]  }
  0x45   : > { %p14226_p10 = pnand %p14225_p9, %p14219_p4 }
  0x47   : > { %14229 = shalt.err (!%p14226_p10)
}
  0x48   : > { %s17729_s26 = smov 128   ;;  %s17731_s5 = smov 8  }
  0x49   : > { %13761 = dma.hbm_to_vmem [thread:$0]  (!%p14879_p5), %s17710_s11, 256, %s716_s28, [#allocation16], %s17729_s26, %s17729_s26, %s17731_s5  }
  0x4a   : > { %s14704_s6 = smov [#allocation18]   ;;  %s14705_s3 = smov [#allocation21]  }
  0x4b   : > { %s739_s2 = sshll.u32 %s14704_s6, 4  ;;  %s765_s1 = sshll.u32 %s14705_s3, 4  ;;  %s740_s2 = int_to_ptr.vmem [resolvable:$true] %s739_s2  ;;  %s766_s1 = int_to_ptr.vmem [resolvable:$true] %s765_s1 }
  0x4c   : > { %s14241_s4 = scalar_lea.vmem %s740_s2, 384  ;;  %p14249_p12 = scmp.lt.s32.totalorder %s740_s2, %s740_s2 }
  0x4d   : > { %p14242_p11 = scmp.ne.s32.totalorder %s740_s2, %s14241_s4  ;;  %p14250_p13 = scmp.lt.s32.totalorder %s14241_s4, %s14241_s4 }
  0x4f   : > { %p14244_p2 = pnand %p14242_p11, %p14889_p6  ;;  %p14251_p0 = por %p14250_p13, %p14249_p12 }
  0x51   : > { %p14245_p3 = pneg %p14244_p2 }
  0x53   : > { %p14252_p1 = pnand %p14251_p0, %p14245_p3 }
  0x55   : > { %14255 = shalt.err (!%p14252_p1)
}
  0x56   : > { %13767 = dma.hbm_to_vmem [thread:$0]  (!%p14879_p5), %s17712_s13, 384, %s740_s2, [#allocation19], %s17729_s26, %s17729_s26, %s17731_s5  }
  0x57   : > { %s14267_s8 = scalar_lea.vmem %s766_s1, 768  ;;  %p14275_p9 = scmp.lt.s32.totalorder %s766_s1, %s766_s1 }
  0x58   : > { %p14268_p4 = scmp.ne.s32.totalorder %s766_s1, %s14267_s8  ;;  %p14276_p10 = scmp.lt.s32.totalorder %s14267_s8, %s14267_s8 }
  0x5a   : > { %p14270_p7 = pnand %p14268_p4, %p14889_p6  ;;  %p14277_p11 = por %p14276_p10, %p14275_p9 }
  0x5c   : > { %p14271_p8 = pneg %p14270_p7 }
  0x5e   : > { %p14278_p2 = pnand %p14277_p11, %p14271_p8 }
  0x60   : > { %14281 = shalt.err (!%p14278_p2)
}
  0x61   : > { %13773 = dma.hbm_to_vmem [thread:$0]  (!%p14879_p5), %s17714_s15, 768, %s766_s1, [#allocation22], %s17729_s26, %s17729_s26, %s17731_s5  }
  0x62   : > { %s14706_s2 = smov [#allocation24]   ;;  %s14707_s4 = smov [#allocation27]  }
  0x63   : > { %s792_s3 = sshll.u32 %s14706_s2, 4  ;;  %s814_s28 = sshll.u32 %s14707_s4, 4  ;;  %s793_s3 = int_to_ptr.vmem [resolvable:$true] %s792_s3  ;;  %s815_s28 = int_to_ptr.vmem [resolvable:$true] %s814_s28 }
  0x64   : > { %s14293_s29 = scalar_lea.vmem %s793_s3, 16  ;;  %s14300_s8 = scalar_lea.vmem %s793_s3, 32 }
  0x65   : > { %p14294_p3 = scmp.ne.s32.totalorder %s793_s3, %s14293_s29  ;;  %p14301_p0 = scmp.lt.s32.totalorder %s793_s3, %s793_s3 }
  0x66   : > { %p14302_p1 = scmp.lt.s32.totalorder %s14300_s8, %s14293_s29 }
  0x67   : > { %p14296_p12 = pnand %p14294_p3, %p14889_p6 }
  0x68   : > { %p14303_p4 = por %p14302_p1, %p14301_p0 }
  0x69   : > { %p14297_p13 = pneg %p14296_p12 }
  0x6b   : > { %p14304_p7 = pnand %p14303_p4, %p14297_p13 }
  0x6d   : > { %14307 = shalt.err (!%p14304_p7)
}
  0x6e   : > { %13779 = dma.hbm_to_vmem [thread:$0]  (!%p14879_p5), %s17716_s17, 16, %s793_s3, [#allocation25]  }
  0x6f   : > { %s14319_s6 = scalar_lea.vmem %s815_s28, 16  ;;  %s14326_s2 = scalar_lea.vmem %s815_s28, 32 }
  0x70   : > { %p14320_p8 = scmp.ne.s32.totalorder %s815_s28, %s14319_s6  ;;  %p14327_p11 = scmp.lt.s32.totalorder %s815_s28, %s815_s28 }
  0x71   : > { %p14328_p2 = scmp.lt.s32.totalorder %s14326_s2, %s14319_s6 }
  0x72   : > { %p14322_p9 = pnand %p14320_p8, %p14889_p6 }
  0x73   : > { %p14329_p3 = por %p14328_p2, %p14327_p11 }
  0x74   : > { %p14323_p10 = pneg %p14322_p9 }
  0x76   : > { %p14330_p12 = pnand %p14329_p3, %p14323_p10 }
  0x78   : > { %14333 = shalt.err (!%p14330_p12)
}
  0x79   : > { %13785 = dma.hbm_to_vmem [thread:$0]  (!%p14879_p5), %s17718_s19, 16, %s815_s28, [#allocation28]  }
  0x7a   : > { %s14708_s3 = smov [#allocation30]   ;;  %s14709_s0 = smov [#allocation4]  }
  0x7b   : > { %s838_s8 = sshll.u32 %s14708_s3, 4  ;;  %s634_s1 = sshll.u32 %s14709_s0, 4  ;;  %s839_s8 = int_to_ptr.vmem [resolvable:$true] %s838_s8  ;;  %s635_s1 = int_to_ptr.vmem [resolvable:$true] %s634_s1 }
  0x7c   : > { %s14345_s26 = scalar_lea.vmem %s839_s8, 16  ;;  %s14352_s6 = scalar_lea.vmem %s839_s8, 32 }
  0x7d   : > { %p14346_p13 = scmp.ne.s32.totalorder %s839_s8, %s14345_s26  ;;  %p14353_p4 = scmp.lt.s32.totalorder %s839_s8, %s839_s8 }
  0x7e   : > { %p14354_p7 = scmp.lt.s32.totalorder %s14352_s6, %s14345_s26 }
  0x7f   : > { %p14348_p0 = pnand %p14346_p13, %p14889_p6 }
  0x80   : > { %p14355_p8 = por %p14354_p7, %p14353_p4 }
  0x81   : > { %p14349_p1 = pneg %p14348_p0 }
  0x83   : > { %p14356_p9 = pnand %p14355_p8, %p14349_p1 }
  0x85   : > { %14359 = shalt.err (!%p14356_p9)
}
  0x86   : > { %13791 = dma.hbm_to_vmem [thread:$0]  (!%p14879_p5), %s17720_s21, 16, %s839_s8, [#allocation31]  }
  0x87   : > { %s14371_s4 = scalar_lea.vmem %s635_s1, 128  ;;  %p14379_p3 = scmp.lt.s32.totalorder %s635_s1, %s635_s1 }
  0x88   : > { %p14372_p10 = scmp.ne.s32.totalorder %s635_s1, %s14371_s4  ;;  %p14380_p12 = scmp.lt.s32.totalorder %s14371_s4, %s14371_s4 }
  0x8a   : > { %p14374_p11 = pnand %p14372_p10, %p14889_p6  ;;  %p14381_p13 = por %p14380_p12, %p14379_p3 }
  0x8c   : > { %p14375_p2 = pneg %p14374_p11 }
  0x8e   : > { %p14382_p0 = pnand %p14381_p13, %p14375_p2 }
  0x90   : > { %14385 = shalt.err (!%p14382_p0)
}
  0x91   : > { %s17774_s3 = sld [smem:[#allocation54_spill]]  ;;  %s14710_s0 = smov [#allocation8]  }
  0x92   : > { %s656_s8 = sshll.u32 %s14710_s0, 4  ;;  %s14711_s6 = smov [#allocation11]   ;;  %s657_s8 = int_to_ptr.vmem [resolvable:$true] %s656_s8 }
  0x93   : > { %s681_s2 = sshll.u32 %s14711_s6, 4  ;;  %s14397_s28 = scalar_lea.vmem %s657_s8, 128  ;;  %s682_s2 = int_to_ptr.vmem [resolvable:$true] %s681_s2 }
  0x94   : > { %p14398_p1 = scmp.ne.s32.totalorder %s657_s8, %s14397_s28  ;;  %p14405_p8 = scmp.lt.s32.totalorder %s657_s8, %s657_s8 }
  0x95   : > { %p14406_p9 = scmp.lt.s32.totalorder %s14397_s28, %s14397_s28 }
  0x96   : > { %p14400_p4 = pnand %p14398_p1, %p14889_p6 }
  0x97   : > { %13740 = dma.hbm_to_vmem [thread:$0]  (!%p14879_p5), %s17774_s3, 128, %s635_s1, [#allocation5]  }
  0x98   : > { %p14401_p7 = pneg %p14400_p4  ;;  %p14407_p10 = por %p14406_p9, %p14405_p8 }
  0x9a   : > { %p14408_p11 = pnand %p14407_p10, %p14401_p7 }
  0x9c   : > { %14411 = shalt.err (!%p14408_p11)
}
  0x9d   : > { %s17775_s1 = sld [smem:[#allocation56_spill]]  ;;  %s14423_s29 = scalar_lea.vmem %s682_s2, 128 }
  0x9e   : > { %p14424_p2 = scmp.ne.s32.totalorder %s682_s2, %s14423_s29  ;;  %p14431_p13 = scmp.lt.s32.totalorder %s682_s2, %s682_s2 }
  0x9f   : > { %p14432_p0 = scmp.lt.s32.totalorder %s14423_s29, %s14423_s29 }
  0xa0   : > { %p14426_p3 = pnand %p14424_p2, %p14889_p6 }
  0xa1   : > { %p14433_p1 = por %p14432_p0, %p14431_p13 }
  0xa2   : > { %p14427_p12 = pneg %p14426_p3 }
  0xa3   : > { %13746 = dma.hbm_to_vmem [thread:$0]  (!%p14879_p5), %s17775_s1, 128, %s657_s8, [#allocation7]  }
  0xa4   : > { %p14434_p4 = pnand %p14433_p1, %p14427_p12 }
  0xa6   : > { %14437 = shalt.err (!%p14434_p4)
}
  0xa7   : > { %s17776_s6 = sld [smem:[#allocation59_spill]]  ;;  %s14712_s28 = smov [#allocation14]  }
  0xa8   : > { %s702_s8 = sshll.u32 %s14712_s28, 4  ;;  %s14713_s4 = smov [#allocation17]   ;;  %s703_s8 = int_to_ptr.vmem [resolvable:$true] %s702_s8 }
  0xa9   : > { %s729_s26 = sshll.u32 %s14713_s4, 4  ;;  %s14449_s1 = scalar_lea.vmem %s703_s8, 256  ;;  %s730_s26 = int_to_ptr.vmem [resolvable:$true] %s729_s26 }
  0xaa   : > { %p14450_p7 = scmp.ne.s32.totalorder %s703_s8, %s14449_s1  ;;  %p14457_p10 = scmp.lt.s32.totalorder %s703_s8, %s703_s8 }
  0xab   : > { %p14458_p11 = scmp.lt.s32.totalorder %s14449_s1, %s14449_s1 }
  0xac   : > { %p14452_p8 = pnand %p14450_p7, %p14889_p6 }
  0xad   : > { %13752 = dma.hbm_to_vmem [thread:$0]  (!%p14879_p5), %s17776_s6, 128, %s682_s2, [#allocation10]  }
  0xae   : > { %p14453_p9 = pneg %p14452_p8  ;;  %p14459_p2 = por %p14458_p11, %p14457_p10 }
  0xb0   : > { %p14460_p3 = pnand %p14459_p2, %p14453_p9 }
  0xb2   : > { %14463 = shalt.err (!%p14460_p3)
}
  0xb3   : > { %s17777_s29 = smov 128   ;;  %s14475_s0 = scalar_lea.vmem %s730_s26, 16 }
  0xb4   : > { %13758 = dma.hbm_to_vmem [thread:$0]  (!%p14879_p5), %s17709_s10, 256, %s703_s8, [#allocation13], %s17777_s29, %s17777_s29, %s17731_s5  }
  0xb5   : > { %p14476_p12 = scmp.ne.s32.totalorder %s730_s26, %s14475_s0  ;;  %s14482_s6 = scalar_lea.vmem %s730_s26, 32 }
  0xb6   : > { %p14483_p1 = scmp.lt.s32.totalorder %s730_s26, %s730_s26  ;;  %p14484_p4 = scmp.lt.s32.totalorder %s14482_s6, %s14475_s0 }
  0xb7   : > { %p14478_p13 = pnand %p14476_p12, %p14889_p6 }
  0xb8   : > { %p14485_p7 = por %p14484_p4, %p14483_p1 }
  0xb9   : > { %p14479_p0 = pneg %p14478_p13 }
  0xbb   : > { %p14486_p8 = pnand %p14485_p7, %p14479_p0 }
  0xbd   : > { %14489 = shalt.err (!%p14486_p8)
}
  0xbe   : > { %13764 = dma.hbm_to_vmem [thread:$0]  (!%p14879_p5), %s17711_s12, 16, %s730_s26, [#allocation16]  }
  0xbf   : > { %s14714_s8 = smov [#allocation20]   ;;  %s14715_s2 = smov [#allocation23]  }
  0xc0   : > { %s752_s1 = sshll.u32 %s14714_s8, 4  ;;  %s778_s3 = sshll.u32 %s14715_s2, 4  ;;  %s753_s1 = int_to_ptr.vmem [resolvable:$true] %s752_s1  ;;  %s779_s3 = int_to_ptr.vmem [resolvable:$true] %s778_s3 }
  0xc1   : > { %s14501_s5 = scalar_lea.vmem %s753_s1, 384  ;;  %p14509_p2 = scmp.lt.s32.totalorder %s753_s1, %s753_s1 }
  0xc2   : > { %p14502_p9 = scmp.ne.s32.totalorder %s753_s1, %s14501_s5  ;;  %p14510_p3 = scmp.lt.s32.totalorder %s14501_s5, %s14501_s5 }
  0xc4   : > { %p14504_p10 = pnand %p14502_p9, %p14889_p6  ;;  %p14511_p12 = por %p14510_p3, %p14509_p2 }
  0xc6   : > { %p14505_p11 = pneg %p14504_p10 }
  0xc8   : > { %p14512_p13 = pnand %p14511_p12, %p14505_p11 }
  0xca   : > { %14515 = shalt.err (!%p14512_p13)
}
  0xcb   : > { %s17778_s0 = smov 8   ;;  %s14527_s28 = scalar_lea.vmem %s779_s3, 768 }
  0xcc   : > { %13770 = dma.hbm_to_vmem [thread:$0]  (!%p14879_p5), %s17713_s14, 384, %s753_s1, [#allocation19], %s17777_s29, %s17777_s29, %s17778_s0  }
  0xcd   : > { %p14528_p0 = scmp.ne.s32.totalorder %s779_s3, %s14527_s28  ;;  %p14535_p7 = scmp.lt.s32.totalorder %s779_s3, %s779_s3 }
  0xce   : > { %p14536_p8 = scmp.lt.s32.totalorder %s14527_s28, %s14527_s28 }
  0xcf   : > { %p14530_p1 = pnand %p14528_p0, %p14889_p6 }
  0xd0   : > { %p14537_p9 = por %p14536_p8, %p14535_p7 }
  0xd1   : > { %p14531_p4 = pneg %p14530_p1 }
  0xd3   : > { %p14538_p10 = pnand %p14537_p9, %p14531_p4 }
  0xd5   : > { %14541 = shalt.err (!%p14538_p10)
}
  0xd6   : > { %13776 = dma.hbm_to_vmem [thread:$0]  (!%p14879_p5), %s17715_s16, 768, %s779_s3, [#allocation22], %s17777_s29, %s17777_s29, %s17778_s0  }
  0xd7   : > { %s14716_s8 = smov [#allocation26]   ;;  %s14717_s2 = smov [#allocation29]  }
  0xd8   : > { %s803_s1 = sshll.u32 %s14716_s8, 4  ;;  %s824_s26 = sshll.u32 %s14717_s2, 4  ;;  %s804_s1 = int_to_ptr.vmem [resolvable:$true] %s803_s1  ;;  %s825_s26 = int_to_ptr.vmem [resolvable:$true] %s824_s26 }
  0xd9   : > { %s14553_s6 = scalar_lea.vmem %s804_s1, 16  ;;  %s14560_s28 = scalar_lea.vmem %s804_s1, 32 }
  0xda   : > { %p14554_p11 = scmp.ne.s32.totalorder %s804_s1, %s14553_s6  ;;  %p14561_p12 = scmp.lt.s32.totalorder %s804_s1, %s804_s1 }
  0xdb   : > { %p14562_p13 = scmp.lt.s32.totalorder %s14560_s28, %s14553_s6 }
  0xdc   : > { %p14556_p2 = pnand %p14554_p11, %p14889_p6 }
  0xdd   : > { %p14563_p0 = por %p14562_p13, %p14561_p12 }
  0xde   : > { %p14557_p3 = pneg %p14556_p2 }
  0xe0   : > { %p14564_p1 = pnand %p14563_p0, %p14557_p3 }
  0xe2   : > { %14567 = shalt.err (!%p14564_p1)
}
  0xe3   : > { %13782 = dma.hbm_to_vmem [thread:$0]  (!%p14879_p5), %s17717_s18, 16, %s804_s1, [#allocation25]  }
  0xe4   : > { %s14579_s4 = scalar_lea.vmem %s825_s26, 768  ;;  %p14587_p9 = scmp.lt.s32.totalorder %s825_s26, %s825_s26 }
  0xe5   : > { %p14580_p4 = scmp.ne.s32.totalorder %s825_s26, %s14579_s4  ;;  %p14588_p10 = scmp.lt.s32.totalorder %s14579_s4, %s14579_s4 }
  0xe7   : > { %p14582_p7 = pnand %p14580_p4, %p14889_p6  ;;  %p14589_p11 = por %p14588_p10, %p14587_p9 }
  0xe9   : > { %p14583_p8 = pneg %p14582_p7 }
  0xeb   : > { %p14590_p2 = pnand %p14589_p11, %p14583_p8 }
  0xed   : > { %14593 = shalt.err (!%p14590_p2)
}
  0xee   : > { %13788 = dma.hbm_to_vmem [thread:$0]  (!%p14879_p5), %s17719_s20, 768, %s825_s26, [#allocation28], %s17777_s29, %s17777_s29, %s17778_s0  }
  0xef   : > { %s14718_s1 = smov [#allocation32]   ;;  %s14719_s28 = smov [#allocation33]  }
  0xf0   : > { %s849_s6 = sshll.u32 %s14718_s1, 4  ;;  %s860_s5 = sshll.u32 %s14719_s28, 4  ;;  %s850_s6 = int_to_ptr.vmem [resolvable:$true] %s849_s6  ;;  %s861_s5 = int_to_ptr.vmem [resolvable:$true] %s860_s5 }
  0xf1   : > { %s14605_s3 = scalar_lea.vmem %s850_s6, 16  ;;  %s14612_s4 = scalar_lea.vmem %s850_s6, 32 }
  0xf2   : > { %p14606_p3 = scmp.ne.s32.totalorder %s850_s6, %s14605_s3  ;;  %p14613_p0 = scmp.lt.s32.totalorder %s850_s6, %s850_s6 }
  0xf3   : > { %p14614_p1 = scmp.lt.s32.totalorder %s14612_s4, %s14605_s3 }
  0xf4   : > { %p14608_p12 = pnand %p14606_p3, %p14889_p6 }
  0xf5   : > { %p14615_p4 = por %p14614_p1, %p14613_p0 }
  0xf6   : > { %p14609_p13 = pneg %p14608_p12 }
  0xf8   : > { %p14616_p7 = pnand %p14615_p4, %p14609_p13 }
  0xfa   : > { %14619 = shalt.err (!%p14616_p7)
}
  0xfb   : > { %13794 = dma.hbm_to_vmem [thread:$0]  (!%p14879_p5), %s17721_s22, 16, %s850_s6, [#allocation31]  }
  0xfc   : > { %s14631_s0 = scalar_lea.vmem %s861_s5, 16  ;;  %s14638_s26 = scalar_lea.vmem %s861_s5, 32 }
  0xfd   : > { %p14632_p8 = scmp.ne.s32.totalorder %s861_s5, %s14631_s0  ;;  %p14639_p11 = scmp.lt.s32.totalorder %s861_s5, %s861_s5 }
  0xfe   : > { %p14640_p2 = scmp.lt.s32.totalorder %s14638_s26, %s14631_s0 }
  0xff   : > { %p14634_p9 = pnand %p14632_p8, %p14889_p6 }
 0x100   : > { %p14641_p3 = por %p14640_p2, %p14639_p11 }
 0x101   : > { %p14635_p10 = pneg %p14634_p9 }
 0x103   : > { %p14642_p12 = pnand %p14641_p3, %p14635_p10 }
 0x105   : > { %14645 = shalt.err (!%p14642_p12)
}
 0x106   : > { %13797 = dma.hbm_to_vmem [thread:$0]  (!%p14879_p5), %s17722_s23, 16, %s861_s5, [#allocation34]  }
 0x107   : > { %p17779_p13 = scmp.ne.s32.totalorder %s17768_s7, 0 }
 0x109   : > { %889 = sbr.rel (%p17779_p13) target bundleno = 6516 (0x1974), region = 116 }
 0x10e   : > { %p17780_p0 = scmp.eq.s32.totalorder %s14866_s30, 0 }
 0x110   : > { %14651 = dma.done.wait (%p17780_p0), [#allocation5], 128   ;;  %p17781_p6 = pmov %p17780_p0 }
 0x111   : > { %p17782_p1 = pmov %p17780_p0 }
 0x112   : > { %14653 = vsyncadd (%p17781_p6), [#allocation5], 4294967168 }
 0x113   : > { %14655 = dma.done.wait (%p17782_p1), [#allocation7], 144   ;;  %p17783_p4 = pmov %p17780_p0 }
 0x114   : > { %p17784_p7 = pmov %p17780_p0 }
 0x115   : > { %14657 = vsyncadd (%p17783_p4), [#allocation7], 4294967152 }
 0x116   : > { %14659 = dma.done.wait (%p17784_p7), [#allocation10], 256   ;;  %p17785_p5 = pmov %p17780_p0 }
 0x117   : > { %p17786_p8 = pmov %p17780_p0 }
 0x118   : > { %14661 = vsyncadd (%p17785_p5), [#allocation10], 4294967040 }
 0x119   : > { %14663 = dma.done.wait (%p17786_p8), [#allocation13], 272   ;;  %p17787_p9 = pmov %p17780_p0 }
 0x11a   : > { %p17788_p10 = pmov %p17780_p0 }
 0x11b   : > { %14665 = vsyncadd (%p17787_p9), [#allocation13], 4294967024 }
 0x11c   : > { %14667 = dma.done.wait (%p17788_p10), [#allocation16], 272   ;;  %p17789_p11 = pmov %p17780_p0 }
 0x11d   : > { %p17790_p2 = pmov %p17780_p0 }
 0x11e   : > { %14669 = vsyncadd (%p17789_p11), [#allocation16], 4294967024 }
 0x11f   : > { %14671 = dma.done.wait (%p17790_p2), [#allocation19], 768   ;;  %p17791_p3 = pmov %p17780_p0 }
 0x120   : > { %p17792_p12 = pmov %p17780_p0 }
 0x121   : > { %14673 = vsyncadd (%p17791_p3), [#allocation19], 4294966528 }
 0x122   : > { %14675 = dma.done.wait (%p17792_p12), [#allocation22], 1536   ;;  %p17793_p13 = pmov %p17780_p0 }
 0x124   : > { %14677 = vsyncadd (%p17793_p13), [#allocation22], 4294965760 }
 0x125   : > { %14679 = dma.done.wait (%p17780_p0), [#allocation25], 32   ;;  %p17794_p6 = pmov %p17780_p0 }
 0x126   : > { %p17795_p1 = pmov %p17780_p0 }
 0x127   : > { %14681 = vsyncadd (%p17794_p6), [#allocation25], 4294967264 }
 0x128   : > { %14683 = dma.done.wait (%p17795_p1), [#allocation28], 784   ;;  %p17796_p4 = pmov %p17780_p0 }
 0x129   : > { %p17797_p7 = pmov %p17780_p0 }
 0x12a   : > { %14685 = vsyncadd (%p17796_p4), [#allocation28], 4294966512 }
 0x12b   : > { %14687 = dma.done.wait (%p17797_p7), [#allocation31], 32   ;;  %p17798_p5 = pmov %p17780_p0 }
 0x12c   : > { %p17799_p8 = pmov %p17780_p0 }
 0x12d   : > { %14689 = vsyncadd (%p17798_p5), [#allocation31], 4294967264 }
 0x12e   : > { %14691 = dma.done.wait (%p17799_p8), [#allocation34], 16   ;;  %p17800_p9 = pmov %p17780_p0 }
 0x12f   : > { %p1043_p10 = scmp.lt.s32.totalorder %s14866_s30, 1  ;;  %v17733_v0 = vmov 0   ;;  %s17801_s6 = sld [smem:[#allocation51_spill]]  ;;  %v15125_v3 = vld [vmem:[#allocation6] ss:$0 sm:$0xff]  ;;  %vm1108_vm0 = vcmask 64512  }
 0x130   : > { %14693 = vsyncadd (%p17800_p9), [#allocation34], 4294967280  ;;  %13878 = vset.pattern.permute.xlu0 %v17733_v0  ;;  %13879 = vset.pattern.permute.xlu1 %v17733_v0  ;;  %s17802_s4 = sld [smem:[#allocation53_spill]]  ;;  %v14721_v19 = vmov 0.0   ;;  %v1181_v22 = vld [vmem:[#allocation4] sm:$0xff]  ;;  %vm14722_vm1 = vmmov 0  }
 0x131   : > { %s17823_s30 = smov (!%p1043_p10, %s14866_s30), 1  ;;  %13015 = vmatprep.subr.mxu0 %v14721_v19  ;;  %13020 = vmatprep.subr.mxu1 %v14721_v19  ;;  %vm1190_vm2 = vcmask 1041409   ;;  %vm1192_vm3 = vcmask 1042434   ;;  %vm1194_vm4 = vcmask 1043459   ;;  %vm1196_vm5 = vcmask 1044484   ;;  %s17803_s26 = sld [smem:[#allocation52_spill]] }
 0x132   : > { %s15111_s7 = sshll.u32 %s17823_s30, 7  ;;  %13016 = vmatpush3.msra.mxu0 %v1181_v22  ;;  %13017 = vmatprep.mubr.msk.f32.mxu0 %vm14722_vm1, %v14721_v19  ;;  %vm1198_vm6 = vcmask 1045509   ;;  %vm1200_vm7 = vcmask 1046534   ;;  %vm1202_vm8 = vcmask 1047559   ;;  %vm1374_vm9 = vcmask 130112   ;;  %s17804_s9 = sld [smem:[#allocation58_spill]] }
 0x133   : > { %13022 = vmatprep.mubr.msk.f32.mxu1 %vm14722_vm1, %v14721_v19  ;;  %vm1446_vm10 = vcmask 130048   ;;  %s17430_s1 = scalar_lea.vmem %s17723_s24, %s15111_s7 }
 0x135   : > { %s15117_s28 = scalar_lea.vmem %s17801_s6, %s15111_s7 }
 0x136   : > { %v1079_v1 = vld [vmem:[%s17802_s4] sm:$0xff]  ;;  %v15128_v4 = vld [vmem:[%s15117_s28 + $0x8] sm:$0xff]  ;;  %v15138_v8 = vld [vmem:[%s15117_s28 + $0x18] sm:$0xff] }
 0x137   : > { %v15123_v2 = vld [vmem:[%s15117_s28] sm:$0xff]  ;;  %1084 = vperm.xlu0 %13878, %v1079_v1   ;;  %v1080_v5 = vld [vmem:[%s17802_s4 + $0x8] sm:$0xff]  ;;  %v1283_v7 = vmul.f32 %v15125_v3, %v15128_v4  ;;  %v1285_v11 = vmul.f32 %v15125_v3, %v15138_v8  ;;  %v1069_v18 = vld [vmem:[%s15117_s28 + $0x30] sm:$0xff]  ;;  %s15259_s2 = scalar_lea.vmem %s17803_s26, %s15111_s7 }
 0x138   : > { %v1282_v6 = vmul.f32 %v15125_v3, %v15123_v2  ;;  %v15145_v12 = vld [vmem:[%s15117_s28 + $0x20] sm:$0xff]  ;;  %v15151_v15 = vld [vmem:[%s15117_s28 + $0x28] sm:$0xff]  ;;  %v1288_v21 = vmul.f32 %v15125_v3, %v1069_v18  ;;  %v15166_v23 = vld [vmem:[%s15117_s28 + $0x38] sm:$0xff] }
 0x139   : > { %v1301_v10 = vsel %vm1108_vm0, %v1283_v7, 0.0  ;;  %v1307_v13 = vsel %vm1108_vm0, %v1285_v11, 0.0  ;;  %v1286_v14 = vmul.f32 %v15125_v3, %v15145_v12  ;;  %v1287_v17 = vmul.f32 %v15125_v3, %v15151_v15  ;;  %v1071_v26 = vld [vmem:[%s15117_s28 + $0x40] sm:$0xff]  ;;  %v1065_v29 = vld [vmem:[%s15117_s28 + $0x10] sm:$0xff]  ;;  %v1072_v31 = vld [vmem:[%s15117_s28 + $0x48] sm:$0xff] }
 0x13a   : > { %v1298_v9 = vsel %vm1108_vm0, %v1282_v6, 0.0  ;;  %v1316_v24 = vsel %vm1108_vm0, %v1288_v21, 0.0  ;;  %v1289_v25 = vmul.f32 %v15125_v3, %v15166_v23  ;;  %v1290_v28 = vmul.f32 %v15125_v3, %v1071_v26  ;;  %v1074_v34 = vld [vmem:[%s15117_s28 + $0x58] sm:$0xff]  ;;  %v1073_v36 = vld [vmem:[%s15117_s28 + $0x50] sm:$0xff]  ;;  %v1076_v40 = vld [vmem:[%s15117_s28 + $0x68] sm:$0xff] }
 0x13b   : > { %1089 = vperm.xlu0 %13878, %v1080_v5   ;;  %1299 = vadd.xlane.f32.xlu1 %v1298_v9  ;;  %v1310_v16 = vsel %vm1108_vm0, %v1286_v14, 0.0  ;;  %v1313_v20 = vsel %vm1108_vm0, %v1287_v17, 0.0  ;;  %v1284_v30 = vmul.f32 %v15125_v3, %v1065_v29  ;;  %v1291_v33 = vmul.f32 %v15125_v3, %v1072_v31  ;;  %v1075_v41 = vld [vmem:[%s15117_s28 + $0x60] sm:$0xff]  ;;  %v1078_v46 = vld [vmem:[%s15117_s28 + $0x78] sm:$0xff]  ;;  %v1077_v47 = vld [vmem:[%s15117_s28 + $0x70] sm:$0xff] }
 0x13c   : > { %v1319_v27 = vsel %vm1108_vm0, %v1289_v25, 0.0  ;;  %v1322_v32 = vsel %vm1108_vm0, %v1290_v28, 0.0  ;;  %v1293_v37 = vmul.f32 %v15125_v3, %v1074_v34  ;;  %v1292_v39 = vmul.f32 %v15125_v3, %v1073_v36 }
 0x13d   : > { %v1304_v35 = vsel %vm1108_vm0, %v1284_v30, 0.0  ;;  %v1325_v38 = vsel %vm1108_vm0, %v1291_v33, 0.0  ;;  %v1295_v43 = vmul.f32 %v15125_v3, %v1076_v40  ;;  %v1294_v45 = vmul.f32 %v15125_v3, %v1075_v41 }
 0x13e   : > { %v1331_v42 = vsel %vm1108_vm0, %v1293_v37, 0.0  ;;  %v1328_v44 = vsel %vm1108_vm0, %v1292_v39, 0.0  ;;  %v1297_v49 = vmul.f32 %v15125_v3, %v1078_v46  ;;  %v1296_v51 = vmul.f32 %v15125_v3, %v1077_v47 }
 0x13f   : > { %1302 = vadd.xlane.f32.xlu1 %v1301_v10  ;;  %v1337_v48 = vsel %vm1108_vm0, %v1295_v43, 0.0  ;;  %v1334_v50 = vsel %vm1108_vm0, %v1294_v45, 0.0 }
 0x140   : > { %v1343_v52 = vsel %vm1108_vm0, %v1297_v49, 0.0  ;;  %v1340_v53 = vsel %vm1108_vm0, %v1296_v51, 0.0 }
 0x143   : > { %1308 = vadd.xlane.f32.xlu1 %v1307_v13 }
 0x147   : > { %1311 = vadd.xlane.f32.xlu1 %v1310_v16 }
 0x14b   : > { %1314 = vadd.xlane.f32.xlu1 %v1313_v20 }
 0x14f   : > { %1317 = vadd.xlane.f32.xlu1 %v1316_v24 }
 0x153   : > { %1320 = vadd.xlane.f32.xlu1 %v1319_v27 }
 0x157   : > { %1323 = vadd.xlane.f32.xlu1 %v1322_v32 }
 0x15a   : > { %1305 = vadd.xlane.f32.xlu0 %v1304_v35 }
 0x15b   : > { %1326 = vadd.xlane.f32.xlu1 %v1325_v38 }
 0x15e   : > { %1332 = vadd.xlane.f32.xlu0 %v1331_v42 }
 0x15f   : > { %1329 = vadd.xlane.f32.xlu1 %v1328_v44 }
 0x162   : > { %1338 = vadd.xlane.f32.xlu0 %v1337_v48 }
 0x163   : > { %1335 = vadd.xlane.f32.xlu1 %v1334_v50 }
 0x166   : > { %1344 = vadd.xlane.f32.xlu0 %v1343_v52 }
 0x167   : > { %1341 = vadd.xlane.f32.xlu1 %v1340_v53 }
 0x1b2   : > { %v1085_v54 = vpop.permute.xlu0 %1084 }
 0x1b3   : > { %v1092_v55 = vmul.f32 %v1085_v54, %v15123_v2  ;;  %v1096_v56 = vmul.f32 %v1085_v54, %v15145_v12  ;;  %v1098_v57 = vmul.f32 %v1085_v54, %v1069_v18  ;;  %v1100_v58 = vmul.f32 %v1085_v54, %v1071_v26 }
 0x1b4   : > { %v1094_v59 = vmul.f32 %v1085_v54, %v1065_v29  ;;  %v1102_v60 = vmul.f32 %v1085_v54, %v1073_v36  ;;  %v1104_v61 = vmul.f32 %v1085_v54, %v1075_v41  ;;  %v1106_v62 = vmul.f32 %v1085_v54, %v1077_v47 }
 0x1b5   : > { %v1109_v63 = vsel %vm1108_vm0, %v1092_v55, 0.0  ;;  %v1127_v1 = vsel %vm1108_vm0, %v1096_v56, 0.0  ;;  %v1136_v3 = vsel %vm1108_vm0, %v1098_v57, 0.0  ;;  %v1145_v5 = vsel %vm1108_vm0, %v1100_v58, 0.0 }
 0x1b6   : > { %v1090_v6 = vpop.permute.xlu0 %1089  ;;  %v1118_v7 = vsel %vm1108_vm0, %v1094_v59, 0.0  ;;  %v1154_v9 = vsel %vm1108_vm0, %v1102_v60, 0.0  ;;  %v1163_v10 = vsel %vm1108_vm0, %v1104_v61, 0.0  ;;  %v1172_v11 = vsel %vm1108_vm0, %v1106_v62, 0.0 }
 0x1b7   : > { %v1093_v12 = vmul.f32 %v1090_v6, %v15128_v4  ;;  %v1103_v13 = vmul.f32 %v1090_v6, %v1074_v34  ;;  %v1097_v14 = vmul.f32 %v1090_v6, %v15151_v15  ;;  %v1099_v16 = vmul.f32 %v1090_v6, %v15166_v23 }
 0x1b8   : > { %v1095_v17 = vmul.f32 %v1090_v6, %v15138_v8  ;;  %v1101_v18 = vmul.f32 %v1090_v6, %v1072_v31  ;;  %v1105_v20 = vmul.f32 %v1090_v6, %v1076_v40  ;;  %v1107_v21 = vmul.f32 %v1090_v6, %v1078_v46 }
 0x1b9   : > { %v1110_v22 = vsel %vm1108_vm0, %v1093_v12, 0.0  ;;  %v1128_v24 = vsel %vm1108_vm0, %v1097_v14, 0.0  ;;  %v1137_v25 = vsel %vm1108_vm0, %v1099_v16, 0.0  ;;  %v1155_v26 = vsel %vm1108_vm0, %v1103_v13, 0.0 }
 0x1ba   : > { %v1111_v27 = vadd.f32 %v1110_v22, %v1109_v63  ;;  %v1129_v28 = vadd.f32 %v1128_v24, %v1127_v1  ;;  %v1138_v29 = vadd.f32 %v1137_v25, %v1136_v3  ;;  %v1119_v15 = vsel %vm1108_vm0, %v1095_v17, 0.0 }
 0x1bb   : > { %v1120_v30 = vadd.f32 %v1119_v15, %v1118_v7  ;;  %v1146_v23 = vsel %vm1108_vm0, %v1101_v18, 0.0  ;;  %v1156_v8 = vadd.f32 %v1155_v26, %v1154_v9  ;;  %v1164_v31 = vsel %vm1108_vm0, %v1105_v20, 0.0 }
 0x1bc   : > { %v1112_v32 = vrot.slane %v1111_v27, 4  ;;  %v1130_v33 = vrot.slane %v1129_v28, 4  ;;  %v1139_v34 = vrot.slane %v1138_v29, 4  ;;  %v1147_v35 = vadd.f32 %v1146_v23, %v1145_v5 }
 0x1bd   : > { %v1121_v36 = vrot.slane %v1120_v30, 4  ;;  %v1157_v37 = vrot.slane %v1156_v8, 4  ;;  %v1165_v38 = vadd.f32 %v1164_v31, %v1163_v10  ;;  %v1173_v39 = vsel %vm1108_vm0, %v1107_v21, 0.0 }
 0x1be   : > { %v1113_v40 = vadd.f32 %v1112_v32, %v1111_v27  ;;  %v1131_v41 = vadd.f32 %v1130_v33, %v1129_v28  ;;  %v1140_v42 = vadd.f32 %v1139_v34, %v1138_v29  ;;  %v1148_v43 = vrot.slane %v1147_v35, 4 }
 0x1bf   : > { %v1122_v44 = vadd.f32 %v1121_v36, %v1120_v30  ;;  %v1158_v45 = vadd.f32 %v1157_v37, %v1156_v8  ;;  %v1166_v46 = vrot.slane %v1165_v38, 4  ;;  %v1174_v47 = vadd.f32 %v1173_v39, %v1172_v11 }
 0x1c0   : > { %v1132_v48 = vrot.slane %v1131_v41, 2  ;;  %v1141_v49 = vrot.slane %v1140_v42, 2  ;;  %v1149_v50 = vadd.f32 %v1148_v43, %v1147_v35  ;;  %v1114_v51 = vrot.slane %v1113_v40, 2 }
 0x1c1   : > { %v1123_v52 = vrot.slane %v1122_v44, 2  ;;  %v1159_v53 = vrot.slane %v1158_v45, 2  ;;  %v1167_v54 = vadd.f32 %v1166_v46, %v1165_v38  ;;  %v1175_v55 = vrot.slane %v1174_v47, 4 }
 0x1c2   : > { %v1133_v56 = vadd.f32 %v1132_v48, %v1131_v41  ;;  %v1142_v57 = vadd.f32 %v1141_v49, %v1140_v42  ;;  %v1150_v58 = vrot.slane %v1149_v50, 2  ;;  %v1115_v59 = vadd.f32 %v1114_v51, %v1113_v40 }
 0x1c3   : > { %v1124_v60 = vadd.f32 %v1123_v52, %v1122_v44  ;;  %v1160_v61 = vadd.f32 %v1159_v53, %v1158_v45  ;;  %v1168_v62 = vrot.slane %v1167_v54, 2  ;;  %v1176_v63 = vadd.f32 %v1175_v55, %v1174_v47 }
 0x1c4   : > { %v1134_v1 = vrot.slane %v1133_v56, 1  ;;  %v1151_v3 = vadd.f32 %v1150_v58, %v1149_v50  ;;  %v1116_v5 = vrot.slane %v1115_v59, 1  ;;  %v1300_v6 = vpop.xlane.xlu1 %1299  ;;  %v1143_v7 = vrot.slane %v1142_v57, 1 }
 0x1c5   : > { %v1125_v9 = vrot.slane %v1124_v60, 1  ;;  %v1169_v10 = vadd.f32 %v1168_v62, %v1167_v54  ;;  %v1177_v11 = vrot.slane %v1176_v63, 2  ;;  %v1161_v17 = vrot.slane %v1160_v61, 1 }
 0x1c6   : > { %v1135_v12 = vadd.f32 %v1134_v1, %v1133_v56  ;;  %v1152_v13 = vrot.slane %v1151_v3, 1  ;;  %v1117_v14 = vadd.f32 %v1116_v5, %v1115_v59  ;;  %v1144_v22 = vadd.f32 %v1143_v7, %v1142_v57 }
 0x1c7   : > { %v1126_v16 = vadd.f32 %v1125_v9, %v1124_v60  ;;  %v1178_v18 = vadd.f32 %v1177_v11, %v1176_v63  ;;  %v1170_v20 = vrot.slane %v1169_v10, 1  ;;  %v1162_v28 = vadd.f32 %v1161_v17, %v1160_v61 }
 0x1c8   : > { %v1303_v21 = vpop.xlane.xlu1 %1302  ;;  %v1153_v26 = vadd.f32 %v1152_v13, %v1151_v3  ;;  %v1363_v34 = vlaneseq }
 0x1c9   : > { %v1179_v24 = vrot.slane %v1178_v18, 1  ;;  %v1191_v25 = vsel %vm1190_vm2, %v1126_v16, %v1117_v14  ;;  %v1171_v15 = vadd.f32 %v1170_v20, %v1169_v10 }
 0x1ca   : > { %v1193_v27 = vsel %vm1192_vm3, %v1135_v12, %v1191_v25  ;;  %v15229_v36 = vand.u32 127, %v1363_v34  ;;  %v1366_v38 = vshrl.u32 %v1363_v34, 7 }
 0x1cb   : > { %v1195_v29 = vsel %vm1194_vm4, %v1144_v22, %v1193_v27  ;;  %v1180_v8 = vadd.f32 %v1179_v24, %v1178_v18 }
 0x1cc   : > { %v1197_v30 = vsel %vm1196_vm5, %v1153_v26, %v1195_v29  ;;  %v1309_v23 = vpop.xlane.xlu1 %1308  ;;  %v1369_v39 = vadd.s32 4294967288, %v15229_v36  ;;  %v1367_v41 = vsub.s32 %v15229_v36, %v1366_v38  ;;  %v1528_v29 = vld [vmem:[#allocation9] sm:$0xff]  ;;  %vm1878_vm11 = vcmp.eq.s32.totalorder %v15229_v36, 1 }
 0x1cd   : > { %v1199_v31 = vsel %vm1198_vm6, %v1162_v28, %v1197_v30  ;;  %vm1857_vm12 = vcmp.eq.s32.totalorder %v15229_v36, 0  ;;  %vm1899_vm13 = vcmp.eq.s32.totalorder %v15229_v36, 2  ;;  %vm1920_vm14 = vcmp.eq.s32.totalorder %v15229_v36, 3 }
 0x1ce   : > { %v1201_v32 = vsel %vm1200_vm7, %v1171_v15, %v1199_v31  ;;  %v1372_v42 = vsub.s32 %v1369_v39, %v1366_v38  ;;  %v1368_v44 = vrot.slane %v1300_v6, %v1367_v41  ;;  %v1346_v15 = vld [vmem:[#allocation8] sm:$0xff]  ;;  %vm1941_vm15 = vcmp.eq.s32.totalorder %v15229_v36, 4 }
 0x1cf   : > { %v1203_v33 = vsel %vm1202_vm8, %v1180_v8, %v1201_v32 }
 0x1d0   : > { %13018 = vmatmul.mubr.msk.f32.vlgmr.msra.gmra.mxu0 %vm1108_vm0, %v1203_v33  ;;  %v1312_v35 = vpop.xlane.xlu1 %1311  ;;  %v1373_v45 = vrot.slane %v1303_v21, %v1372_v42  ;;  %v1383_v49 = vrot.slane %v1309_v23, %v1372_v42 }
 0x1d1   : > { %v1388_v47 = vrot.slane %v1312_v35, %v1367_v41  ;;  %v1833_v35 = vld [vmem:[%s17804_s9] sm:$0xff] }
 0x1d2   : > { %v1375_v53 = vsel %vm1374_vm9, %v1373_v45, %v1368_v44  ;;  %13641 = vpush %v1833_v35  ;;  %v1883_v38 = vrot.slane %v1833_v35, 2  ;;  %v1904_v39 = vrot.slane %v1833_v35, 3 }
 0x1d4   : > { %v1315_v37 = vpop.xlane.xlu1 %1314 }
 0x1d5   : > { %v1392_v48 = vrot.slane %v1315_v37, %v1372_v42  ;;  %v1862_v37 = vrot.slane %v1833_v35, 1 }
 0x1d7   : > { %v1393_v57 = vsel %vm1374_vm9, %v1392_v48, %v1388_v47  ;;  %13643 = vpush %v1862_v37 }
 0x1d8   : > { %v1318_v40 = vpop.xlane.xlu1 %1317  ;;  %13645 = vpush %v1883_v38 }
 0x1d9   : > { %v1397_v50 = vrot.slane %v1318_v40, %v1367_v41  ;;  %v1925_v40 = vrot.slane %v1833_v35, 4  ;;  %13647 = vpush %v1904_v39 }
 0x1db   : > { %13649 = vpush %v1925_v40 }
 0x1dc   : > { %v1321_v43 = vpop.xlane.xlu1 %1320 }
 0x1dd   : > { %v1401_v51 = vrot.slane %v1321_v43, %v1372_v42  ;;  %v1988_v43 = vrot.slane %v1833_v35, 7 }
 0x1df   : > { %v1402_v59 = vsel %vm1374_vm9, %v1401_v51, %v1397_v50 }
 0x1e0   : > { %v1324_v46 = vpop.xlane.xlu1 %1323 }
 0x1e1   : > { %v1406_v54 = vrot.slane %v1324_v46, %v1367_v41 }
 0x1e3   : > { %v1306_v52 = vpop.xlane.xlu0 %1305 }
 0x1e4   : > { %v1379_v55 = vrot.slane %v1306_v52, %v1367_v41  ;;  %v1327_v56 = vpop.xlane.xlu1 %1326 }
 0x1e5   : > { %v1410_v58 = vrot.slane %v1327_v56, %v1372_v42 }
 0x1e6   : > { %v1384_v60 = vsel %vm1374_vm9, %v1383_v49, %v1379_v55 }
 0x1e7   : > { %v1439_v61 = vsel %vm1190_vm2, %v1384_v60, %v1375_v53  ;;  %v1333_v62 = vpop.xlane.xlu0 %1332  ;;  %v1411_v1 = vsel %vm1374_vm9, %v1410_v58, %v1406_v54  ;;  %vm1983_vm2 = vcmp.eq.s32.totalorder %v15229_v36, 6 }
 0x1e8   : > { %v1440_v63 = vsel %vm1192_vm3, %v1393_v57, %v1439_v61  ;;  %v1419_v3 = vrot.slane %v1333_v62, %v1372_v42  ;;  %v1330_v5 = vpop.xlane.xlu1 %1329  ;;  %vm2004_vm3 = vcmp.eq.s32.totalorder %v15229_v36, 7 }
 0x1e9   : > { %v1441_v6 = vsel %vm1194_vm4, %v1402_v59, %v1440_v63  ;;  %v1415_v7 = vrot.slane %v1330_v5, %v1367_v41  ;;  %v1626_v5 = vld [vmem:[%s15259_s2 + $0x10] sm:$0xff] }
 0x1ea   : > { %v1442_v9 = vsel %vm1196_vm5, %v1411_v1, %v1441_v6  ;;  %v1627_v6 = vld [vmem:[%s15259_s2 + $0x18] sm:$0xff] }
 0x1eb   : > { %v1420_v10 = vsel %vm1374_vm9, %v1419_v3, %v1415_v7  ;;  %v1339_v11 = vpop.xlane.xlu0 %1338  ;;  %v1625_v3 = vld [vmem:[%s15259_s2 + $0x8] sm:$0xff]  ;;  %v1628_v7 = vld [vmem:[%s15259_s2 + $0x20] sm:$0xff] }
 0x1ec   : > { %v1428_v12 = vrot.slane %v1339_v11, %v1372_v42  ;;  %v1336_v13 = vpop.xlane.xlu1 %1335  ;;  %v1443_v16 = vsel %vm1198_vm6, %v1420_v10, %v1442_v9  ;;  %v1629_v9 = vld [vmem:[%s15259_s2 + $0x28] sm:$0xff]  ;;  %v1630_v10 = vld [vmem:[%s15259_s2 + $0x30] sm:$0xff]  ;;  %v1631_v11 = vld [vmem:[%s15259_s2 + $0x38] sm:$0xff] }
 0x1ed   : > { %v1424_v14 = vrot.slane %v1336_v13, %v1367_v41  ;;  %v1633_v13 = vld [vmem:[%s15259_s2 + $0x48] sm:$0xff] }
 0x1ef   : > { %v1345_v17 = vpop.xlane.xlu0 %1344  ;;  %v1429_v18 = vsel %vm1374_vm9, %v1428_v12, %v1424_v14  ;;  %v1632_v12 = vld [vmem:[%s15259_s2 + $0x40] sm:$0xff]  ;;  %v1634_v14 = vld [vmem:[%s15259_s2 + $0x50] sm:$0xff] }
 0x1f0   : > { %v1437_v20 = vrot.slane %v1345_v17, %v1372_v42  ;;  %v1342_v21 = vpop.xlane.xlu1 %1341  ;;  %v1444_v24 = vsel %vm1200_vm7, %v1429_v18, %v1443_v16  ;;  %v1967_v42 = vrot.slane %v1833_v35, 6  ;;  %v1635_v16 = vld [vmem:[%s15259_s2 + $0x58] sm:$0xff]  ;;  %v1636_v17 = vld [vmem:[%s15259_s2 + $0x60] sm:$0xff]  ;;  %v1637_v18 = vld [vmem:[%s15259_s2 + $0x68] sm:$0xff] }
 0x1f1   : > { %v1433_v22 = vrot.slane %v1342_v21, %v1367_v41  ;;  %v1946_v41 = vrot.slane %v1833_v35, 5  ;;  %v1639_v21 = vld [vmem:[%s15259_s2 + $0x78] sm:$0xff] }
 0x1f3   : > { %v1438_v25 = vsel %vm1374_vm9, %v1437_v20, %v1433_v22  ;;  %13651 = vpush %v1946_v41  ;;  %v1638_v20 = vld [vmem:[%s15259_s2 + $0x70] sm:$0xff]  ;;  %v2009_v22 = vld [vmem:[#allocation11] sm:$0xff] }
 0x1f4   : > { %v1445_v26 = vsel %vm1202_vm8, %v1438_v25, %v1444_v24  ;;  %13653 = vpush %v1967_v42  ;;  %13056 = vmatprep.subr.mxu0 %v2009_v22  ;;  %v15298_v24 = vld [vmem:[#allocation12] ss:$0 sm:$0xff] }
 0x1f5   : > { %13021 = vmatpush3.xpose.msk.msra.mxu1 %vm1446_vm10, %v1445_v26  ;;  %13655 = vpush %v1988_v43  ;;  %13057 = vmatpush3.msra.mxu0 %v2009_v22 }
 0x1f6   : > { %13025 = vmatprep.subr.mxu1 %v14721_v19 }
 0x203   : > { %s15309_s6 = spop %13641 }
 0x208   : > { %s13644_s5 = spop %13643 }
 0x209   : > { %s13646_s3 = spop %13645  ;;  %v1864_v43 = vstv %s13644_s5 }
 0x20a   : > { %s15315_s30 = spop %13647 }
 0x20c   : > { %s15320_s8 = spop %13649 }
 0x224   : > { %s15325_s29 = spop %13651 }
 0x225   : > { %s13654_s0 = spop %13653 }
 0x226   : > { %s15335_s26 = spop %13655 }
 0x290   : > { %v1272_v27 = vpop.f32.mrf.mxu0 }
 0x291   : > { %13023 = vmatmul.mubr.msk.f32.vlgmr.msra.gmra.mxu1 %vm1446_vm10, %v1272_v27 }
 0x292   : > { %v13019_v28 = vpop.f32.mrf.mxu0  ;;  %13027 = vmatprep.mubr.msk.f32.mxu1 %vm14722_vm1, %v14721_v19  ;;  %13026 = vmatpush3.xpose.msk.msra.mxu1 %vm1108_vm0, %v1528_v29  ;;  %v1624_v19 = vld [vmem:[%s15259_s2] sm:$0xff]  ;;  %vm1962_vm1 = vcmp.eq.s32.totalorder %v15229_v36, 5 }
 0x351   : > { %v1518_v30 = vpop.f32.mrf.mxu1 }
 0x352   : > { %v1519_v23 = vadd.f32 %v1518_v30, %v1346_v15 }
 0x353   : > { %v13024_v8 = vpop.f32.mrf.mxu1 }
 0x354   : > { %v12329_v31 = vmul.f32 -1.442695, %v1519_v23 }
 0x356   : > { %13965 = vpow2.f32 %v12329_v31 }
 0x363   : > { %v13966_v32 = vpop.eup %13965 }
 0x364   : > { %v1525_v33 = vadd.f32 1.0, %v13966_v32 }
 0x366   : > { %13967 = vrcp.f32 %v1525_v33 }
 0x373   : > { %v13968_v34 = vpop.eup %13967 }
 0x374   : > { %13028 = vmatmul.mubr.msk.f32.vlgmr.msra.gmra.mxu1 %vm1108_vm0, %v13968_v34 }
 0x375   : > { %13032 = vmatprep.mubr.msk.f32.mxu1 %vm1108_vm0, %v1624_v19 }
 0x434   : > { %v1601_v44 = vpop.f32.mrf.mxu1 }
 0x435   : > { %v1605_v45 = vsel %vm1108_vm0, %v1601_v44, -inf }
 0x436   : > { %v1606_v46 = vrot.slane %v1605_v45, 4  ;;  %v13029_v47 = vpop.f32.mrf.mxu1 }
 0x438   : > { %v1607_v48 = vmax.f32 %v1605_v45, %v1606_v46  ;;  %v1837_v46 = vstv %s15309_s6  ;;  %s17617_s6 = scalar_lea.vmem %s17724_s25, %s15111_s7 }
 0x43a   : > { %v1608_v49 = vrot.slane %v1607_v48, 2 }
 0x43c   : > { %v1609_v50 = vmax.f32 %v1607_v48, %v1608_v49  ;;  %v1885_v49 = vstv %s13646_s3 }
 0x43e   : > { %v1610_v51 = vrot.slane %v1609_v50, 1 }
 0x440   : > { %v1611_v52 = vmax.f32 %v1609_v50, %v1610_v51 }
 0x442   : > { %v1612_v53 = vsub.f32 %v1601_v44, %v1611_v52 }
 0x444   : > { %v1613_v54 = vmul.f32 1.442695, %v1612_v53  ;;  %v1906_v53 = vstv %s15315_s30 }
 0x446   : > { %13969 = vpow2.f32 %v1613_v54 }
 0x453   : > { %v13970_v55 = vpop.eup %13969 }
 0x454   : > { %v1615_v56 = vsel %vm1108_vm0, %v13970_v55, 0.0 }
 0x455   : > { %v1616_v57 = vrot.slane %v1615_v56, 4 }
 0x457   : > { %v1617_v58 = vadd.f32 %v1616_v57, %v1615_v56 }
 0x459   : > { %v1618_v59 = vrot.slane %v1617_v58, 2 }
 0x45b   : > { %v1619_v60 = vadd.f32 %v1618_v59, %v1617_v58 }
 0x45d   : > { %v1620_v61 = vrot.slane %v1619_v60, 1 }
 0x45f   : > { %v1621_v62 = vadd.f32 %v1620_v61, %v1619_v60  ;;  %v1927_v61 = vstv %s15320_s8 }
 0x461   : > { %13971 = vrcp.f32 %v1621_v62 }
 0x46e   : > { %v13972_v63 = vpop.eup %13971 }
 0x46f   : > { %v1623_v1 = vmul.f32 %v13972_v63, %v13970_v55 }
 0x471   : > { %13030 = vmatprep.subr.mxu1 %v1623_v1 }
 0x472   : > { %13031 = vmatpush3.msra.mxu1 %v1623_v1 }
 0x473   : > { %13033 = vmatmul.mubr.msk.f32.vlgmr.msra.gmra.mxu1 %vm1108_vm0, %v1625_v3 }
 0x474   : > { %13035 = vmatprep.mubr.msk.f32.mxu1 %vm1108_vm0, %v1626_v5 }
 0x477   : > { %13036 = vmatmul.mubr.msk.f32.gmra.mxu1 %vm1108_vm0, %v1627_v6 }
 0x478   : > { %13038 = vmatprep.mubr.msk.f32.mxu1 %vm1108_vm0, %v1628_v7 }
 0x47b   : > { %13039 = vmatmul.mubr.msk.f32.gmra.mxu1 %vm1108_vm0, %v1629_v9  ;;  %v1948_v9 = vstv %s15325_s29 }
 0x47c   : > { %13041 = vmatprep.mubr.msk.f32.mxu1 %vm1108_vm0, %v1630_v10 }
 0x47f   : > { %13042 = vmatmul.mubr.msk.f32.gmra.mxu1 %vm1108_vm0, %v1631_v11 }
 0x480   : > { %13044 = vmatprep.mubr.msk.f32.mxu1 %vm1108_vm0, %v1632_v12 }
 0x483   : > { %13045 = vmatmul.mubr.msk.f32.gmra.mxu1 %vm1108_vm0, %v1633_v13 }
 0x484   : > { %13047 = vmatprep.mubr.msk.f32.mxu1 %vm1108_vm0, %v1634_v14 }
 0x487   : > { %13048 = vmatmul.mubr.msk.f32.gmra.mxu1 %vm1108_vm0, %v1635_v16 }
 0x488   : > { %13050 = vmatprep.mubr.msk.f32.mxu1 %vm1108_vm0, %v1636_v17 }
 0x48b   : > { %13051 = vmatmul.mubr.msk.f32.gmra.mxu1 %vm1108_vm0, %v1637_v18  ;;  %v1969_v18 = vstv %s13654_s0 }
 0x48c   : > { %13053 = vmatprep.mubr.msk.f32.mxu1 %vm1108_vm0, %v1638_v20 }
 0x48f   : > { %13054 = vmatmul.mubr.msk.f32.gmra.mxu1 %vm1108_vm0, %v1639_v21 }
 0x533   : > { %v13034_v25 = vpop.f32.mrf.mxu1 }
 0x534   : > { %v1850_v26 = vmul.f32 %v13034_v25, %v15298_v24  ;;  %v1840_v59 = vmul.f32 %v13034_v25, %v1837_v46 }
 0x535   : > { %v1754_v27 = vpop.f32.mrf.mxu1 }
 0x536   : > { %v1854_v28 = vsel %vm1108_vm0, %v1850_v26, 0.0  ;;  %v1849_v29 = vmul.f32 %v15298_v24, %v1754_v27  ;;  %v1839_v55 = vmul.f32 %v1837_v46, %v1754_v27 }
 0x537   : > { %1855 = vadd.xlane.f32.xlu0 %v1854_v28  ;;  %v13037_v15 = vpop.f32.mrf.mxu1 }
 0x538   : > { %v1871_v30 = vmul.f32 %v13037_v15, %v15298_v24  ;;  %v1851_v23 = vsel %vm1108_vm0, %v1849_v29, 0.0  ;;  %v1867_v52 = vmul.f32 %v13037_v15, %v1864_v43  ;;  %v1990_v15 = vstv %s15335_s26 }
 0x539   : > { %1852 = vadd.xlane.f32.xlu1 %v1851_v23  ;;  %v1764_v8 = vpop.f32.mrf.mxu1 }
 0x53a   : > { %v1875_v31 = vsel %vm1108_vm0, %v1871_v30, 0.0  ;;  %v1870_v32 = vmul.f32 %v15298_v24, %v1764_v8  ;;  %v1866_v48 = vmul.f32 %v1864_v43, %v1764_v8  ;;  %v1869_v6 = vadd.f32 %v1867_v52, %v1840_v59 }
 0x53b   : > { %1876 = vadd.xlane.f32.xlu0 %v1875_v31  ;;  %v13040_v33 = vpop.f32.mrf.mxu1  ;;  %v17743_v52 = vmov 4  }
 0x53c   : > { %v1892_v34 = vmul.f32 %v13040_v33, %v15298_v24  ;;  %v1872_v19 = vsel %vm1108_vm0, %v1870_v32, 0.0  ;;  %v1888_v60 = vmul.f32 %v13040_v33, %v1885_v49  ;;  %v1868_v63 = vadd.f32 %v1866_v48, %v1839_v55 }
 0x53d   : > { %1873 = vadd.xlane.f32.xlu1 %v1872_v19  ;;  %v1774_v35 = vpop.f32.mrf.mxu1 }
 0x53e   : > { %v1896_v37 = vsel %vm1108_vm0, %v1892_v34, 0.0  ;;  %v1891_v38 = vmul.f32 %v15298_v24, %v1774_v35  ;;  %v1887_v56 = vmul.f32 %v1885_v49, %v1774_v35  ;;  %v1890_v16 = vadd.f32 %v1888_v60, %v1869_v6  ;;  %v15350_v49 = vld [vmem:[#allocation17] ss:$0 sm:$0xff] }
 0x53f   : > { %1897 = vadd.xlane.f32.xlu0 %v1896_v37  ;;  %v13043_v39 = vpop.f32.mrf.mxu1 }
 0x540   : > { %v1913_v40 = vmul.f32 %v13043_v39, %v15298_v24  ;;  %v1893_v41 = vsel %vm1108_vm0, %v1891_v38, 0.0  ;;  %v1909_v7 = vmul.f32 %v13043_v39, %v1906_v53  ;;  %v1889_v11 = vadd.f32 %v1887_v56, %v1868_v63 }
 0x541   : > { %1894 = vadd.xlane.f32.xlu1 %v1893_v41  ;;  %v1784_v42 = vpop.f32.mrf.mxu1 }
 0x542   : > { %v1917_v44 = vsel %vm1108_vm0, %v1913_v40, 0.0  ;;  %v1912_v45 = vmul.f32 %v15298_v24, %v1784_v42  ;;  %v1908_v1 = vmul.f32 %v1906_v53, %v1784_v42  ;;  %v1911_v27 = vadd.f32 %v1909_v7, %v1890_v16 }
 0x543   : > { %1918 = vadd.xlane.f32.xlu0 %v1917_v44  ;;  %v13046_v47 = vpop.f32.mrf.mxu1  ;;  %v17739_v53 = vmov 5  }
 0x544   : > { %v1934_v50 = vmul.f32 %v13046_v47, %v15298_v24  ;;  %v1914_v51 = vsel %vm1108_vm0, %v1912_v45, 0.0  ;;  %v1930_v17 = vmul.f32 %v13046_v47, %v1927_v61  ;;  %v1910_v21 = vadd.f32 %v1908_v1, %v1889_v11 }
 0x545   : > { %1915 = vadd.xlane.f32.xlu1 %v1914_v51  ;;  %v1794_v54 = vpop.f32.mrf.mxu1  ;;  %v17741_v51 = vmov 3  }
 0x546   : > { %v1938_v57 = vsel %vm1108_vm0, %v1934_v50, 0.0  ;;  %v1933_v58 = vmul.f32 %v15298_v24, %v1794_v54  ;;  %v1929_v12 = vmul.f32 %v1927_v61, %v1794_v54  ;;  %v1932_v32 = vadd.f32 %v1930_v17, %v1911_v27 }
 0x547   : > { %1939 = vadd.xlane.f32.xlu0 %v1938_v57  ;;  %v13049_v62 = vpop.f32.mrf.mxu1  ;;  %v17747_v50 = vmov 1   ;;  %v17737_v54 = vmov 6  }
 0x548   : > { %v1955_v3 = vmul.f32 %v13049_v62, %v15298_v24  ;;  %v1935_v5 = vsel %vm1108_vm0, %v1933_v58, 0.0  ;;  %v1951_v28 = vmul.f32 %v13049_v62, %v1948_v9  ;;  %v1931_v30 = vadd.f32 %v1929_v12, %v1910_v21 }
 0x549   : > { %1936 = vadd.xlane.f32.xlu1 %v1935_v5  ;;  %v1804_v10 = vpop.f32.mrf.mxu1 }
 0x54a   : > { %v1959_v13 = vsel %vm1108_vm0, %v1955_v3, 0.0  ;;  %v1954_v14 = vmul.f32 %v15298_v24, %v1804_v10  ;;  %v1950_v22 = vmul.f32 %v1948_v9, %v1804_v10  ;;  %v1953_v38 = vadd.f32 %v1951_v28, %v1932_v32 }
 0x54b   : > { %1960 = vadd.xlane.f32.xlu0 %v1959_v13  ;;  %v13052_v20 = vpop.f32.mrf.mxu1 }
 0x54c   : > { %v1976_v25 = vmul.f32 %v13052_v20, %v15298_v24  ;;  %v1956_v26 = vsel %vm1108_vm0, %v1954_v14, 0.0  ;;  %v1972_v33 = vmul.f32 %v13052_v20, %v1969_v18  ;;  %v1952_v19 = vadd.f32 %v1950_v22, %v1931_v30 }
 0x54d   : > { %1957 = vadd.xlane.f32.xlu1 %v1956_v26  ;;  %v1814_v29 = vpop.f32.mrf.mxu1 }
 0x54e   : > { %v1971_v23 = vmul.f32 %v1969_v18, %v1814_v29  ;;  %v1980_v8 = vsel %vm1108_vm0, %v1976_v25, 0.0  ;;  %v1975_v31 = vmul.f32 %v15298_v24, %v1814_v29  ;;  %v1974_v45 = vadd.f32 %v1972_v33, %v1953_v38 }
 0x54f   : > { %1981 = vadd.xlane.f32.xlu0 %v1980_v8  ;;  %v13055_v34 = vpop.f32.mrf.mxu1 }
 0x550   : > { %v1997_v35 = vmul.f32 %v13055_v34, %v15298_v24  ;;  %v1977_v37 = vsel %vm1108_vm0, %v1975_v31, 0.0  ;;  %v1993_v39 = vmul.f32 %v13055_v34, %v1990_v15  ;;  %v1973_v41 = vadd.f32 %v1971_v23, %v1952_v19 }
 0x551   : > { %1978 = vadd.xlane.f32.xlu1 %v1977_v37  ;;  %v1824_v40 = vpop.f32.mrf.mxu1 }
 0x552   : > { %v1992_v42 = vmul.f32 %v1990_v15, %v1824_v40  ;;  %v2001_v43 = vsel %vm1108_vm0, %v1997_v35, 0.0  ;;  %v1996_v44 = vmul.f32 %v15298_v24, %v1824_v40  ;;  %v1995_v48 = vadd.f32 %v1993_v39, %v1974_v45 }
 0x553   : > { %2002 = vadd.xlane.f32.xlu0 %v2001_v43  ;;  %v17745_v24 = vmov 2  }
 0x554   : > { %v1994_v46 = vadd.f32 %v1992_v42, %v1973_v41  ;;  %v1998_v47 = vsel %vm1108_vm0, %v1996_v44, 0.0  ;;  %v15397_v41 = vld [vmem:[%s15117_s28 + $0x8] sm:$0xff] }
 0x555   : > { %1999 = vadd.xlane.f32.xlu1 %v1998_v47 }
 0x556   : > { %13058 = vmatprep.mubr.msk.f32.mxu0 %vm1108_vm0, %v1994_v46 }
 0x557   : > { %13059 = vmatmul.mubr.msk.f32.vlgmr.msra.gmra.mxu0 %vm1108_vm0, %v1995_v48 }
 0x566   : > { %2327 = vperm.xlu1 %13879, %v15123_v2  }
 0x569   : > { %2332 = vperm.xlu0 %13878, %v15128_v4  }
 0x56a   : > { %13881 = vset.pattern.permute.xlu1 %v17747_v50 }
 0x56b   : > { %2429 = vperm.xlu1 %13881, %v15350_v49  }
 0x56d   : > { %13880 = vset.pattern.permute.xlu0 %v17747_v50 }
 0x56e   : > { %2385 = vperm.xlu0 %13880, %v15123_v2  }
 0x56f   : > { %13883 = vset.pattern.permute.xlu1 %v17745_v24 }
 0x570   : > { %2441 = vperm.xlu1 %13883, %v15128_v4  }
 0x572   : > { %2389 = vperm.xlu0 %13880, %v15128_v4  }
 0x574   : > { %13885 = vset.pattern.permute.xlu1 %v17741_v51 }
 0x575   : > { %2533 = vperm.xlu1 %13885, %v15350_v49  }
 0x576   : > { %13882 = vset.pattern.permute.xlu0 %v17745_v24 }
 0x577   : > { %2437 = vperm.xlu0 %13882, %v15123_v2  }
 0x579   : > { %13887 = vset.pattern.permute.xlu1 %v17743_v52 }
 0x57a   : > { %2545 = vperm.xlu1 %13887, %v15128_v4  }
 0x57b   : > { %2481 = vperm.xlu0 %13882, %v15350_v49  }
 0x57f   : > { %13884 = vset.pattern.permute.xlu0 %v17741_v51 }
 0x580   : > { %2489 = vperm.xlu0 %13884, %v15123_v2  }
 0x584   : > { %2493 = vperm.xlu0 %13884, %v15128_v4  }
 0x588   : > { %13886 = vset.pattern.permute.xlu0 %v17743_v52 }
 0x589   : > { %2541 = vperm.xlu0 %13886, %v15123_v2  }
 0x58d   : > { %2585 = vperm.xlu0 %13886, %v15350_v49  }
 0x591   : > { %13888 = vset.pattern.permute.xlu0 %v17739_v53 }
 0x592   : > { %2593 = vperm.xlu0 %13888, %v15123_v2  }
 0x596   : > { %2597 = vperm.xlu0 %13888, %v15128_v4  }
 0x59a   : > { %2637 = vperm.xlu0 %13888, %v15350_v49  }
 0x59e   : > { %13889 = vset.pattern.permute.xlu0 %v17737_v54 }
 0x59f   : > { %2645 = vperm.xlu0 %13889, %v15123_v2  }
 0x5c0   : > { %v1856_v55 = vpop.xlane.xlu0 %1855 }
 0x5c1   : > { %v1859_v1 = vsel %vm1857_vm12, %v1856_v55, 0.0 }
 0x5c2   : > { %v1853_v56 = vpop.xlane.xlu1 %1852 }
 0x5c3   : > { %v1858_v7 = vsel %vm1857_vm12, %v1853_v56, 0.0 }
 0x5c4   : > { %v1877_v57 = vpop.xlane.xlu0 %1876 }
 0x5c5   : > { %v1880_v62 = vsel %vm1878_vm11, %v1877_v57, 0.0 }
 0x5c6   : > { %v1874_v58 = vpop.xlane.xlu1 %1873  ;;  %v1882_v5 = vadd.f32 %v1880_v62, %v1859_v1 }
 0x5c7   : > { %v1879_v2 = vsel %vm1878_vm11, %v1874_v58, 0.0 }
 0x5c8   : > { %v1898_v59 = vpop.xlane.xlu0 %1897  ;;  %v1881_v11 = vadd.f32 %v1879_v2, %v1858_v7  ;;  %v15448_v2 = vld [vmem:[%s15117_s28] sm:$0xff] }
 0x5c9   : > { %v1901_v3 = vsel %vm1899_vm13, %v1898_v59, 0.0 }
 0x5ca   : > { %v1895_v60 = vpop.xlane.xlu1 %1894  ;;  %v1903_v12 = vadd.f32 %v1901_v3, %v1882_v5  ;;  %v17735_v3 = vmov 7   ;;  %v2193_v5 = vld [vmem:[#allocation15 + $0x8] sm:$0xff] }
 0x5cb   : > { %v1900_v9 = vsel %vm1899_vm13, %v1895_v60, 0.0  ;;  %13068 = vmatprep.subr.msk.mxu0 %vm1446_vm10, %v2193_v5 }
 0x5cc   : > { %v1919_v61 = vpop.xlane.xlu0 %1918  ;;  %v1902_v17 = vadd.f32 %v1900_v9, %v1881_v11  ;;  %13069 = vmatpush3.xpose.msk.msra.mxu0 %vm1446_vm10, %v2193_v5 }
 0x5cd   : > { %v1922_v10 = vsel %vm1920_vm14, %v1919_v61, 0.0 }
 0x5ce   : > { %v1916_v4 = vpop.xlane.xlu1 %1915  ;;  %v1924_v18 = vadd.f32 %v1922_v10, %v1903_v12 }
 0x5cf   : > { %v1921_v14 = vsel %vm1920_vm14, %v1916_v4, 0.0 }
 0x5d0   : > { %v1940_v63 = vpop.xlane.xlu0 %1939  ;;  %v1923_v25 = vadd.f32 %v1921_v14, %v1902_v17 }
 0x5d1   : > { %v1943_v16 = vsel %vm1941_vm15, %v1940_v63, 0.0 }
 0x5d2   : > { %v1937_v6 = vpop.xlane.xlu1 %1936  ;;  %v1945_v26 = vadd.f32 %v1943_v16, %v1924_v18 }
 0x5d3   : > { %v1942_v21 = vsel %vm1941_vm15, %v1937_v6, 0.0  ;;  %v2192_v6 = vld [vmem:[#allocation15] sm:$0xff] }
 0x5d4   : > { %v1961_v13 = vpop.xlane.xlu0 %1960  ;;  %v1944_v15 = vadd.f32 %v1942_v21, %v1923_v25  ;;  %13070 = vmatprep.subr.msk.mxu0 %vm1446_vm10, %v2192_v6 }
 0x5d5   : > { %v1964_v22 = vsel %vm1962_vm1, %v1961_v13, 0.0  ;;  %13071 = vmatpush3.xpose.msk.msra.mxu0 %vm1446_vm10, %v2192_v6 }
 0x5d6   : > { %v1958_v20 = vpop.xlane.xlu1 %1957  ;;  %v1966_v30 = vadd.f32 %v1964_v22, %v1945_v26  ;;  %13075 = vmatprep.subr.mxu0 %v15397_v41  ;;  %v2092_v22 = vld [vmem:[#allocation14 + $0x8] sm:$0xff]  ;;  %v2091_v26 = vld [vmem:[#allocation14] sm:$0xff] }
 0x5d7   : > { %v1963_v28 = vsel %vm1962_vm1, %v1958_v20, 0.0 }
 0x5d8   : > { %v1982_v27 = vpop.xlane.xlu0 %1981  ;;  %v1965_v31 = vadd.f32 %v1963_v28, %v1944_v15 }
 0x5d9   : > { %v1985_v29 = vsel %vm1983_vm2, %v1982_v27, 0.0 }
 0x5da   : > { %v1979_v23 = vpop.xlane.xlu1 %1978  ;;  %v1987_v32 = vadd.f32 %v1985_v29, %v1966_v30 }
 0x5db   : > { %v1984_v8 = vsel %vm1983_vm2, %v1979_v23, 0.0 }
 0x5dc   : > { %v2003_v33 = vpop.xlane.xlu0 %2002  ;;  %v1986_v19 = vadd.f32 %v1984_v8, %v1965_v31 }
 0x5dd   : > { %v2006_v34 = vsel %vm2004_vm3, %v2003_v33, 0.0 }
 0x5de   : > { %v2008_v35 = vadd.f32 %v2006_v34, %v1987_v32  ;;  %v2000_v37 = vpop.xlane.xlu1 %1999 }
 0x5df   : > { %v2005_v38 = vsel %vm2004_vm3, %v2000_v37, 0.0 }
 0x5e0   : > { %v2007_v39 = vadd.f32 %v2005_v38, %v1986_v19  ;;  %13061 = vmatprep.subr.msk.mxu1 %vm1108_vm0, %v2008_v35  ;;  %v15495_v19 = vld [vmem:[%s15117_s28 + $0x18] sm:$0xff] }
 0x5e1   : > { %13062 = vmatpush3.xpose.msk.msra.mxu1 %vm1108_vm0, %v2008_v35 }
 0x5e2   : > { %13063 = vmatprep.subr.msk.mxu1 %vm1108_vm0, %v2007_v39  ;;  %v15390_v40 = vpop.permute.xlu1 %2327 }
 0x5e3   : > { %2335 = vxpose.xlu1.b32.start [1/2] (short) (narrow) %v15390_v40, 16 }
 0x5e4   : > { %v15393_v36 = vpop.permute.xlu0 %2332 }
 0x5e5   : > { %13064 = vmatpush3.xpose.msk.msra.mxu1 %vm1108_vm0, %v2007_v39 }
 0x5e6   : > { %13096 = vmatprep.subr.mxu1 %v15397_v41  ;;  %v15407_v44 = vpop.permute.xlu1 %2429 }
 0x5e7   : > { %2336 = vxpose.xlu1.b32.end [2/2] (short) (narrow) %v15393_v36, 16 }
 0x5e9   : > { %v15401_v42 = vpop.permute.xlu0 %2385 }
 0x5ea   : > { %2392 = vxpose.xlu0.b32.start [1/2] (short) (narrow) %v15401_v42, 16 }
 0x5eb   : > { %v15412_v46 = vpop.permute.xlu1 %2441 }
 0x5ed   : > { %v15404_v43 = vpop.permute.xlu0 %2389 }
 0x5ee   : > { %2393 = vxpose.xlu0.b32.end [2/2] (short) (narrow) %v15404_v43, 16 }
 0x5f0   : > { %v15423_v56 = vpop.permute.xlu1 %2533 }
 0x5f2   : > { %v15409_v45 = vpop.permute.xlu0 %2437 }
 0x5f3   : > { %2444 = vxpose.xlu1.b32.start [1/2] (short) (narrow) %v15409_v45, 16 }
 0x5f5   : > { %v15428_v58 = vpop.permute.xlu1 %2545 }
 0x5f6   : > { %v15414_v47 = vpop.permute.xlu0 %2481 }
 0x5f7   : > { %2445 = vxpose.xlu1.b32.end [2/2] (short) (narrow) %v15412_v46, 16 }
 0x5fb   : > { %v15417_v48 = vpop.permute.xlu0 %2489 }
 0x5fc   : > { %2496 = vxpose.xlu0.b32.start [1/2] (short) (narrow) %v15417_v48, 16 }
 0x5ff   : > { %v15420_v55 = vpop.permute.xlu0 %2493 }
 0x600   : > { %2497 = vxpose.xlu0.b32.end [2/2] (short) (narrow) %v15420_v55, 16 }
 0x604   : > { %v15425_v57 = vpop.permute.xlu0 %2541 }
 0x605   : > { %2548 = vxpose.xlu1.b32.start [1/2] (short) (narrow) %v15425_v57, 16 }
 0x608   : > { %v15430_v59 = vpop.permute.xlu0 %2585 }
 0x609   : > { %2549 = vxpose.xlu1.b32.end [2/2] (short) (narrow) %v15428_v58, 16 }
 0x60d   : > { %v15433_v60 = vpop.permute.xlu0 %2593 }
 0x60e   : > { %2600 = vxpose.xlu1.b32.start [1/2] (short) (narrow) %v15433_v60, 16 }
 0x611   : > { %v15436_v61 = vpop.permute.xlu0 %2597 }
 0x612   : > { %2601 = vxpose.xlu1.b32.end [2/2] (short) (narrow) %v15436_v61, 16 }
 0x615   : > { %v15439_v4 = vpop.permute.xlu0 %2637 }
 0x617   : > { %v13060_v62 = vpop.f32.mrf.mxu0 }
 0x619   : > { %v2082_v63 = vpop.f32.mrf.mxu0 }
 0x61a   : > { %13065 = vmatprep.mubr.msk.f32.mxu1 %vm1108_vm0, %v2082_v63  ;;  %v15442_v1 = vpop.permute.xlu0 %2645 }
 0x61b   : > { %13066 = vmatmul.mubr.msk.f32.vlgmr.msra.gmra.mxu1 %vm1108_vm0, %v13060_v62  ;;  %2652 = vxpose.xlu0.b32.start [1/2] (short) (narrow) %v15442_v1, 16 }
 0x61c   : > { %13097 = vmatpush3.msra.mxu1 %v15397_v41 }
 0x61d   : > { %13098 = vmatprep.subr.mxu1 %v15448_v2 }
 0x61e   : > { %13099 = vmatpush3.msra.mxu1 %v15448_v2 }
 0x61f   : > { %13110 = vmatprep.subr.mxu1 %v15495_v19 }
 0x630   : > { %13890 = vset.pattern.permute.xlu1 %v17737_v54 }
 0x631   : > { %2649 = vperm.xlu1 %13890, %v15397_v41  }
 0x635   : > { %2689 = vperm.xlu1 %13890, %v15350_v49  }
 0x639   : > { %13891 = vset.pattern.permute.xlu1 %v17735_v3 }
 0x63a   : > { %2697 = vperm.xlu1 %13891, %v15448_v2  }
 0x63e   : > { %2701 = vperm.xlu1 %13891, %v15397_v41  }
 0x642   : > { %2741 = vperm.xlu1 %13891, %v15350_v49  }
 0x646   : > { %13893 = vset.pattern.permute.xlu1 %v17733_v0 }
 0x65f   : > { %v15465_v7 = vpop.trf.xlu1 }
 0x663   : > { %v15467_v9 = vpop.trf.xlu1 }
 0x66f   : > { %v2460_v10 = vpop.trf.xlu1 }
 0x673   : > { %v2461_v11 = vpop.trf.xlu1 }
 0x681   : > { %v15469_v12 = vpop.trf.xlu1 }
 0x685   : > { %v15471_v13 = vpop.trf.xlu1 }
 0x68a   : > { %v15473_v14 = vpop.trf.xlu1 }
 0x68e   : > { %v15475_v16 = vpop.trf.xlu1 }
 0x6ac   : > { %v15477_v17 = vpop.permute.xlu1 %2649 }
 0x6ad   : > { %2653 = vxpose.xlu0.b32.end [2/2] (short) (narrow) %v15477_v17, 16 }
 0x6b0   : > { %v15480_v18 = vpop.permute.xlu1 %2689 }
 0x6b5   : > { %v15482_v20 = vpop.permute.xlu1 %2697 }
 0x6b6   : > { %2704 = vxpose.xlu0.b32.start [1/2] (short) (narrow) %v15482_v20, 16 }
 0x6b9   : > { %v15485_v21 = vpop.permute.xlu1 %2701 }
 0x6ba   : > { %2705 = vxpose.xlu0.b32.end [2/2] (short) (narrow) %v15485_v21, 16 }
 0x6db   : > { %v13067_v25 = vpop.f32.mrf.mxu1 }
 0x6dc   : > { %v2177_v27 = vadd.f32 %v13067_v25, %v2092_v22  ;;  %v2476_v22 = vsub.f32 %v15409_v45, %v2460_v10  ;;  %v2477_v25 = vsub.f32 %v15412_v46, %v2461_v11  ;;  %v2581_v45 = vsub.f32 %v15428_v58, %v15471_v13 }
 0x6dd   : > { %v2171_v28 = vpop.f32.mrf.mxu1 }
 0x6de   : > { %v12356_v29 = vmul.f32 -1.442695, %v2177_v27  ;;  %v2172_v15 = vadd.f32 %v2171_v28, %v2091_v26  ;;  %v2367_v26 = vsub.f32 %v15390_v40, %v15465_v7  ;;  %v2368_v27 = vsub.f32 %v15393_v36, %v15467_v9 }
 0x6df   : > { %v2632_v36 = vsub.f32 %v15433_v60, %v15473_v14 }
 0x6e0   : > { %13973 = vpow2.f32 %v12356_v29  ;;  %v12355_v30 = vmul.f32 -1.442695, %v2172_v15  ;;  %v2369_v46 = vand.u32 2147483647, %v2367_v26  ;;  %v2370_v40 = vand.u32 2147483647, %v2368_v27 }
 0x6e2   : > { %13975 = vpow2.f32 %v12355_v30 }
 0x6e3   : > { %13892 = vset.pattern.permute.xlu0 %v17733_v0 }
 0x6e4   : > { %2377 = vperm.xlu0 %13892, %v15350_v49   ;;  %v2408_v49 = vpop.trf.xlu0 }
 0x6e5   : > { %v2424_v5 = vsub.f32 %v15401_v42, %v2408_v49  ;;  %v2478_v42 = vand.u32 2147483647, %v2476_v22  ;;  %v2634_v49 = vand.u32 2147483647, %v2632_v36 }
 0x6e7   : > { %v2426_v30 = vand.u32 2147483647, %v2424_v5  ;;  %v2640_v26 = vmul.f32 %v15439_v4, %v2634_v49 }
 0x6e8   : > { %v2409_v35 = vpop.trf.xlu0 }
 0x6e9   : > { %v2425_v6 = vsub.f32 %v15404_v43, %v2409_v35  ;;  %v2580_v43 = vsub.f32 %v15425_v57, %v15469_v12  ;;  %v2432_v9 = vmul.f32 %v15407_v44, %v2426_v30  ;;  %v2484_v12 = vmul.f32 %v15414_v47, %v2478_v42  ;;  %v15537_v42 = vpop.permute.xlu1 %2741 }
 0x6ec   : > { %v2512_v37 = vpop.trf.xlu0 }
 0x6ed   : > { %v13974_v23 = vpop.eup %13973  ;;  %v2528_v28 = vsub.f32 %v15417_v48, %v2512_v37  ;;  %v2633_v48 = vsub.f32 %v15436_v61, %v15475_v16 }
 0x6ee   : > { %v2187_v31 = vadd.f32 1.0, %v13974_v23  ;;  %v2427_v23 = vand.u32 2147483647, %v2425_v6 }
 0x6ef   : > { %v13976_v8 = vpop.eup %13975  ;;  %v2530_v7 = vand.u32 2147483647, %v2528_v28  ;;  %v2635_v35 = vand.u32 2147483647, %v2633_v48 }
 0x6f0   : > { %v2186_v32 = vadd.f32 1.0, %v13976_v8  ;;  %v2513_v38 = vpop.trf.xlu0  ;;  %v2479_v8 = vand.u32 2147483647, %v2477_v25  ;;  %v2433_v11 = vmul.f32 %v15407_v44, %v2427_v23 }
 0x6f1   : > { %v2529_v29 = vsub.f32 %v15420_v55, %v2513_v38  ;;  %v2641_v27 = vmul.f32 %v15439_v4, %v2635_v35 }
 0x6f2   : > { %13977 = vrcp.f32 %v2186_v32  ;;  %v2485_v13 = vmul.f32 %v15414_v47, %v2479_v8  ;;  %v2583_v32 = vand.u32 2147483647, %v2581_v45 }
 0x6f3   : > { %13979 = vrcp.f32 %v2187_v31  ;;  %v2531_v10 = vand.u32 2147483647, %v2529_v29  ;;  %v2582_v31 = vand.u32 2147483647, %v2580_v43 }
 0x6f5   : > { %v2588_v22 = vmul.f32 %v15430_v59, %v2582_v31 }
 0x6ff   : > { %v13978_v33 = vpop.eup %13977 }
 0x700   : > { %v13980_v34 = vpop.eup %13979  ;;  %13072 = vmatprep.mubr.msk.f32.mxu0 %vm1446_vm10, %v13978_v33  ;;  %v2536_v33 = vmul.f32 %v15423_v56, %v2530_v7 }
 0x701   : > { %13073 = vmatmul.mubr.msk.f32.vlgmr.msra.gmra.mxu0 %vm1446_vm10, %v13980_v34  ;;  %v2537_v34 = vmul.f32 %v15423_v56, %v2531_v10 }
 0x702   : > { %13076 = vmatpush3.msra.mxu0 %v15397_v41 }
 0x703   : > { %13077 = vmatprep.subr.mxu0 %v15448_v2 }
 0x704   : > { %13078 = vmatpush3.msra.mxu0 %v15448_v2 }
 0x725   : > { %v2668_v39 = vpop.trf.xlu0 }
 0x726   : > { %v2684_v60 = vsub.f32 %v15442_v1, %v2668_v39  ;;  %v2589_v1 = vmul.f32 %v15430_v59, %v2583_v32 }
 0x728   : > { %v2686_v39 = vand.u32 2147483647, %v2684_v60 }
 0x729   : > { %v2669_v62 = vpop.trf.xlu0 }
 0x72a   : > { %v2685_v61 = vsub.f32 %v15477_v17, %v2669_v62 }
 0x72c   : > { %v2687_v17 = vand.u32 2147483647, %v2685_v61 }
 0x732   : > { %v2720_v63 = vpop.trf.xlu0 }
 0x733   : > { %v2736_v37 = vsub.f32 %v15482_v20, %v2720_v63  ;;  %v2693_v63 = vmul.f32 %v15480_v18, %v2687_v17 }
 0x735   : > { %v2738_v28 = vand.u32 2147483647, %v2736_v37 }
 0x736   : > { %v2721_v15 = vpop.trf.xlu0 }
 0x737   : > { %v2737_v38 = vsub.f32 %v15485_v21, %v2721_v15  ;;  %v2692_v21 = vmul.f32 %v15480_v18, %v2686_v39  ;;  %v2744_v8 = vmul.f32 %v15537_v42, %v2738_v28 }
 0x739   : > { %v2739_v29 = vand.u32 2147483647, %v2737_v38 }
 0x73b   : > { %v2745_v43 = vmul.f32 %v15537_v42, %v2739_v29 }
 0x75f   : > { %v15517_v55 = vpop.permute.xlu0 %2377 }
 0x760   : > { %v2381_v57 = vmul.f32 %v15517_v55, %v2370_v40  ;;  %v2380_v58 = vmul.f32 %v15517_v55, %v2369_v46 }
 0x762   : > { %v2435_v14 = vadd.f32 %v2433_v11, %v2381_v57  ;;  %v2434_v16 = vadd.f32 %v2432_v9, %v2380_v58 }
 0x764   : > { %v2487_v5 = vadd.f32 %v2485_v13, %v2435_v14  ;;  %v2486_v6 = vadd.f32 %v2484_v12, %v2434_v16  ;;  %v15551_v13 = vld [vmem:[%s15117_s28 + $0x10] sm:$0xff] }
 0x766   : > { %v2539_v62 = vadd.f32 %v2537_v34, %v2487_v5  ;;  %v2538_v25 = vadd.f32 %v2536_v33, %v2486_v6 }
 0x768   : > { %v2591_v30 = vadd.f32 %v2589_v1, %v2539_v62  ;;  %v2590_v20 = vadd.f32 %v2588_v22, %v2538_v25 }
 0x76a   : > { %v2643_v15 = vadd.f32 %v2641_v27, %v2591_v30  ;;  %v2642_v23 = vadd.f32 %v2640_v26, %v2590_v20 }
 0x76c   : > { %v2695_v45 = vadd.f32 %v2693_v63, %v2643_v15  ;;  %v2694_v46 = vadd.f32 %v2692_v21, %v2642_v23  ;;  %v2314_v63 = vld [vmem:[#allocation21 + $0x10] sm:$0xff]  ;;  %v2315_v15 = vld [vmem:[#allocation21 + $0x18] sm:$0xff] }
 0x76e   : > { %v2747_v40 = vadd.f32 %v2745_v43, %v2695_v45  ;;  %v2746_v7 = vadd.f32 %v2744_v8, %v2694_v46 }
 0x770   : > { %v2749_v10 = vsub.f32 0.0, %v2747_v40  ;;  %v2748_v36 = vsub.f32 0.0, %v2746_v7 }
 0x772   : > { %v2752_v48 = vmul.f32 1.442695, %v2749_v10  ;;  %v2750_v9 = vmul.f32 1.442695, %v2748_v36 }
 0x774   : > { %13981 = vpow2.f32 %v2752_v48 }
 0x775   : > { %13983 = vpow2.f32 %v2750_v9 }
 0x781   : > { %v15541_v11 = vpop.eup %13981 }
 0x782   : > { %v15543_v57 = vpop.eup %13983  ;;  %v2757_v58 = vsel %vm1446_vm10, %v15541_v11, 0.0 }
 0x783   : > { %2758 = vadd.xlane.f32.xlu0 %v2757_v58  ;;  %v2754_v12 = vsel %vm1446_vm10, %v15543_v57, 0.0 }
 0x784   : > { %2755 = vadd.xlane.f32.xlu1 %v2754_v12 }
 0x795   : > { %3225 = vperm.xlu1 %13893, %v15495_v19  }
 0x799   : > { %13894 = vset.pattern.permute.xlu1 %v17747_v50  ;;  %3220 = vperm.xlu0 %13892, %v15551_v13  }
 0x79a   : > { %3269 = vperm.xlu1 %13894, %v15551_v13  }
 0x79e   : > { %3273 = vperm.xlu1 %13894, %v15495_v19  }
 0x7a2   : > { %13895 = vset.pattern.permute.xlu1 %v17745_v24 }
 0x7a3   : > { %3317 = vperm.xlu1 %13895, %v15551_v13  }
 0x7a7   : > { %3321 = vperm.xlu1 %13895, %v15495_v19  }
 0x7ab   : > { %13896 = vset.pattern.permute.xlu1 %v17741_v51 }
 0x7ac   : > { %3365 = vperm.xlu1 %13896, %v15551_v13  }
 0x7b0   : > { %3369 = vperm.xlu1 %13896, %v15495_v19  }
 0x7b4   : > { %13897 = vset.pattern.permute.xlu1 %v17743_v52 }
 0x7b5   : > { %3413 = vperm.xlu1 %13897, %v15551_v13  }
 0x7b9   : > { %3417 = vperm.xlu1 %13897, %v15495_v19  }
 0x7bd   : > { %13898 = vset.pattern.permute.xlu1 %v17739_v53 }
 0x7be   : > { %3461 = vperm.xlu1 %13898, %v15551_v13  }
 0x7c1   : > { %v13074_v31 = vpop.f32.mrf.mxu0 }
 0x7c2   : > { %3465 = vperm.xlu1 %13898, %v15495_v19   ;;  %v2282_v60 = vsel %vm1446_vm10, %v13074_v31, -inf }
 0x7c3   : > { %v2272_v32 = vpop.f32.mrf.mxu0 }
 0x7c4   : > { %v2281_v61 = vsel %vm1446_vm10, %v2272_v32, -inf }
 0x7c5   : > { %v2283_v14 = vmax.f32 %v2281_v61, %v2282_v60 }
 0x7c6   : > { %13899 = vset.pattern.permute.xlu1 %v17737_v54 }
 0x7c7   : > { %v2284_v16 = vrot.slane %v2283_v14, 4  ;;  %3509 = vperm.xlu1 %13899, %v15551_v13  }
 0x7c9   : > { %v2285_v33 = vmax.f32 %v2283_v14, %v2284_v16 }
 0x7cb   : > { %v2286_v34 = vrot.slane %v2285_v33, 2  ;;  %3513 = vperm.xlu1 %13899, %v15495_v19  }
 0x7cd   : > { %v2287_v49 = vmax.f32 %v2285_v33, %v2286_v34 }
 0x7cf   : > { %v2288_v35 = vrot.slane %v2287_v49, 1  ;;  %13900 = vset.pattern.permute.xlu1 %v17735_v3 }
 0x7d0   : > { %3557 = vperm.xlu1 %13900, %v15551_v13  }
 0x7d1   : > { %v2289_v37 = vmax.f32 %v2287_v49, %v2288_v35 }
 0x7d3   : > { %v2290_v38 = vsub.f32 %v2272_v32, %v2289_v37  ;;  %v2291_v5 = vsub.f32 %v13074_v31, %v2289_v37 }
 0x7d4   : > { %3561 = vperm.xlu1 %13900, %v15495_v19  }
 0x7d5   : > { %v2292_v6 = vmul.f32 1.442695, %v2290_v38  ;;  %v2294_v22 = vmul.f32 1.442695, %v2291_v5 }
 0x7d7   : > { %13985 = vpow2.f32 %v2292_v6 }
 0x7d8   : > { %13987 = vpow2.f32 %v2294_v22 }
 0x7e4   : > { %v13986_v1 = vpop.eup %13985 }
 0x7e5   : > { %v13988_v39 = vpop.eup %13987  ;;  %v2296_v17 = vsel %vm1446_vm10, %v13986_v1, 0.0 }
 0x7e6   : > { %v2297_v62 = vsel %vm1446_vm10, %v13988_v39, 0.0 }
 0x7e7   : > { %v2298_v25 = vadd.f32 %v2297_v62, %v2296_v17 }
 0x7e9   : > { %v2299_v26 = vrot.slane %v2298_v25, 4 }
 0x7eb   : > { %v2300_v27 = vadd.f32 %v2299_v26, %v2298_v25 }
 0x7ed   : > { %v2301_v28 = vrot.slane %v2300_v27, 2 }
 0x7ef   : > { %v2302_v29 = vadd.f32 %v2301_v28, %v2300_v27 }
 0x7f1   : > { %v2303_v30 = vrot.slane %v2302_v29, 1 }
 0x7f3   : > { %v2304_v20 = vadd.f32 %v2303_v30, %v2302_v29 }
 0x7f5   : > { %13989 = vrcp.f32 %v2304_v20 }
 0x802   : > { %v13990_v21 = vpop.eup %13989 }
 0x803   : > { %v15579_v23 = vmul.f32 %v13990_v21, %v13986_v1  ;;  %v15581_v8 = vmul.f32 %v13990_v21, %v13988_v39 }
 0x805   : > { %v15584_v43 = vmul.f32 %v2314_v63, %v15579_v23  ;;  %v15587_v45 = vmul.f32 %v2315_v15, %v15581_v8 }
 0x807   : > { %17805 = vst [vmem:[#allocation47_spill] sm:$0xff] %v15587_v45  ;;  %13100 = vmatprep.mubr.msk.f32.mxu1 %vm1446_vm10, %v15584_v43 }
 0x808   : > { %13101 = vmatmul.mubr.msk.f32.vlgmr.msra.gmra.mxu1 %vm1446_vm10, %v15587_v45 }
 0x809   : > { %13111 = vmatpush3.msra.mxu1 %v15495_v19 }
 0x80a   : > { %13112 = vmatprep.subr.mxu1 %v15551_v13 }
 0x80b   : > { %13113 = vmatpush3.msra.mxu1 %v15551_v13 }
 0x80c   : > { %13124 = vmatprep.subr.mxu1 %v15495_v19  ;;  %v15599_v40 = vpop.xlane.xlu0 %2758 }
 0x80d   : > { %v15597_v46 = vpop.xlane.xlu1 %2755 }
 0x811   : > { %v3226_v7 = vpop.permute.xlu1 %3225 }
 0x814   : > { %v3221_v10 = vpop.permute.xlu0 %3220 }
 0x815   : > { %v3270_v36 = vpop.permute.xlu1 %3269  ;;  %3228 = vxpose.xlu0.b32.start [1/2] (short) (narrow) %v3221_v10, 16 }
 0x819   : > { %v3274_v48 = vpop.permute.xlu1 %3273  ;;  %3229 = vxpose.xlu0.b32.end [2/2] (short) (narrow) %v3226_v7, 16 }
 0x81d   : > { %3276 = vxpose.xlu0.b32.start [1/2] (short) (narrow) %v3270_v36, 16 }
 0x81e   : > { %v3318_v9 = vpop.permute.xlu1 %3317 }
 0x821   : > { %3277 = vxpose.xlu0.b32.end [2/2] (short) (narrow) %v3274_v48, 16 }
 0x822   : > { %v3322_v58 = vpop.permute.xlu1 %3321 }
 0x825   : > { %3324 = vxpose.xlu0.b32.start [1/2] (short) (narrow) %v3318_v9, 16 }
 0x827   : > { %v3366_v12 = vpop.permute.xlu1 %3365 }
 0x829   : > { %3325 = vxpose.xlu0.b32.end [2/2] (short) (narrow) %v3322_v58, 16 }
 0x82b   : > { %v3370_v31 = vpop.permute.xlu1 %3369 }
 0x82d   : > { %3372 = vxpose.xlu0.b32.start [1/2] (short) (narrow) %v3366_v12, 16 }
 0x830   : > { %v3414_v32 = vpop.permute.xlu1 %3413 }
 0x831   : > { %3373 = vxpose.xlu0.b32.end [2/2] (short) (narrow) %v3370_v31, 16 }
 0x834   : > { %v3418_v60 = vpop.permute.xlu1 %3417 }
 0x835   : > { %3420 = vxpose.xlu0.b32.start [1/2] (short) (narrow) %v3414_v32, 16 }
 0x839   : > { %v3462_v61 = vpop.permute.xlu1 %3461  ;;  %3421 = vxpose.xlu0.b32.end [2/2] (short) (narrow) %v3418_v60, 16 }
 0x83d   : > { %v15601_v14 = vpop.permute.xlu1 %3465  ;;  %3468 = vxpose.xlu0.b32.start [1/2] (short) (narrow) %v3462_v61, 16 }
 0x841   : > { %3469 = vxpose.xlu0.b32.end [2/2] (short) (narrow) %v15601_v14, 16 }
 0x842   : > { %v3510_v16 = vpop.permute.xlu1 %3509 }
 0x845   : > { %3516 = vxpose.xlu0.b32.start [1/2] (short) (narrow) %v3510_v16, 16 }
 0x846   : > { %v15604_v33 = vpop.permute.xlu1 %3513 }
 0x849   : > { %3517 = vxpose.xlu0.b32.end [2/2] (short) (narrow) %v15604_v33, 16 }
 0x84b   : > { %v15607_v34 = vpop.permute.xlu1 %3557 }
 0x84d   : > { %3564 = vxpose.xlu0.b32.start [1/2] (short) (narrow) %v15607_v34, 16 }
 0x84f   : > { %v15610_v49 = vpop.permute.xlu1 %3561 }
 0x851   : > { %3565 = vxpose.xlu0.b32.end [2/2] (short) (narrow) %v15610_v49, 16 }
 0x891   : > { %v3244_v35 = vpop.trf.xlu0 }
 0x892   : > { %v3260_v27 = vsub.f32 %v3221_v10, %v3244_v35 }
 0x894   : > { %v3262_v0 = vand.u32 2147483647, %v3260_v27 }
 0x895   : > { %v3245_v37 = vpop.trf.xlu0 }
 0x896   : > { %v3261_v21 = vsub.f32 %v3226_v7, %v3245_v37 }
 0x898   : > { %v3263_v45 = vand.u32 2147483647, %v3261_v21 }
 0x899   : > { %v3292_v38 = vpop.trf.xlu0 }
 0x89a   : > { %v3308_v25 = vsub.f32 %v3270_v36, %v3292_v38 }
 0x89c   : > { %v3310_v30 = vand.u32 2147483647, %v3308_v25 }
 0x89d   : > { %v3293_v5 = vpop.trf.xlu0 }
 0x89e   : > { %v3309_v29 = vsub.f32 %v3274_v48, %v3293_v5  ;;  %v3312_v52 = vmul.f32 %v3310_v30, %v15407_v44  ;;  %v3264_v48 = vmul.f32 %v3262_v0, %v15517_v55 }
 0x8a0   : > { %v3311_v53 = vand.u32 2147483647, %v3309_v29 }
 0x8a1   : > { %v3340_v6 = vpop.trf.xlu0 }
 0x8a2   : > { %v3356_v28 = vsub.f32 %v3318_v9, %v3340_v6 }
 0x8a4   : > { %v3358_v3 = vand.u32 2147483647, %v3356_v28 }
 0x8a5   : > { %v3341_v22 = vpop.trf.xlu0 }
 0x8a6   : > { %v3357_v63 = vsub.f32 %v3322_v58, %v3341_v22  ;;  %v3360_v9 = vmul.f32 %v3358_v3, %v15414_v47 }
 0x8a8   : > { %v3359_v36 = vand.u32 2147483647, %v3357_v63 }
 0x8a9   : > { %v3388_v1 = vpop.trf.xlu0 }
 0x8aa   : > { %v3404_v20 = vsub.f32 %v3366_v12, %v3388_v1  ;;  %v3313_v12 = vmul.f32 %v3311_v53, %v15407_v44 }
 0x8ac   : > { %v3406_v24 = vand.u32 2147483647, %v3404_v20 }
 0x8ad   : > { %v3389_v39 = vpop.trf.xlu0 }
 0x8ae   : > { %v3405_v51 = vsub.f32 %v3370_v31, %v3389_v39  ;;  %v3408_v31 = vmul.f32 %v3406_v24, %v15423_v56 }
 0x8b0   : > { %v3407_v35 = vand.u32 2147483647, %v3405_v51 }
 0x8b1   : > { %v3436_v17 = vpop.trf.xlu0 }
 0x8b2   : > { %v3452_v54 = vsub.f32 %v3414_v32, %v3436_v17  ;;  %v3314_v32 = vadd.f32 %v3312_v52, %v3264_v48  ;;  %v3409_v51 = vmul.f32 %v3407_v35, %v15423_v56 }
 0x8b4   : > { %v3454_v7 = vand.u32 2147483647, %v3452_v54  ;;  %v3362_v0 = vadd.f32 %v3360_v9, %v3314_v32 }
 0x8b5   : > { %v3437_v62 = vpop.trf.xlu0 }
 0x8b6   : > { %v3453_v38 = vsub.f32 %v3418_v60, %v3437_v62  ;;  %v3361_v60 = vmul.f32 %v3359_v36, %v15414_v47  ;;  %v3456_v3 = vmul.f32 %v3454_v7, %v15430_v59  ;;  %v3410_v52 = vadd.f32 %v3408_v31, %v3362_v0 }
 0x8b7   : > { %v17807_v0 = vmov 2  }
 0x8b8   : > { %v3455_v6 = vand.u32 2147483647, %v3453_v38  ;;  %v3458_v17 = vadd.f32 %v3456_v3, %v3410_v52 }
 0x8b9   : > { %v3484_v26 = vpop.trf.xlu0 }
 0x8ba   : > { %v3500_v50 = vsub.f32 %v3462_v61, %v3484_v26  ;;  %v3265_v61 = vmul.f32 %v3263_v45, %v15517_v55  ;;  %v3457_v45 = vmul.f32 %v3455_v6, %v15430_v59  ;;  %v15642_v6 = vld [vmem:[%s15117_s28 + $0x28] sm:$0xff] }
 0x8bc   : > { %v3502_v37 = vand.u32 2147483647, %v3500_v50  ;;  %v3315_v53 = vadd.f32 %v3313_v12, %v3265_v61 }
 0x8bd   : > { %v3485_v15 = vpop.trf.xlu0 }
 0x8be   : > { %v3501_v5 = vsub.f32 %v15601_v14, %v3485_v15  ;;  %v3504_v50 = vmul.f32 %v3502_v37, %v15439_v4  ;;  %v3363_v1 = vadd.f32 %v3361_v60, %v3315_v53  ;;  %v15638_v60 = vld [vmem:[%s15117_s28 + $0x20] sm:$0xff] }
 0x8c0   : > { %v3503_v24 = vand.u32 2147483647, %v3501_v5  ;;  %v3411_v27 = vadd.f32 %v3409_v51, %v3363_v1  ;;  %v3506_v28 = vadd.f32 %v3504_v50, %v3458_v17 }
 0x8c1   : > { %v3532_v10 = vpop.trf.xlu0 }
 0x8c2   : > { %v3548_v58 = vsub.f32 %v3510_v16, %v3532_v10  ;;  %v3505_v29 = vmul.f32 %v3503_v24, %v15439_v4  ;;  %v3459_v20 = vadd.f32 %v3457_v45, %v3411_v27  ;;  %v17809_v27 = vmov 3  }
 0x8c4   : > { %v3550_v54 = vand.u32 2147483647, %v3548_v58  ;;  %v3507_v10 = vadd.f32 %v3505_v29, %v3459_v20  ;;  %v17811_v29 = vmov 6  }
 0x8c5   : > { %v3533_v22 = vpop.trf.xlu0 }
 0x8c6   : > { %v3549_v16 = vsub.f32 %v15604_v33, %v3533_v22  ;;  %v3552_v62 = vmul.f32 %v3550_v54, %v15480_v18  ;;  %v17806_v22 = vmov 1   ;;  %v17808_v54 = vmov 4  }
 0x8c8   : > { %v13102_v14 = vpop.f32.mrf.mxu1  ;;  %v3551_v25 = vand.u32 2147483647, %v3549_v16  ;;  %v3554_v63 = vadd.f32 %v3552_v62, %v3506_v28  ;;  %v17810_v28 = vmov 5  }
 0x8c9   : > { %3130 = vst.msk [vmem:[#allocation2 + $0x188] sm:$0xff] %vm1108_vm0, %v13102_v14  ;;  %v3580_v39 = vpop.trf.xlu0 }
 0x8ca   : > { %v3596_v33 = vsub.f32 %v15607_v34, %v3580_v39  ;;  %v3119_v26 = vpop.f32.mrf.mxu1  ;;  %v3553_v15 = vmul.f32 %v3551_v25, %v15480_v18 }
 0x8cb   : > { %3129 = vst.msk [vmem:[#allocation2 + $0x180] sm:$0xff] %vm1108_vm0, %v3119_v26 }
 0x8cc   : > { %v3598_v30 = vand.u32 2147483647, %v3596_v33  ;;  %v3555_v9 = vadd.f32 %v3553_v15, %v3507_v10 }
 0x8cd   : > { %v3581_v21 = vpop.trf.xlu0 }
 0x8ce   : > { %v3600_v36 = vmul.f32 %v3598_v30, %v15537_v42  ;;  %v3597_v38 = vsub.f32 %v15610_v49, %v3581_v21  ;;  %v17812_v30 = vmov 7  }
 0x8d0   : > { %v3602_v48 = vadd.f32 %v3600_v36, %v3554_v63  ;;  %v3599_v34 = vand.u32 2147483647, %v3597_v38  ;;  %v2309_v63 = vld [vmem:[#allocation21] sm:$0xff]  ;;  %v2310_v38 = vld [vmem:[#allocation21 + $0x8] sm:$0xff] }
 0x8d1   : > { %v15702_v10 = vmul.f32 %v2309_v63, %v15579_v23 }
 0x8d2   : > { %v3604_v7 = vsub.f32 0.0, %v3602_v48  ;;  %v3601_v58 = vmul.f32 %v3599_v34, %v15537_v42  ;;  %v2319_v48 = vld [vmem:[#allocation21 + $0x20] sm:$0xff]  ;;  %v15710_v34 = vmul.f32 %v2310_v38, %v15581_v8 }
 0x8d4   : > { %v3606_v12 = vmul.f32 1.442695, %v3604_v7  ;;  %v3603_v35 = vadd.f32 %v3601_v58, %v3555_v9  ;;  %17813 = vst [vmem:[#allocation48_spill] sm:$0xff] %v15710_v34  ;;  %v2320_v9 = vld [vmem:[#allocation21 + $0x28] sm:$0xff]  ;;  %v15714_v7 = vmul.f32 %v2319_v48, %v15579_v23 }
 0x8d5   : > { %v15724_v58 = vmul.f32 %v2320_v9, %v15581_v8 }
 0x8d6   : > { %13991 = vpow2.f32 %v3606_v12  ;;  %v3605_v32 = vsub.f32 0.0, %v3603_v35  ;;  %17814 = vst [vmem:[#allocation49_spill] sm:$0xff] %v15714_v7 }
 0x8d7   : > { %17815 = vst [vmem:[#allocation50_spill] sm:$0xff] %v15724_v58 }
 0x8d8   : > { %v3608_v31 = vmul.f32 1.442695, %v3605_v32 }
 0x8da   : > { %13993 = vpow2.f32 %v3608_v31 }
 0x8db   : > { %13995 = vrcp.f32 %v15597_v46 }
 0x8dc   : > { %13997 = vrcp.f32 %v15599_v40 }
 0x8e3   : > { %v13992_v37 = vpop.eup %13991 }
 0x8e4   : > { %v3610_v5 = vsel %vm1446_vm10, %v13992_v37, 0.0 }
 0x8e5   : > { %3611 = vadd.xlane.f32.xlu1 %v3610_v5 }
 0x8e7   : > { %v13994_v49 = vpop.eup %13993 }
 0x8e8   : > { %v3613_v61 = vsel %vm1446_vm10, %v13994_v49, 0.0  ;;  %v13996_v3 = vpop.eup %13995 }
 0x8e9   : > { %3614 = vadd.xlane.f32.xlu0 %v3613_v61  ;;  %v2761_v16 = vmul.f32 %v13996_v3, %v15543_v57  ;;  %v13998_v46 = vpop.eup %13997 }
 0x8ea   : > { %v2763_v53 = vmul.f32 %v13998_v46, %v15541_v11  ;;  %v17816_v46 = vmov 0  }
 0x8ff   : > { %4054 = vperm.xlu0 %13892, %v15638_v60  }
 0x903   : > { %4059 = vperm.xlu0 %13892, %v15642_v6  }
 0x907   : > { %13902 = vset.pattern.permute.xlu0 %v17806_v22 }
 0x908   : > { %4107 = vperm.xlu0 %13902, %v15642_v6  }
 0x90c   : > { %13903 = vset.pattern.permute.xlu0 %v17807_v0 }
 0x90d   : > { %4151 = vperm.xlu0 %13903, %v15638_v60  }
 0x911   : > { %4155 = vperm.xlu0 %13903, %v15642_v6  }
 0x915   : > { %13905 = vset.pattern.permute.xlu0 %v17808_v54 }
 0x916   : > { %4247 = vperm.xlu0 %13905, %v15638_v60  }
 0x918   : > { %2764 = vxpose.xlu1.b32.start [1/2] (short) (narrow) %v2761_v16, 16 }
 0x91c   : > { %2765 = vxpose.xlu1.b32.end [2/2] (short) (narrow) %v2763_v53, 16 }
 0x96e   : > { %v3612_v51 = vpop.xlane.xlu1 %3611 }
 0x96f   : > { %13999 = vrcp.f32 %v3612_v51 }
 0x972   : > { %v3615_v40 = vpop.xlane.xlu0 %3614 }
 0x973   : > { %14001 = vrcp.f32 %v3615_v40 }
 0x97a   : > { %v15656_v52 = vpop.permute.xlu0 %4054 }
 0x97b   : > { %4062 = vxpose.xlu0.b32.start [1/2] (short) (narrow) %v15656_v52, 16 }
 0x97c   : > { %v14000_v50 = vpop.eup %13999 }
 0x97d   : > { %v3617_v24 = vmul.f32 %v14000_v50, %v13992_v37 }
 0x97e   : > { %v15659_v14 = vpop.permute.xlu0 %4059 }
 0x97f   : > { %3620 = vxpose.xlu1.b32.start [1/2] (short) (narrow) %v3617_v24, 16  ;;  %4063 = vxpose.xlu0.b32.end [2/2] (short) (narrow) %v15659_v14, 16 }
 0x980   : > { %v14002_v57 = vpop.eup %14001 }
 0x981   : > { %v3619_v1 = vmul.f32 %v14002_v57, %v13994_v49 }
 0x983   : > { %3621 = vxpose.xlu1.b32.end [2/2] (short) (narrow) %v3619_v1, 16  ;;  %v15662_v11 = vpop.permute.xlu0 %4107 }
 0x988   : > { %v15664_v45 = vpop.permute.xlu0 %4151 }
 0x989   : > { %4158 = vxpose.xlu0.b32.start [1/2] (short) (narrow) %v15664_v45, 16 }
 0x98c   : > { %v15667_v39 = vpop.permute.xlu0 %4155 }
 0x98d   : > { %4159 = vxpose.xlu0.b32.end [2/2] (short) (narrow) %v15667_v39, 16 }
 0x991   : > { %v15670_v17 = vpop.permute.xlu0 %4247 }
 0x992   : > { %4254 = vxpose.xlu0.b32.start [1/2] (short) (narrow) %v15670_v17, 16 }
 0x994   : > { %v2780_v62 = vpop.trf.xlu1 }
 0x995   : > { %v2796_v25 = vmin.f32 %v2761_v16, %v2780_v62 }
 0x997   : > { %13079 = vmatprep.mubr.msk.f32.mxu0 %vm1446_vm10, %v2796_v25 }
 0x998   : > { %v2781_v33 = vpop.trf.xlu1 }
 0x999   : > { %v15674_v26 = vmin.f32 %v2763_v53, %v2781_v33 }
 0x99b   : > { %13080 = vmatmul.mubr.msk.f32.vlgmr.msra.gmra.mxu0 %vm1446_vm10, %v15674_v26 }
 0x99c   : > { %13086 = vmatprep.mubr.msk.f32.mxu0 %vm1446_vm10, %v2796_v25 }
 0x9a1   : > { %13901 = vset.pattern.permute.xlu1 %v17806_v22 }
 0x9a2   : > { %4103 = vperm.xlu1 %13901, %v15638_v60  }
 0x9a6   : > { %13904 = vset.pattern.permute.xlu1 %v17809_v27 }
 0x9a7   : > { %4199 = vperm.xlu1 %13904, %v15638_v60  }
 0x9ab   : > { %4203 = vperm.xlu1 %13904, %v15642_v6  }
 0x9af   : > { %13906 = vset.pattern.permute.xlu1 %v17808_v54 }
 0x9b0   : > { %4251 = vperm.xlu1 %13906, %v15642_v6  }
 0x9b4   : > { %13907 = vset.pattern.permute.xlu1 %v17810_v28 }
 0x9b5   : > { %4295 = vperm.xlu1 %13907, %v15638_v60  }
 0x9b9   : > { %4299 = vperm.xlu1 %13907, %v15642_v6  }
 0x9bd   : > { %13908 = vset.pattern.permute.xlu1 %v17811_v29 }
 0x9be   : > { %4343 = vperm.xlu1 %13908, %v15638_v60  }
 0x9c2   : > { %4347 = vperm.xlu1 %13908, %v15642_v6  }
 0x9c6   : > { %13909 = vset.pattern.permute.xlu1 %v17812_v30 }
 0x9c7   : > { %4391 = vperm.xlu1 %13909, %v15638_v60  }
 0x9cb   : > { %4395 = vperm.xlu1 %13909, %v15642_v6  }
 0x9f7   : > { %v4078_v53 = vpop.trf.xlu0 }
 0x9fb   : > { %v3636_v20 = vpop.trf.xlu1  ;;  %v4079_v51 = vpop.trf.xlu0 }
 0x9fc   : > { %v15695_v21 = vmin.f32 %v3617_v24, %v3636_v20  ;;  %v4095_v20 = vsub.f32 %v15659_v14, %v4079_v51 }
 0x9fe   : > { %13114 = vmatprep.mubr.msk.f32.mxu1 %vm1446_vm10, %v15695_v21 }
 0x9ff   : > { %v3637_v15 = vpop.trf.xlu1 }
 0xa00   : > { %v15699_v36 = vmin.f32 %v3619_v1, %v3637_v15 }
 0xa02   : > { %13115 = vmatmul.mubr.msk.f32.vlgmr.msra.gmra.mxu1 %vm1446_vm10, %v15699_v36 }
 0xa03   : > { %13125 = vmatpush3.msra.mxu1 %v15495_v19  ;;  %13128 = vmatprep.mubr.msk.f32.mxu1 %vm1446_vm10, %v15702_v10 }
 0xa04   : > { %13126 = vmatprep.subr.mxu1 %v15551_v13 }
 0xa05   : > { %13127 = vmatpush3.msra.mxu1 %v15551_v13  ;;  %v4174_v40 = vpop.trf.xlu0 }
 0xa06   : > { %13129 = vmatmul.mubr.msk.f32.vlgmr.msra.gmra.mxu1 %vm1446_vm10, %v15710_v34  ;;  %13138 = vmatprep.subr.mxu1 %v15495_v19  ;;  %v4190_v63 = vsub.f32 %v15664_v45, %v4174_v40 }
 0xa07   : > { %13139 = vmatpush3.msra.mxu1 %v15495_v19  ;;  %13142 = vmatprep.mubr.msk.f32.mxu1 %vm1446_vm10, %v15714_v7 }
 0xa08   : > { %13140 = vmatprep.subr.mxu1 %v15551_v13 }
 0xa09   : > { %13141 = vmatpush3.msra.mxu1 %v15551_v13 }
 0xa0a   : > { %13143 = vmatmul.mubr.msk.f32.vlgmr.msra.gmra.mxu1 %vm1446_vm10, %v15724_v58 }
 0xa1d   : > { %v4104_v23 = vpop.permute.xlu1 %4103 }
 0xa1e   : > { %4110 = vxpose.xlu1.b32.start [1/2] (short) (narrow) %v4104_v23, 16 }
 0xa22   : > { %v15730_v12 = vpop.permute.xlu1 %4199  ;;  %4111 = vxpose.xlu1.b32.end [2/2] (short) (narrow) %v15662_v11, 16 }
 0xa26   : > { %v15733_v35 = vpop.permute.xlu1 %4203  ;;  %4206 = vxpose.xlu1.b32.start [1/2] (short) (narrow) %v15730_v12, 16 }
 0xa2a   : > { %4207 = vxpose.xlu1.b32.end [2/2] (short) (narrow) %v15733_v35, 16 }
 0xa2b   : > { %v15737_v8 = vpop.permute.xlu1 %4251 }
 0xa2c   : > { %4255 = vxpose.xlu0.b32.end [2/2] (short) (narrow) %v15737_v8, 16 }
 0xa30   : > { %v15740_v32 = vpop.permute.xlu1 %4295 }
 0xa31   : > { %4302 = vxpose.xlu0.b32.start [1/2] (short) (narrow) %v15740_v32, 16 }
 0xa34   : > { %v15743_v31 = vpop.permute.xlu1 %4299 }
 0xa35   : > { %4303 = vxpose.xlu0.b32.end [2/2] (short) (narrow) %v15743_v31, 16 }
 0xa39   : > { %v15746_v37 = vpop.permute.xlu1 %4343 }
 0xa3a   : > { %4350 = vxpose.xlu1.b32.start [1/2] (short) (narrow) %v15746_v37, 16 }
 0xa3d   : > { %v15749_v5 = vpop.permute.xlu1 %4347 }
 0xa3e   : > { %4351 = vxpose.xlu1.b32.end [2/2] (short) (narrow) %v15749_v5, 16 }
 0xa42   : > { %v15752_v49 = vpop.permute.xlu1 %4391 }
 0xa43   : > { %4398 = vxpose.xlu0.b32.start [1/2] (short) (narrow) %v15752_v49, 16 }
 0xa46   : > { %v15755_v61 = vpop.permute.xlu1 %4395 }
 0xa47   : > { %4399 = vxpose.xlu0.b32.end [2/2] (short) (narrow) %v15755_v61, 16 }
 0xa5b   : > { %v13081_v3 = vpop.f32.mrf.mxu0 }
 0xa5c   : > { %2880 = vst.msk [vmem:[#allocation2 + $0x8] sm:$0xff] %vm1108_vm0, %v13081_v3  ;;  %13082 = vmatprep.subr.mxu0 %v13081_v3 }
 0xa5d   : > { %v2870_v16 = vpop.f32.mrf.mxu0  ;;  %13083 = vmatpush3.msra.mxu0 %v13081_v3 }
 0xa5e   : > { %2879 = vst.msk [vmem:[#allocation2] sm:$0xff] %vm1108_vm0, %v2870_v16  ;;  %13084 = vmatprep.subr.mxu0 %v2870_v16 }
 0xa5f   : > { %13085 = vmatpush3.msra.mxu0 %v2870_v16 }
 0xa60   : > { %13087 = vmatmul.mubr.msk.f32.vlgmr.msra.gmra.mxu0 %vm1446_vm10, %v15674_v26  ;;  %13089 = vmatprep.subr.mxu0 %v15397_v41 }
 0xa61   : > { %13090 = vmatpush3.msra.mxu0 %v15397_v41  ;;  %13093 = vmatprep.mubr.msk.f32.mxu0 %vm1446_vm10, %v15702_v10 }
 0xa62   : > { %13091 = vmatprep.subr.mxu0 %v15448_v2 }
 0xa63   : > { %13092 = vmatpush3.msra.mxu0 %v15448_v2 }
 0xa64   : > { %13094 = vmatmul.mubr.msk.f32.vlgmr.msra.gmra.mxu0 %vm1446_vm10, %v15710_v34  ;;  %13103 = vmatprep.subr.mxu0 %v15397_v41 }
 0xa65   : > { %13104 = vmatpush3.msra.mxu0 %v15397_v41  ;;  %13107 = vmatprep.mubr.msk.f32.mxu0 %vm1446_vm10, %v15714_v7  ;;  %v4175_v41 = vpop.trf.xlu0 }
 0xa66   : > { %13105 = vmatprep.subr.mxu0 %v15448_v2  ;;  %v4191_v16 = vsub.f32 %v15667_v39, %v4175_v41 }
 0xa67   : > { %13106 = vmatpush3.msra.mxu0 %v15448_v2  ;;  %v4094_v2 = vsub.f32 %v15656_v52, %v4078_v53  ;;  %v4192_v53 = vand.u32 2147483647, %v4190_v63 }
 0xa68   : > { %13108 = vmatmul.mubr.msk.f32.vlgmr.msra.gmra.mxu0 %vm1446_vm10, %v15724_v58 }
 0xa69   : > { %13121 = vmatprep.mubr.msk.f32.mxu0 %vm1446_vm10, %v15695_v21  ;;  %v4096_v21 = vand.u32 2147483647, %v4094_v2 }
 0xa70   : > { %13910 = vset.pattern.permute.xlu0 %v17816_v46 }
 0xa9a   : > { %v4126_v50 = vpop.trf.xlu1 }
 0xa9b   : > { %v4142_v1 = vsub.f32 %v4104_v23, %v4126_v50  ;;  %v4097_v23 = vand.u32 2147483647, %v4095_v20 }
 0xa9d   : > { %v4144_v26 = vand.u32 2147483647, %v4142_v1  ;;  %v4193_v1 = vand.u32 2147483647, %v4191_v16 }
 0xa9e   : > { %v4127_v24 = vpop.trf.xlu1 }
 0xa9f   : > { %v4143_v33 = vsub.f32 %v15662_v11, %v4127_v24  ;;  %v4146_v3 = vmul.f32 %v4144_v26, %v15407_v44  ;;  %v4098_v11 = vmul.f32 %v4096_v21, %v15517_v55  ;;  %v4099_v24 = vmul.f32 %v4097_v23, %v15517_v55 }
 0xaa0   : > { %v4195_v63 = vmul.f32 %v4193_v1, %v15414_v47 }
 0xaa1   : > { %v4145_v48 = vand.u32 2147483647, %v4143_v33  ;;  %v4148_v51 = vadd.f32 %v4146_v3, %v4098_v11 }
 0xaa2   : > { %v4222_v62 = vpop.trf.xlu1 }
 0xaa3   : > { %v4238_v15 = vsub.f32 %v15730_v12, %v4222_v62  ;;  %v4147_v45 = vmul.f32 %v4145_v48, %v15407_v44 }
 0xaa4   : > { %v4270_v57 = vpop.trf.xlu0 }
 0xaa5   : > { %v4240_v50 = vand.u32 2147483647, %v4238_v15  ;;  %v4286_v14 = vsub.f32 %v15670_v17, %v4270_v57  ;;  %v4149_v57 = vadd.f32 %v4147_v45, %v4099_v24 }
 0xaa6   : > { %v4223_v38 = vpop.trf.xlu1 }
 0xaa7   : > { %v4239_v52 = vsub.f32 %v15733_v35, %v4223_v38  ;;  %v4194_v35 = vmul.f32 %v4192_v53, %v15414_v47  ;;  %v4242_v2 = vmul.f32 %v4240_v50, %v15423_v56  ;;  %v4288_v33 = vand.u32 2147483647, %v4286_v14 }
 0xaa8   : > { %v4271_v25 = vpop.trf.xlu0  ;;  %v4197_v3 = vadd.f32 %v4195_v63, %v4149_v57  ;;  %v17817_v63 = vld [vmem:[#allocation47_spill] sm:$0xff] }
 0xaa9   : > { %v4241_v62 = vand.u32 2147483647, %v4239_v52  ;;  %v4287_v39 = vsub.f32 %v15737_v8, %v4271_v25  ;;  %v4196_v26 = vadd.f32 %v4194_v35, %v4148_v51  ;;  %v4290_v25 = vmul.f32 %v4288_v33, %v15430_v59 }
 0xaab   : > { %v4243_v15 = vmul.f32 %v4241_v62, %v15423_v56  ;;  %v4289_v38 = vand.u32 2147483647, %v4287_v39  ;;  %v4244_v8 = vadd.f32 %v4242_v2, %v4196_v26 }
 0xaad   : > { %v4318_v9 = vpop.trf.xlu0  ;;  %v4245_v16 = vadd.f32 %v4243_v15, %v4197_v3  ;;  %v4291_v52 = vmul.f32 %v4289_v38, %v15430_v59  ;;  %v4292_v11 = vadd.f32 %v4290_v25, %v4244_v8  ;;  %v15836_v3 = vld [vmem:[%s15117_s28 + $0x30] sm:$0xff] }
 0xaae   : > { %v4334_v12 = vsub.f32 %v15740_v32, %v4318_v9 }
 0xab0   : > { %v4336_v20 = vand.u32 2147483647, %v4334_v12 }
 0xab1   : > { %v4319_v41 = vpop.trf.xlu0 }
 0xab2   : > { %v4335_v32 = vsub.f32 %v15743_v31, %v4319_v41 }
 0xab4   : > { %v4337_v23 = vand.u32 2147483647, %v4335_v32 }
 0xab6   : > { %v4366_v40 = vpop.trf.xlu1  ;;  %v4339_v51 = vmul.f32 %v4337_v23, %v15439_v4 }
 0xab7   : > { %v4382_v17 = vsub.f32 %v15746_v37, %v4366_v40  ;;  %v4338_v37 = vmul.f32 %v4336_v20, %v15439_v4 }
 0xab9   : > { %v4384_v48 = vand.u32 2147483647, %v4382_v17  ;;  %v4340_v45 = vadd.f32 %v4338_v37, %v4292_v11  ;;  %v15842_v37 = vld [vmem:[%s15117_s28 + $0x38] sm:$0xff] }
 0xaba   : > { %v4367_v21 = vpop.trf.xlu1 }
 0xabb   : > { %v4383_v9 = vsub.f32 %v15749_v5, %v4367_v21  ;;  %v4386_v53 = vmul.f32 %v4384_v48, %v15480_v18  ;;  %v4293_v5 = vadd.f32 %v4291_v52, %v4245_v16 }
 0xabd   : > { %v4385_v50 = vand.u32 2147483647, %v4383_v9  ;;  %v4388_v1 = vadd.f32 %v4386_v53, %v4340_v45 }
 0xabf   : > { %v4414_v31 = vpop.trf.xlu0  ;;  %v4387_v62 = vmul.f32 %v4385_v50, %v15480_v18 }
 0xac0   : > { %v4430_v14 = vsub.f32 %v15752_v49, %v4414_v31  ;;  %v4341_v49 = vadd.f32 %v4339_v51, %v4293_v5  ;;  %v14117_v31 = vld [vmem:[%s15117_s28 + $0x8] sm:$0xff] }
 0xac2   : > { %v4432_v12 = vand.u32 2147483647, %v4430_v14  ;;  %v13116_v40 = vpop.f32.mrf.mxu1  ;;  %v4389_v57 = vadd.f32 %v4387_v62, %v4341_v49  ;;  %v14118_v14 = vld [vmem:[%s15117_s28] sm:$0xff] }
 0xac3   : > { %3736 = vst.msk [vmem:[#allocation2 + $0x18] sm:$0xff] %vm1108_vm0, %v13116_v40  ;;  %v4415_v24 = vpop.trf.xlu0  ;;  %13117 = vmatprep.subr.mxu0 %v13116_v40 }
 0xac4   : > { %v4434_v39 = vmul.f32 %v4432_v12, %v15537_v42  ;;  %v4431_v41 = vsub.f32 %v15755_v61, %v4415_v24  ;;  %v3726_v35 = vpop.f32.mrf.mxu1  ;;  %13118 = vmatpush3.msra.mxu0 %v13116_v40 }
 0xac5   : > { %3735 = vst.msk [vmem:[#allocation2 + $0x10] sm:$0xff] %vm1108_vm0, %v3726_v35  ;;  %13119 = vmatprep.subr.mxu0 %v3726_v35 }
 0xac6   : > { %v4436_v2 = vadd.f32 %v4434_v39, %v4388_v1  ;;  %v4433_v33 = vand.u32 2147483647, %v4431_v41  ;;  %13120 = vmatpush3.msra.mxu0 %v3726_v35  ;;  %v13130_v17 = vpop.f32.mrf.mxu1 }
 0xac7   : > { %3894 = vst.msk [vmem:[#allocation2 + $0x118] sm:$0xff] %vm1108_vm0, %v13130_v17  ;;  %13122 = vmatmul.mubr.msk.f32.vlgmr.msra.gmra.mxu0 %vm1446_vm10, %v15699_v36  ;;  %13131 = vmatprep.subr.mxu0 %v15495_v19 }
 0xac8   : > { %v4438_v26 = vsub.f32 0.0, %v4436_v2  ;;  %v4435_v61 = vmul.f32 %v4433_v33, %v15537_v42  ;;  %v3884_v20 = vpop.f32.mrf.mxu1  ;;  %13132 = vmatpush3.msra.mxu0 %v15495_v19  ;;  %13135 = vmatprep.mubr.msk.f32.mxu0 %vm1446_vm10, %v15584_v43  ;;  %v14119_v33 = vld [vmem:[%s15117_s28 + $0x18] sm:$0xff] }
 0xac9   : > { %3893 = vst.msk [vmem:[#allocation2 + $0x110] sm:$0xff] %vm1108_vm0, %v3884_v20  ;;  %13133 = vmatprep.subr.mxu0 %v15551_v13 }
 0xaca   : > { %v4440_v32 = vmul.f32 1.442695, %v4438_v26  ;;  %v4437_v21 = vadd.f32 %v4435_v61, %v4389_v57  ;;  %13134 = vmatpush3.msra.mxu0 %v15551_v13  ;;  %v13144_v36 = vpop.f32.mrf.mxu1 }
 0xacb   : > { %4048 = vst.msk [vmem:[#allocation2 + $0x218] sm:$0xff] %vm1108_vm0, %v13144_v36  ;;  %13136 = vmatmul.mubr.msk.f32.vlgmr.msra.gmra.mxu0 %vm1446_vm10, %v17817_v63  ;;  %13145 = vmatprep.subr.mxu0 %v15642_v6 }
 0xacc   : > { %14003 = vpow2.f32 %v4440_v32  ;;  %v4439_v19 = vsub.f32 0.0, %v4437_v21  ;;  %v4038_v15 = vpop.f32.mrf.mxu1  ;;  %13146 = vmatpush3.msra.mxu0 %v15642_v6 }
 0xacd   : > { %4047 = vst.msk [vmem:[#allocation2 + $0x210] sm:$0xff] %vm1108_vm0, %v4038_v15  ;;  %13147 = vmatprep.subr.mxu0 %v15638_v60 }
 0xace   : > { %v4442_v38 = vmul.f32 1.442695, %v4439_v19  ;;  %13148 = vmatpush3.msra.mxu0 %v15638_v60 }
 0xacf   : > { %13159 = vmatprep.subr.mxu0 %v15642_v6 }
 0xad0   : > { %14005 = vpow2.f32 %v4442_v38 }
 0xad9   : > { %v14004_v8 = vpop.eup %14003 }
 0xada   : > { %v4444_v25 = vsel %vm1446_vm10, %v14004_v8, 0.0 }
 0xadb   : > { %4445 = vadd.xlane.f32.xlu1 %v4444_v25 }
 0xadd   : > { %v14006_v48 = vpop.eup %14005 }
 0xade   : > { %v4447_v9 = vsel %vm1446_vm10, %v14006_v48, 0.0 }
 0xadf   : > { %4448 = vadd.xlane.f32.xlu0 %v4447_v9 }
 0xaf5   : > { %4888 = vperm.xlu0 %13910, %v15836_v3  }
 0xaf9   : > { %13913 = vset.pattern.permute.xlu0 %v17807_v0 }
 0xafa   : > { %4985 = vperm.xlu0 %13913, %v15836_v3  }
 0xafe   : > { %13920 = vset.pattern.permute.xlu0 %v17812_v30 }
 0xaff   : > { %5229 = vperm.xlu0 %13920, %v15842_v37  }
 0xb20   : > { %v13088_v23 = vpop.f32.mrf.mxu0 }
 0xb21   : > { %v2957_v16 = vmul.f32 2.0, %v13088_v23 }
 0xb22   : > { %v2947_v52 = vpop.f32.mrf.mxu0 }
 0xb23   : > { %v2959_v11 = vsub.f32 %v2957_v16, %v14117_v31  ;;  %v2956_v53 = vmul.f32 2.0, %v2947_v52 }
 0xb24   : > { %v13095_v50 = vpop.f32.mrf.mxu0 }
 0xb25   : > { %2962 = vst.msk [vmem:[#allocation2 + $0x88] sm:$0xff] %vm1108_vm0, %v2959_v11  ;;  %v2958_v45 = vsub.f32 %v2956_v53, %v14118_v14  ;;  %3046 = vst.msk [vmem:[#allocation2 + $0x108] sm:$0xff] %vm1108_vm0, %v13095_v50 }
 0xb26   : > { %v3035_v51 = vpop.f32.mrf.mxu0 }
 0xb27   : > { %2961 = vst.msk [vmem:[#allocation2 + $0x80] sm:$0xff] %vm1108_vm0, %v2958_v45  ;;  %3045 = vst.msk [vmem:[#allocation2 + $0x100] sm:$0xff] %vm1108_vm0, %v3035_v51 }
 0xb28   : > { %v13109_v12 = vpop.f32.mrf.mxu0 }
 0xb29   : > { %3214 = vst.msk [vmem:[#allocation2 + $0x208] sm:$0xff] %vm1108_vm0, %v13109_v12 }
 0xb2a   : > { %v3203_v40 = vpop.f32.mrf.mxu0 }
 0xb2b   : > { %3213 = vst.msk [vmem:[#allocation2 + $0x200] sm:$0xff] %vm1108_vm0, %v3203_v40 }
 0xb64   : > { %v4446_v5 = vpop.xlane.xlu1 %4445 }
 0xb65   : > { %14007 = vrcp.f32 %v4446_v5 }
 0xb68   : > { %v4449_v24 = vpop.xlane.xlu0 %4448 }
 0xb69   : > { %14009 = vrcp.f32 %v4449_v24 }
 0xb70   : > { %v15855_v26 = vpop.permute.xlu0 %4888 }
 0xb71   : > { %4896 = vxpose.xlu0.b32.start [1/2] (short) (narrow) %v15855_v26, 16 }
 0xb72   : > { %v14008_v1 = vpop.eup %14007 }
 0xb73   : > { %v4451_v62 = vmul.f32 %v14008_v1, %v14004_v8 }
 0xb75   : > { %4454 = vxpose.xlu1.b32.start [1/2] (short) (narrow) %v4451_v62, 16  ;;  %v4986_v38 = vpop.permute.xlu0 %4985 }
 0xb76   : > { %v14010_v39 = vpop.eup %14009 }
 0xb77   : > { %v4453_v41 = vmul.f32 %v14010_v39, %v14006_v48 }
 0xb79   : > { %4455 = vxpose.xlu1.b32.end [2/2] (short) (narrow) %v4453_v41, 16 }
 0xb7a   : > { %v15935_v45 = vpop.permute.xlu0 %5229 }
 0xb87   : > { %v13123_v35 = vpop.f32.mrf.mxu0 }
 0xb88   : > { %v3813_v49 = vmul.f32 2.0, %v13123_v35 }
 0xb89   : > { %v3803_v2 = vpop.f32.mrf.mxu0 }
 0xb8a   : > { %v3815_v17 = vsub.f32 %v3813_v49, %v14119_v33  ;;  %v3812_v57 = vmul.f32 2.0, %v3803_v2 }
 0xb8b   : > { %v13137_v61 = vpop.f32.mrf.mxu0 }
 0xb8c   : > { %3817 = vst.msk [vmem:[#allocation2 + $0x98] sm:$0xff] %vm1108_vm0, %v3815_v17  ;;  %v3814_v20 = vsub.f32 %v3812_v57, %v15551_v13  ;;  %3971 = vst.msk [vmem:[#allocation2 + $0x198] sm:$0xff] %vm1108_vm0, %v13137_v61 }
 0xb8d   : > { %v3961_v32 = vpop.f32.mrf.mxu0 }
 0xb8e   : > { %3816 = vst.msk [vmem:[#allocation2 + $0x90] sm:$0xff] %vm1108_vm0, %v3814_v20  ;;  %3970 = vst.msk [vmem:[#allocation2 + $0x190] sm:$0xff] %vm1108_vm0, %v3961_v32 }
 0xb97   : > { %13911 = vset.pattern.permute.xlu1 %v17816_v46 }
 0xb98   : > { %4893 = vperm.xlu1 %13911, %v15842_v37  }
 0xb9c   : > { %13912 = vset.pattern.permute.xlu1 %v17806_v22 }
 0xb9d   : > { %4937 = vperm.xlu1 %13912, %v15836_v3  }
 0xba1   : > { %4941 = vperm.xlu1 %13912, %v15842_v37  }
 0xba5   : > { %13914 = vset.pattern.permute.xlu1 %v17807_v0 }
 0xba6   : > { %4989 = vperm.xlu1 %13914, %v15842_v37  }
 0xbaa   : > { %13915 = vset.pattern.permute.xlu1 %v17809_v27 }
 0xbab   : > { %5033 = vperm.xlu1 %13915, %v15836_v3  }
 0xbaf   : > { %5037 = vperm.xlu1 %13915, %v15842_v37  }
 0xbb3   : > { %13916 = vset.pattern.permute.xlu1 %v17808_v54 }
 0xbb4   : > { %5081 = vperm.xlu1 %13916, %v15836_v3  }
 0xbb8   : > { %5085 = vperm.xlu1 %13916, %v15842_v37  }
 0xbbc   : > { %13917 = vset.pattern.permute.xlu1 %v17810_v28 }
 0xbbd   : > { %5129 = vperm.xlu1 %13917, %v15836_v3  }
 0xbc1   : > { %5133 = vperm.xlu1 %13917, %v15842_v37  }
 0xbc5   : > { %13918 = vset.pattern.permute.xlu1 %v17811_v29 }
 0xbc6   : > { %5177 = vperm.xlu1 %13918, %v15836_v3  }
 0xbca   : > { %5181 = vperm.xlu1 %13918, %v15842_v37  }
 0xbce   : > { %13919 = vset.pattern.permute.xlu1 %v17812_v30 }
 0xbcf   : > { %5225 = vperm.xlu1 %13919, %v15836_v3  }
 0xbf1   : > { %v4470_v13 = vpop.trf.xlu1 }
 0xbf2   : > { %v4486_v21 = vmin.f32 %v4451_v62, %v4470_v13 }
 0xbf4   : > { %13149 = vmatprep.mubr.msk.f32.mxu0 %vm1446_vm10, %v4486_v21  ;;  %13156 = vmatprep.mubr.msk.f32.mxu1 %vm1446_vm10, %v4486_v21 }
 0xbf5   : > { %v4471_v36 = vpop.trf.xlu1 }
 0xbf6   : > { %v15886_v19 = vmin.f32 %v4453_v41, %v4471_v36 }
 0xbf8   : > { %13150 = vmatmul.mubr.msk.f32.vlgmr.msra.gmra.mxu0 %vm1446_vm10, %v15886_v19 }
 0xbf9   : > { %13160 = vmatpush3.msra.mxu0 %v15642_v6  ;;  %13163 = vmatprep.mubr.msk.f32.mxu0 %vm1446_vm10, %v15702_v10 }
 0xbfa   : > { %13161 = vmatprep.subr.mxu0 %v15638_v60 }
 0xbfb   : > { %13162 = vmatpush3.msra.mxu0 %v15638_v60 }
 0xbfc   : > { %13164 = vmatmul.mubr.msk.f32.vlgmr.msra.gmra.mxu0 %vm1446_vm10, %v15710_v34  ;;  %13173 = vmatprep.subr.mxu0 %v15642_v6 }
 0xbfd   : > { %13174 = vmatpush3.msra.mxu0 %v15642_v6  ;;  %13177 = vmatprep.mubr.msk.f32.mxu0 %vm1446_vm10, %v15714_v7 }
 0xbfe   : > { %13175 = vmatprep.subr.mxu0 %v15638_v60 }
 0xbff   : > { %13176 = vmatpush3.msra.mxu0 %v15638_v60 }
 0xc00   : > { %13178 = vmatmul.mubr.msk.f32.vlgmr.msra.gmra.mxu0 %vm1446_vm10, %v15724_v58 }
 0xc13   : > { %v15905_v15 = vpop.permute.xlu1 %4893 }
 0xc14   : > { %4897 = vxpose.xlu0.b32.end [2/2] (short) (narrow) %v15905_v15, 16 }
 0xc18   : > { %v4938_v8 = vpop.permute.xlu1 %4937  ;;  %4992 = vxpose.xlu0.b32.start [1/2] (short) (narrow) %v4986_v38, 16 }
 0xc19   : > { %4944 = vxpose.xlu1.b32.start [1/2] (short) (narrow) %v4938_v8, 16 }
 0xc1c   : > { %v4942_v25 = vpop.permute.xlu1 %4941 }
 0xc1d   : > { %4945 = vxpose.xlu1.b32.end [2/2] (short) (narrow) %v4942_v25, 16 }
 0xc21   : > { %v15908_v48 = vpop.permute.xlu1 %4989 }
 0xc22   : > { %4993 = vxpose.xlu0.b32.end [2/2] (short) (narrow) %v15908_v48, 16 }
 0xc26   : > { %v5034_v9 = vpop.permute.xlu1 %5033 }
 0xc27   : > { %5040 = vxpose.xlu0.b32.start [1/2] (short) (narrow) %v5034_v9, 16 }
 0xc2a   : > { %v15911_v23 = vpop.permute.xlu1 %5037 }
 0xc2b   : > { %5041 = vxpose.xlu0.b32.end [2/2] (short) (narrow) %v15911_v23, 16 }
 0xc2f   : > { %v15914_v16 = vpop.permute.xlu1 %5081 }
 0xc30   : > { %5088 = vxpose.xlu1.b32.start [1/2] (short) (narrow) %v15914_v16, 16 }
 0xc33   : > { %v15917_v52 = vpop.permute.xlu1 %5085 }
 0xc34   : > { %5089 = vxpose.xlu1.b32.end [2/2] (short) (narrow) %v15917_v52, 16 }
 0xc38   : > { %v15920_v31 = vpop.permute.xlu1 %5129 }
 0xc39   : > { %5136 = vxpose.xlu0.b32.start [1/2] (short) (narrow) %v15920_v31, 16 }
 0xc3c   : > { %v15923_v11 = vpop.permute.xlu1 %5133 }
 0xc3d   : > { %5137 = vxpose.xlu0.b32.end [2/2] (short) (narrow) %v15923_v11, 16 }
 0xc41   : > { %v15926_v53 = vpop.permute.xlu1 %5177 }
 0xc42   : > { %5184 = vxpose.xlu1.b32.start [1/2] (short) (narrow) %v15926_v53, 16 }
 0xc45   : > { %v15929_v50 = vpop.permute.xlu1 %5181 }
 0xc46   : > { %5185 = vxpose.xlu1.b32.end [2/2] (short) (narrow) %v15929_v50, 16 }
 0xc4a   : > { %v15932_v14 = vpop.permute.xlu1 %5225 }
 0xc4b   : > { %5232 = vxpose.xlu0.b32.start [1/2] (short) (narrow) %v15932_v14, 16 }
 0xc4f   : > { %5233 = vxpose.xlu0.b32.end [2/2] (short) (narrow) %v15935_v45, 16 }
 0xc64   : > { %13923 = vset.pattern.permute.xlu1 %v17806_v22 }
 0xc78   : > { %13921 = vset.pattern.permute.xlu0 %v17816_v46 }
 0xc8c   : > { %v4912_v51 = vpop.trf.xlu0 }
 0xc8d   : > { %v4928_v49 = vsub.f32 %v15855_v26, %v4912_v51 }
 0xc8f   : > { %v4930_v26 = vand.u32 2147483647, %v4928_v49 }
 0xc90   : > { %v4913_v12 = vpop.trf.xlu0 }
 0xc91   : > { %v4929_v21 = vsub.f32 %v15905_v15, %v4913_v12 }
 0xc95   : > { %v4960_v24 = vpop.trf.xlu1 }
 0xc96   : > { %v4976_v35 = vsub.f32 %v4938_v8, %v4960_v24 }
 0xc98   : > { %v4978_v61 = vand.u32 2147483647, %v4976_v35 }
 0xc99   : > { %v4961_v62 = vpop.trf.xlu1 }
 0xc9a   : > { %v5008_v40 = vpop.trf.xlu0  ;;  %v4977_v17 = vsub.f32 %v4942_v25, %v4961_v62  ;;  %v4980_v15 = vmul.f32 %v4978_v61, %v15407_v44 }
 0xc9b   : > { %v5024_v2 = vsub.f32 %v4986_v38, %v5008_v40 }
 0xc9c   : > { %v4979_v51 = vand.u32 2147483647, %v4977_v17 }
 0xc9d   : > { %v5026_v38 = vand.u32 2147483647, %v5024_v2 }
 0xc9e   : > { %v5009_v5 = vpop.trf.xlu0 }
 0xc9f   : > { %v5025_v36 = vsub.f32 %v15908_v48, %v5009_v5 }
 0xca3   : > { %v5056_v1 = vpop.trf.xlu0 }
 0xca4   : > { %v5072_v20 = vsub.f32 %v5034_v9, %v5056_v1 }
 0xca6   : > { %v5074_v48 = vand.u32 2147483647, %v5072_v20 }
 0xca7   : > { %v5057_v41 = vpop.trf.xlu0 }
 0xca8   : > { %v5073_v40 = vsub.f32 %v15911_v23, %v5057_v41  ;;  %v4931_v23 = vand.u32 2147483647, %v4929_v21  ;;  %v4981_v41 = vmul.f32 %v4979_v51, %v15407_v44  ;;  %v5076_v49 = vmul.f32 %v5074_v48, %v15423_v56 }
 0xcaa   : > { %v5075_v35 = vand.u32 2147483647, %v5073_v40 }
 0xcac   : > { %v5104_v39 = vpop.trf.xlu1 }
 0xcad   : > { %v5120_v8 = vsub.f32 %v15914_v16, %v5104_v39  ;;  %v5027_v16 = vand.u32 2147483647, %v5025_v36  ;;  %v5077_v36 = vmul.f32 %v5075_v35, %v15423_v56 }
 0xcaf   : > { %v5122_v62 = vand.u32 2147483647, %v5120_v8 }
 0xcb0   : > { %v5105_v32 = vpop.trf.xlu1 }
 0xcb1   : > { %v5121_v24 = vsub.f32 %v15917_v52, %v5105_v32  ;;  %v5124_v32 = vmul.f32 %v5122_v62, %v15430_v59 }
 0xcb3   : > { %v5123_v61 = vand.u32 2147483647, %v5121_v24 }
 0xcb5   : > { %v5152_v57 = vpop.trf.xlu0  ;;  %v5125_v51 = vmul.f32 %v5123_v61, %v15430_v59 }
 0xcb6   : > { %v5168_v9 = vsub.f32 %v15920_v31, %v5152_v57  ;;  %v5028_v31 = vmul.f32 %v5026_v38, %v15414_v47  ;;  %v5029_v57 = vmul.f32 %v5027_v16, %v15414_v47 }
 0xcb8   : > { %v13151_v33 = vpop.f32.mrf.mxu0  ;;  %v5170_v2 = vand.u32 2147483647, %v5168_v9 }
 0xcb9   : > { %4570 = vst.msk [vmem:[#allocation2 + $0x28] sm:$0xff] %vm1108_vm0, %v13151_v33  ;;  %13152 = vmatprep.subr.mxu1 %v13151_v33  ;;  %v5153_v1 = vpop.trf.xlu0 }
 0xcba   : > { %v4560_v13 = vpop.f32.mrf.mxu0  ;;  %13153 = vmatpush3.msra.mxu1 %v13151_v33  ;;  %v5169_v33 = vsub.f32 %v15923_v11, %v5153_v1  ;;  %v5172_v38 = vmul.f32 %v5170_v2, %v15439_v4 }
 0xcbb   : > { %4569 = vst.msk [vmem:[#allocation2 + $0x20] sm:$0xff] %vm1108_vm0, %v4560_v13  ;;  %13154 = vmatprep.subr.mxu1 %v4560_v13 }
 0xcbc   : > { %13155 = vmatpush3.msra.mxu1 %v4560_v13  ;;  %v13165_v25 = vpop.f32.mrf.mxu0  ;;  %v5171_v8 = vand.u32 2147483647, %v5169_v33 }
 0xcbd   : > { %4728 = vst.msk [vmem:[#allocation2 + $0x128] sm:$0xff] %vm1108_vm0, %v13165_v25  ;;  %13157 = vmatmul.mubr.msk.f32.vlgmr.msra.gmra.mxu1 %vm1446_vm10, %v15886_v19  ;;  %13166 = vmatprep.subr.mxu1 %v15642_v6  ;;  %v4932_v19 = vmul.f32 %v4930_v26, %v15517_v55 }
 0xcbe   : > { %v5200_v12 = vpop.trf.xlu1  ;;  %v4718_v5 = vpop.f32.mrf.mxu0  ;;  %13167 = vmatpush3.msra.mxu1 %v15642_v6  ;;  %13170 = vmatprep.mubr.msk.f32.mxu1 %vm1446_vm10, %v15584_v43 }
 0xcbf   : > { %4727 = vst.msk [vmem:[#allocation2 + $0x120] sm:$0xff] %vm1108_vm0, %v4718_v5  ;;  %13168 = vmatprep.subr.mxu1 %v15638_v60  ;;  %v5216_v39 = vsub.f32 %v15926_v53, %v5200_v12  ;;  %v4982_v52 = vadd.f32 %v4980_v15, %v4932_v19 }
 0xcc0   : > { %13169 = vmatpush3.msra.mxu1 %v15638_v60  ;;  %v13179_v6 = vpop.f32.mrf.mxu0  ;;  %v4933_v60 = vmul.f32 %v4931_v23, %v15517_v55  ;;  %v5173_v23 = vmul.f32 %v5171_v8, %v15439_v4 }
 0xcc1   : > { %4882 = vst.msk [vmem:[#allocation2 + $0x228] sm:$0xff] %vm1108_vm0, %v13179_v6  ;;  %13171 = vmatmul.mubr.msk.f32.vlgmr.msra.gmra.mxu1 %vm1446_vm10, %v17817_v63  ;;  %13180 = vmatprep.subr.mxu1 %v15842_v37  ;;  %v5030_v20 = vadd.f32 %v5028_v31, %v4982_v52  ;;  %v5218_v13 = vand.u32 2147483647, %v5216_v39 }
 0xcc2   : > { %v5201_v53 = vpop.trf.xlu1  ;;  %v4872_v17 = vpop.f32.mrf.mxu0  ;;  %13181 = vmatpush3.msra.mxu1 %v15842_v37  ;;  %v4983_v11 = vadd.f32 %v4981_v41, %v4933_v60 }
 0xcc3   : > { %4881 = vst.msk [vmem:[#allocation2 + $0x220] sm:$0xff] %vm1108_vm0, %v4872_v17  ;;  %13182 = vmatprep.subr.mxu1 %v15836_v3  ;;  %v5217_v21 = vsub.f32 %v15929_v50, %v5201_v53  ;;  %v5078_v26 = vadd.f32 %v5076_v49, %v5030_v20  ;;  %v5220_v48 = vmul.f32 %v5218_v13, %v15480_v18  ;;  %v15992_v20 = vld [vmem:[%s15117_s28 + $0x48] sm:$0xff] }
 0xcc4   : > { %13183 = vmatpush3.msra.mxu1 %v15836_v3  ;;  %v5031_v25 = vadd.f32 %v5029_v57, %v4983_v11 }
 0xcc5   : > { %13194 = vmatprep.subr.mxu1 %v15842_v37  ;;  %v5126_v15 = vadd.f32 %v5124_v32, %v5078_v26  ;;  %v5219_v9 = vand.u32 2147483647, %v5217_v21  ;;  %v15998_v32 = vld [vmem:[%s15117_s28 + $0x40] sm:$0xff] }
 0xcc6   : > { %v5079_v12 = vadd.f32 %v5077_v36, %v5031_v25 }
 0xcc7   : > { %v5248_v40 = vpop.trf.xlu0  ;;  %v5174_v5 = vadd.f32 %v5172_v38, %v5126_v15  ;;  %v5221_v31 = vmul.f32 %v5219_v9, %v15480_v18 }
 0xcc8   : > { %v5264_v50 = vsub.f32 %v15932_v14, %v5248_v40  ;;  %v5127_v24 = vadd.f32 %v5125_v51, %v5079_v12 }
 0xcc9   : > { %v5222_v19 = vadd.f32 %v5220_v48, %v5174_v5  ;;  %v14120_v48 = vld [vmem:[%s15117_s28 + $0x28] sm:$0xff] }
 0xcca   : > { %v5266_v16 = vand.u32 2147483647, %v5264_v50  ;;  %v5175_v6 = vadd.f32 %v5173_v23, %v5127_v24  ;;  %v14121_v23 = vld [vmem:[%s15117_s28 + $0x20] sm:$0xff] }
 0xccb   : > { %v5249_v1 = vpop.trf.xlu0 }
 0xccc   : > { %v5268_v62 = vmul.f32 %v5266_v16, %v15537_v42  ;;  %v5265_v39 = vsub.f32 %v15935_v45, %v5249_v1  ;;  %v5223_v52 = vadd.f32 %v5221_v31, %v5175_v6 }
 0xcce   : > { %v5270_v41 = vadd.f32 %v5268_v62, %v5222_v19  ;;  %v5267_v35 = vand.u32 2147483647, %v5265_v39 }
 0xcd0   : > { %v5272_v14 = vsub.f32 0.0, %v5270_v41  ;;  %v5269_v49 = vmul.f32 %v5267_v35, %v15537_v42 }
 0xcd2   : > { %v5274_v2 = vmul.f32 1.442695, %v5272_v14  ;;  %v5271_v33 = vadd.f32 %v5269_v49, %v5223_v52 }
 0xcd4   : > { %14011 = vpow2.f32 %v5274_v2  ;;  %v5273_v53 = vsub.f32 0.0, %v5271_v33 }
 0xcd6   : > { %v5276_v17 = vmul.f32 1.442695, %v5273_v53 }
 0xcd8   : > { %14013 = vpow2.f32 %v5276_v17 }
 0xce1   : > { %v14012_v60 = vpop.eup %14011 }
 0xce2   : > { %v5278_v57 = vsel %vm1446_vm10, %v14012_v60, 0.0 }
 0xce3   : > { %5279 = vadd.xlane.f32.xlu1 %v5278_v57 }
 0xce5   : > { %v14014_v45 = vpop.eup %14013 }
 0xce6   : > { %v5281_v61 = vsel %vm1446_vm10, %v14014_v45, 0.0 }
 0xce7   : > { %5282 = vadd.xlane.f32.xlu0 %v5281_v61 }
 0xcf4   : > { %5775 = vperm.xlu1 %13923, %v15992_v20  }
 0xcf8   : > { %13927 = vset.pattern.permute.xlu1 %v17808_v54 }
 0xcf9   : > { %5919 = vperm.xlu1 %13927, %v15992_v20  }
 0xcfd   : > { %5722 = vperm.xlu0 %13921, %v15998_v32   ;;  %13928 = vset.pattern.permute.xlu1 %v17810_v28 }
 0xcfe   : > { %5963 = vperm.xlu1 %13928, %v15998_v32  }
 0xd01   : > { %5727 = vperm.xlu0 %13921, %v15992_v20  }
 0xd02   : > { %13930 = vset.pattern.permute.xlu1 %v17811_v29 }
 0xd03   : > { %6011 = vperm.xlu1 %13930, %v15998_v32  }
 0xd05   : > { %13922 = vset.pattern.permute.xlu0 %v17806_v22 }
 0xd06   : > { %5771 = vperm.xlu0 %13922, %v15998_v32  }
 0xd07   : > { %6015 = vperm.xlu1 %13930, %v15992_v20  }
 0xd0a   : > { %13924 = vset.pattern.permute.xlu0 %v17807_v0 }
 0xd0b   : > { %5819 = vperm.xlu0 %13924, %v15998_v32   ;;  %13932 = vset.pattern.permute.xlu1 %v17812_v30 }
 0xd0c   : > { %6063 = vperm.xlu1 %13932, %v15992_v20  }
 0xd0f   : > { %5823 = vperm.xlu0 %13924, %v15992_v20  }
 0xd13   : > { %13925 = vset.pattern.permute.xlu0 %v17809_v27 }
 0xd14   : > { %5867 = vperm.xlu0 %13925, %v15998_v32  }
 0xd18   : > { %5871 = vperm.xlu0 %13925, %v15992_v20  }
 0xd1c   : > { %13926 = vset.pattern.permute.xlu0 %v17808_v54 }
 0xd1d   : > { %5915 = vperm.xlu0 %13926, %v15998_v32  }
 0xd21   : > { %13929 = vset.pattern.permute.xlu0 %v17810_v28 }
 0xd22   : > { %5967 = vperm.xlu0 %13929, %v15992_v20  }
 0xd26   : > { %13931 = vset.pattern.permute.xlu0 %v17812_v30 }
 0xd27   : > { %6059 = vperm.xlu0 %13931, %v15998_v32  }
 0xd6c   : > { %v5280_v13 = vpop.xlane.xlu1 %5279 }
 0xd6d   : > { %14015 = vrcp.f32 %v5280_v13 }
 0xd70   : > { %v5283_v21 = vpop.xlane.xlu0 %5282  ;;  %v5776_v19 = vpop.permute.xlu1 %5775 }
 0xd71   : > { %14017 = vrcp.f32 %v5283_v21 }
 0xd74   : > { %v16044_v62 = vpop.permute.xlu1 %5919 }
 0xd78   : > { %v16023_v11 = vpop.permute.xlu0 %5722 }
 0xd79   : > { %v16049_v41 = vpop.permute.xlu1 %5963 }
 0xd7a   : > { %v14016_v36 = vpop.eup %14015 }
 0xd7b   : > { %v5285_v26 = vmul.f32 %v14016_v36, %v14012_v60 }
 0xd7c   : > { %v16025_v38 = vpop.permute.xlu0 %5727 }
 0xd7d   : > { %5288 = vxpose.xlu1.b32.start [1/2] (short) (narrow) %v5285_v26, 16  ;;  %v13158_v8 = vpop.f32.mrf.mxu1 }
 0xd7e   : > { %v14018_v25 = vpop.eup %14017  ;;  %v4647_v51 = vmul.f32 2.0, %v13158_v8  ;;  %v16055_v52 = vpop.permute.xlu1 %6011 }
 0xd7f   : > { %v4637_v40 = vpop.f32.mrf.mxu1  ;;  %v5287_v15 = vmul.f32 %v14018_v25, %v14014_v45 }
 0xd80   : > { %v4649_v9 = vsub.f32 %v4647_v51, %v14120_v48  ;;  %v4646_v50 = vmul.f32 2.0, %v4637_v40 }
 0xd81   : > { %5289 = vxpose.xlu1.b32.end [2/2] (short) (narrow) %v5287_v15, 16  ;;  %v13172_v12 = vpop.f32.mrf.mxu1  ;;  %v16028_v5 = vpop.permute.xlu0 %5771 }
 0xd82   : > { %4651 = vst.msk [vmem:[#allocation2 + $0xa8] sm:$0xff] %vm1108_vm0, %v4649_v9  ;;  %v4648_v16 = vsub.f32 %v4646_v50, %v14121_v23  ;;  %4805 = vst.msk [vmem:[#allocation2 + $0x1a8] sm:$0xff] %vm1108_vm0, %v13172_v12  ;;  %v16061_v49 = vpop.permute.xlu1 %6015 }
 0xd83   : > { %v4795_v24 = vpop.f32.mrf.mxu1 }
 0xd84   : > { %4650 = vst.msk [vmem:[#allocation2 + $0xa0] sm:$0xff] %vm1108_vm0, %v4648_v16  ;;  %4804 = vst.msk [vmem:[#allocation2 + $0x1a0] sm:$0xff] %vm1108_vm0, %v4795_v24 }
 0xd85   : > { %5730 = vxpose.xlu1.b32.start [1/2] (short) (narrow) %v16023_v11, 16 }
 0xd86   : > { %v16036_v1 = vpop.permute.xlu0 %5819 }
 0xd87   : > { %5826 = vxpose.xlu0.b32.start [1/2] (short) (narrow) %v16036_v1, 16  ;;  %v16067_v33 = vpop.permute.xlu1 %6063 }
 0xd89   : > { %5731 = vxpose.xlu1.b32.end [2/2] (short) (narrow) %v16025_v38, 16 }
 0xd8a   : > { %v16040_v31 = vpop.permute.xlu0 %5823 }
 0xd8b   : > { %5827 = vxpose.xlu0.b32.end [2/2] (short) (narrow) %v16040_v31, 16 }
 0xd8d   : > { %5778 = vxpose.xlu1.b32.start [1/2] (short) (narrow) %v16028_v5, 16 }
 0xd8f   : > { %v5868_v39 = vpop.permute.xlu0 %5867 }
 0xd90   : > { %5874 = vxpose.xlu0.b32.start [1/2] (short) (narrow) %v5868_v39, 16 }
 0xd91   : > { %5779 = vxpose.xlu1.b32.end [2/2] (short) (narrow) %v5776_v19, 16 }
 0xd93   : > { %v16046_v6 = vpop.permute.xlu0 %5871 }
 0xd94   : > { %5875 = vxpose.xlu0.b32.end [2/2] (short) (narrow) %v16046_v6, 16 }
 0xd95   : > { %5970 = vxpose.xlu1.b32.start [1/2] (short) (narrow) %v16049_v41, 16 }
 0xd98   : > { %v16052_v35 = vpop.permute.xlu0 %5915 }
 0xd99   : > { %5922 = vxpose.xlu0.b32.start [1/2] (short) (narrow) %v16052_v35, 16 }
 0xd9d   : > { %5923 = vxpose.xlu0.b32.end [2/2] (short) (narrow) %v16044_v62, 16  ;;  %v16058_v14 = vpop.permute.xlu0 %5967 }
 0xd9e   : > { %5971 = vxpose.xlu1.b32.end [2/2] (short) (narrow) %v16058_v14, 16 }
 0xda1   : > { %6018 = vxpose.xlu0.b32.start [1/2] (short) (narrow) %v16055_v52, 16 }
 0xda2   : > { %v16064_v2 = vpop.permute.xlu0 %6059 }
 0xda3   : > { %6066 = vxpose.xlu1.b32.start [1/2] (short) (narrow) %v16064_v2, 16 }
 0xda5   : > { %6019 = vxpose.xlu0.b32.end [2/2] (short) (narrow) %v16061_v49, 16 }
 0xda7   : > { %6067 = vxpose.xlu1.b32.end [2/2] (short) (narrow) %v16067_v33, 16 }
 0xdce   : > { %13933 = vset.pattern.permute.xlu0 %v17816_v46 }
 0xdf9   : > { %v5304_v53 = vpop.trf.xlu1 }
 0xdfa   : > { %v5320_v17 = vmin.f32 %v5285_v26, %v5304_v53 }
 0xdfc   : > { %13184 = vmatprep.mubr.msk.f32.mxu1 %vm1446_vm10, %v5320_v17  ;;  %13191 = vmatprep.mubr.msk.f32.mxu0 %vm1446_vm10, %v5320_v17 }
 0xdfd   : > { %v5305_v60 = vpop.trf.xlu1 }
 0xdfe   : > { %v16074_v57 = vmin.f32 %v5287_v15, %v5305_v60 }
 0xe00   : > { %13185 = vmatmul.mubr.msk.f32.vlgmr.msra.gmra.mxu1 %vm1446_vm10, %v16074_v57 }
 0xe01   : > { %v5746_v45 = vpop.trf.xlu1  ;;  %13195 = vmatpush3.msra.mxu1 %v15842_v37  ;;  %13198 = vmatprep.mubr.msk.f32.mxu1 %vm1446_vm10, %v15702_v10 }
 0xe02   : > { %13196 = vmatprep.subr.mxu1 %v15836_v3  ;;  %v5762_v36 = vsub.f32 %v16023_v11, %v5746_v45 }
 0xe03   : > { %v5842_v61 = vpop.trf.xlu0  ;;  %13197 = vmatpush3.msra.mxu1 %v15836_v3 }
 0xe04   : > { %13199 = vmatmul.mubr.msk.f32.vlgmr.msra.gmra.mxu1 %vm1446_vm10, %v15710_v34  ;;  %13208 = vmatprep.subr.mxu1 %v15842_v37  ;;  %v5764_v40 = vand.u32 2147483647, %v5762_v36  ;;  %v5858_v15 = vsub.f32 %v16036_v1, %v5842_v61 }
 0xe05   : > { %v5747_v13 = vpop.trf.xlu1  ;;  %13209 = vmatpush3.msra.mxu1 %v15842_v37  ;;  %13212 = vmatprep.mubr.msk.f32.mxu1 %vm1446_vm10, %v15714_v7 }
 0xe06   : > { %13210 = vmatprep.subr.mxu1 %v15836_v3  ;;  %v5763_v9 = vsub.f32 %v16025_v38, %v5747_v13  ;;  %v5766_v53 = vmul.f32 %v5764_v40, %v15517_v55  ;;  %v5860_v11 = vand.u32 2147483647, %v5858_v15 }
 0xe07   : > { %v5843_v21 = vpop.trf.xlu0  ;;  %13211 = vmatpush3.msra.mxu1 %v15836_v3 }
 0xe08   : > { %13213 = vmatmul.mubr.msk.f32.vlgmr.msra.gmra.mxu1 %vm1446_vm10, %v15724_v58  ;;  %v5765_v17 = vand.u32 2147483647, %v5763_v9  ;;  %v5862_v38 = vmul.f32 %v5860_v11, %v15414_v47 }
 0xe09   : > { %v5794_v26 = vpop.trf.xlu1 }
 0xe0a   : > { %v5810_v8 = vsub.f32 %v16028_v5, %v5794_v26  ;;  %v5859_v5 = vsub.f32 %v16040_v31, %v5843_v21  ;;  %v5767_v61 = vmul.f32 %v5765_v17, %v15517_v55 }
 0xe0c   : > { %v5812_v25 = vand.u32 2147483647, %v5810_v8  ;;  %v5890_v51 = vpop.trf.xlu0 }
 0xe0d   : > { %v5795_v48 = vpop.trf.xlu1  ;;  %v5906_v23 = vsub.f32 %v5868_v39, %v5890_v51  ;;  %v5861_v39 = vand.u32 2147483647, %v5859_v5 }
 0xe0e   : > { %v5811_v50 = vsub.f32 %v5776_v19, %v5795_v48  ;;  %v5814_v12 = vmul.f32 %v5812_v25, %v15407_v44 }
 0xe0f   : > { %v5908_v45 = vand.u32 2147483647, %v5906_v23 }
 0xe10   : > { %v5813_v16 = vand.u32 2147483647, %v5811_v50  ;;  %v5891_v24 = vpop.trf.xlu0  ;;  %v5816_v60 = vadd.f32 %v5814_v12, %v5766_v53 }
 0xe11   : > { %v5907_v1 = vsub.f32 %v16046_v6, %v5891_v24  ;;  %v5910_v25 = vmul.f32 %v5908_v45, %v15423_v56  ;;  %v5863_v6 = vmul.f32 %v5861_v39, %v15414_v47 }
 0xe12   : > { %v5815_v36 = vmul.f32 %v5813_v16, %v15407_v44  ;;  %v5864_v8 = vadd.f32 %v5862_v38, %v5816_v60 }
 0xe13   : > { %v5909_v51 = vand.u32 2147483647, %v5907_v1 }
 0xe14   : > { %v5817_v21 = vadd.f32 %v5815_v36, %v5767_v61  ;;  %v5912_v23 = vadd.f32 %v5910_v25, %v5864_v8 }
 0xe15   : > { %v5938_v19 = vpop.trf.xlu0  ;;  %v5911_v24 = vmul.f32 %v5909_v51, %v15423_v56 }
 0xe16   : > { %v5954_v13 = vsub.f32 %v16052_v35, %v5938_v19  ;;  %v5986_v26 = vpop.trf.xlu1  ;;  %v5865_v16 = vadd.f32 %v5863_v6, %v5817_v21 }
 0xe17   : > { %v6002_v31 = vsub.f32 %v16049_v41, %v5986_v26 }
 0xe18   : > { %v5956_v40 = vand.u32 2147483647, %v5954_v13  ;;  %v5913_v1 = vadd.f32 %v5911_v24, %v5865_v16 }
 0xe19   : > { %v6004_v15 = vand.u32 2147483647, %v6002_v31  ;;  %v5939_v48 = vpop.trf.xlu0 }
 0xe1a   : > { %v5958_v9 = vmul.f32 %v5956_v40, %v15430_v59  ;;  %v5955_v50 = vsub.f32 %v16044_v62, %v5939_v48  ;;  %v5987_v12 = vpop.trf.xlu1 }
 0xe1b   : > { %v6003_v35 = vsub.f32 %v16058_v14, %v5987_v12  ;;  %v6006_v11 = vmul.f32 %v6004_v15, %v15439_v4 }
 0xe1c   : > { %v5957_v53 = vand.u32 2147483647, %v5955_v50  ;;  %v5960_v41 = vadd.f32 %v5958_v9, %v5912_v23 }
 0xe1d   : > { %v6005_v17 = vand.u32 2147483647, %v6003_v35  ;;  %v6034_v5 = vpop.trf.xlu0 }
 0xe1e   : > { %v5959_v60 = vmul.f32 %v5957_v53, %v15430_v59  ;;  %v6050_v45 = vsub.f32 %v16055_v52, %v6034_v5  ;;  %v6008_v19 = vadd.f32 %v6006_v11, %v5960_v41  ;;  %v16126_v41 = vld [vmem:[%s15117_s28 + $0x50] sm:$0xff]  ;;  %v16130_v11 = vld [vmem:[%s15117_s28 + $0x58] sm:$0xff] }
 0xe1f   : > { %v6082_v36 = vpop.trf.xlu1  ;;  %v6007_v14 = vmul.f32 %v6005_v17, %v15439_v4 }
 0xe20   : > { %v6052_v62 = vand.u32 2147483647, %v6050_v45  ;;  %v6098_v38 = vsub.f32 %v16064_v2, %v6082_v36  ;;  %v5961_v39 = vadd.f32 %v5959_v60, %v5913_v1 }
 0xe21   : > { %v6035_v61 = vpop.trf.xlu0 }
 0xe22   : > { %v6054_v13 = vmul.f32 %v6052_v62, %v15480_v18  ;;  %v6100_v26 = vand.u32 2147483647, %v6098_v38  ;;  %v6051_v8 = vsub.f32 %v16061_v49, %v6035_v61  ;;  %v6009_v40 = vadd.f32 %v6007_v14, %v5961_v39 }
 0xe23   : > { %v6083_v25 = vpop.trf.xlu1 }
 0xe24   : > { %v6056_v31 = vadd.f32 %v6054_v13, %v6008_v19  ;;  %v6102_v21 = vmul.f32 %v6100_v26, %v15537_v42  ;;  %v6053_v52 = vand.u32 2147483647, %v6051_v8  ;;  %v6099_v51 = vsub.f32 %v16067_v33, %v6083_v25 }
 0xe26   : > { %v6104_v15 = vadd.f32 %v6102_v21, %v6056_v31  ;;  %v6055_v2 = vmul.f32 %v6053_v52, %v15480_v18  ;;  %v6101_v48 = vand.u32 2147483647, %v6099_v51 }
 0xe28   : > { %v6106_v6 = vsub.f32 0.0, %v6104_v15  ;;  %v6057_v9 = vadd.f32 %v6055_v2, %v6009_v40  ;;  %v6103_v50 = vmul.f32 %v6101_v48, %v15537_v42 }
 0xe2a   : > { %v6108_v12 = vmul.f32 1.442695, %v6106_v6  ;;  %v6105_v49 = vadd.f32 %v6103_v50, %v6057_v9  ;;  %v14122_v6 = vld [vmem:[%s15117_s28 + $0x38] sm:$0xff] }
 0xe2c   : > { %14019 = vpow2.f32 %v6108_v12  ;;  %v6107_v23 = vsub.f32 0.0, %v6105_v49  ;;  %v14123_v49 = vld [vmem:[%s15117_s28 + $0x30] sm:$0xff] }
 0xe2e   : > { %v6110_v35 = vmul.f32 1.442695, %v6107_v23 }
 0xe30   : > { %14021 = vpow2.f32 %v6110_v35 }
 0xe39   : > { %v14020_v16 = vpop.eup %14019 }
 0xe3a   : > { %v6112_v33 = vsel %vm1446_vm10, %v14020_v16, 0.0 }
 0xe3b   : > { %6113 = vadd.xlane.f32.xlu0 %v6112_v33 }
 0xe3d   : > { %v14022_v24 = vpop.eup %14021 }
 0xe3e   : > { %v6115_v53 = vsel %vm1446_vm10, %v14022_v24, 0.0 }
 0xe3f   : > { %6116 = vadd.xlane.f32.xlu1 %v6115_v53 }
 0xe51   : > { %6556 = vperm.xlu0 %13933, %v16126_v41  }
 0xe55   : > { %6561 = vperm.xlu0 %13933, %v16130_v11  }
 0xe59   : > { %13935 = vset.pattern.permute.xlu0 %v17807_v0 }
 0xe5a   : > { %6653 = vperm.xlu0 %13935, %v16126_v41  }
 0xe5e   : > { %13942 = vset.pattern.permute.xlu0 %v17812_v30 }
 0xe5f   : > { %6897 = vperm.xlu0 %13942, %v16130_v11  }
 0xec0   : > { %v13186_v17 = vpop.f32.mrf.mxu1 }
 0xec1   : > { %5404 = vst.msk [vmem:[#allocation2 + $0x38] sm:$0xff] %vm1108_vm0, %v13186_v17  ;;  %13187 = vmatprep.subr.mxu0 %v13186_v17 }
 0xec2   : > { %v5394_v5 = vpop.f32.mrf.mxu1  ;;  %13188 = vmatpush3.msra.mxu0 %v13186_v17 }
 0xec3   : > { %5403 = vst.msk [vmem:[#allocation2 + $0x30] sm:$0xff] %vm1108_vm0, %v5394_v5  ;;  %13189 = vmatprep.subr.mxu0 %v5394_v5 }
 0xec4   : > { %v6114_v60 = vpop.xlane.xlu0 %6113  ;;  %13190 = vmatpush3.msra.mxu0 %v5394_v5  ;;  %v13200_v45 = vpop.f32.mrf.mxu1 }
 0xec5   : > { %14023 = vrcp.f32 %v6114_v60  ;;  %5562 = vst.msk [vmem:[#allocation2 + $0x138] sm:$0xff] %vm1108_vm0, %v13200_v45  ;;  %13192 = vmatmul.mubr.msk.f32.vlgmr.msra.gmra.mxu0 %vm1446_vm10, %v16074_v57  ;;  %13201 = vmatprep.subr.mxu0 %v15842_v37 }
 0xec6   : > { %v5552_v36 = vpop.f32.mrf.mxu1  ;;  %13202 = vmatpush3.msra.mxu0 %v15842_v37  ;;  %13205 = vmatprep.mubr.msk.f32.mxu0 %vm1446_vm10, %v15584_v43 }
 0xec7   : > { %5561 = vst.msk [vmem:[#allocation2 + $0x130] sm:$0xff] %vm1108_vm0, %v5552_v36  ;;  %13203 = vmatprep.subr.mxu0 %v15836_v3 }
 0xec8   : > { %v6117_v1 = vpop.xlane.xlu1 %6116  ;;  %13204 = vmatpush3.msra.mxu0 %v15836_v3  ;;  %v13214_v62 = vpop.f32.mrf.mxu1 }
 0xec9   : > { %14025 = vrcp.f32 %v6117_v1  ;;  %5716 = vst.msk [vmem:[#allocation2 + $0x238] sm:$0xff] %vm1108_vm0, %v13214_v62  ;;  %13206 = vmatmul.mubr.msk.f32.vlgmr.msra.gmra.mxu0 %vm1446_vm10, %v17817_v63  ;;  %13215 = vmatprep.subr.mxu0 %v15992_v20 }
 0xeca   : > { %v5706_v37 = vpop.f32.mrf.mxu1  ;;  %13216 = vmatpush3.msra.mxu0 %v15992_v20 }
 0xecb   : > { %5715 = vst.msk [vmem:[#allocation2 + $0x230] sm:$0xff] %vm1108_vm0, %v5706_v37  ;;  %13217 = vmatprep.subr.mxu0 %v15998_v32 }
 0xecc   : > { %v16156_v57 = vpop.permute.xlu0 %6556  ;;  %13218 = vmatpush3.msra.mxu0 %v15998_v32 }
 0xecd   : > { %6564 = vxpose.xlu0.b32.start [1/2] (short) (narrow) %v16156_v57, 16  ;;  %13229 = vmatprep.subr.mxu0 %v15992_v20 }
 0xed0   : > { %v16161_v3 = vpop.permute.xlu0 %6561 }
 0xed1   : > { %6565 = vxpose.xlu0.b32.end [2/2] (short) (narrow) %v16161_v3, 16 }
 0xed2   : > { %v14024_v38 = vpop.eup %14023 }
 0xed3   : > { %v6119_v19 = vmul.f32 %v14024_v38, %v14020_v16 }
 0xed5   : > { %6122 = vxpose.xlu1.b32.start [1/2] (short) (narrow) %v6119_v19, 16  ;;  %v16164_v14 = vpop.permute.xlu0 %6653 }
 0xed6   : > { %v14026_v61 = vpop.eup %14025  ;;  %6660 = vxpose.xlu0.b32.start [1/2] (short) (narrow) %v16164_v14, 16 }
 0xed7   : > { %v6121_v39 = vmul.f32 %v14026_v61, %v14022_v24 }
 0xed9   : > { %6123 = vxpose.xlu1.b32.end [2/2] (short) (narrow) %v6121_v39, 16 }
 0xeda   : > { %v16237_v45 = vpop.permute.xlu0 %6897 }
 0xef7   : > { %13934 = vset.pattern.permute.xlu1 %v17806_v22 }
 0xef8   : > { %6605 = vperm.xlu1 %13934, %v16126_v41  }
 0xefc   : > { %6609 = vperm.xlu1 %13934, %v16130_v11  }
 0xf00   : > { %13936 = vset.pattern.permute.xlu1 %v17807_v0 }
 0xf01   : > { %6657 = vperm.xlu1 %13936, %v16130_v11  }
 0xf05   : > { %13937 = vset.pattern.permute.xlu1 %v17809_v27 }
 0xf06   : > { %6701 = vperm.xlu1 %13937, %v16126_v41  }
 0xf0a   : > { %6705 = vperm.xlu1 %13937, %v16130_v11  }
 0xf0e   : > { %13938 = vset.pattern.permute.xlu1 %v17808_v54 }
 0xf0f   : > { %6749 = vperm.xlu1 %13938, %v16126_v41  }
 0xf13   : > { %6753 = vperm.xlu1 %13938, %v16130_v11  }
 0xf17   : > { %13939 = vset.pattern.permute.xlu1 %v17810_v28 }
 0xf18   : > { %6797 = vperm.xlu1 %13939, %v16126_v41  }
 0xf1c   : > { %6801 = vperm.xlu1 %13939, %v16130_v11  }
 0xf20   : > { %13940 = vset.pattern.permute.xlu1 %v17811_v29 }
 0xf21   : > { %6845 = vperm.xlu1 %13940, %v16126_v41  }
 0xf25   : > { %6849 = vperm.xlu1 %13940, %v16130_v11  }
 0xf29   : > { %13941 = vset.pattern.permute.xlu1 %v17812_v30 }
 0xf2a   : > { %6893 = vperm.xlu1 %13941, %v16126_v41  }
 0xf49   : > { %v6580_v36 = vpop.trf.xlu0 }
 0xf4d   : > { %v6581_v1 = vpop.trf.xlu0 }
 0xf51   : > { %v6138_v13 = vpop.trf.xlu1 }
 0xf52   : > { %v6154_v26 = vmin.f32 %v6119_v19, %v6138_v13 }
 0xf54   : > { %13219 = vmatprep.mubr.msk.f32.mxu0 %vm1446_vm10, %v6154_v26  ;;  %13226 = vmatprep.mubr.msk.f32.mxu1 %vm1446_vm10, %v6154_v26 }
 0xf55   : > { %v6139_v8 = vpop.trf.xlu1 }
 0xf56   : > { %v16188_v25 = vmin.f32 %v6121_v39, %v6139_v8  ;;  %v6596_v8 = vsub.f32 %v16156_v57, %v6580_v36 }
 0xf58   : > { %13220 = vmatmul.mubr.msk.f32.vlgmr.msra.gmra.mxu0 %vm1446_vm10, %v16188_v25 }
 0xf59   : > { %13230 = vmatpush3.msra.mxu0 %v15992_v20  ;;  %13233 = vmatprep.mubr.msk.f32.mxu0 %vm1446_vm10, %v15702_v10 }
 0xf5a   : > { %13231 = vmatprep.subr.mxu0 %v15998_v32 }
 0xf5b   : > { %13232 = vmatpush3.msra.mxu0 %v15998_v32 }
 0xf5c   : > { %13234 = vmatmul.mubr.msk.f32.vlgmr.msra.gmra.mxu0 %vm1446_vm10, %v15710_v34  ;;  %13243 = vmatprep.subr.mxu0 %v15992_v20 }
 0xf5d   : > { %13244 = vmatpush3.msra.mxu0 %v15992_v20  ;;  %13247 = vmatprep.mubr.msk.f32.mxu0 %vm1446_vm10, %v15714_v7 }
 0xf5e   : > { %13245 = vmatprep.subr.mxu0 %v15998_v32 }
 0xf5f   : > { %13246 = vmatpush3.msra.mxu0 %v15998_v32 }
 0xf60   : > { %13248 = vmatmul.mubr.msk.f32.vlgmr.msra.gmra.mxu0 %vm1446_vm10, %v15724_v58 }
 0xf73   : > { %v6606_v31 = vpop.permute.xlu1 %6605 }
 0xf74   : > { %6612 = vxpose.xlu1.b32.start [1/2] (short) (narrow) %v6606_v31, 16 }
 0xf77   : > { %v6610_v21 = vpop.permute.xlu1 %6609 }
 0xf78   : > { %6613 = vxpose.xlu1.b32.end [2/2] (short) (narrow) %v6610_v21, 16 }
 0xf7c   : > { %v16207_v52 = vpop.permute.xlu1 %6657 }
 0xf7d   : > { %6661 = vxpose.xlu0.b32.end [2/2] (short) (narrow) %v16207_v52, 16 }
 0xf81   : > { %v6702_v51 = vpop.permute.xlu1 %6701 }
 0xf82   : > { %6708 = vxpose.xlu0.b32.start [1/2] (short) (narrow) %v6702_v51, 16 }
 0xf85   : > { %v16210_v40 = vpop.permute.xlu1 %6705  ;;  %v13193_v15 = vpop.f32.mrf.mxu0 }
 0xf86   : > { %v5481_v2 = vmul.f32 2.0, %v13193_v15  ;;  %6709 = vxpose.xlu0.b32.end [2/2] (short) (narrow) %v16210_v40, 16 }
 0xf87   : > { %v5471_v48 = vpop.f32.mrf.mxu0 }
 0xf88   : > { %v5483_v9 = vsub.f32 %v5481_v2, %v14122_v6  ;;  %v5480_v50 = vmul.f32 2.0, %v5471_v48 }
 0xf89   : > { %v13207_v12 = vpop.f32.mrf.mxu0 }
 0xf8a   : > { %5485 = vst.msk [vmem:[#allocation2 + $0xb8] sm:$0xff] %vm1108_vm0, %v5483_v9  ;;  %v5482_v23 = vsub.f32 %v5480_v50, %v14123_v49  ;;  %5639 = vst.msk [vmem:[#allocation2 + $0x1b8] sm:$0xff] %vm1108_vm0, %v13207_v12  ;;  %v6750_v35 = vpop.permute.xlu1 %6749  ;;  %v6597_v12 = vsub.f32 %v16161_v3, %v6581_v1 }
 0xf8b   : > { %6756 = vxpose.xlu1.b32.start [1/2] (short) (narrow) %v6750_v35, 16  ;;  %v5629_v16 = vpop.f32.mrf.mxu0 }
 0xf8c   : > { %5484 = vst.msk [vmem:[#allocation2 + $0xb0] sm:$0xff] %vm1108_vm0, %v5482_v23  ;;  %5638 = vst.msk [vmem:[#allocation2 + $0x1b0] sm:$0xff] %vm1108_vm0, %v5629_v16  ;;  %v6598_v23 = vand.u32 2147483647, %v6596_v8 }
 0xf8e   : > { %v16219_v33 = vpop.permute.xlu1 %6753 }
 0xf8f   : > { %6757 = vxpose.xlu1.b32.end [2/2] (short) (narrow) %v16219_v33, 16 }
 0xf93   : > { %v16222_v24 = vpop.permute.xlu1 %6797 }
 0xf94   : > { %6804 = vxpose.xlu0.b32.start [1/2] (short) (narrow) %v16222_v24, 16 }
 0xf97   : > { %v16225_v53 = vpop.permute.xlu1 %6801 }
 0xf98   : > { %6805 = vxpose.xlu0.b32.end [2/2] (short) (narrow) %v16225_v53, 16 }
 0xf9c   : > { %v16228_v17 = vpop.permute.xlu1 %6845 }
 0xf9d   : > { %6852 = vxpose.xlu1.b32.start [1/2] (short) (narrow) %v16228_v17, 16 }
 0xfa0   : > { %v16231_v5 = vpop.permute.xlu1 %6849 }
 0xfa1   : > { %6853 = vxpose.xlu1.b32.end [2/2] (short) (narrow) %v16231_v5, 16 }
 0xfa5   : > { %v16234_v60 = vpop.permute.xlu1 %6893 }
 0xfa6   : > { %6900 = vxpose.xlu0.b32.start [1/2] (short) (narrow) %v16234_v60, 16 }
 0xfaa   : > { %6901 = vxpose.xlu0.b32.end [2/2] (short) (narrow) %v16237_v45, 16 }
 0xfbf   : > { %13945 = vset.pattern.permute.xlu1 %v17806_v22 }
 0xfd3   : > { %13943 = vset.pattern.permute.xlu0 %v17816_v46 }
 0xff0   : > { %v6628_v38 = vpop.trf.xlu1 }
 0xff1   : > { %v6644_v26 = vsub.f32 %v6606_v31, %v6628_v38 }
 0xff3   : > { %v6646_v6 = vand.u32 2147483647, %v6644_v26 }
 0xff4   : > { %v6629_v61 = vpop.trf.xlu1 }
 0xff5   : > { %v6676_v62 = vpop.trf.xlu0  ;;  %v6645_v2 = vsub.f32 %v6610_v21, %v6629_v61  ;;  %v6648_v57 = vmul.f32 %v6646_v6, %v15407_v44 }
 0xff6   : > { %v6692_v15 = vsub.f32 %v16164_v14, %v6676_v62 }
 0xff7   : > { %v6647_v7 = vand.u32 2147483647, %v6645_v2 }
 0xff8   : > { %v6694_v16 = vand.u32 2147483647, %v6692_v15 }
 0xff9   : > { %v6677_v37 = vpop.trf.xlu0 }
 0xffa   : > { %v6693_v49 = vsub.f32 %v16207_v52, %v6677_v37 }
 0xffc   : > { %v6695_v3 = vand.u32 2147483647, %v6693_v49 }
 0xffe   : > { %v6724_v19 = vpop.trf.xlu0 }
 0xfff   : > { %v6740_v9 = vsub.f32 %v6702_v51, %v6724_v19  ;;  %v6599_v51 = vand.u32 2147483647, %v6597_v12 }
0x1001   : > { %v6742_v36 = vand.u32 2147483647, %v6740_v9 }
0x1002   : > { %v6725_v13 = vpop.trf.xlu0 }
0x1003   : > { %v6741_v34 = vsub.f32 %v16210_v40, %v6725_v13  ;;  %v6696_v40 = vmul.f32 %v6694_v16, %v15414_v47 }
0x1005   : > { %v6743_v19 = vand.u32 2147483647, %v6741_v34  ;;  %v6697_v34 = vmul.f32 %v6695_v3, %v15414_v47 }
0x1007   : > { %v6772_v39 = vpop.trf.xlu1  ;;  %v6745_v6 = vmul.f32 %v6743_v19, %v15423_v56 }
0x1008   : > { %v6788_v58 = vsub.f32 %v6750_v35, %v6772_v39  ;;  %v6600_v35 = vmul.f32 %v6598_v23, %v15517_v55 }
0x100a   : > { %v6790_v37 = vand.u32 2147483647, %v6788_v58  ;;  %v6650_v39 = vadd.f32 %v6648_v57, %v6600_v35  ;;  %v6601_v58 = vmul.f32 %v6599_v51, %v15517_v55 }
0x100b   : > { %v6773_v50 = vpop.trf.xlu1 }
0x100c   : > { %v6789_v52 = vsub.f32 %v16219_v33, %v6773_v50  ;;  %v6744_v33 = vmul.f32 %v6742_v36, %v15423_v56  ;;  %v6792_v15 = vmul.f32 %v6790_v37, %v15430_v59 }
0x1010   : > { %v6820_v48 = vpop.trf.xlu0 }
0x1011   : > { %v6836_v14 = vsub.f32 %v16222_v24, %v6820_v48  ;;  %v6649_v24 = vmul.f32 %v6647_v7, %v15407_v44  ;;  %v6791_v7 = vand.u32 2147483647, %v6789_v52 }
0x1013   : > { %v6838_v13 = vand.u32 2147483647, %v6836_v14  ;;  %v6793_v23 = vmul.f32 %v6791_v7, %v15430_v59 }
0x1014   : > { %v6821_v1 = vpop.trf.xlu0 }
0x1015   : > { %v6837_v26 = vsub.f32 %v16225_v53, %v6821_v1  ;;  %v6698_v53 = vadd.f32 %v6696_v40, %v6650_v39  ;;  %v6840_v12 = vmul.f32 %v6838_v13, %v15439_v4 }
0x1017   : > { %v6746_v50 = vadd.f32 %v6744_v33, %v6698_v53  ;;  %v6839_v49 = vand.u32 2147483647, %v6837_v26 }
0x1018   : > { %v13221_v31 = vpop.f32.mrf.mxu0 }
0x1019   : > { %6238 = vst.msk [vmem:[#allocation2 + $0x48] sm:$0xff] %vm1108_vm0, %v13221_v31  ;;  %v6868_v21 = vpop.trf.xlu1  ;;  %13222 = vmatprep.subr.mxu1 %v13221_v31  ;;  %v6794_v57 = vadd.f32 %v6792_v15, %v6746_v50  ;;  %v6841_v52 = vmul.f32 %v6839_v49, %v15439_v4  ;;  %v16294_v15 = vld [vmem:[%s15117_s28 + $0x68] sm:$0xff] }
0x101a   : > { %v6228_v62 = vpop.f32.mrf.mxu0  ;;  %13223 = vmatpush3.msra.mxu1 %v13221_v31  ;;  %v6884_v38 = vsub.f32 %v16228_v17, %v6868_v21 }
0x101b   : > { %6237 = vst.msk [vmem:[#allocation2 + $0x40] sm:$0xff] %vm1108_vm0, %v6228_v62  ;;  %13224 = vmatprep.subr.mxu1 %v6228_v62  ;;  %v6842_v3 = vadd.f32 %v6840_v12, %v6794_v57 }
0x101c   : > { %13225 = vmatpush3.msra.mxu1 %v6228_v62  ;;  %v13235_v61 = vpop.f32.mrf.mxu0  ;;  %v6886_v2 = vand.u32 2147483647, %v6884_v38 }
0x101d   : > { %6396 = vst.msk [vmem:[#allocation2 + $0x148] sm:$0xff] %vm1108_vm0, %v13235_v61  ;;  %v6869_v8 = vpop.trf.xlu1  ;;  %13227 = vmatmul.mubr.msk.f32.vlgmr.msra.gmra.mxu1 %vm1446_vm10, %v16188_v25  ;;  %13236 = vmatprep.subr.mxu1 %v15992_v20  ;;  %v6651_v25 = vadd.f32 %v6649_v24, %v6601_v58 }
0x101e   : > { %v6386_v17 = vpop.f32.mrf.mxu0  ;;  %13237 = vmatpush3.msra.mxu1 %v15992_v20  ;;  %13240 = vmatprep.mubr.msk.f32.mxu1 %vm1446_vm10, %v15584_v43  ;;  %v6885_v48 = vsub.f32 %v16231_v5, %v6869_v8  ;;  %v6888_v36 = vmul.f32 %v6886_v2, %v15480_v18  ;;  %v16300_v2 = vld [vmem:[%s15117_s28 + $0x60] sm:$0xff] }
0x101f   : > { %6395 = vst.msk [vmem:[#allocation2 + $0x140] sm:$0xff] %vm1108_vm0, %v6386_v17  ;;  %13238 = vmatprep.subr.mxu1 %v15998_v32  ;;  %v6699_v5 = vadd.f32 %v6697_v34, %v6651_v25 }
0x1020   : > { %13239 = vmatpush3.msra.mxu1 %v15998_v32  ;;  %v13249_v9 = vpop.f32.mrf.mxu0  ;;  %v6887_v14 = vand.u32 2147483647, %v6885_v48  ;;  %v6890_v40 = vadd.f32 %v6888_v36, %v6842_v3 }
0x1021   : > { %6550 = vst.msk [vmem:[#allocation2 + $0x248] sm:$0xff] %vm1108_vm0, %v13249_v9  ;;  %13241 = vmatmul.mubr.msk.f32.vlgmr.msra.gmra.mxu1 %vm1446_vm10, %v17817_v63  ;;  %13250 = vmatprep.subr.mxu1 %v16130_v11  ;;  %v6747_v51 = vadd.f32 %v6745_v6, %v6699_v5 }
0x1022   : > { %v6916_v16 = vpop.trf.xlu0  ;;  %v6540_v31 = vpop.f32.mrf.mxu0  ;;  %13251 = vmatpush3.msra.mxu1 %v16130_v11  ;;  %v6889_v37 = vmul.f32 %v6887_v14, %v15480_v18 }
0x1023   : > { %v6932_v21 = vsub.f32 %v16234_v60, %v6916_v16  ;;  %6549 = vst.msk [vmem:[#allocation2 + $0x240] sm:$0xff] %vm1108_vm0, %v6540_v31  ;;  %13252 = vmatprep.subr.mxu1 %v16126_v41  ;;  %v6795_v62 = vadd.f32 %v6793_v23, %v6747_v51 }
0x1024   : > { %13253 = vmatpush3.msra.mxu1 %v16126_v41 }
0x1025   : > { %v6934_v1 = vand.u32 2147483647, %v6932_v21  ;;  %13264 = vmatprep.subr.mxu1 %v16130_v11  ;;  %v6843_v24 = vadd.f32 %v6841_v52, %v6795_v62 }
0x1026   : > { %v6917_v35 = vpop.trf.xlu0 }
0x1027   : > { %v6936_v60 = vmul.f32 %v6934_v1, %v15537_v42  ;;  %v6933_v38 = vsub.f32 %v16237_v45, %v6917_v35  ;;  %v6891_v39 = vadd.f32 %v6889_v37, %v6843_v24 }
0x1029   : > { %v6938_v19 = vadd.f32 %v6936_v60, %v6890_v40  ;;  %v6935_v61 = vand.u32 2147483647, %v6933_v38 }
0x102b   : > { %v6940_v33 = vsub.f32 0.0, %v6938_v19  ;;  %v6937_v13 = vmul.f32 %v6935_v61, %v15537_v42 }
0x102d   : > { %v6942_v26 = vmul.f32 1.442695, %v6940_v33  ;;  %v6939_v8 = vadd.f32 %v6937_v13, %v6891_v39 }
0x102f   : > { %14027 = vpow2.f32 %v6942_v26  ;;  %v6941_v58 = vsub.f32 0.0, %v6939_v8 }
0x1031   : > { %v6944_v34 = vmul.f32 1.442695, %v6941_v58 }
0x1033   : > { %14029 = vpow2.f32 %v6944_v34 }
0x103c   : > { %v14028_v7 = vpop.eup %14027 }
0x103d   : > { %v6946_v17 = vsel %vm1446_vm10, %v14028_v7, 0.0 }
0x103e   : > { %6947 = vadd.xlane.f32.xlu1 %v6946_v17 }
0x1040   : > { %v14030_v45 = vpop.eup %14029 }
0x1041   : > { %v6949_v53 = vsel %vm1446_vm10, %v14030_v45, 0.0 }
0x1042   : > { %6950 = vadd.xlane.f32.xlu0 %v6949_v53 }
0x104f   : > { %7443 = vperm.xlu1 %13945, %v16294_v15  }
0x1053   : > { %13949 = vset.pattern.permute.xlu1 %v17808_v54 }
0x1054   : > { %7587 = vperm.xlu1 %13949, %v16294_v15  }
0x1058   : > { %7390 = vperm.xlu0 %13943, %v16300_v2   ;;  %13951 = vset.pattern.permute.xlu1 %v17810_v28 }
0x1059   : > { %7635 = vperm.xlu1 %13951, %v16294_v15  }
0x105c   : > { %7395 = vperm.xlu0 %13943, %v16294_v15  }
0x105d   : > { %13952 = vset.pattern.permute.xlu1 %v17811_v29 }
0x105e   : > { %7679 = vperm.xlu1 %13952, %v16300_v2  }
0x1060   : > { %13944 = vset.pattern.permute.xlu0 %v17806_v22 }
0x1061   : > { %7439 = vperm.xlu0 %13944, %v16300_v2  }
0x1062   : > { %13954 = vset.pattern.permute.xlu1 %v17812_v30 }
0x1063   : > { %7727 = vperm.xlu1 %13954, %v16300_v2  }
0x1065   : > { %13946 = vset.pattern.permute.xlu0 %v17807_v0 }
0x1066   : > { %7487 = vperm.xlu0 %13946, %v16300_v2  }
0x1067   : > { %7731 = vperm.xlu1 %13954, %v16294_v15  }
0x106a   : > { %7491 = vperm.xlu0 %13946, %v16294_v15  }
0x106e   : > { %13947 = vset.pattern.permute.xlu0 %v17809_v27 }
0x106f   : > { %7535 = vperm.xlu0 %13947, %v16300_v2  }
0x1073   : > { %7539 = vperm.xlu0 %13947, %v16294_v15  }
0x1077   : > { %13948 = vset.pattern.permute.xlu0 %v17808_v54 }
0x1078   : > { %7583 = vperm.xlu0 %13948, %v16300_v2  }
0x107c   : > { %13950 = vset.pattern.permute.xlu0 %v17810_v28 }
0x107d   : > { %7631 = vperm.xlu0 %13950, %v16300_v2  }
0x1081   : > { %13953 = vset.pattern.permute.xlu0 %v17811_v29 }
0x1082   : > { %7683 = vperm.xlu0 %13953, %v16294_v15  }
0x10c7   : > { %v6948_v48 = vpop.xlane.xlu1 %6947 }
0x10c8   : > { %14031 = vrcp.f32 %v6948_v48 }
0x10cb   : > { %v6951_v25 = vpop.xlane.xlu0 %6950  ;;  %v16332_v57 = vpop.permute.xlu1 %7443 }
0x10cc   : > { %14033 = vrcp.f32 %v6951_v25 }
0x10d3   : > { %v16325_v6 = vpop.permute.xlu0 %7390 }
0x10d5   : > { %v14032_v9 = vpop.eup %14031 }
0x10d6   : > { %v6953_v50 = vmul.f32 %v14032_v9, %v14028_v7  ;;  %v17819_v7 = vld [vmem:[#allocation49_spill] sm:$0xff] }
0x10d7   : > { %v16327_v12 = vpop.permute.xlu0 %7395 }
0x10d8   : > { %6956 = vxpose.xlu1.b32.start [1/2] (short) (narrow) %v6953_v50, 16 }
0x10d9   : > { %v14034_v49 = vpop.eup %14033 }
0x10da   : > { %v6955_v5 = vmul.f32 %v14034_v49, %v14030_v45  ;;  %v17820_v45 = vld [vmem:[#allocation50_spill] sm:$0xff] }
0x10dc   : > { %6957 = vxpose.xlu1.b32.end [2/2] (short) (narrow) %v6955_v5, 16  ;;  %v16329_v23 = vpop.permute.xlu0 %7439 }
0x10dd   : > { %7446 = vxpose.xlu0.b32.start [1/2] (short) (narrow) %v16329_v23, 16  ;;  %v13228_v16 = vpop.f32.mrf.mxu1 }
0x10de   : > { %v6315_v31 = vmul.f32 2.0, %v13228_v16 }
0x10df   : > { %v6305_v36 = vpop.f32.mrf.mxu1 }
0x10e0   : > { %v6317_v14 = vsub.f32 %v6315_v31, %v15992_v20  ;;  %v6314_v21 = vmul.f32 2.0, %v6305_v36  ;;  %7398 = vxpose.xlu1.b32.start [1/2] (short) (narrow) %v16325_v6, 16 }
0x10e1   : > { %7447 = vxpose.xlu0.b32.end [2/2] (short) (narrow) %v16332_v57, 16  ;;  %v16337_v51 = vpop.permute.xlu0 %7487  ;;  %v13242_v3 = vpop.f32.mrf.mxu1 }
0x10e2   : > { %6319 = vst.msk [vmem:[#allocation2 + $0xc8] sm:$0xff] %vm1108_vm0, %v6317_v14  ;;  %v6316_v52 = vsub.f32 %v6314_v21, %v15998_v32  ;;  %6473 = vst.msk [vmem:[#allocation2 + $0x1c8] sm:$0xff] %vm1108_vm0, %v13242_v3  ;;  %v16352_v32 = vpop.permute.xlu1 %7587 }
0x10e3   : > { %v6463_v1 = vpop.f32.mrf.mxu1 }
0x10e4   : > { %6318 = vst.msk [vmem:[#allocation2 + $0xc0] sm:$0xff] %vm1108_vm0, %v6316_v52  ;;  %6472 = vst.msk [vmem:[#allocation2 + $0x1c0] sm:$0xff] %vm1108_vm0, %v6463_v1  ;;  %7399 = vxpose.xlu1.b32.end [2/2] (short) (narrow) %v16327_v12, 16 }
0x10e5   : > { %v16345_v20 = vpop.permute.xlu0 %7491 }
0x10e6   : > { %v16357_v40 = vpop.permute.xlu1 %7635 }
0x10e8   : > { %7494 = vxpose.xlu1.b32.start [1/2] (short) (narrow) %v16337_v51, 16 }
0x10ea   : > { %v16348_v62 = vpop.permute.xlu0 %7535  ;;  %v16362_v38 = vpop.permute.xlu1 %7679 }
0x10eb   : > { %7542 = vxpose.xlu0.b32.start [1/2] (short) (narrow) %v16348_v62, 16 }
0x10ec   : > { %7495 = vxpose.xlu1.b32.end [2/2] (short) (narrow) %v16345_v20, 16 }
0x10ee   : > { %v16354_v35 = vpop.permute.xlu0 %7539  ;;  %v16369_v19 = vpop.permute.xlu1 %7727 }
0x10ef   : > { %7543 = vxpose.xlu0.b32.end [2/2] (short) (narrow) %v16354_v35, 16 }
0x10f2   : > { %v16373_v61 = vpop.permute.xlu1 %7731 }
0x10f3   : > { %v7584_v37 = vpop.permute.xlu0 %7583 }
0x10f4   : > { %7590 = vxpose.xlu0.b32.start [1/2] (short) (narrow) %v7584_v37, 16 }
0x10f8   : > { %7591 = vxpose.xlu0.b32.end [2/2] (short) (narrow) %v16352_v32, 16  ;;  %v16360_v60 = vpop.permute.xlu0 %7631 }
0x10f9   : > { %7638 = vxpose.xlu1.b32.start [1/2] (short) (narrow) %v16360_v60, 16 }
0x10fc   : > { %7686 = vxpose.xlu0.b32.start [1/2] (short) (narrow) %v16362_v38, 16 }
0x10fd   : > { %7639 = vxpose.xlu1.b32.end [2/2] (short) (narrow) %v16357_v40, 16  ;;  %v16367_v24 = vpop.permute.xlu0 %7683 }
0x1100   : > { %7687 = vxpose.xlu0.b32.end [2/2] (short) (narrow) %v16367_v24, 16 }
0x1101   : > { %7734 = vxpose.xlu1.b32.start [1/2] (short) (narrow) %v16369_v19, 16 }
0x1105   : > { %7735 = vxpose.xlu1.b32.end [2/2] (short) (narrow) %v16373_v61, 16 }
0x1129   : > { %13955 = vset.pattern.permute.xlu0 %v17816_v46  ;;  %v17818_v46 = vld [vmem:[#allocation48_spill] sm:$0xff] }
0x1154   : > { %v6972_v39 = vpop.trf.xlu1 }
0x1155   : > { %v6988_v33 = vmin.f32 %v6953_v50, %v6972_v39 }
0x1157   : > { %13254 = vmatprep.mubr.msk.f32.mxu1 %vm1446_vm10, %v6988_v33  ;;  %13261 = vmatprep.mubr.msk.f32.mxu0 %vm1446_vm10, %v6988_v33 }
0x1158   : > { %v6973_v13 = vpop.trf.xlu1 }
0x1159   : > { %v16379_v26 = vmin.f32 %v6955_v5, %v6973_v13  ;;  %v7462_v58 = vpop.trf.xlu0 }
0x115a   : > { %v7478_v9 = vsub.f32 %v16329_v23, %v7462_v58 }
0x115b   : > { %13255 = vmatmul.mubr.msk.f32.vlgmr.msra.gmra.mxu1 %vm1446_vm10, %v16379_v26 }
0x115c   : > { %v7414_v8 = vpop.trf.xlu1  ;;  %13265 = vmatpush3.msra.mxu1 %v16130_v11  ;;  %13268 = vmatprep.mubr.msk.f32.mxu1 %vm1446_vm10, %v15702_v10  ;;  %v7480_v36 = vand.u32 2147483647, %v7478_v9 }
0x115d   : > { %13266 = vmatprep.subr.mxu1 %v16126_v41  ;;  %v7463_v17 = vpop.trf.xlu0  ;;  %v7430_v48 = vsub.f32 %v16325_v6, %v7414_v8 }
0x115e   : > { %13267 = vmatpush3.msra.mxu1 %v16126_v41  ;;  %v7479_v3 = vsub.f32 %v16332_v57, %v7463_v17  ;;  %v7482_v23 = vmul.f32 %v7480_v36, %v15407_v44 }
0x115f   : > { %13269 = vmatmul.mubr.msk.f32.vlgmr.msra.gmra.mxu1 %vm1446_vm10, %v17818_v46  ;;  %13278 = vmatprep.subr.mxu1 %v16130_v11  ;;  %v7432_v49 = vand.u32 2147483647, %v7430_v48 }
0x1160   : > { %v7415_v34 = vpop.trf.xlu1  ;;  %13279 = vmatpush3.msra.mxu1 %v16130_v11  ;;  %13282 = vmatprep.mubr.msk.f32.mxu1 %vm1446_vm10, %v17819_v7  ;;  %v7481_v8 = vand.u32 2147483647, %v7479_v3 }
0x1161   : > { %13280 = vmatprep.subr.mxu1 %v16126_v41  ;;  %v7431_v31 = vsub.f32 %v16327_v12, %v7415_v34  ;;  %v7434_v6 = vmul.f32 %v7432_v49, %v15517_v55 }
0x1162   : > { %13281 = vmatpush3.msra.mxu1 %v16126_v41  ;;  %v7483_v9 = vmul.f32 %v7481_v8, %v15407_v44 }
0x1163   : > { %13283 = vmatmul.mubr.msk.f32.vlgmr.msra.gmra.mxu1 %vm1446_vm10, %v17820_v45  ;;  %v7433_v1 = vand.u32 2147483647, %v7431_v31  ;;  %v7484_v34 = vadd.f32 %v7482_v23, %v7434_v6 }
0x1164   : > { %v7510_v53 = vpop.trf.xlu1 }
0x1165   : > { %v7526_v50 = vsub.f32 %v16337_v51, %v7510_v53  ;;  %v7435_v57 = vmul.f32 %v7433_v1, %v15517_v55 }
0x1167   : > { %v7558_v25 = vpop.trf.xlu0  ;;  %v7528_v14 = vand.u32 2147483647, %v7526_v50 }
0x1168   : > { %v7511_v5 = vpop.trf.xlu1  ;;  %v7574_v21 = vsub.f32 %v16348_v62, %v7558_v25 }
0x1169   : > { %v7527_v52 = vsub.f32 %v16345_v20, %v7511_v5  ;;  %v7530_v51 = vmul.f32 %v7528_v14, %v15414_v47  ;;  %v7485_v5 = vadd.f32 %v7483_v9, %v7435_v57 }
0x116a   : > { %v7576_v33 = vand.u32 2147483647, %v7574_v21 }
0x116b   : > { %v7559_v16 = vpop.trf.xlu0  ;;  %v7529_v12 = vand.u32 2147483647, %v7527_v52  ;;  %v7532_v20 = vadd.f32 %v7530_v51, %v7484_v34 }
0x116c   : > { %v7575_v58 = vsub.f32 %v16354_v35, %v7559_v16  ;;  %v7578_v53 = vmul.f32 %v7576_v33, %v15423_v56 }
0x116d   : > { %v7531_v50 = vmul.f32 %v7529_v12, %v15414_v47 }
0x116e   : > { %v7580_v14 = vadd.f32 %v7578_v53, %v7532_v20 }
0x116f   : > { %v7533_v52 = vadd.f32 %v7531_v50, %v7485_v5 }
0x1170   : > { %v7606_v39 = vpop.trf.xlu0 }
0x1171   : > { %v7622_v13 = vsub.f32 %v7584_v37, %v7606_v39  ;;  %v7577_v37 = vand.u32 2147483647, %v7575_v58 }
0x1173   : > { %v7624_v62 = vand.u32 2147483647, %v7622_v13 }
0x1174   : > { %v7607_v17 = vpop.trf.xlu0 }
0x1175   : > { %v7623_v48 = vsub.f32 %v16352_v32, %v7607_v17  ;;  %v7654_v25 = vpop.trf.xlu1  ;;  %v7626_v35 = vmul.f32 %v7624_v62, %v15430_v59  ;;  %v7579_v32 = vmul.f32 %v7577_v37, %v15423_v56 }
0x1176   : > { %v7670_v49 = vsub.f32 %v16360_v60, %v7654_v25 }
0x1177   : > { %v7625_v16 = vand.u32 2147483647, %v7623_v48  ;;  %v7628_v39 = vadd.f32 %v7626_v35, %v7580_v14  ;;  %v7581_v58 = vadd.f32 %v7579_v32, %v7533_v52  ;;  %v16432_v52 = vld [vmem:[%s15117_s28 + $0x70] sm:$0xff]  ;;  %v16436_v32 = vld [vmem:[%s15117_s28 + $0x78] sm:$0xff] }
0x1178   : > { %v7672_v31 = vand.u32 2147483647, %v7670_v49  ;;  %v7702_v36 = vpop.trf.xlu0 }
0x1179   : > { %v7718_v21 = vsub.f32 %v16362_v38, %v7702_v36  ;;  %v7655_v3 = vpop.trf.xlu1  ;;  %v7627_v60 = vmul.f32 %v7625_v16, %v15430_v59 }
0x117a   : > { %v7674_v6 = vmul.f32 %v7672_v31, %v15439_v4  ;;  %v7671_v1 = vsub.f32 %v16357_v40, %v7655_v3 }
0x117b   : > { %v7720_v23 = vand.u32 2147483647, %v7718_v21  ;;  %v7629_v17 = vadd.f32 %v7627_v60, %v7581_v58 }
0x117c   : > { %v7673_v51 = vand.u32 2147483647, %v7671_v1  ;;  %v7703_v33 = vpop.trf.xlu0  ;;  %v7676_v13 = vadd.f32 %v7674_v6, %v7628_v39 }
0x117d   : > { %v7722_v8 = vmul.f32 %v7720_v23, %v15480_v18  ;;  %v7719_v12 = vsub.f32 %v16367_v24, %v7703_v33  ;;  %v7750_v38 = vpop.trf.xlu1 }
0x117e   : > { %v7675_v34 = vmul.f32 %v7673_v51, %v15439_v4  ;;  %v7766_v62 = vsub.f32 %v16369_v19, %v7750_v38 }
0x117f   : > { %v7721_v57 = vand.u32 2147483647, %v7719_v12  ;;  %v7724_v20 = vadd.f32 %v7722_v8, %v7676_v13 }
0x1180   : > { %v7768_v40 = vand.u32 2147483647, %v7766_v62  ;;  %v7677_v48 = vadd.f32 %v7675_v34, %v7629_v17 }
0x1181   : > { %v7751_v53 = vpop.trf.xlu1  ;;  %v7723_v25 = vmul.f32 %v7721_v57, %v15480_v18 }
0x1182   : > { %v7770_v9 = vmul.f32 %v7768_v40, %v15537_v42  ;;  %v7767_v50 = vsub.f32 %v16373_v61, %v7751_v53  ;;  %v14124_v40 = vld [vmem:[%s15117_s28 + $0x58] sm:$0xff] }
0x1183   : > { %v7725_v49 = vadd.f32 %v7723_v25, %v7677_v48 }
0x1184   : > { %v7772_v37 = vadd.f32 %v7770_v9, %v7724_v20  ;;  %v7769_v24 = vand.u32 2147483647, %v7767_v50  ;;  %v14125_v9 = vld [vmem:[%s15117_s28 + $0x50] sm:$0xff] }
0x1186   : > { %v7774_v35 = vsub.f32 0.0, %v7772_v37  ;;  %v7771_v19 = vmul.f32 %v7769_v24, %v15537_v42 }
0x1188   : > { %v7776_v5 = vmul.f32 1.442695, %v7774_v35  ;;  %v7773_v16 = vadd.f32 %v7771_v19, %v7725_v49 }
0x118a   : > { %14035 = vpow2.f32 %v7776_v5  ;;  %v7775_v31 = vsub.f32 0.0, %v7773_v16 }
0x118c   : > { %v7778_v36 = vmul.f32 1.442695, %v7775_v31 }
0x118e   : > { %14037 = vpow2.f32 %v7778_v36 }
0x1197   : > { %v14036_v14 = vpop.eup %14035 }
0x1198   : > { %v7780_v21 = vsel %vm1446_vm10, %v14036_v14, 0.0 }
0x1199   : > { %7781 = vadd.xlane.f32.xlu0 %v7780_v21 }
0x119b   : > { %v14038_v3 = vpop.eup %14037 }
0x119c   : > { %v7783_v61 = vsel %vm1446_vm10, %v14038_v3, 0.0 }
0x119d   : > { %7784 = vadd.xlane.f32.xlu1 %v7783_v61 }
0x11af   : > { %8224 = vperm.xlu0 %13955, %v16432_v52  }
0x11b3   : > { %8229 = vperm.xlu0 %13955, %v16436_v32  }
0x11b7   : > { %13957 = vset.pattern.permute.xlu0 %v17806_v22 }
0x11b8   : > { %8277 = vperm.xlu0 %13957, %v16436_v32  }
0x11bc   : > { %13964 = vset.pattern.permute.xlu0 %v17812_v30 }
0x11bd   : > { %8565 = vperm.xlu0 %13964, %v16436_v32  }
0x121b   : > { %v13256_v6 = vpop.f32.mrf.mxu1 }
0x121c   : > { %7072 = vst.msk [vmem:[#allocation2 + $0x58] sm:$0xff] %vm1108_vm0, %v13256_v6  ;;  %13257 = vmatprep.subr.mxu0 %v13256_v6 }
0x121d   : > { %v7062_v1 = vpop.f32.mrf.mxu1  ;;  %13258 = vmatpush3.msra.mxu0 %v13256_v6 }
0x121e   : > { %7071 = vst.msk [vmem:[#allocation2 + $0x50] sm:$0xff] %vm1108_vm0, %v7062_v1  ;;  %13259 = vmatprep.subr.mxu0 %v7062_v1 }
0x121f   : > { %13260 = vmatpush3.msra.mxu0 %v7062_v1  ;;  %v13270_v39 = vpop.f32.mrf.mxu1 }
0x1220   : > { %7230 = vst.msk [vmem:[#allocation2 + $0x158] sm:$0xff] %vm1108_vm0, %v13270_v39  ;;  %13262 = vmatmul.mubr.msk.f32.vlgmr.msra.gmra.mxu0 %vm1446_vm10, %v16379_v26  ;;  %13271 = vmatprep.subr.mxu0 %v16130_v11 }
0x1221   : > { %v7220_v23 = vpop.f32.mrf.mxu1  ;;  %13272 = vmatpush3.msra.mxu0 %v16130_v11  ;;  %13275 = vmatprep.mubr.msk.f32.mxu0 %vm1446_vm10, %v15584_v43 }
0x1222   : > { %7229 = vst.msk [vmem:[#allocation2 + $0x150] sm:$0xff] %vm1108_vm0, %v7220_v23  ;;  %v7782_v60 = vpop.xlane.xlu0 %7781  ;;  %13273 = vmatprep.subr.mxu0 %v16126_v41 }
0x1223   : > { %14039 = vrcp.f32 %v7782_v60  ;;  %13274 = vmatpush3.msra.mxu0 %v16126_v41  ;;  %v13284_v51 = vpop.f32.mrf.mxu1 }
0x1224   : > { %7384 = vst.msk [vmem:[#allocation2 + $0x258] sm:$0xff] %vm1108_vm0, %v13284_v51  ;;  %13276 = vmatmul.mubr.msk.f32.vlgmr.msra.gmra.mxu0 %vm1446_vm10, %v17817_v63  ;;  %13285 = vmatprep.subr.mxu0 %v16294_v15 }
0x1225   : > { %v7374_v11 = vpop.f32.mrf.mxu1  ;;  %13286 = vmatpush3.msra.mxu0 %v16294_v15 }
0x1226   : > { %7383 = vst.msk [vmem:[#allocation2 + $0x250] sm:$0xff] %vm1108_vm0, %v7374_v11  ;;  %v7785_v26 = vpop.xlane.xlu1 %7784  ;;  %13287 = vmatprep.subr.mxu0 %v16300_v2 }
0x1227   : > { %14041 = vrcp.f32 %v7785_v26  ;;  %13288 = vmatpush3.msra.mxu0 %v16300_v2 }
0x1228   : > { %13299 = vmatprep.subr.mxu0 %v16294_v15 }
0x122a   : > { %v16464_v41 = vpop.permute.xlu0 %8224 }
0x122b   : > { %8232 = vxpose.xlu0.b32.start [1/2] (short) (narrow) %v16464_v41, 16 }
0x122e   : > { %v16467_v33 = vpop.permute.xlu0 %8229 }
0x122f   : > { %8233 = vxpose.xlu0.b32.end [2/2] (short) (narrow) %v16467_v33, 16 }
0x1230   : > { %v14040_v13 = vpop.eup %14039 }
0x1231   : > { %v7787_v8 = vmul.f32 %v14040_v13, %v14036_v14 }
0x1233   : > { %7790 = vxpose.xlu1.b32.start [1/2] (short) (narrow) %v7787_v8, 16 }
0x1234   : > { %v14042_v12 = vpop.eup %14041 }
0x1235   : > { %v7789_v38 = vmul.f32 %v14042_v12, %v14038_v3 }
0x1237   : > { %7791 = vxpose.xlu1.b32.end [2/2] (short) (narrow) %v7789_v38, 16 }
0x1255   : > { %13956 = vset.pattern.permute.xlu1 %v17806_v22 }
0x1256   : > { %8273 = vperm.xlu1 %13956, %v16432_v52  }
0x125a   : > { %13958 = vset.pattern.permute.xlu1 %v17807_v0 }
0x125b   : > { %8321 = vperm.xlu1 %13958, %v16432_v52  }
0x125f   : > { %8325 = vperm.xlu1 %13958, %v16436_v32  }
0x1263   : > { %13959 = vset.pattern.permute.xlu1 %v17809_v27 }
0x1264   : > { %8369 = vperm.xlu1 %13959, %v16432_v52  }
0x1268   : > { %8373 = vperm.xlu1 %13959, %v16436_v32  }
0x126c   : > { %13960 = vset.pattern.permute.xlu1 %v17808_v54 }
0x126d   : > { %8417 = vperm.xlu1 %13960, %v16432_v52  }
0x1271   : > { %8421 = vperm.xlu1 %13960, %v16436_v32  }
0x1275   : > { %13961 = vset.pattern.permute.xlu1 %v17810_v28 }
0x1276   : > { %8465 = vperm.xlu1 %13961, %v16432_v52  }
0x127a   : > { %8469 = vperm.xlu1 %13961, %v16436_v32  }
0x127e   : > { %13962 = vset.pattern.permute.xlu1 %v17811_v29  ;;  %v8278_v29 = vpop.permute.xlu0 %8277 }
0x127f   : > { %8513 = vperm.xlu1 %13962, %v16432_v52  }
0x1282   : > { %v16537_v36 = vpop.permute.xlu0 %8565 }
0x1283   : > { %8517 = vperm.xlu1 %13962, %v16436_v32  }
0x1287   : > { %13963 = vset.pattern.permute.xlu1 %v17812_v30 }
0x1288   : > { %8561 = vperm.xlu1 %13963, %v16432_v52  }
0x12a7   : > { %v8248_v14 = vpop.trf.xlu0 }
0x12a8   : > { %v8264_v11 = vsub.f32 %v16464_v41, %v8248_v14 }
0x12ab   : > { %v8249_v21 = vpop.trf.xlu0 }
0x12af   : > { %v7806_v22 = vpop.trf.xlu1 }
0x12b0   : > { %v7822_v0 = vmin.f32 %v7787_v8, %v7806_v22 }
0x12b2   : > { %13289 = vmatprep.mubr.msk.f32.mxu0 %vm1446_vm10, %v7822_v0  ;;  %13296 = vmatprep.mubr.msk.f32.mxu1 %vm1446_vm10, %v7822_v0  ;;  %v8265_v0 = vsub.f32 %v16467_v33, %v8249_v21 }
0x12b3   : > { %v7807_v54 = vpop.trf.xlu1 }
0x12b4   : > { %v16491_v27 = vmin.f32 %v7789_v38, %v7807_v54 }
0x12b6   : > { %13290 = vmatmul.mubr.msk.f32.vlgmr.msra.gmra.mxu0 %vm1446_vm10, %v16491_v27 }
0x12b7   : > { %13300 = vmatpush3.msra.mxu0 %v16294_v15  ;;  %13303 = vmatprep.mubr.msk.f32.mxu0 %vm1446_vm10, %v15702_v10 }
0x12b8   : > { %13301 = vmatprep.subr.mxu0 %v16300_v2 }
0x12b9   : > { %13302 = vmatpush3.msra.mxu0 %v16300_v2 }
0x12ba   : > { %13304 = vmatmul.mubr.msk.f32.vlgmr.msra.gmra.mxu0 %vm1446_vm10, %v17818_v46  ;;  %13313 = vmatprep.subr.mxu0 %v16294_v15 }
0x12bb   : > { %13314 = vmatpush3.msra.mxu0 %v16294_v15  ;;  %13317 = vmatprep.mubr.msk.f32.mxu0 %vm1446_vm10, %v17819_v7 }
0x12bc   : > { %13315 = vmatprep.subr.mxu0 %v16300_v2 }
0x12bd   : > { %13316 = vmatpush3.msra.mxu0 %v16300_v2 }
0x12be   : > { %13318 = vmatmul.mubr.msk.f32.vlgmr.msra.gmra.mxu0 %vm1446_vm10, %v17820_v45 }
0x12d1   : > { %v8274_v28 = vpop.permute.xlu1 %8273 }
0x12d2   : > { %8280 = vxpose.xlu1.b32.start [1/2] (short) (narrow) %v8274_v28, 16 }
0x12d6   : > { %v8322_v30 = vpop.permute.xlu1 %8321  ;;  %8281 = vxpose.xlu1.b32.end [2/2] (short) (narrow) %v8278_v29, 16 }
0x12d7   : > { %8328 = vxpose.xlu0.b32.start [1/2] (short) (narrow) %v8322_v30, 16 }
0x12da   : > { %v16510_v58 = vpop.permute.xlu1 %8325 }
0x12db   : > { %8329 = vxpose.xlu0.b32.end [2/2] (short) (narrow) %v16510_v58, 16 }
0x12df   : > { %v8370_v34 = vpop.permute.xlu1 %8369 }
0x12e0   : > { %8376 = vxpose.xlu0.b32.start [1/2] (short) (narrow) %v8370_v34, 16  ;;  %v13263_v62 = vpop.f32.mrf.mxu0 }
0x12e1   : > { %v7149_v57 = vmul.f32 2.0, %v13263_v62  ;;  %v8266_v62 = vand.u32 2147483647, %v8264_v11 }
0x12e2   : > { %v7139_v17 = vpop.f32.mrf.mxu0 }
0x12e3   : > { %v7151_v20 = vsub.f32 %v7149_v57, %v14124_v40  ;;  %v7148_v53 = vmul.f32 2.0, %v7139_v17  ;;  %v16514_v48 = vpop.permute.xlu1 %8373 }
0x12e4   : > { %8377 = vxpose.xlu0.b32.end [2/2] (short) (narrow) %v16514_v48, 16  ;;  %v13277_v25 = vpop.f32.mrf.mxu0 }
0x12e5   : > { %7153 = vst.msk [vmem:[#allocation2 + $0xd8] sm:$0xff] %vm1108_vm0, %v7151_v20  ;;  %v7150_v50 = vsub.f32 %v7148_v53, %v14125_v9  ;;  %7307 = vst.msk [vmem:[#allocation2 + $0x1d8] sm:$0xff] %vm1108_vm0, %v13277_v25 }
0x12e6   : > { %v7297_v37 = vpop.f32.mrf.mxu0 }
0x12e7   : > { %7152 = vst.msk [vmem:[#allocation2 + $0xd0] sm:$0xff] %vm1108_vm0, %v7150_v50  ;;  %7306 = vst.msk [vmem:[#allocation2 + $0x1d0] sm:$0xff] %vm1108_vm0, %v7297_v37  ;;  %v8268_v50 = vmul.f32 %v8266_v62, %v15517_v55 }
0x12e8   : > { %v8418_v24 = vpop.permute.xlu1 %8417 }
0x12e9   : > { %8424 = vxpose.xlu1.b32.start [1/2] (short) (narrow) %v8418_v24, 16 }
0x12ec   : > { %v16522_v49 = vpop.permute.xlu1 %8421 }
0x12ed   : > { %8425 = vxpose.xlu1.b32.end [2/2] (short) (narrow) %v16522_v49, 16 }
0x12f1   : > { %v8466_v35 = vpop.permute.xlu1 %8465 }
0x12f2   : > { %8472 = vxpose.xlu0.b32.start [1/2] (short) (narrow) %v8466_v35, 16 }
0x12f5   : > { %v16525_v19 = vpop.permute.xlu1 %8469 }
0x12f6   : > { %8473 = vxpose.xlu0.b32.end [2/2] (short) (narrow) %v16525_v19, 16 }
0x12fa   : > { %v16528_v5 = vpop.permute.xlu1 %8513 }
0x12fb   : > { %8520 = vxpose.xlu1.b32.start [1/2] (short) (narrow) %v16528_v5, 16 }
0x12fe   : > { %v16531_v16 = vpop.permute.xlu1 %8517 }
0x12ff   : > { %8521 = vxpose.xlu1.b32.end [2/2] (short) (narrow) %v16531_v16, 16 }
0x1303   : > { %v16534_v31 = vpop.permute.xlu1 %8561 }
0x1304   : > { %8568 = vxpose.xlu0.b32.start [1/2] (short) (narrow) %v16534_v31, 16 }
0x1308   : > { %8569 = vxpose.xlu0.b32.end [2/2] (short) (narrow) %v16537_v36, 16 }
0x134e   : > { %v8296_v6 = vpop.trf.xlu1 }
0x134f   : > { %v8312_v51 = vsub.f32 %v8274_v28, %v8296_v6 }
0x1351   : > { %v8314_v12 = vand.u32 2147483647, %v8312_v51 }
0x1352   : > { %v8297_v39 = vpop.trf.xlu1 }
0x1353   : > { %v8344_v3 = vpop.trf.xlu0  ;;  %v8313_v13 = vsub.f32 %v8278_v29, %v8297_v39  ;;  %v8316_v28 = vmul.f32 %v8314_v12, %v15407_v44 }
0x1354   : > { %v8360_v26 = vsub.f32 %v8322_v30, %v8344_v3 }
0x1355   : > { %v8315_v40 = vand.u32 2147483647, %v8313_v13  ;;  %v8318_v3 = vadd.f32 %v8316_v28, %v8268_v50 }
0x1356   : > { %v8362_v57 = vand.u32 2147483647, %v8360_v26 }
0x1357   : > { %v8345_v61 = vpop.trf.xlu0 }
0x1358   : > { %v8361_v54 = vsub.f32 %v16510_v58, %v8345_v61 }
0x135a   : > { %v8363_v25 = vand.u32 2147483647, %v8361_v54 }
0x135c   : > { %v8392_v1 = vpop.trf.xlu0 }
0x135d   : > { %v8408_v38 = vsub.f32 %v8370_v34, %v8392_v1  ;;  %v8267_v34 = vand.u32 2147483647, %v8265_v0 }
0x135f   : > { %v8410_v41 = vand.u32 2147483647, %v8408_v38 }
0x1360   : > { %v8393_v60 = vpop.trf.xlu0 }
0x1361   : > { %v8409_v20 = vsub.f32 %v16514_v48, %v8393_v60  ;;  %v8364_v48 = vmul.f32 %v8362_v57, %v15414_v47 }
0x1363   : > { %v8411_v14 = vand.u32 2147483647, %v8409_v20 }
0x1365   : > { %v8440_v23 = vpop.trf.xlu1 }
0x1366   : > { %v8456_v17 = vsub.f32 %v8418_v24, %v8440_v23 }
0x1368   : > { %v8458_v37 = vand.u32 2147483647, %v8456_v17 }
0x1369   : > { %v8441_v22 = vpop.trf.xlu1 }
0x136a   : > { %v8457_v33 = vsub.f32 %v16522_v49, %v8441_v22  ;;  %v8412_v49 = vmul.f32 %v8410_v41, %v15423_v56  ;;  %v8460_v60 = vmul.f32 %v8458_v37, %v15430_v59 }
0x136c   : > { %v8459_v39 = vand.u32 2147483647, %v8457_v33 }
0x136e   : > { %v8488_v8 = vpop.trf.xlu0  ;;  %v8461_v12 = vmul.f32 %v8459_v39, %v15430_v59 }
0x136f   : > { %v8504_v30 = vsub.f32 %v8466_v35, %v8488_v8  ;;  %v8317_v35 = vmul.f32 %v8315_v40, %v15407_v44  ;;  %v8365_v44 = vmul.f32 %v8363_v25, %v15414_v47  ;;  %v8413_v47 = vmul.f32 %v8411_v14, %v15423_v56 }
0x1371   : > { %v8506_v61 = vand.u32 2147483647, %v8504_v30 }
0x1372   : > { %v8489_v58 = vpop.trf.xlu0 }
0x1373   : > { %v8505_v6 = vsub.f32 %v16525_v19, %v8489_v58  ;;  %v8366_v19 = vadd.f32 %v8364_v48, %v8318_v3  ;;  %v8508_v13 = vmul.f32 %v8506_v61, %v15439_v4 }
0x1375   : > { %v8414_v26 = vadd.f32 %v8412_v49, %v8366_v19  ;;  %v8507_v8 = vand.u32 2147483647, %v8505_v6 }
0x1376   : > { %v13291_v53 = vpop.f32.mrf.mxu0 }
0x1377   : > { %7906 = vst.msk [vmem:[#allocation2 + $0x68] sm:$0xff] %vm1108_vm0, %v13291_v53  ;;  %v8536_v29 = vpop.trf.xlu1  ;;  %13292 = vmatprep.subr.mxu1 %v13291_v53  ;;  %v8462_v56 = vadd.f32 %v8460_v60, %v8414_v26  ;;  %v8509_v59 = vmul.f32 %v8507_v8, %v15439_v4  ;;  %v9058_v26 = vld [vmem:[#allocation2 + $0x28] sm:$0xff]  ;;  %v9061_v8 = vld [vmem:[#allocation2 + $0x40] sm:$0xff] }
0x1378   : > { %v7896_v9 = vpop.f32.mrf.mxu0  ;;  %13293 = vmatpush3.msra.mxu1 %v13291_v53  ;;  %v8552_v24 = vsub.f32 %v16528_v5, %v8536_v29  ;;  %v8269_v5 = vmul.f32 %v8267_v34, %v15517_v55 }
0x1379   : > { %7905 = vst.msk [vmem:[#allocation2 + $0x60] sm:$0xff] %vm1108_vm0, %v7896_v9  ;;  %13294 = vmatprep.subr.mxu1 %v7896_v9  ;;  %v8510_v17 = vadd.f32 %v8508_v13, %v8462_v56  ;;  %v9060_v13 = vld [vmem:[#allocation2 + $0x38] sm:$0xff] }
0x137a   : > { %13295 = vmatpush3.msra.mxu1 %v7896_v9  ;;  %v13305_v21 = vpop.f32.mrf.mxu0  ;;  %v8554_v51 = vand.u32 2147483647, %v8552_v24  ;;  %v8319_v55 = vadd.f32 %v8317_v35, %v8269_v5 }
0x137b   : > { %8064 = vst.msk [vmem:[#allocation2 + $0x168] sm:$0xff] %vm1108_vm0, %v13305_v21  ;;  %v8537_v1 = vpop.trf.xlu1  ;;  %13297 = vmatmul.mubr.msk.f32.vlgmr.msra.gmra.mxu1 %vm1446_vm10, %v16491_v27  ;;  %13306 = vmatprep.subr.mxu1 %v16294_v15 }
0x137c   : > { %v8054_v23 = vpop.f32.mrf.mxu0  ;;  %13307 = vmatpush3.msra.mxu1 %v16294_v15  ;;  %13310 = vmatprep.mubr.msk.f32.mxu1 %vm1446_vm10, %v15584_v43  ;;  %v8553_v11 = vsub.f32 %v16531_v16, %v8537_v1  ;;  %v8367_v16 = vadd.f32 %v8365_v44, %v8319_v55  ;;  %v8556_v0 = vmul.f32 %v8554_v51, %v15480_v18 }
0x137d   : > { %8063 = vst.msk [vmem:[#allocation2 + $0x160] sm:$0xff] %vm1108_vm0, %v8054_v23  ;;  %13308 = vmatprep.subr.mxu1 %v16300_v2 }
0x137e   : > { %13309 = vmatpush3.msra.mxu1 %v16300_v2  ;;  %v13319_v27 = vpop.f32.mrf.mxu0  ;;  %v8555_v54 = vand.u32 2147483647, %v8553_v11  ;;  %v8415_v57 = vadd.f32 %v8413_v47, %v8367_v16  ;;  %v8558_v28 = vadd.f32 %v8556_v0, %v8510_v17  ;;  %v9055_v47 = vld [vmem:[#allocation2 + $0x10] sm:$0xff]  ;;  %v9062_v16 = vld [vmem:[#allocation2 + $0x48] sm:$0xff]  ;;  %v9506_v0 = vld [vmem:[#allocation20] sm:$0xff] }
0x137f   : > { %8218 = vst.msk [vmem:[#allocation2 + $0x268] sm:$0xff] %vm1108_vm0, %v13319_v27  ;;  %13311 = vmatmul.mubr.msk.f32.vlgmr.msra.gmra.mxu1 %vm1446_vm10, %v17817_v63  ;;  %13320 = vmatprep.subr.mxu1 %v16436_v32  ;;  %v9057_v27 = vld [vmem:[#allocation2 + $0x20] sm:$0xff]  ;;  %v9066_v56 = vld [vmem:[#allocation2 + $0x68] sm:$0xff] }
0x1380   : > { %v8584_v38 = vpop.trf.xlu0  ;;  %v8208_v22 = vpop.f32.mrf.mxu0  ;;  %13321 = vmatpush3.msra.mxu1 %v16436_v32  ;;  %v8463_v20 = vadd.f32 %v8461_v12, %v8415_v57  ;;  %v8557_v41 = vmul.f32 %v8555_v54, %v15480_v18  ;;  %v9063_v12 = vld [vmem:[#allocation2 + $0x50] sm:$0xff] }
0x1381   : > { %v8600_v62 = vsub.f32 %v16534_v31, %v8584_v38  ;;  %8217 = vst.msk [vmem:[#allocation2 + $0x260] sm:$0xff] %vm1108_vm0, %v8208_v22  ;;  %13322 = vmatprep.subr.mxu1 %v16432_v52  ;;  %v9064_v38 = vld [vmem:[#allocation2 + $0x58] sm:$0xff]  ;;  %v9065_v22 = vld [vmem:[#allocation2 + $0x60] sm:$0xff] }
0x1382   : > { %13323 = vmatpush3.msra.mxu1 %v16432_v52  ;;  %v8511_v29 = vadd.f32 %v8509_v59, %v8463_v20  ;;  %v9087_v59 = vld [vmem:[#allocation18 + $0x8] sm:$0xff]  ;;  %v9524_v20 = vld [vmem:[#allocation20 + $0x8] sm:$0xff] }
0x1383   : > { %v8602_v40 = vand.u32 2147483647, %v8600_v62  ;;  %13334 = vmatprep.subr.mxu1 %v16436_v32 }
0x1384   : > { %v8585_v53 = vpop.trf.xlu0  ;;  %v8559_v33 = vadd.f32 %v8557_v41, %v8511_v29  ;;  %v9491_v29 = vld [vmem:[#allocation2 + $0x108] sm:$0xff] }
0x1385   : > { %v8604_v31 = vmul.f32 %v8602_v40, %v15537_v42  ;;  %v8601_v30 = vsub.f32 %v16537_v36, %v8585_v53  ;;  %v9070_v53 = vld [vmem:[#allocation2 + $0x80] sm:$0xff] }
0x1387   : > { %v8606_v34 = vadd.f32 %v8604_v31, %v8558_v28  ;;  %v8603_v25 = vand.u32 2147483647, %v8601_v30  ;;  %v9071_v31 = vld [vmem:[#allocation2 + $0x88] sm:$0xff]  ;;  %v9490_v30 = vld [vmem:[#allocation2 + $0x100] sm:$0xff] }
0x1389   : > { %v8608_v58 = vsub.f32 0.0, %v8606_v34  ;;  %v8605_v9 = vmul.f32 %v8603_v25, %v15537_v42  ;;  %v9073_v34 = vld [vmem:[#allocation2 + $0x98] sm:$0xff]  ;;  %v9492_v25 = vld [vmem:[#allocation2 + $0x110] sm:$0xff] }
0x138b   : > { %v8610_v4 = vmul.f32 1.442695, %v8608_v58  ;;  %v8607_v50 = vadd.f32 %v8605_v9, %v8559_v33  ;;  %v9074_v33 = vld [vmem:[#allocation2 + $0xa0] sm:$0xff]  ;;  %v9493_v58 = vld [vmem:[#allocation2 + $0x118] sm:$0xff]  ;;  %v9075_v9 = vld [vmem:[#allocation2 + $0xa8] sm:$0xff] }
0x138d   : > { %14043 = vpow2.f32 %v8610_v4  ;;  %v8609_v48 = vsub.f32 0.0, %v8607_v50  ;;  %v9494_v4 = vld [vmem:[#allocation2 + $0x120] sm:$0xff]  ;;  %v9076_v50 = vld [vmem:[#allocation2 + $0xb0] sm:$0xff] }
0x138f   : > { %v8612_v37 = vmul.f32 1.442695, %v8609_v48  ;;  %v9495_v48 = vld [vmem:[#allocation2 + $0x128] sm:$0xff] }
0x1391   : > { %14045 = vpow2.f32 %v8612_v37  ;;  %v9077_v37 = vld [vmem:[#allocation2 + $0xb8] sm:$0xff] }
0x139a   : > { %v14044_v24 = vpop.eup %14043 }
0x139b   : > { %v8614_v18 = vsel %vm1446_vm10, %v14044_v24, 0.0 }
0x139c   : > { %8615 = vadd.xlane.f32.xlu1 %v8614_v18  ;;  %v9078_v18 = vld [vmem:[#allocation2 + $0xc0] sm:$0xff] }
0x139e   : > { %v14046_v35 = vpop.eup %14045 }
0x139f   : > { %v8617_v36 = vsel %vm1446_vm10, %v14046_v35, 0.0 }
0x13a0   : > { %8618 = vadd.xlane.f32.xlu0 %v8617_v36  ;;  %v9079_v36 = vld [vmem:[#allocation2 + $0xc8] sm:$0xff] }
0x1425   : > { %v8616_v14 = vpop.xlane.xlu1 %8615 }
0x1426   : > { %14047 = vrcp.f32 %v8616_v14  ;;  %v9498_v14 = vld [vmem:[#allocation2 + $0x140] sm:$0xff] }
0x1429   : > { %v8619_v21 = vpop.xlane.xlu0 %8618 }
0x142a   : > { %14049 = vrcp.f32 %v8619_v21  ;;  %v9080_v21 = vld [vmem:[#allocation2 + $0xd0] sm:$0xff] }
0x1433   : > { %v14048_v3 = vpop.eup %14047 }
0x1434   : > { %v8621_v42 = vmul.f32 %v14048_v3, %v14044_v24  ;;  %v9496_v24 = vld [vmem:[#allocation2 + $0x130] sm:$0xff]  ;;  %v9499_v3 = vld [vmem:[#allocation2 + $0x148] sm:$0xff] }
0x1436   : > { %8624 = vxpose.xlu1.b32.start [1/2] (short) (narrow) %v8621_v42, 16 }
0x1437   : > { %v14050_v49 = vpop.eup %14049 }
0x1438   : > { %v8623_v61 = vmul.f32 %v14050_v49, %v14046_v35  ;;  %v9497_v35 = vld [vmem:[#allocation2 + $0x138] sm:$0xff]  ;;  %v9500_v49 = vld [vmem:[#allocation2 + $0x150] sm:$0xff] }
0x143a   : > { %8625 = vxpose.xlu1.b32.end [2/2] (short) (narrow) %v8623_v61, 16 }
0x143b   : > { %v13298_v6 = vpop.f32.mrf.mxu1 }
0x143c   : > { %v7983_v1 = vmul.f32 2.0, %v13298_v6  ;;  %v9501_v6 = vld [vmem:[#allocation2 + $0x158] sm:$0xff] }
0x143d   : > { %v7973_v5 = vpop.f32.mrf.mxu1 }
0x143e   : > { %v7985_v44 = vsub.f32 %v7983_v1, %v16294_v15  ;;  %v7982_v39 = vmul.f32 2.0, %v7973_v5  ;;  %v9502_v5 = vld [vmem:[#allocation2 + $0x160] sm:$0xff] }
0x143f   : > { %v13312_v23 = vpop.f32.mrf.mxu1 }
0x1440   : > { %7987 = vst.msk [vmem:[#allocation2 + $0xe8] sm:$0xff] %vm1108_vm0, %v7985_v44  ;;  %v7984_v19 = vsub.f32 %v7982_v39, %v16300_v2  ;;  %8141 = vst.msk [vmem:[#allocation2 + $0x1e8] sm:$0xff] %vm1108_vm0, %v13312_v23  ;;  %v9069_v2 = vld [vmem:[#allocation18] sm:$0xff] }
0x1441   : > { %v8131_v60 = vpop.f32.mrf.mxu1  ;;  %v9503_v44 = vld [vmem:[#allocation2 + $0x168] sm:$0xff] }
0x1442   : > { %7986 = vst.msk [vmem:[#allocation2 + $0xe0] sm:$0xff] %vm1108_vm0, %v7984_v19  ;;  %8140 = vst.msk [vmem:[#allocation2 + $0x1e0] sm:$0xff] %vm1108_vm0, %v8131_v60  ;;  %v10192_v19 = vld [vmem:[#allocation23 + $0x8] sm:$0xff]  ;;  %v10191_v60 = vld [vmem:[#allocation23] sm:$0xff] }
0x1447   : > { %v9083_v1 = vld [vmem:[#allocation2 + $0xe8] sm:$0xff] }
0x14b2   : > { %v8640_v51 = vpop.trf.xlu1 }
0x14b3   : > { %v8656_v11 = vmin.f32 %v8621_v42, %v8640_v51  ;;  %v9081_v42 = vld [vmem:[#allocation2 + $0xd8] sm:$0xff]  ;;  %v16674_v51 = vld [vmem:[#allocation20 + $0x10] sm:$0xff] }
0x14b5   : > { %13324 = vmatprep.mubr.msk.f32.mxu1 %vm1446_vm10, %v8656_v11  ;;  %13331 = vmatprep.mubr.msk.f32.mxu0 %vm1446_vm10, %v8656_v11  ;;  %v10416_v11 = vld [vmem:[#allocation23 + $0x18] sm:$0xff] }
0x14b6   : > { %v8641_v15 = vpop.trf.xlu1 }
0x14b7   : > { %v8657_v55 = vmin.f32 %v8623_v61, %v8641_v15  ;;  %v9082_v61 = vld [vmem:[#allocation2 + $0xe0] sm:$0xff] }
0x14b9   : > { %13325 = vmatmul.mubr.msk.f32.vlgmr.msra.gmra.mxu1 %vm1446_vm10, %v8657_v55 }
0x14ba   : > { %13335 = vmatpush3.msra.mxu1 %v16436_v32  ;;  %13338 = vmatprep.mubr.msk.f32.mxu1 %vm1446_vm10, %v15702_v10  ;;  %v9053_v10 = vld [vmem:[#allocation2] sm:$0xff] }
0x14bb   : > { %13336 = vmatprep.subr.mxu1 %v16432_v52 }
0x14bc   : > { %13337 = vmatpush3.msra.mxu1 %v16432_v52 }
0x14bd   : > { %13339 = vmatmul.mubr.msk.f32.vlgmr.msra.gmra.mxu1 %vm1446_vm10, %v17818_v46  ;;  %13348 = vmatprep.subr.mxu1 %v16436_v32  ;;  %v9054_v46 = vld [vmem:[#allocation2 + $0x8] sm:$0xff] }
0x14be   : > { %13349 = vmatpush3.msra.mxu1 %v16436_v32  ;;  %13352 = vmatprep.mubr.msk.f32.mxu1 %vm1446_vm10, %v17819_v7  ;;  %v9056_v7 = vld [vmem:[#allocation2 + $0x18] sm:$0xff] }
0x14bf   : > { %13350 = vmatprep.subr.mxu1 %v16432_v52 }
0x14c0   : > { %13351 = vmatpush3.msra.mxu1 %v16432_v52 }
0x14c1   : > { %13353 = vmatmul.mubr.msk.f32.vlgmr.msra.gmra.mxu1 %vm1446_vm10, %v17820_v45  ;;  %13381 = vmatprep.subr.mxu1 %v9069_v2  ;;  %v9059_v45 = vld [vmem:[#allocation2 + $0x30] sm:$0xff] }
0x14c2   : > { %13383 = vmatprep.mubr.msk.f32.mxu1 %vm1108_vm0, %v9053_v10  ;;  %13382 = vmatpush3.msra.mxu1 %v9069_v2 }
0x14c3   : > { %13433 = vmatprep.subr.mxu1 %v9506_v0 }
0x14c5   : > { %13384 = vmatmul.mubr.msk.f32.vlgmr.msra.gmra.mxu1 %vm1108_vm0, %v9054_v46 }
0x14c6   : > { %13386 = vmatprep.mubr.msk.f32.mxu1 %vm1108_vm0, %v9055_v47  ;;  %13434 = vmatpush3.msra.mxu1 %v9506_v0 }
0x14c7   : > { %13485 = vmatprep.subr.mxu1 %v10192_v19 }
0x14c9   : > { %13387 = vmatmul.mubr.msk.f32.gmra.mxu1 %vm1108_vm0, %v9056_v7 }
0x14ca   : > { %13389 = vmatprep.mubr.msk.f32.mxu1 %vm1108_vm0, %v9057_v27 }
0x14cd   : > { %13390 = vmatmul.mubr.msk.f32.gmra.mxu1 %vm1108_vm0, %v9058_v26 }
0x14ce   : > { %13392 = vmatprep.mubr.msk.f32.mxu1 %vm1108_vm0, %v9059_v45 }
0x14d1   : > { %13393 = vmatmul.mubr.msk.f32.gmra.mxu1 %vm1108_vm0, %v9060_v13 }
0x14d2   : > { %13395 = vmatprep.mubr.msk.f32.mxu1 %vm1108_vm0, %v9061_v8 }
0x14d5   : > { %13396 = vmatmul.mubr.msk.f32.gmra.mxu1 %vm1108_vm0, %v9062_v16 }
0x14d6   : > { %13398 = vmatprep.mubr.msk.f32.mxu1 %vm1108_vm0, %v9063_v12 }
0x14d9   : > { %13399 = vmatmul.mubr.msk.f32.gmra.mxu1 %vm1108_vm0, %v9064_v38 }
0x14da   : > { %13401 = vmatprep.mubr.msk.f32.mxu1 %vm1108_vm0, %v9065_v22 }
0x14dd   : > { %13402 = vmatmul.mubr.msk.f32.gmra.mxu1 %vm1108_vm0, %v9066_v56 }
0x1579   : > { %v13326_v54 = vpop.f32.mrf.mxu1 }
0x157a   : > { %8740 = vst.msk [vmem:[#allocation2 + $0x78] sm:$0xff] %vm1108_vm0, %v13326_v54  ;;  %13327 = vmatprep.subr.mxu0 %v13326_v54 }
0x157b   : > { %v8730_v62 = vpop.f32.mrf.mxu1  ;;  %13328 = vmatpush3.msra.mxu0 %v13326_v54 }
0x157c   : > { %8739 = vst.msk [vmem:[#allocation2 + $0x70] sm:$0xff] %vm1108_vm0, %v8730_v62  ;;  %13329 = vmatprep.subr.mxu0 %v8730_v62 }
0x157d   : > { %13330 = vmatpush3.msra.mxu0 %v8730_v62  ;;  %v13340_v57 = vpop.f32.mrf.mxu1 }
0x157e   : > { %8898 = vst.msk [vmem:[#allocation2 + $0x178] sm:$0xff] %vm1108_vm0, %v13340_v57  ;;  %13332 = vmatmul.mubr.msk.f32.vlgmr.msra.gmra.mxu0 %vm1446_vm10, %v8657_v55  ;;  %13341 = vmatprep.subr.mxu0 %v16436_v32 }
0x157f   : > { %v8888_v17 = vpop.f32.mrf.mxu1  ;;  %13342 = vmatpush3.msra.mxu0 %v16436_v32  ;;  %13345 = vmatprep.mubr.msk.f32.mxu0 %vm1446_vm10, %v15584_v43 }
0x1580   : > { %8897 = vst.msk [vmem:[#allocation2 + $0x170] sm:$0xff] %vm1108_vm0, %v8888_v17  ;;  %13343 = vmatprep.subr.mxu0 %v16432_v52 }
0x1581   : > { %13344 = vmatpush3.msra.mxu0 %v16432_v52  ;;  %v13354_v40 = vpop.f32.mrf.mxu1  ;;  %v9068_v41 = vld [vmem:[#allocation2 + $0x78] sm:$0xff] }
0x1582   : > { %9052 = vst.msk [vmem:[#allocation2 + $0x278] sm:$0xff] %vm1108_vm0, %v13354_v40  ;;  %13346 = vmatmul.mubr.msk.f32.vlgmr.msra.gmra.mxu0 %vm1446_vm10, %v17817_v63  ;;  %13355 = vmatprep.subr.mxu0 %v9087_v59  ;;  %v9072_v63 = vld [vmem:[#allocation2 + $0x90] sm:$0xff] }
0x1583   : > { %v9042_v28 = vpop.f32.mrf.mxu1  ;;  %13357 = vmatprep.mubr.msk.f32.mxu0 %vm1108_vm0, %v9070_v53  ;;  %v9067_v43 = vld [vmem:[#allocation2 + $0x70] sm:$0xff]  ;;  %13356 = vmatpush3.msra.mxu0 %v9087_v59 }
0x1584   : > { %9051 = vst.msk [vmem:[#allocation2 + $0x270] sm:$0xff] %vm1108_vm0, %v9042_v28  ;;  %13404 = vmatprep.mubr.msk.f32.mxu1 %vm1108_vm0, %v9067_v43  ;;  %13407 = vmatprep.subr.mxu0 %v9524_v20  ;;  %v10415_v43 = vld [vmem:[#allocation23 + $0x10] sm:$0xff] }
0x1585   : > { %13405 = vmatmul.mubr.msk.f32.gmra.mxu1 %vm1108_vm0, %v9068_v41  ;;  %v9505_v23 = vld [vmem:[#allocation2 + $0x178] sm:$0xff]  ;;  %v13385_v15 = vpop.f32.mrf.mxu1 }
0x1586   : > { %13358 = vmatmul.mubr.msk.f32.vlgmr.msra.gmra.mxu0 %vm1108_vm0, %v9071_v31  ;;  %13435 = vmatprep.mubr.msk.f32.mxu1 %vm1108_vm0, %v9490_v30  ;;  %v9507_v31 = vld [vmem:[#allocation2 + $0x180] sm:$0xff] }
0x1587   : > { %13360 = vmatprep.mubr.msk.f32.mxu0 %vm1108_vm0, %v9072_v63  ;;  %13408 = vmatpush3.msra.mxu0 %v9524_v20  ;;  %v9504_v39 = vld [vmem:[#allocation2 + $0x170] sm:$0xff]  ;;  %v9395_v55 = vpop.f32.mrf.mxu1 }
0x1588   : > { %13459 = vmatprep.subr.mxu0 %v16674_v51 }
0x1589   : > { %13436 = vmatmul.mubr.msk.f32.vlgmr.msra.gmra.mxu1 %vm1108_vm0, %v9491_v29  ;;  %v13388_v2 = vpop.f32.mrf.mxu1 }
0x158a   : > { %13361 = vmatmul.mubr.msk.f32.gmra.mxu0 %vm1108_vm0, %v9073_v34  ;;  %13438 = vmatprep.mubr.msk.f32.mxu1 %vm1108_vm0, %v9492_v25 }
0x158b   : > { %13363 = vmatprep.mubr.msk.f32.mxu0 %vm1108_vm0, %v9074_v33  ;;  %13486 = vmatpush3.msra.mxu1 %v10192_v19  ;;  %v9405_v10 = vpop.f32.mrf.mxu1 }
0x158c   : > { %13487 = vmatprep.subr.mxu1 %v10191_v60 }
0x158d   : > { %13439 = vmatmul.mubr.msk.f32.gmra.mxu1 %vm1108_vm0, %v9493_v58  ;;  %v13391_v46 = vpop.f32.mrf.mxu1  ;;  %v9508_v58 = vld [vmem:[#allocation2 + $0x188] sm:$0xff] }
0x158e   : > { %13364 = vmatmul.mubr.msk.f32.gmra.mxu0 %vm1108_vm0, %v9075_v9  ;;  %13441 = vmatprep.mubr.msk.f32.mxu1 %vm1108_vm0, %v9494_v4  ;;  %v16704_v9 = vld [vmem:[#allocation23 + $0x28] sm:$0xff] }
0x158f   : > { %13366 = vmatprep.mubr.msk.f32.mxu0 %vm1108_vm0, %v9076_v50  ;;  %13488 = vmatpush3.msra.mxu1 %v10191_v60  ;;  %v9415_v27 = vpop.f32.mrf.mxu1  ;;  %v9509_v50 = vld [vmem:[#allocation2 + $0x190] sm:$0xff] }
0x1590   : > { %13510 = vmatprep.subr.mxu1 %v10416_v11 }
0x1591   : > { %13442 = vmatmul.mubr.msk.f32.gmra.mxu1 %vm1108_vm0, %v9495_v48  ;;  %v13394_v12 = vpop.f32.mrf.mxu1 }
0x1592   : > { %13367 = vmatmul.mubr.msk.f32.gmra.mxu0 %vm1108_vm0, %v9077_v37  ;;  %13444 = vmatprep.mubr.msk.f32.mxu1 %vm1108_vm0, %v9496_v24 }
0x1593   : > { %13369 = vmatprep.mubr.msk.f32.mxu0 %vm1108_vm0, %v9078_v18  ;;  %v9425_v56 = vpop.f32.mrf.mxu1 }
0x1595   : > { %13445 = vmatmul.mubr.msk.f32.gmra.mxu1 %vm1108_vm0, %v9497_v35  ;;  %v13397_v17 = vpop.f32.mrf.mxu1 }
0x1596   : > { %13370 = vmatmul.mubr.msk.f32.gmra.mxu0 %vm1108_vm0, %v9079_v36  ;;  %13447 = vmatprep.mubr.msk.f32.mxu1 %vm1108_vm0, %v9498_v14  ;;  %v9510_v14 = vld [vmem:[#allocation2 + $0x198] sm:$0xff] }
0x1597   : > { %13372 = vmatprep.mubr.msk.f32.mxu0 %vm1108_vm0, %v9080_v21  ;;  %v9435_v63 = vpop.f32.mrf.mxu1 }
0x1599   : > { %13448 = vmatmul.mubr.msk.f32.gmra.mxu1 %vm1108_vm0, %v9499_v3  ;;  %v13400_v37 = vpop.f32.mrf.mxu1  ;;  %v9511_v3 = vld [vmem:[#allocation2 + $0x1a0] sm:$0xff] }
0x159a   : > { %13373 = vmatmul.mubr.msk.f32.gmra.mxu0 %vm1108_vm0, %v9081_v42  ;;  %13450 = vmatprep.mubr.msk.f32.mxu1 %vm1108_vm0, %v9500_v49 }
0x159b   : > { %13375 = vmatprep.mubr.msk.f32.mxu0 %vm1108_vm0, %v9082_v61  ;;  %v9445_v49 = vpop.f32.mrf.mxu1 }
0x159d   : > { %13451 = vmatmul.mubr.msk.f32.gmra.mxu1 %vm1108_vm0, %v9501_v6  ;;  %v13403_v60 = vpop.f32.mrf.mxu1 }
0x159e   : > { %13376 = vmatmul.mubr.msk.f32.gmra.mxu0 %vm1108_vm0, %v9083_v1  ;;  %13453 = vmatprep.mubr.msk.f32.mxu1 %vm1108_vm0, %v9502_v5 }
0x15a1   : > { %13454 = vmatmul.mubr.msk.f32.gmra.mxu1 %vm1108_vm0, %v9503_v44  ;;  %v9512_v44 = vld [vmem:[#allocation2 + $0x1a8] sm:$0xff] }
0x15a2   : > { %13456 = vmatprep.mubr.msk.f32.mxu1 %vm1108_vm0, %v9504_v39 }
0x15a5   : > { %13457 = vmatmul.mubr.msk.f32.gmra.mxu1 %vm1108_vm0, %v9505_v23  ;;  %v9513_v23 = vld [vmem:[#allocation2 + $0x1b0] sm:$0xff] }
0x163e   : > { %v13333_v47 = vpop.f32.mrf.mxu0 }
0x163f   : > { %v8817_v7 = vmul.f32 2.0, %v13333_v47 }
0x1640   : > { %v8807_v26 = vpop.f32.mrf.mxu0 }
0x1641   : > { %v8819_v45 = vsub.f32 %v8817_v7, %v16436_v32  ;;  %v8816_v13 = vmul.f32 2.0, %v8807_v26  ;;  %v9455_v7 = vpop.f32.mrf.mxu1 }
0x1642   : > { %v13347_v8 = vpop.f32.mrf.mxu0 }
0x1643   : > { %8821 = vst.msk [vmem:[#allocation2 + $0xf8] sm:$0xff] %vm1108_vm0, %v8819_v45  ;;  %v8818_v16 = vsub.f32 %v8816_v13, %v16432_v52  ;;  %8975 = vst.msk [vmem:[#allocation2 + $0x1f8] sm:$0xff] %vm1108_vm0, %v13347_v8  ;;  %v9516_v8 = vld [vmem:[#allocation2 + $0x1c8] sm:$0xff] }
0x1644   : > { %v8965_v38 = vpop.f32.mrf.mxu0 }
0x1645   : > { %8820 = vst.msk [vmem:[#allocation2 + $0xf0] sm:$0xff] %vm1108_vm0, %v8818_v16  ;;  %8974 = vst.msk [vmem:[#allocation2 + $0x1f0] sm:$0xff] %vm1108_vm0, %v8965_v38  ;;  %v9517_v16 = vld [vmem:[#allocation2 + $0x1d0] sm:$0xff] }
0x1646   : > { %v13359_v22 = vpop.f32.mrf.mxu0 }
0x1647   : > { %v16683_v0 = vadd.f32 %v13385_v15, %v13359_v22  ;;  %v9518_v22 = vld [vmem:[#allocation2 + $0x1d8] sm:$0xff] }
0x1648   : > { %v9202_v54 = vpop.f32.mrf.mxu0 }
0x1649   : > { %v16685_v32 = vadd.f32 %v9395_v55, %v9202_v54  ;;  %v9475_v52 = vmax.f32 %v16683_v0, 0.0  ;;  %v9520_v54 = vld [vmem:[#allocation2 + $0x1e8] sm:$0xff] }
0x164a   : > { %v13362_v62 = vpop.f32.mrf.mxu0  ;;  %v9085_v28 = vld [vmem:[#allocation2 + $0xf8] sm:$0xff]  ;;  %v9912_v0 = vld [vmem:[#allocation2 + $0x208] sm:$0xff] }
0x164b   : > { %v9474_v57 = vmax.f32 %v16685_v32, 0.0  ;;  %v9411_v59 = vadd.f32 %v13388_v2, %v13362_v62  ;;  %v9514_v2 = vld [vmem:[#allocation2 + $0x1b8] sm:$0xff]  ;;  %v9911_v32 = vld [vmem:[#allocation2 + $0x200] sm:$0xff] }
0x164c   : > { %v9212_v40 = vpop.f32.mrf.mxu0  ;;  %v9084_v20 = vld [vmem:[#allocation2 + $0xf0] sm:$0xff] }
0x164d   : > { %v9406_v53 = vadd.f32 %v9405_v10, %v9212_v40  ;;  %13378 = vmatprep.mubr.msk.f32.mxu0 %vm1108_vm0, %v9084_v20  ;;  %13489 = vmatprep.mubr.msk.f32.mxu1 %vm1446_vm10, %v9474_v57  ;;  %v16700_v29 = vmax.f32 %v9411_v59, 0.0  ;;  %v9521_v62 = vld [vmem:[#allocation2 + $0x1f0] sm:$0xff]  ;;  %v9914_v59 = vld [vmem:[#allocation2 + $0x218] sm:$0xff]  ;;  %v9915_v40 = vld [vmem:[#allocation2 + $0x220] sm:$0xff] }
0x164e   : > { %v13365_v41 = vpop.f32.mrf.mxu0  ;;  %13379 = vmatmul.mubr.msk.f32.gmra.mxu0 %vm1108_vm0, %v9085_v28  ;;  %13490 = vmatmul.mubr.msk.f32.vlgmr.msra.gmra.mxu1 %vm1446_vm10, %v9475_v52  ;;  %v9916_v20 = vld [vmem:[#allocation2 + $0x228] sm:$0xff]  ;;  %v9918_v28 = vld [vmem:[#allocation2 + $0x238] sm:$0xff] }
0x164f   : > { %v16697_v30 = vmax.f32 %v9406_v53, 0.0  ;;  %13409 = vmatprep.mubr.msk.f32.mxu0 %vm1108_vm0, %v9507_v31  ;;  %13511 = vmatpush3.msra.mxu1 %v10416_v11  ;;  %v9421_v34 = vadd.f32 %v13391_v46, %v13365_v41  ;;  %v9515_v46 = vld [vmem:[#allocation2 + $0x1c0] sm:$0xff]  ;;  %v9917_v53 = vld [vmem:[#allocation2 + $0x230] sm:$0xff]  ;;  %v9920_v41 = vld [vmem:[#allocation2 + $0x248] sm:$0xff] }
0x1650   : > { %v9222_v25 = vpop.f32.mrf.mxu0  ;;  %13512 = vmatprep.subr.mxu1 %v10415_v43  ;;  %v9921_v31 = vld [vmem:[#allocation2 + $0x250] sm:$0xff] }
0x1651   : > { %v9416_v33 = vadd.f32 %v9415_v27, %v9222_v25  ;;  %13492 = vmatprep.mubr.msk.f32.mxu1 %vm1446_vm10, %v16697_v30  ;;  %13513 = vmatpush3.msra.mxu1 %v10415_v43  ;;  %v16713_v24 = vmax.f32 %v9421_v34, 0.0  ;;  %v9919_v43 = vld [vmem:[#allocation2 + $0x240] sm:$0xff]  ;;  %v9924_v25 = vld [vmem:[#allocation2 + $0x268] sm:$0xff] }
0x1652   : > { %v13368_v4 = vpop.f32.mrf.mxu0  ;;  %13410 = vmatmul.mubr.msk.f32.vlgmr.msra.gmra.mxu0 %vm1108_vm0, %v9508_v58  ;;  %13493 = vmatmul.mubr.msk.f32.gmra.mxu1 %vm1446_vm10, %v16700_v29  ;;  %v9923_v34 = vld [vmem:[#allocation2 + $0x260] sm:$0xff]  ;;  %v12536_v58 = vld [vmem:[#allocation24] ss:$0 sm:$0xff] }
0x1653   : > { %v16709_v48 = vmax.f32 %v9416_v33, 0.0  ;;  %13412 = vmatprep.mubr.msk.f32.mxu0 %vm1108_vm0, %v9509_v50  ;;  %13460 = vmatpush3.msra.mxu0 %v16674_v51  ;;  %v9431_v18 = vadd.f32 %v13394_v12, %v13368_v4  ;;  %v9925_v33 = vld [vmem:[#allocation2 + $0x270] sm:$0xff]  ;;  %10164 = vst.msk [vmem:[#allocation3 + $0x18] sm:$0xff] %vm1446_vm10, %v12536_v58  ;;  %10161 = vst.msk [vmem:[#allocation3] sm:$0xff] %vm1446_vm10, %v12536_v58 }
0x1654   : > { %v9232_v35 = vpop.f32.mrf.mxu0  ;;  %13538 = vmatprep.subr.mxu0 %v16704_v9  ;;  %10162 = vst.msk [vmem:[#allocation3 + $0x8] sm:$0xff] %vm1446_vm10, %v12536_v58  ;;  %10163 = vst.msk [vmem:[#allocation3 + $0x10] sm:$0xff] %vm1446_vm10, %v12536_v58  ;;  %v11329_v4 = vld [vmem:[#allocation29 + $0x18] sm:$0xff]  ;;  %v11328_v50 = vld [vmem:[#allocation29 + $0x10] sm:$0xff] }
0x1655   : > { %v9426_v36 = vadd.f32 %v9425_v56, %v9232_v35  ;;  %13495 = vmatprep.mubr.msk.f32.mxu1 %vm1446_vm10, %v16709_v48  ;;  %v16724_v61 = vmax.f32 %v9431_v18, 0.0  ;;  %v9519_v56 = vld [vmem:[#allocation2 + $0x1e0] sm:$0xff]  ;;  %10165 = vst.msk [vmem:[#allocation3 + $0x20] sm:$0xff] %vm1446_vm10, %v12536_v58  ;;  %10166 = vst.msk [vmem:[#allocation3 + $0x28] sm:$0xff] %vm1446_vm10, %v12536_v58  ;;  %13588 = vmatprep.subr.mxu1 %v11329_v4 }
0x1656   : > { %v13371_v21 = vpop.f32.mrf.mxu0  ;;  %13413 = vmatmul.mubr.msk.f32.gmra.mxu0 %vm1108_vm0, %v9510_v14  ;;  %13496 = vmatmul.mubr.msk.f32.gmra.mxu1 %vm1446_vm10, %v16713_v24  ;;  %10167 = vst.msk [vmem:[#allocation3 + $0x30] sm:$0xff] %vm1446_vm10, %v12536_v58  ;;  %10168 = vst.msk [vmem:[#allocation3 + $0x38] sm:$0xff] %vm1446_vm10, %v12536_v58 }
0x1657   : > { %v16721_v42 = vmax.f32 %v9426_v36, 0.0  ;;  %13415 = vmatprep.mubr.msk.f32.mxu0 %vm1108_vm0, %v9511_v3  ;;  %v9441_v6 = vadd.f32 %v13397_v17, %v13371_v21  ;;  %v9522_v17 = vld [vmem:[#allocation2 + $0x1f8] sm:$0xff]  ;;  %10169 = vst.msk [vmem:[#allocation3 + $0x40] sm:$0xff] %vm1446_vm10, %v12536_v58  ;;  %10170 = vst.msk [vmem:[#allocation3 + $0x48] sm:$0xff] %vm1446_vm10, %v12536_v58 }
0x1658   : > { %v9242_v1 = vpop.f32.mrf.mxu0  ;;  %10171 = vst.msk [vmem:[#allocation3 + $0x50] sm:$0xff] %vm1446_vm10, %v12536_v58  ;;  %10172 = vst.msk [vmem:[#allocation3 + $0x58] sm:$0xff] %vm1446_vm10, %v12536_v58 }
0x1659   : > { %v9436_v5 = vadd.f32 %v9435_v63, %v9242_v1  ;;  %13498 = vmatprep.mubr.msk.f32.mxu1 %vm1446_vm10, %v16721_v42  ;;  %v16734_v51 = vmax.f32 %v9441_v6, 0.0  ;;  %v9922_v63 = vld [vmem:[#allocation2 + $0x258] sm:$0xff]  ;;  %10173 = vst.msk [vmem:[#allocation3 + $0x60] sm:$0xff] %vm1446_vm10, %v12536_v58  ;;  %10174 = vst.msk [vmem:[#allocation3 + $0x68] sm:$0xff] %vm1446_vm10, %v12536_v58 }
0x165a   : > { %v13374_v39 = vpop.f32.mrf.mxu0  ;;  %13416 = vmatmul.mubr.msk.f32.gmra.mxu0 %vm1108_vm0, %v9512_v44  ;;  %13499 = vmatmul.mubr.msk.f32.gmra.mxu1 %vm1446_vm10, %v16724_v61  ;;  %10175 = vst.msk [vmem:[#allocation3 + $0x70] sm:$0xff] %vm1446_vm10, %v12536_v58  ;;  %10176 = vst.msk [vmem:[#allocation3 + $0x78] sm:$0xff] %vm1446_vm10, %v12536_v58 }
0x165b   : > { %v16731_v19 = vmax.f32 %v9436_v5, 0.0  ;;  %13418 = vmatprep.mubr.msk.f32.mxu0 %vm1108_vm0, %v9513_v23  ;;  %v9451_v11 = vadd.f32 %v13400_v37, %v13374_v39  ;;  %v13406_v37 = vpop.f32.mrf.mxu1 }
0x165c   : > { %v9252_v15 = vpop.f32.mrf.mxu0 }
0x165d   : > { %v9446_v55 = vadd.f32 %v9445_v49, %v9252_v15  ;;  %13501 = vmatprep.mubr.msk.f32.mxu1 %vm1446_vm10, %v16731_v19  ;;  %v16744_v27 = vmax.f32 %v9451_v11, 0.0  ;;  %v10177_v15 = vld [vmem:[#allocation3 + $0x10] sm:$0xff] }
0x165e   : > { %v13377_v10 = vpop.f32.mrf.mxu0  ;;  %13419 = vmatmul.mubr.msk.f32.gmra.mxu0 %vm1108_vm0, %v9514_v2  ;;  %13502 = vmatmul.mubr.msk.f32.gmra.mxu1 %vm1446_vm10, %v16734_v51 }
0x165f   : > { %v16741_v47 = vmax.f32 %v9446_v55, 0.0  ;;  %13421 = vmatprep.mubr.msk.f32.mxu0 %vm1108_vm0, %v9515_v46  ;;  %v9461_v26 = vadd.f32 %v13403_v60, %v13377_v10  ;;  %v10178_v60 = vld [vmem:[#allocation3 + $0x18] sm:$0xff]  ;;  %v10185_v58 = vld [vmem:[#allocation3 + $0x50] sm:$0xff] }
0x1660   : > { %v9262_v45 = vpop.f32.mrf.mxu0 }
0x1661   : > { %v9456_v13 = vadd.f32 %v9455_v7, %v9262_v45  ;;  %13504 = vmatprep.mubr.msk.f32.mxu1 %vm1446_vm10, %v16741_v47  ;;  %v16754_v38 = vmax.f32 %v9461_v26, 0.0 }
0x1662   : > { %13422 = vmatmul.mubr.msk.f32.gmra.mxu0 %vm1108_vm0, %v9516_v8  ;;  %13505 = vmatmul.mubr.msk.f32.gmra.mxu1 %vm1446_vm10, %v16744_v27 }
0x1663   : > { %v16751_v12 = vmax.f32 %v9456_v13, 0.0  ;;  %13424 = vmatprep.mubr.msk.f32.mxu0 %vm1108_vm0, %v9517_v16  ;;  %v10179_v13 = vld [vmem:[#allocation3 + $0x20] sm:$0xff] }
0x1665   : > { %13507 = vmatprep.mubr.msk.f32.mxu1 %vm1446_vm10, %v16751_v12 }
0x1666   : > { %13425 = vmatmul.mubr.msk.f32.gmra.mxu0 %vm1108_vm0, %v9518_v22  ;;  %13508 = vmatmul.mubr.msk.f32.gmra.mxu1 %vm1446_vm10, %v16754_v38 }
0x1667   : > { %13427 = vmatprep.mubr.msk.f32.mxu0 %vm1108_vm0, %v9519_v56  ;;  %13514 = vmatprep.mubr.msk.f32.mxu1 %vm1446_vm10, %v9474_v57  ;;  %v9913_v57 = vld [vmem:[#allocation2 + $0x210] sm:$0xff]  ;;  %v10182_v56 = vld [vmem:[#allocation3 + $0x38] sm:$0xff] }
0x166a   : > { %13428 = vmatmul.mubr.msk.f32.gmra.mxu0 %vm1108_vm0, %v9520_v54  ;;  %13515 = vmatmul.mubr.msk.f32.vlgmr.msra.gmra.mxu1 %vm1446_vm10, %v9475_v52  ;;  %v10615_v52 = vld [vmem:[#allocation23 + $0x20] sm:$0xff] }
0x166b   : > { %13430 = vmatprep.mubr.msk.f32.mxu0 %vm1108_vm0, %v9521_v62  ;;  %13517 = vmatprep.mubr.msk.f32.mxu1 %vm1446_vm10, %v16697_v30 }
0x166c   : > { %13589 = vmatpush3.msra.mxu1 %v11329_v4  ;;  %v10188_v4 = vld [vmem:[#allocation3 + $0x68] sm:$0xff] }
0x166d   : > { %13590 = vmatprep.subr.mxu1 %v11328_v50 }
0x166e   : > { %13431 = vmatmul.mubr.msk.f32.gmra.mxu0 %vm1108_vm0, %v9522_v17  ;;  %13518 = vmatmul.mubr.msk.f32.gmra.mxu1 %vm1446_vm10, %v16700_v29 }
0x166f   : > { %13461 = vmatprep.mubr.msk.f32.mxu0 %vm1108_vm0, %v9911_v32  ;;  %13520 = vmatprep.mubr.msk.f32.mxu1 %vm1446_vm10, %v16709_v48  ;;  %v10181_v32 = vld [vmem:[#allocation3 + $0x30] sm:$0xff] }
0x1670   : > { %13591 = vmatpush3.msra.mxu1 %v11328_v50 }
0x1672   : > { %13462 = vmatmul.mubr.msk.f32.vlgmr.msra.gmra.mxu0 %vm1108_vm0, %v9912_v0  ;;  %13521 = vmatmul.mubr.msk.f32.gmra.mxu1 %vm1446_vm10, %v16713_v24 }
0x1673   : > { %13464 = vmatprep.mubr.msk.f32.mxu0 %vm1108_vm0, %v9913_v57  ;;  %13523 = vmatprep.mubr.msk.f32.mxu1 %vm1446_vm10, %v16721_v42 }
0x1674   : > { %13539 = vmatpush3.msra.mxu0 %v16704_v9  ;;  %v9926_v9 = vld [vmem:[#allocation2 + $0x278] sm:$0xff] }
0x1675   : > { %13540 = vmatprep.subr.mxu0 %v10615_v52 }
0x1676   : > { %13465 = vmatmul.mubr.msk.f32.gmra.mxu0 %vm1108_vm0, %v9914_v59  ;;  %13524 = vmatmul.mubr.msk.f32.gmra.mxu1 %vm1446_vm10, %v16724_v61  ;;  %v10184_v59 = vld [vmem:[#allocation3 + $0x48] sm:$0xff] }
0x1677   : > { %13467 = vmatprep.mubr.msk.f32.mxu0 %vm1108_vm0, %v9915_v40  ;;  %13526 = vmatprep.mubr.msk.f32.mxu1 %vm1446_vm10, %v16731_v19 }
0x1678   : > { %13541 = vmatpush3.msra.mxu0 %v10615_v52 }
0x167a   : > { %13468 = vmatmul.mubr.msk.f32.gmra.mxu0 %vm1108_vm0, %v9916_v20  ;;  %13527 = vmatmul.mubr.msk.f32.gmra.mxu1 %vm1446_vm10, %v16734_v51 }
0x167b   : > { %13470 = vmatprep.mubr.msk.f32.mxu0 %vm1108_vm0, %v9917_v53  ;;  %13529 = vmatprep.mubr.msk.f32.mxu1 %vm1446_vm10, %v16741_v47 }
0x167e   : > { %13471 = vmatmul.mubr.msk.f32.gmra.mxu0 %vm1108_vm0, %v9918_v28  ;;  %13530 = vmatmul.mubr.msk.f32.gmra.mxu1 %vm1446_vm10, %v16744_v27  ;;  %v10183_v28 = vld [vmem:[#allocation3 + $0x40] sm:$0xff] }
0x167f   : > { %13473 = vmatprep.mubr.msk.f32.mxu0 %vm1108_vm0, %v9919_v43  ;;  %13532 = vmatprep.mubr.msk.f32.mxu1 %vm1446_vm10, %v16751_v12 }
0x1682   : > { %13474 = vmatmul.mubr.msk.f32.gmra.mxu0 %vm1108_vm0, %v9920_v41  ;;  %13533 = vmatmul.mubr.msk.f32.gmra.mxu1 %vm1446_vm10, %v16754_v38 }
0x1683   : > { %13476 = vmatprep.mubr.msk.f32.mxu0 %vm1108_vm0, %v9921_v31 }
0x1686   : > { %13477 = vmatmul.mubr.msk.f32.gmra.mxu0 %vm1108_vm0, %v9922_v63  ;;  %v10186_v63 = vld [vmem:[#allocation3 + $0x58] sm:$0xff] }
0x1687   : > { %13479 = vmatprep.mubr.msk.f32.mxu0 %vm1108_vm0, %v9923_v34 }
0x168a   : > { %13480 = vmatmul.mubr.msk.f32.gmra.mxu0 %vm1108_vm0, %v9924_v25 }
0x168b   : > { %13482 = vmatprep.mubr.msk.f32.mxu0 %vm1108_vm0, %v9925_v33 }
0x168e   : > { %13483 = vmatmul.mubr.msk.f32.gmra.mxu0 %vm1108_vm0, %v9926_v9 }
0x168f   : > { %13542 = vmatprep.mubr.msk.f32.mxu0 %vm1446_vm10, %v16697_v30  ;;  %v11105_v30 = vld [vmem:[#allocation29 + $0x8] sm:$0xff] }
0x1690   : > { %13563 = vmatprep.subr.mxu0 %v11105_v30 }
0x1692   : > { %13543 = vmatmul.mubr.msk.f32.vlgmr.msra.gmra.mxu0 %vm1446_vm10, %v16700_v29  ;;  %v11104_v29 = vld [vmem:[#allocation29] sm:$0xff] }
0x1693   : > { %13545 = vmatprep.mubr.msk.f32.mxu0 %vm1446_vm10, %v16709_v48  ;;  %13564 = vmatpush3.msra.mxu0 %v11105_v30  ;;  %v16852_v48 = vld [vmem:[#allocation29 + $0x28] sm:$0xff] }
0x1694   : > { %13565 = vmatprep.subr.mxu0 %v11104_v29 }
0x1695   : > { %13566 = vmatpush3.msra.mxu0 %v11104_v29 }
0x1696   : > { %13546 = vmatmul.mubr.msk.f32.gmra.mxu0 %vm1446_vm10, %v16713_v24  ;;  %13616 = vmatprep.subr.mxu0 %v16852_v48  ;;  %v9465_v24 = vpop.f32.mrf.mxu1 }
0x1697   : > { %13548 = vmatprep.mubr.msk.f32.mxu0 %vm1446_vm10, %v16721_v42 }
0x1698   : > { %v16855_v18 = vpop.f32.mrf.mxu1 }
0x169a   : > { %13549 = vmatmul.mubr.msk.f32.gmra.mxu0 %vm1446_vm10, %v16724_v61  ;;  %v16857_v35 = vpop.f32.mrf.mxu1 }
0x169b   : > { %13551 = vmatprep.mubr.msk.f32.mxu0 %vm1446_vm10, %v16731_v19 }
0x169c   : > { %v16859_v36 = vpop.f32.mrf.mxu1 }
0x169e   : > { %13552 = vmatmul.mubr.msk.f32.gmra.mxu0 %vm1446_vm10, %v16734_v51  ;;  %v16861_v14 = vpop.f32.mrf.mxu1 }
0x169f   : > { %13554 = vmatprep.mubr.msk.f32.mxu0 %vm1446_vm10, %v16741_v47  ;;  %v10180_v47 = vld [vmem:[#allocation3 + $0x28] sm:$0xff] }
0x16a0   : > { %v16863_v21 = vpop.f32.mrf.mxu1 }
0x16a2   : > { %13555 = vmatmul.mubr.msk.f32.gmra.mxu0 %vm1446_vm10, %v16744_v27  ;;  %v16865_v3 = vpop.f32.mrf.mxu1 }
0x16a3   : > { %13557 = vmatprep.mubr.msk.f32.mxu0 %vm1446_vm10, %v16751_v12 }
0x16a4   : > { %v16867_v42 = vpop.f32.mrf.mxu1 }
0x16a6   : > { %13558 = vmatmul.mubr.msk.f32.gmra.mxu0 %vm1446_vm10, %v16754_v38  ;;  %v16869_v49 = vpop.f32.mrf.mxu1 }
0x16a8   : > { %v16871_v61 = vpop.f32.mrf.mxu1 }
0x16aa   : > { %v16873_v6 = vpop.f32.mrf.mxu1 }
0x16ac   : > { %v16875_v1 = vpop.f32.mrf.mxu1 }
0x16ae   : > { %v16877_v5 = vpop.f32.mrf.mxu1 }
0x16b0   : > { %v16879_v44 = vpop.f32.mrf.mxu1 }
0x16b2   : > { %v16881_v39 = vpop.f32.mrf.mxu1 }
0x16b4   : > { %v16883_v23 = vpop.f32.mrf.mxu1 }
0x16b6   : > { %v16885_v19 = vpop.f32.mrf.mxu1 }
0x170e   : > { %v13380_v51 = vpop.f32.mrf.mxu0  ;;  %v13491_v11 = vpop.f32.mrf.mxu1 }
0x170f   : > { %v10371_v55 = vadd.f32 %v13491_v11, %v10178_v60  ;;  %v9471_v2 = vadd.f32 %v13406_v37, %v13380_v51  ;;  %v10187_v60 = vld [vmem:[#allocation3 + $0x60] sm:$0xff] }
0x1710   : > { %v9272_v10 = vpop.f32.mrf.mxu0  ;;  %v10301_v46 = vpop.f32.mrf.mxu1 }
0x1711   : > { %10385 = vst.msk [vmem:[#allocation3 + $0x18] sm:$0xff] %vm1446_vm10, %v10371_v55  ;;  %v9466_v7 = vadd.f32 %v9465_v24, %v9272_v10  ;;  %v10370_v27 = vadd.f32 %v10301_v46, %v10177_v15  ;;  %v9489_v12 = vmax.f32 %v9471_v2, 0.0  ;;  %v10190_v55 = vld [vmem:[#allocation3 + $0x78] sm:$0xff] }
0x1712   : > { %v16888_v26 = vpop.f32.mrf.mxu0  ;;  %v13494_v45 = vpop.f32.mrf.mxu1 }
0x1713   : > { %v9488_v8 = vmax.f32 %v9466_v7, 0.0  ;;  %10384 = vst.msk [vmem:[#allocation3 + $0x10] sm:$0xff] %vm1446_vm10, %v10370_v27  ;;  %v10373_v16 = vadd.f32 %v13494_v45, %v10180_v47  ;;  %v10189_v47 = vld [vmem:[#allocation3 + $0x70] sm:$0xff] }
0x1714   : > { %v16891_v38 = vpop.f32.mrf.mxu0  ;;  %v10311_v22 = vpop.f32.mrf.mxu1 }
0x1715   : > { %10387 = vst.msk [vmem:[#allocation3 + $0x28] sm:$0xff] %vm1446_vm10, %v10373_v16  ;;  %v10372_v54 = vadd.f32 %v10311_v22, %v10179_v13  ;;  %13535 = vmatprep.mubr.msk.f32.mxu1 %vm1446_vm10, %v9488_v8  ;;  %13560 = vmatprep.mubr.msk.f32.mxu0 %vm1446_vm10, %v9488_v8  ;;  %v10399_v13 = vld [vmem:[#allocation3 + $0x8] sm:$0xff]  ;;  %v10398_v22 = vld [vmem:[#allocation3] sm:$0xff] }
0x1716   : > { %v16896_v62 = vpop.f32.mrf.mxu0  ;;  %v13497_v17 = vpop.f32.mrf.mxu1  ;;  %13536 = vmatmul.mubr.msk.f32.gmra.mxu1 %vm1446_vm10, %v9489_v12  ;;  %13561 = vmatmul.mubr.msk.f32.gmra.mxu0 %vm1446_vm10, %v9489_v12 }
0x1717   : > { %10386 = vst.msk [vmem:[#allocation3 + $0x20] sm:$0xff] %vm1446_vm10, %v10372_v54  ;;  %v10375_v0 = vadd.f32 %v13497_v17, %v10182_v56 }
0x1718   : > { %v16901_v57 = vpop.f32.mrf.mxu0  ;;  %v10321_v52 = vpop.f32.mrf.mxu1 }
0x1719   : > { %10389 = vst.msk [vmem:[#allocation3 + $0x38] sm:$0xff] %vm1446_vm10, %v10375_v0  ;;  %v10374_v40 = vadd.f32 %v10321_v52, %v10181_v32  ;;  %v10401_v52 = vld [vmem:[#allocation3 + $0x18] sm:$0xff] }
0x171a   : > { %v16904_v20 = vpop.f32.mrf.mxu0  ;;  %v13500_v53 = vpop.f32.mrf.mxu1 }
0x171b   : > { %10388 = vst.msk [vmem:[#allocation3 + $0x30] sm:$0xff] %vm1446_vm10, %v10374_v40  ;;  %v10377_v43 = vadd.f32 %v13500_v53, %v10184_v59 }
0x171c   : > { %v16907_v41 = vpop.f32.mrf.mxu0  ;;  %v10331_v31 = vpop.f32.mrf.mxu1 }
0x171d   : > { %10391 = vst.msk [vmem:[#allocation3 + $0x48] sm:$0xff] %vm1446_vm10, %v10377_v43  ;;  %v10376_v34 = vadd.f32 %v10331_v31, %v10183_v28  ;;  %v10400_v28 = vld [vmem:[#allocation3 + $0x10] sm:$0xff] }
0x171e   : > { %v16910_v25 = vpop.f32.mrf.mxu0  ;;  %v13503_v33 = vpop.f32.mrf.mxu1 }
0x171f   : > { %10390 = vst.msk [vmem:[#allocation3 + $0x40] sm:$0xff] %vm1446_vm10, %v10376_v34  ;;  %v10379_v9 = vadd.f32 %v13503_v33, %v10186_v63  ;;  %v9838_v63 = vadd.f32 %v16855_v18, %v16888_v26  ;;  %v10403_v33 = vld [vmem:[#allocation3 + $0x28] sm:$0xff]  ;;  %v9848_v18 = vadd.f32 %v16859_v36, %v16896_v62  ;;  %v11528_v36 = vld [vmem:[#allocation29 + $0x20] sm:$0xff] }
0x1720   : > { %v16913_v30 = vpop.f32.mrf.mxu0  ;;  %v10341_v29 = vpop.f32.mrf.mxu1 }
0x1721   : > { %10393 = vst.msk [vmem:[#allocation3 + $0x58] sm:$0xff] %vm1446_vm10, %v10379_v9  ;;  %v10378_v50 = vadd.f32 %v10341_v29, %v10185_v58  ;;  %v9833_v9 = vadd.f32 %v16857_v35, %v16891_v38  ;;  %v9843_v35 = vadd.f32 %v16861_v14, %v16901_v57  ;;  %v9858_v14 = vadd.f32 %v16863_v21, %v16904_v20 }
0x1722   : > { %v16916_v37 = vpop.f32.mrf.mxu0  ;;  %v13506_v24 = vpop.f32.mrf.mxu1 }
0x1723   : > { %10392 = vst.msk [vmem:[#allocation3 + $0x50] sm:$0xff] %vm1446_vm10, %v10378_v50  ;;  %v10381_v51 = vadd.f32 %v13506_v24, %v10188_v4  ;;  %v10402_v24 = vld [vmem:[#allocation3 + $0x20] sm:$0xff] }
0x1724   : > { %v16919_v11 = vpop.f32.mrf.mxu0  ;;  %v10351_v15 = vpop.f32.mrf.mxu1  ;;  %v10407_v57 = vld [vmem:[#allocation3 + $0x48] sm:$0xff] }
0x1725   : > { %10395 = vst.msk [vmem:[#allocation3 + $0x68] sm:$0xff] %vm1446_vm10, %v10381_v51  ;;  %v10380_v2 = vadd.f32 %v10351_v15, %v10187_v60 }
0x1726   : > { %v16922_v10 = vpop.f32.mrf.mxu0  ;;  %v13509_v46 = vpop.f32.mrf.mxu1 }
0x1727   : > { %10394 = vst.msk [vmem:[#allocation3 + $0x60] sm:$0xff] %vm1446_vm10, %v10380_v2  ;;  %v10383_v7 = vadd.f32 %v13509_v46, %v10190_v55  ;;  %v10405_v55 = vld [vmem:[#allocation3 + $0x38] sm:$0xff] }
0x1728   : > { %v16925_v27 = vpop.f32.mrf.mxu0  ;;  %v10361_v45 = vpop.f32.mrf.mxu1 }
0x1729   : > { %10397 = vst.msk [vmem:[#allocation3 + $0x78] sm:$0xff] %vm1446_vm10, %v10383_v7  ;;  %v10382_v8 = vadd.f32 %v10361_v45, %v10189_v47 }
0x172a   : > { %v16928_v16 = vpop.f32.mrf.mxu0  ;;  %v13516_v12 = vpop.f32.mrf.mxu1 }
0x172b   : > { %10396 = vst.msk [vmem:[#allocation3 + $0x70] sm:$0xff] %vm1446_vm10, %v10382_v8  ;;  %v10569_v56 = vadd.f32 %v13516_v12, %v10399_v13  ;;  %v10404_v13 = vld [vmem:[#allocation3 + $0x30] sm:$0xff] }
0x172c   : > { %v16931_v54 = vpop.f32.mrf.mxu0  ;;  %v10489_v17 = vpop.f32.mrf.mxu1 }
0x172d   : > { %10585 = vst.msk [vmem:[#allocation3 + $0x8] sm:$0xff] %vm1446_vm10, %v10569_v56  ;;  %v10568_v32 = vadd.f32 %v10489_v17, %v10398_v22  ;;  %v9853_v17 = vadd.f32 %v16865_v3, %v16907_v41  ;;  %v10409_v41 = vld [vmem:[#allocation3 + $0x58] sm:$0xff] }
0x172e   : > { %v16934_v0 = vpop.f32.mrf.mxu0  ;;  %v13519_v59 = vpop.f32.mrf.mxu1 }
0x172f   : > { %10584 = vst.msk [vmem:[#allocation3] sm:$0xff] %vm1446_vm10, %v10568_v32  ;;  %v10571_v40 = vadd.f32 %v13519_v59, %v10401_v52 }
0x1730   : > { %v16937_v53 = vpop.f32.mrf.mxu0  ;;  %v10499_v43 = vpop.f32.mrf.mxu1 }
0x1731   : > { %10587 = vst.msk [vmem:[#allocation3 + $0x18] sm:$0xff] %vm1446_vm10, %v10571_v40  ;;  %v10570_v31 = vadd.f32 %v10499_v43, %v10400_v28  ;;  %v10406_v40 = vld [vmem:[#allocation3 + $0x40] sm:$0xff] }
0x1732   : > { %v13463_v34 = vpop.f32.mrf.mxu0  ;;  %v13522_v58 = vpop.f32.mrf.mxu1 }
0x1733   : > { %10586 = vst.msk [vmem:[#allocation3 + $0x10] sm:$0xff] %vm1446_vm10, %v10570_v31  ;;  %v10573_v29 = vadd.f32 %v13522_v58, %v10403_v33  ;;  %v10123_v4 = vadd.f32 %v13463_v34, %v9838_v63  ;;  %v9863_v34 = vadd.f32 %v16869_v49, %v16913_v30  ;;  %v9878_v49 = vadd.f32 %v16871_v61, %v16916_v37 }
0x1734   : > { %v10043_v50 = vpop.f32.mrf.mxu0  ;;  %v10509_v60 = vpop.f32.mrf.mxu1 }
0x1735   : > { %10589 = vst.msk [vmem:[#allocation3 + $0x28] sm:$0xff] %vm1446_vm10, %v10573_v29  ;;  %v10122_v51 = vadd.f32 %v10043_v50, %v9833_v9  ;;  %v10572_v15 = vadd.f32 %v10509_v60, %v10402_v24  ;;  %v10139_v47 = vmax.f32 %v10123_v4, 0.0  ;;  %v10408_v29 = vld [vmem:[#allocation3 + $0x50] sm:$0xff]  ;;  %v10411_v60 = vld [vmem:[#allocation3 + $0x68] sm:$0xff] }
0x1736   : > { %v13466_v26 = vpop.f32.mrf.mxu0  ;;  %v13525_v2 = vpop.f32.mrf.mxu1 }
0x1737   : > { %v10138_v38 = vmax.f32 %v10122_v51, 0.0  ;;  %10588 = vst.msk [vmem:[#allocation3 + $0x20] sm:$0xff] %vm1446_vm10, %v10572_v15  ;;  %v10575_v46 = vadd.f32 %v13525_v2, %v10405_v55  ;;  %v10125_v7 = vadd.f32 %v13466_v26, %v9848_v18  ;;  %v9873_v15 = vadd.f32 %v16873_v6, %v16919_v11  ;;  %v10410_v2 = vld [vmem:[#allocation3 + $0x60] sm:$0xff] }
0x1738   : > { %v10053_v45 = vpop.f32.mrf.mxu0  ;;  %v10519_v8 = vpop.f32.mrf.mxu1  ;;  %v9888_v6 = vadd.f32 %v16875_v1, %v16922_v10  ;;  %v9898_v1 = vadd.f32 %v16879_v44, %v16928_v16  ;;  %v9908_v44 = vadd.f32 %v16883_v23, %v16934_v0  ;;  %v10601_v23 = vld [vmem:[#allocation3 + $0x8] sm:$0xff] }
0x1739   : > { %10591 = vst.msk [vmem:[#allocation3 + $0x38] sm:$0xff] %vm1446_vm10, %v10575_v46  ;;  %v10124_v12 = vadd.f32 %v10053_v45, %v9843_v35  ;;  %v10574_v22 = vadd.f32 %v10519_v8, %v10404_v13  ;;  %13567 = vmatprep.mubr.msk.f32.mxu0 %vm1446_vm10, %v10138_v38  ;;  %13592 = vmatprep.mubr.msk.f32.mxu1 %vm1446_vm10, %v10138_v38  ;;  %v16964_v59 = vmax.f32 %v10125_v7, 0.0 }
0x173a   : > { %v13469_v62 = vpop.f32.mrf.mxu0  ;;  %v13528_v56 = vpop.f32.mrf.mxu1  ;;  %13568 = vmatmul.mubr.msk.f32.vlgmr.msra.gmra.mxu0 %vm1446_vm10, %v10139_v47  ;;  %13593 = vmatmul.mubr.msk.f32.vlgmr.msra.gmra.mxu1 %vm1446_vm10, %v10139_v47  ;;  %v9883_v47 = vadd.f32 %v16877_v5, %v16925_v27  ;;  %v9893_v5 = vadd.f32 %v16881_v39, %v16931_v54  ;;  %v9903_v39 = vadd.f32 %v16885_v19, %v16937_v53 }
0x173b   : > { %v16960_v32 = vmax.f32 %v10124_v12, 0.0  ;;  %10590 = vst.msk [vmem:[#allocation3 + $0x30] sm:$0xff] %vm1446_vm10, %v10574_v22  ;;  %v10577_v52 = vadd.f32 %v13528_v56, %v10407_v57  ;;  %13617 = vmatpush3.msra.mxu0 %v16852_v48  ;;  %v10127_v21 = vadd.f32 %v13469_v62, %v9858_v14  ;;  %v9868_v48 = vadd.f32 %v16867_v42, %v16910_v25 }
0x173c   : > { %v10063_v20 = vpop.f32.mrf.mxu0  ;;  %v10529_v28 = vpop.f32.mrf.mxu1  ;;  %13618 = vmatprep.subr.mxu0 %v11528_v36 }
0x173d   : > { %10593 = vst.msk [vmem:[#allocation3 + $0x48] sm:$0xff] %vm1446_vm10, %v10577_v52  ;;  %v10126_v43 = vadd.f32 %v10063_v20, %v9853_v17  ;;  %v10576_v31 = vadd.f32 %v10529_v28, %v10406_v40  ;;  %13570 = vmatprep.mubr.msk.f32.mxu0 %vm1446_vm10, %v16960_v32  ;;  %13595 = vmatprep.mubr.msk.f32.mxu1 %vm1446_vm10, %v16960_v32  ;;  %v16982_v9 = vmax.f32 %v10127_v21, 0.0  ;;  %v10600_v20 = vld [vmem:[#allocation3] sm:$0xff] }
0x173e   : > { %v13472_v3 = vpop.f32.mrf.mxu0  ;;  %v13531_v63 = vpop.f32.mrf.mxu1  ;;  %13571 = vmatmul.mubr.msk.f32.gmra.mxu0 %vm1446_vm10, %v16964_v59  ;;  %13596 = vmatmul.mubr.msk.f32.gmra.mxu1 %vm1446_vm10, %v16964_v59 }
0x173f   : > { %v16979_v33 = vmax.f32 %v10126_v43, 0.0  ;;  %10592 = vst.msk [vmem:[#allocation3 + $0x40] sm:$0xff] %vm1446_vm10, %v10576_v31  ;;  %v10579_v58 = vadd.f32 %v13531_v63, %v10409_v41  ;;  %13619 = vmatpush3.msra.mxu0 %v11528_v36  ;;  %v10129_v42 = vadd.f32 %v13472_v3, %v9868_v48  ;;  %v10603_v43 = vld [vmem:[#allocation3 + $0x18] sm:$0xff]  ;;  %v10602_v48 = vld [vmem:[#allocation3 + $0x10] sm:$0xff]  ;;  %v10605_v63 = vld [vmem:[#allocation3 + $0x28] sm:$0xff] }
0x1740   : > { %v10073_v25 = vpop.f32.mrf.mxu0  ;;  %v10539_v4 = vpop.f32.mrf.mxu1 }
0x1741   : > { %10595 = vst.msk [vmem:[#allocation3 + $0x58] sm:$0xff] %vm1446_vm10, %v10579_v58  ;;  %v10128_v50 = vadd.f32 %v10073_v25, %v9863_v34  ;;  %v10578_v24 = vadd.f32 %v10539_v4, %v10408_v29  ;;  %13573 = vmatprep.mubr.msk.f32.mxu0 %vm1446_vm10, %v16979_v33  ;;  %13598 = vmatprep.mubr.msk.f32.mxu1 %vm1446_vm10, %v16979_v33  ;;  %v17000_v55 = vmax.f32 %v10129_v42, 0.0  ;;  %v17083_v58 = vld [vmem:[#allocation30] ss:$0 sm:$0xff]  ;;  %v10604_v42 = vld [vmem:[#allocation3 + $0x20] sm:$0xff] }
0x1742   : > { %v13475_v30 = vpop.f32.mrf.mxu0  ;;  %v13534_v51 = vpop.f32.mrf.mxu1  ;;  %13574 = vmatmul.mubr.msk.f32.gmra.mxu0 %vm1446_vm10, %v16982_v9  ;;  %13599 = vmatmul.mubr.msk.f32.gmra.mxu1 %vm1446_vm10, %v16982_v9 }
0x1743   : > { %v16997_v18 = vmax.f32 %v10128_v50, 0.0  ;;  %10594 = vst.msk [vmem:[#allocation3 + $0x50] sm:$0xff] %vm1446_vm10, %v10578_v24  ;;  %v10581_v26 = vadd.f32 %v13534_v51, %v10411_v60  ;;  %v10131_v61 = vadd.f32 %v13475_v30, %v9878_v49  ;;  %v10606_v30 = vld [vmem:[#allocation3 + $0x30] sm:$0xff] }
0x1744   : > { %v10083_v37 = vpop.f32.mrf.mxu0  ;;  %v10549_v35 = vpop.f32.mrf.mxu1 }
0x1745   : > { %10597 = vst.msk [vmem:[#allocation3 + $0x68] sm:$0xff] %vm1446_vm10, %v10581_v26  ;;  %v10130_v38 = vadd.f32 %v10083_v37, %v9873_v15  ;;  %v10580_v46 = vadd.f32 %v10549_v35, %v10410_v2  ;;  %13576 = vmatprep.mubr.msk.f32.mxu0 %vm1446_vm10, %v16997_v18  ;;  %13601 = vmatprep.mubr.msk.f32.mxu1 %vm1446_vm10, %v16997_v18  ;;  %v17018_v45 = vmax.f32 %v10131_v61, 0.0  ;;  %v10609_v26 = vld [vmem:[#allocation3 + $0x48] sm:$0xff] }
0x1746   : > { %v13478_v11 = vpop.f32.mrf.mxu0  ;;  %13577 = vmatmul.mubr.msk.f32.gmra.mxu0 %vm1446_vm10, %v17000_v55  ;;  %13602 = vmatmul.mubr.msk.f32.gmra.mxu1 %vm1446_vm10, %v17000_v55  ;;  %v10608_v2 = vld [vmem:[#allocation3 + $0x40] sm:$0xff] }
0x1747   : > { %v17015_v7 = vmax.f32 %v10130_v38, 0.0  ;;  %10596 = vst.msk [vmem:[#allocation3 + $0x60] sm:$0xff] %vm1446_vm10, %v10580_v46  ;;  %v10133_v13 = vadd.f32 %v13478_v11, %v9888_v6 }
0x1748   : > { %v10093_v8 = vpop.f32.mrf.mxu0  ;;  %v10611_v11 = vld [vmem:[#allocation3 + $0x58] sm:$0xff] }
0x1749   : > { %v10132_v12 = vadd.f32 %v10093_v8, %v9883_v47  ;;  %13579 = vmatprep.mubr.msk.f32.mxu0 %vm1446_vm10, %v17015_v7  ;;  %13604 = vmatprep.mubr.msk.f32.mxu1 %vm1446_vm10, %v17015_v7  ;;  %v17034_v22 = vmax.f32 %v10133_v13, 0.0 }
0x174a   : > { %v13481_v10 = vpop.f32.mrf.mxu0  ;;  %13580 = vmatmul.mubr.msk.f32.gmra.mxu0 %vm1446_vm10, %v17018_v45  ;;  %13605 = vmatmul.mubr.msk.f32.gmra.mxu1 %vm1446_vm10, %v17018_v45  ;;  %v10610_v13 = vld [vmem:[#allocation3 + $0x50] sm:$0xff] }
0x174b   : > { %v17032_v27 = vmax.f32 %v10132_v12, 0.0  ;;  %v10135_v36 = vadd.f32 %v13481_v10, %v9898_v1 }
0x174c   : > { %v10103_v14 = vpop.f32.mrf.mxu0 }
0x174d   : > { %v10134_v62 = vadd.f32 %v10103_v14, %v9893_v5  ;;  %13582 = vmatprep.mubr.msk.f32.mxu0 %vm1446_vm10, %v17032_v27  ;;  %13607 = vmatprep.mubr.msk.f32.mxu1 %vm1446_vm10, %v17032_v27  ;;  %v17050_v57 = vmax.f32 %v10135_v36, 0.0 }
0x174e   : > { %v13484_v16 = vpop.f32.mrf.mxu0  ;;  %13583 = vmatmul.mubr.msk.f32.gmra.mxu0 %vm1446_vm10, %v17034_v22  ;;  %13608 = vmatmul.mubr.msk.f32.gmra.mxu1 %vm1446_vm10, %v17034_v22 }
0x174f   : > { %v17048_v54 = vmax.f32 %v10134_v62, 0.0  ;;  %v17052_v56 = vadd.f32 %v13484_v16, %v9908_v44 }
0x1750   : > { %v10113_v17 = vpop.f32.mrf.mxu0 }
0x1751   : > { %v17054_v52 = vadd.f32 %v10113_v17, %v9903_v39  ;;  %13585 = vmatprep.mubr.msk.f32.mxu0 %vm1446_vm10, %v17048_v54  ;;  %13610 = vmatprep.mubr.msk.f32.mxu1 %vm1446_vm10, %v17048_v54  ;;  %v10153_v21 = vmax.f32 %v17052_v56, 0.0 }
0x1752   : > { %v13544_v0 = vpop.f32.mrf.mxu0  ;;  %13586 = vmatmul.mubr.msk.f32.gmra.mxu0 %vm1446_vm10, %v17050_v57  ;;  %13611 = vmatmul.mubr.msk.f32.gmra.mxu1 %vm1446_vm10, %v17050_v57 }
0x1753   : > { %v10152_v19 = vmax.f32 %v17054_v52, 0.0  ;;  %v10753_v53 = vadd.f32 %v13544_v0, %v10601_v23  ;;  %13620 = vmatprep.mubr.msk.f32.mxu0 %vm1446_vm10, %v16960_v32  ;;  %v10413_v52 = vld [vmem:[#allocation3 + $0x78] sm:$0xff]  ;;  %v10613_v0 = vld [vmem:[#allocation3 + $0x68] sm:$0xff] }
0x1754   : > { %v10683_v40 = vpop.f32.mrf.mxu0 }
0x1755   : > { %10767 = vst.msk [vmem:[#allocation3 + $0x8] sm:$0xff] %vm1446_vm10, %v10753_v53  ;;  %v10752_v28 = vadd.f32 %v10683_v40, %v10600_v20  ;;  %13613 = vmatprep.mubr.msk.f32.mxu1 %vm1446_vm10, %v10152_v19  ;;  %v10412_v20 = vld [vmem:[#allocation3 + $0x70] sm:$0xff] }
0x1756   : > { %v13547_v31 = vpop.f32.mrf.mxu0  ;;  %13614 = vmatmul.mubr.msk.f32.gmra.mxu1 %vm1446_vm10, %v10153_v21  ;;  %13621 = vmatmul.mubr.msk.f32.vlgmr.msra.gmra.mxu0 %vm1446_vm10, %v16964_v59 }
0x1757   : > { %10766 = vst.msk [vmem:[#allocation3] sm:$0xff] %vm1446_vm10, %v10752_v28  ;;  %v10755_v32 = vadd.f32 %v13547_v31, %v10603_v43  ;;  %13623 = vmatprep.mubr.msk.f32.mxu0 %vm1446_vm10, %v16979_v33  ;;  %v10612_v28 = vld [vmem:[#allocation3 + $0x60] sm:$0xff] }
0x1758   : > { %v10693_v3 = vpop.f32.mrf.mxu0 }
0x1759   : > { %10769 = vst.msk [vmem:[#allocation3 + $0x18] sm:$0xff] %vm1446_vm10, %v10755_v32  ;;  %v10754_v41 = vadd.f32 %v10693_v3, %v10602_v48 }
0x175a   : > { %v13550_v34 = vpop.f32.mrf.mxu0  ;;  %13624 = vmatmul.mubr.msk.f32.gmra.mxu0 %vm1446_vm10, %v16982_v9  ;;  %v10607_v9 = vld [vmem:[#allocation3 + $0x38] sm:$0xff] }
0x175b   : > { %10768 = vst.msk [vmem:[#allocation3 + $0x10] sm:$0xff] %vm1446_vm10, %v10754_v41  ;;  %v10757_v59 = vadd.f32 %v13550_v34, %v10605_v63  ;;  %13626 = vmatprep.mubr.msk.f32.mxu0 %vm1446_vm10, %v16997_v18 }
0x175c   : > { %v10703_v33 = vpop.f32.mrf.mxu0  ;;  %v17088_v25 = vld [vmem:[#allocation3 + $0x8] sm:$0xff] }
0x175d   : > { %10771 = vst.msk [vmem:[#allocation3 + $0x28] sm:$0xff] %vm1446_vm10, %v10757_v59  ;;  %v10756_v29 = vadd.f32 %v10703_v33, %v10604_v42  ;;  %v10799_v4 = vsel %vm1446_vm10, %v17088_v25, 0.0  ;;  %11075 = vst.msk [vmem:[#allocation3 + $0x8] sm:$0xff] %vm1446_vm10, %v17083_v58 }
0x175e   : > { %v13553_v50 = vpop.f32.mrf.mxu0  ;;  %10800 = vadd.xlane.f32.xlu0 %v10799_v4  ;;  %13627 = vmatmul.mubr.msk.f32.gmra.mxu0 %vm1446_vm10, %v17000_v55  ;;  %v17097_v24 = vld [vmem:[#allocation3] sm:$0xff] }
0x175f   : > { %10770 = vst.msk [vmem:[#allocation3 + $0x20] sm:$0xff] %vm1446_vm10, %v10756_v29  ;;  %v10759_v49 = vadd.f32 %v13553_v50, %v10607_v9  ;;  %13629 = vmatprep.mubr.msk.f32.mxu0 %vm1446_vm10, %v17015_v7  ;;  %11074 = vst.msk [vmem:[#allocation3] sm:$0xff] %vm1446_vm10, %v17083_v58  ;;  %v10796_v18 = vsel %vm1446_vm10, %v17097_v24, 0.0 }
0x1760   : > { %v10713_v60 = vpop.f32.mrf.mxu0  ;;  %v17104_v51 = vld [vmem:[#allocation3 + $0x18] sm:$0xff] }
0x1761   : > { %10773 = vst.msk [vmem:[#allocation3 + $0x38] sm:$0xff] %vm1446_vm10, %v10759_v49  ;;  %v10758_v15 = vadd.f32 %v10713_v60, %v10606_v30  ;;  %11077 = vst.msk [vmem:[#allocation3 + $0x18] sm:$0xff] %vm1446_vm10, %v17083_v58  ;;  %v10805_v6 = vsel %vm1446_vm10, %v17104_v51, 0.0 }
0x1762   : > { %v13556_v55 = vpop.f32.mrf.mxu0  ;;  %10797 = vadd.xlane.f32.xlu0 %v10796_v18  ;;  %13630 = vmatmul.mubr.msk.f32.gmra.mxu0 %vm1446_vm10, %v17018_v45  ;;  %v17113_v61 = vld [vmem:[#allocation3 + $0x10] sm:$0xff] }
0x1763   : > { %10772 = vst.msk [vmem:[#allocation3 + $0x30] sm:$0xff] %vm1446_vm10, %v10758_v15  ;;  %v10761_v37 = vadd.f32 %v13556_v55, %v10609_v26  ;;  %13632 = vmatprep.mubr.msk.f32.mxu0 %vm1446_vm10, %v17032_v27  ;;  %11076 = vst.msk [vmem:[#allocation3 + $0x10] sm:$0xff] %vm1446_vm10, %v17083_v58  ;;  %v10802_v10 = vsel %vm1446_vm10, %v17113_v61, 0.0 }
0x1764   : > { %v10723_v35 = vpop.f32.mrf.mxu0  ;;  %v17120_v38 = vld [vmem:[#allocation3 + $0x28] sm:$0xff] }
0x1765   : > { %10775 = vst.msk [vmem:[#allocation3 + $0x48] sm:$0xff] %vm1446_vm10, %v10761_v37  ;;  %v10760_v46 = vadd.f32 %v10723_v35, %v10608_v2  ;;  %11079 = vst.msk [vmem:[#allocation3 + $0x28] sm:$0xff] %vm1446_vm10, %v17083_v58 }
0x1766   : > { %v13559_v47 = vpop.f32.mrf.mxu0  ;;  %10806 = vadd.xlane.f32.xlu0 %v10805_v6  ;;  %13633 = vmatmul.mubr.msk.f32.gmra.mxu0 %vm1446_vm10, %v17034_v22  ;;  %v17129_v7 = vld [vmem:[#allocation3 + $0x20] sm:$0xff]  ;;  %v10811_v22 = vsel %vm1446_vm10, %v17120_v38, 0.0 }
0x1767   : > { %10774 = vst.msk [vmem:[#allocation3 + $0x40] sm:$0xff] %vm1446_vm10, %v10760_v46  ;;  %v10763_v45 = vadd.f32 %v13559_v47, %v10611_v11  ;;  %13635 = vmatprep.mubr.msk.f32.mxu0 %vm1446_vm10, %v17048_v54  ;;  %11078 = vst.msk [vmem:[#allocation3 + $0x20] sm:$0xff] %vm1446_vm10, %v17083_v58  ;;  %v10808_v62 = vsel %vm1446_vm10, %v17129_v7, 0.0 }
0x1768   : > { %v10733_v8 = vpop.f32.mrf.mxu0  ;;  %v17136_v12 = vld [vmem:[#allocation3 + $0x38] sm:$0xff] }
0x1769   : > { %10777 = vst.msk [vmem:[#allocation3 + $0x58] sm:$0xff] %vm1446_vm10, %v10763_v45  ;;  %v10762_v1 = vadd.f32 %v10733_v8, %v10610_v13  ;;  %11081 = vst.msk [vmem:[#allocation3 + $0x38] sm:$0xff] %vm1446_vm10, %v17083_v58  ;;  %v10817_v16 = vsel %vm1446_vm10, %v17136_v12, 0.0  ;;  %v11091_v47 = vld [vmem:[#allocation3 + $0x18] sm:$0xff]  ;;  %v11312_v45 = vld [vmem:[#allocation3 + $0x8] sm:$0xff] }
0x176a   : > { %10803 = vadd.xlane.f32.xlu0 %v10802_v10  ;;  %13636 = vmatmul.mubr.msk.f32.gmra.mxu0 %vm1446_vm10, %v17050_v57  ;;  %v17145_v5 = vld [vmem:[#allocation3 + $0x30] sm:$0xff] }
0x176b   : > { %10776 = vst.msk [vmem:[#allocation3 + $0x50] sm:$0xff] %vm1446_vm10, %v10762_v1  ;;  %13638 = vmatprep.mubr.msk.f32.mxu0 %vm1446_vm10, %v10152_v19  ;;  %11080 = vst.msk [vmem:[#allocation3 + $0x30] sm:$0xff] %vm1446_vm10, %v17083_v58  ;;  %v10814_v39 = vsel %vm1446_vm10, %v17145_v5, 0.0 }
0x176c   : > { %v17153_v27 = vld [vmem:[#allocation3 + $0x48] sm:$0xff] }
0x176d   : > { %11083 = vst.msk [vmem:[#allocation3 + $0x48] sm:$0xff] %vm1446_vm10, %v17083_v58  ;;  %v10823_v54 = vsel %vm1446_vm10, %v17153_v27, 0.0 }
0x176e   : > { %10812 = vadd.xlane.f32.xlu0 %v10811_v22  ;;  %13639 = vmatmul.mubr.msk.f32.gmra.mxu0 %vm1446_vm10, %v10153_v21  ;;  %v17162_v36 = vld [vmem:[#allocation3 + $0x40] sm:$0xff]  ;;  %v11090_v22 = vld [vmem:[#allocation3 + $0x10] sm:$0xff] }
0x176f   : > { %11082 = vst.msk [vmem:[#allocation3 + $0x40] sm:$0xff] %vm1446_vm10, %v17083_v58  ;;  %v10820_v57 = vsel %vm1446_vm10, %v17162_v36, 0.0 }
0x1770   : > { %v17166_v14 = vld [vmem:[#allocation3 + $0x58] sm:$0xff] }
0x1771   : > { %11085 = vst.msk [vmem:[#allocation3 + $0x58] sm:$0xff] %vm1446_vm10, %v17083_v58  ;;  %v10829_v56 = vsel %vm1446_vm10, %v17166_v14, 0.0 }
0x1772   : > { %10809 = vadd.xlane.f32.xlu0 %v10808_v62  ;;  %v17172_v44 = vld [vmem:[#allocation3 + $0x50] sm:$0xff] }
0x1773   : > { %11084 = vst.msk [vmem:[#allocation3 + $0x50] sm:$0xff] %vm1446_vm10, %v17083_v58  ;;  %v10826_v17 = vsel %vm1446_vm10, %v17172_v44, 0.0 }
0x1776   : > { %10818 = vadd.xlane.f32.xlu0 %v10817_v16 }
0x177a   : > { %10815 = vadd.xlane.f32.xlu0 %v10814_v39 }
0x177e   : > { %10824 = vadd.xlane.f32.xlu0 %v10823_v54 }
0x1782   : > { %10821 = vadd.xlane.f32.xlu0 %v10820_v57 }
0x1786   : > { %10830 = vadd.xlane.f32.xlu0 %v10829_v56 }
0x178a   : > { %10827 = vadd.xlane.f32.xlu0 %v10826_v17  ;;  %v11093_v17 = vld [vmem:[#allocation3 + $0x28] sm:$0xff] }
0x17d6   : > { %v13537_v23 = vpop.f32.mrf.mxu1  ;;  %v13562_v19 = vpop.f32.mrf.mxu0 }
0x17d7   : > { %v10583_v53 = vadd.f32 %v13537_v23, %v10413_v52  ;;  %v10765_v21 = vadd.f32 %v13562_v19, %v10613_v0 }
0x17d8   : > { %v10559_v40 = vpop.f32.mrf.mxu1  ;;  %v10743_v43 = vpop.f32.mrf.mxu0 }
0x17d9   : > { %10599 = vst.msk [vmem:[#allocation3 + $0x78] sm:$0xff] %vm1446_vm10, %v10583_v53  ;;  %10779 = vst.msk [vmem:[#allocation3 + $0x68] sm:$0xff] %vm1446_vm10, %v10765_v21  ;;  %v10582_v31 = vadd.f32 %v10559_v40, %v10412_v20  ;;  %v10764_v32 = vadd.f32 %v10743_v43, %v10612_v28  ;;  %v11092_v20 = vld [vmem:[#allocation3 + $0x20] sm:$0xff] }
0x17db   : > { %10598 = vst.msk [vmem:[#allocation3 + $0x70] sm:$0xff] %vm1446_vm10, %v10582_v31  ;;  %10778 = vst.msk [vmem:[#allocation3 + $0x60] sm:$0xff] %vm1446_vm10, %v10764_v32 }
0x17e0   : > { %v17192_v48 = vld [vmem:[#allocation3 + $0x68] sm:$0xff]  ;;  %v17194_v3 = vld [vmem:[#allocation3 + $0x78] sm:$0xff] }
0x17e1   : > { %v10835_v41 = vsel %vm1446_vm10, %v17192_v48, 0.0  ;;  %11087 = vst.msk [vmem:[#allocation3 + $0x68] sm:$0xff] %vm1446_vm10, %v17083_v58  ;;  %11089 = vst.msk [vmem:[#allocation3 + $0x78] sm:$0xff] %vm1446_vm10, %v17083_v58  ;;  %v10841_v42 = vsel %vm1446_vm10, %v17194_v3, 0.0 }
0x17e2   : > { %10836 = vadd.xlane.f32.xlu0 %v10835_v41  ;;  %v17202_v63 = vld [vmem:[#allocation3 + $0x60] sm:$0xff]  ;;  %v17204_v34 = vld [vmem:[#allocation3 + $0x70] sm:$0xff]  ;;  %v11095_v41 = vld [vmem:[#allocation3 + $0x38] sm:$0xff] }
0x17e3   : > { %v10832_v59 = vsel %vm1446_vm10, %v17202_v63, 0.0  ;;  %11086 = vst.msk [vmem:[#allocation3 + $0x60] sm:$0xff] %vm1446_vm10, %v17083_v58  ;;  %11088 = vst.msk [vmem:[#allocation3 + $0x70] sm:$0xff] %vm1446_vm10, %v17083_v58  ;;  %v10838_v4 = vsel %vm1446_vm10, %v17204_v34, 0.0 }
0x17e4   : > { %10833 = vadd.xlane.f32.xlu1 %v10832_v59 }
0x17e6   : > { %10842 = vadd.xlane.f32.xlu0 %v10841_v42 }
0x17e7   : > { %v10801_v33 = vpop.xlane.xlu0 %10800 }
0x17e8   : > { %v10846_v29 = vmul.f32 0.0625, %v10801_v33 }
0x17ea   : > { %v17217_v9 = vsub.f32 %v17088_v25, %v10846_v29  ;;  %10839 = vadd.xlane.f32.xlu0 %v10838_v4 }
0x17eb   : > { %v10798_v50 = vpop.xlane.xlu0 %10797 }
0x17ec   : > { %v10845_v49 = vmul.f32 0.0625, %v10798_v50  ;;  %v10878_v30 = vmul.f32 %v17217_v9, %v17217_v9  ;;  %v11094_v50 = vld [vmem:[#allocation3 + $0x30] sm:$0xff] }
0x17ee   : > { %v17222_v58 = vsub.f32 %v17097_v24, %v10845_v49  ;;  %v10896_v60 = vsel %vm1446_vm10, %v10878_v30, 0.0 }
0x17ef   : > { %v10807_v15 = vpop.xlane.xlu0 %10806  ;;  %10897 = vadd.xlane.f32.xlu0 %v10896_v60 }
0x17f0   : > { %v10848_v18 = vmul.f32 0.0625, %v10807_v15  ;;  %v10877_v26 = vmul.f32 %v17222_v58, %v17222_v58 }
0x17f2   : > { %v17228_v25 = vsub.f32 %v17104_v51, %v10848_v18  ;;  %v10893_v55 = vsel %vm1446_vm10, %v10877_v26, 0.0 }
0x17f3   : > { %v10804_v37 = vpop.xlane.xlu0 %10803  ;;  %10894 = vadd.xlane.f32.xlu0 %v10893_v55  ;;  %v11097_v55 = vld [vmem:[#allocation3 + $0x48] sm:$0xff] }
0x17f4   : > { %v10847_v2 = vmul.f32 0.0625, %v10804_v37  ;;  %v10880_v24 = vmul.f32 %v17228_v25, %v17228_v25 }
0x17f6   : > { %v17234_v35 = vsub.f32 %v17113_v61, %v10847_v2  ;;  %v10902_v46 = vsel %vm1446_vm10, %v10880_v24, 0.0  ;;  %v11311_v61 = vld [vmem:[#allocation3] sm:$0xff] }
0x17f7   : > { %v10813_v6 = vpop.xlane.xlu0 %10812  ;;  %10903 = vadd.xlane.f32.xlu0 %v10902_v46 }
0x17f8   : > { %v10850_v11 = vmul.f32 0.0625, %v10813_v6  ;;  %v10879_v51 = vmul.f32 %v17234_v35, %v17234_v35 }
0x17fa   : > { %v17240_v13 = vsub.f32 %v17120_v38, %v10850_v11  ;;  %v13569_v8 = vpop.f32.mrf.mxu0  ;;  %v13594_v1 = vpop.f32.mrf.mxu1  ;;  %v10899_v10 = vsel %vm1446_vm10, %v10879_v51, 0.0 }
0x17fb   : > { %v11284_v62 = vadd.f32 %v13569_v8, %v11091_v47  ;;  %v11482_v16 = vadd.f32 %v13594_v1, %v11312_v45  ;;  %v10810_v39 = vpop.xlane.xlu0 %10809  ;;  %10900 = vadd.xlane.f32.xlu0 %v10899_v10  ;;  %v11096_v45 = vld [vmem:[#allocation3 + $0x40] sm:$0xff] }
0x17fc   : > { %v10849_v54 = vmul.f32 0.0625, %v10810_v39  ;;  %v11214_v57 = vpop.f32.mrf.mxu0  ;;  %v11402_v56 = vpop.f32.mrf.mxu1  ;;  %v10882_v52 = vmul.f32 %v17240_v13, %v17240_v13 }
0x17fd   : > { %11298 = vst.msk [vmem:[#allocation3 + $0x18] sm:$0xff] %vm1446_vm10, %v11284_v62  ;;  %11498 = vst.msk [vmem:[#allocation3 + $0x8] sm:$0xff] %vm1446_vm10, %v11482_v16  ;;  %v11283_v38 = vadd.f32 %v11214_v57, %v11090_v22  ;;  %v11481_v23 = vadd.f32 %v11402_v56, %v11311_v61  ;;  %v11099_v16 = vld [vmem:[#allocation3 + $0x58] sm:$0xff] }
0x17fe   : > { %v17248_v0 = vsub.f32 %v17129_v7, %v10849_v54  ;;  %v13572_v19 = vpop.f32.mrf.mxu0  ;;  %v13597_v53 = vpop.f32.mrf.mxu1  ;;  %v10908_v21 = vsel %vm1446_vm10, %v10882_v52, 0.0 }
0x17ff   : > { %11297 = vst.msk [vmem:[#allocation3 + $0x10] sm:$0xff] %vm1446_vm10, %v11283_v38  ;;  %11497 = vst.msk [vmem:[#allocation3] sm:$0xff] %vm1446_vm10, %v11481_v23  ;;  %v11286_v40 = vadd.f32 %v13572_v19, %v11093_v17  ;;  %v10819_v28 = vpop.xlane.xlu0 %10818  ;;  %10909 = vadd.xlane.f32.xlu0 %v10908_v21  ;;  %v11098_v23 = vld [vmem:[#allocation3 + $0x50] sm:$0xff] }
0x1800   : > { %v10852_v43 = vmul.f32 0.0625, %v10819_v28  ;;  %v11224_v31 = vpop.f32.mrf.mxu0  ;;  %v11412_v32 = vpop.f32.mrf.mxu1  ;;  %v10881_v7 = vmul.f32 %v17248_v0, %v17248_v0 }
0x1801   : > { %11300 = vst.msk [vmem:[#allocation3 + $0x28] sm:$0xff] %vm1446_vm10, %v11286_v40  ;;  %v11285_v59 = vadd.f32 %v11224_v31, %v11092_v20  ;;  %v11101_v31 = vld [vmem:[#allocation3 + $0x68] sm:$0xff] }
0x1802   : > { %v17257_v42 = vsub.f32 %v17136_v12, %v10852_v43  ;;  %v13575_v33 = vpop.f32.mrf.mxu0  ;;  %v13600_v29 = vpop.f32.mrf.mxu1  ;;  %v10905_v4 = vsel %vm1446_vm10, %v10881_v7, 0.0 }
0x1803   : > { %11299 = vst.msk [vmem:[#allocation3 + $0x20] sm:$0xff] %vm1446_vm10, %v11285_v59  ;;  %v11288_v49 = vadd.f32 %v13575_v33, %v11095_v41  ;;  %v10816_v30 = vpop.xlane.xlu0 %10815  ;;  %10906 = vadd.xlane.f32.xlu0 %v10905_v4 }
0x1804   : > { %v11314_v60 = vld [vmem:[#allocation3 + $0x18] sm:$0xff]  ;;  %v10851_v15 = vmul.f32 0.0625, %v10816_v30  ;;  %v11234_v18 = vpop.f32.mrf.mxu0  ;;  %v11422_v26 = vpop.f32.mrf.mxu1  ;;  %v10884_v37 = vmul.f32 %v17257_v42, %v17257_v42 }
0x1805   : > { %v11484_v12 = vadd.f32 %v13597_v53, %v11314_v60  ;;  %11302 = vst.msk [vmem:[#allocation3 + $0x38] sm:$0xff] %vm1446_vm10, %v11288_v49  ;;  %v11287_v2 = vadd.f32 %v11234_v18, %v11094_v50  ;;  %v11100_v50 = vld [vmem:[#allocation3 + $0x60] sm:$0xff] }
0x1806   : > { %v11313_v24 = vld [vmem:[#allocation3 + $0x10] sm:$0xff]  ;;  %v17265_v46 = vsub.f32 %v17145_v5, %v10851_v15  ;;  %v13578_v6 = vpop.f32.mrf.mxu0  ;;  %v13603_v11 = vpop.f32.mrf.mxu1  ;;  %v10914_v47 = vsel %vm1446_vm10, %v10884_v37, 0.0  ;;  %v11103_v37 = vld [vmem:[#allocation3 + $0x78] sm:$0xff] }
0x1807   : > { %11500 = vst.msk [vmem:[#allocation3 + $0x18] sm:$0xff] %vm1446_vm10, %v11484_v12  ;;  %v11483_v51 = vadd.f32 %v11412_v32, %v11313_v24  ;;  %11301 = vst.msk [vmem:[#allocation3 + $0x30] sm:$0xff] %vm1446_vm10, %v11287_v2  ;;  %v11290_v8 = vadd.f32 %v13578_v6, %v11097_v55  ;;  %v10825_v1 = vpop.xlane.xlu0 %10824  ;;  %10915 = vadd.xlane.f32.xlu1 %v10914_v47 }
0x1808   : > { %v11316_v10 = vld [vmem:[#allocation3 + $0x28] sm:$0xff]  ;;  %v10854_v22 = vmul.f32 0.0625, %v10825_v1  ;;  %v11244_v61 = vpop.f32.mrf.mxu0  ;;  %v11432_v62 = vpop.f32.mrf.mxu1  ;;  %v10883_v5 = vmul.f32 %v17265_v46, %v17265_v46 }
0x1809   : > { %11499 = vst.msk [vmem:[#allocation3 + $0x10] sm:$0xff] %vm1446_vm10, %v11483_v51  ;;  %v11486_v39 = vadd.f32 %v13600_v29, %v11316_v10  ;;  %11304 = vst.msk [vmem:[#allocation3 + $0x48] sm:$0xff] %vm1446_vm10, %v11290_v8  ;;  %v11289_v54 = vadd.f32 %v11244_v61, %v11096_v45  ;;  %v11102_v51 = vld [vmem:[#allocation3 + $0x70] sm:$0xff] }
0x180a   : > { %v11315_v57 = vld [vmem:[#allocation3 + $0x20] sm:$0xff]  ;;  %v17275_v56 = vsub.f32 %v17153_v27, %v10854_v22  ;;  %v13581_v17 = vpop.f32.mrf.mxu0  ;;  %v13606_v52 = vpop.f32.mrf.mxu1  ;;  %v10911_v38 = vsel %vm1446_vm10, %v10883_v5, 0.0 }
0x180b   : > { %11502 = vst.msk [vmem:[#allocation3 + $0x28] sm:$0xff] %vm1446_vm10, %v11486_v39  ;;  %v11485_v19 = vadd.f32 %v11422_v26, %v11315_v57  ;;  %11303 = vst.msk [vmem:[#allocation3 + $0x40] sm:$0xff] %vm1446_vm10, %v11289_v54  ;;  %v11292_v53 = vadd.f32 %v13581_v17, %v11099_v16  ;;  %v10822_v21 = vpop.xlane.xlu0 %10821  ;;  %10912 = vadd.xlane.f32.xlu0 %v10911_v38  ;;  %v11514_v17 = vld [vmem:[#allocation3 + $0x8] sm:$0xff] }
0x180c   : > { %v11318_v20 = vld [vmem:[#allocation3 + $0x38] sm:$0xff]  ;;  %v10853_v40 = vmul.f32 0.0625, %v10822_v21  ;;  %v11254_v28 = vpop.f32.mrf.mxu0  ;;  %v11442_v43 = vpop.f32.mrf.mxu1  ;;  %v10886_v27 = vmul.f32 %v17275_v56, %v17275_v56  ;;  %v11513_v21 = vld [vmem:[#allocation3] sm:$0xff] }
0x180d   : > { %11501 = vst.msk [vmem:[#allocation3 + $0x20] sm:$0xff] %vm1446_vm10, %v11485_v19  ;;  %v11488_v32 = vadd.f32 %v13603_v11, %v11318_v20  ;;  %11306 = vst.msk [vmem:[#allocation3 + $0x58] sm:$0xff] %vm1446_vm10, %v11292_v53  ;;  %v11291_v41 = vadd.f32 %v11254_v28, %v11098_v23 }
0x180e   : > { %v11317_v7 = vld [vmem:[#allocation3 + $0x30] sm:$0xff]  ;;  %v17285_v59 = vsub.f32 %v17162_v36, %v10853_v40  ;;  %v13584_v33 = vpop.f32.mrf.mxu0  ;;  %v13609_v29 = vpop.f32.mrf.mxu1  ;;  %v10920_v4 = vsel %vm1446_vm10, %v10886_v27, 0.0  ;;  %v11516_v27 = vld [vmem:[#allocation3 + $0x18] sm:$0xff] }
0x180f   : > { %11504 = vst.msk [vmem:[#allocation3 + $0x38] sm:$0xff] %vm1446_vm10, %v11488_v32  ;;  %v11487_v49 = vadd.f32 %v11432_v62, %v11317_v7  ;;  %11305 = vst.msk [vmem:[#allocation3 + $0x50] sm:$0xff] %vm1446_vm10, %v11291_v41  ;;  %v11294_v30 = vadd.f32 %v13584_v33, %v11101_v31  ;;  %v10831_v60 = vpop.xlane.xlu0 %10830  ;;  %10921 = vadd.xlane.f32.xlu1 %v10920_v4 }
0x1810   : > { %v11320_v15 = vld [vmem:[#allocation3 + $0x48] sm:$0xff]  ;;  %v10856_v18 = vmul.f32 0.0625, %v10831_v60  ;;  %v11264_v26 = vpop.f32.mrf.mxu0  ;;  %v11452_v55 = vpop.f32.mrf.mxu1  ;;  %v10885_v36 = vmul.f32 %v17285_v59, %v17285_v59  ;;  %v11515_v4 = vld [vmem:[#allocation3 + $0x10] sm:$0xff] }
0x1811   : > { %11503 = vst.msk [vmem:[#allocation3 + $0x30] sm:$0xff] %vm1446_vm10, %v11487_v49  ;;  %v11490_v12 = vadd.f32 %v13606_v52, %v11320_v15  ;;  %11308 = vst.msk [vmem:[#allocation3 + $0x68] sm:$0xff] %vm1446_vm10, %v11294_v30  ;;  %v11293_v2 = vadd.f32 %v11264_v26, %v11100_v50 }
0x1812   : > { %v11319_v24 = vld [vmem:[#allocation3 + $0x40] sm:$0xff]  ;;  %v17295_v6 = vsub.f32 %v17166_v14, %v10856_v18  ;;  %v13587_v11 = vpop.f32.mrf.mxu0  ;;  %v13612_v47 = vpop.f32.mrf.mxu1  ;;  %v10917_v45 = vsel %vm1446_vm10, %v10885_v36, 0.0  ;;  %v11518_v18 = vld [vmem:[#allocation3 + $0x28] sm:$0xff] }
0x1813   : > { %11506 = vst.msk [vmem:[#allocation3 + $0x48] sm:$0xff] %vm1446_vm10, %v11490_v12  ;;  %v11489_v8 = vadd.f32 %v11442_v43, %v11319_v24  ;;  %11307 = vst.msk [vmem:[#allocation3 + $0x60] sm:$0xff] %vm1446_vm10, %v11293_v2  ;;  %v11296_v1 = vadd.f32 %v13587_v11, %v11103_v37  ;;  %v10828_v10 = vpop.xlane.xlu0 %10827  ;;  %10918 = vadd.xlane.f32.xlu0 %v10917_v45 }
0x1814   : > { %v11322_v22 = vld [vmem:[#allocation3 + $0x58] sm:$0xff]  ;;  %v10855_v61 = vmul.f32 0.0625, %v10828_v10  ;;  %v11274_v62 = vpop.f32.mrf.mxu0  ;;  %v10888_v14 = vmul.f32 %v17295_v6, %v17295_v6  ;;  %v11462_v57 = vpop.f32.mrf.mxu1  ;;  %v11517_v36 = vld [vmem:[#allocation3 + $0x20] sm:$0xff] }
0x1815   : > { %11505 = vst.msk [vmem:[#allocation3 + $0x40] sm:$0xff] %vm1446_vm10, %v11489_v8  ;;  %v11492_v16 = vadd.f32 %v13609_v29, %v11322_v22  ;;  %11310 = vst.msk [vmem:[#allocation3 + $0x78] sm:$0xff] %vm1446_vm10, %v11296_v1  ;;  %v11295_v5 = vadd.f32 %v11274_v62, %v11102_v51 }
0x1816   : > { %v11321_v39 = vld [vmem:[#allocation3 + $0x50] sm:$0xff]  ;;  %v17305_v54 = vsub.f32 %v17172_v44, %v10855_v61  ;;  %v13622_v52 = vpop.f32.mrf.mxu0  ;;  %v10926_v38 = vsel %vm1446_vm10, %v10888_v14, 0.0  ;;  %v13615_v31 = vpop.f32.mrf.mxu1 }
0x1817   : > { %11508 = vst.msk [vmem:[#allocation3 + $0x58] sm:$0xff] %vm1446_vm10, %v11492_v16  ;;  %v11491_v23 = vadd.f32 %v11452_v55, %v11321_v39  ;;  %11309 = vst.msk [vmem:[#allocation3 + $0x70] sm:$0xff] %vm1446_vm10, %v11295_v5  ;;  %v11666_v19 = vadd.f32 %v13622_v52, %v11514_v17  ;;  %10927 = vadd.xlane.f32.xlu1 %v10926_v38 }
0x1818   : > { %v11324_v53 = vld [vmem:[#allocation3 + $0x68] sm:$0xff]  ;;  %v11596_v20 = vpop.f32.mrf.mxu0  ;;  %v10887_v40 = vmul.f32 %v17305_v54, %v17305_v54  ;;  %v11472_v15 = vpop.f32.mrf.mxu1  ;;  %v11519_v10 = vld [vmem:[#allocation3 + $0x30] sm:$0xff] }
0x1819   : > { %11507 = vst.msk [vmem:[#allocation3 + $0x50] sm:$0xff] %vm1446_vm10, %v11491_v23  ;;  %v11494_v44 = vadd.f32 %v13612_v47, %v11324_v53  ;;  %11680 = vst.msk [vmem:[#allocation3 + $0x8] sm:$0xff] %vm1446_vm10, %v11666_v19  ;;  %v11665_v28 = vadd.f32 %v11596_v20, %v11513_v21  ;;  %v11520_v47 = vld [vmem:[#allocation3 + $0x38] sm:$0xff] }
0x181a   : > { %v11323_v43 = vld [vmem:[#allocation3 + $0x60] sm:$0xff]  ;;  %v13625_v32 = vpop.f32.mrf.mxu0  ;;  %v10923_v41 = vsel %vm1446_vm10, %v10887_v40, 0.0  ;;  %v11522_v16 = vld [vmem:[#allocation3 + $0x48] sm:$0xff] }
0x181b   : > { %11510 = vst.msk [vmem:[#allocation3 + $0x68] sm:$0xff] %vm1446_vm10, %v11494_v44  ;;  %v11493_v7 = vadd.f32 %v11462_v57, %v11323_v43  ;;  %11679 = vst.msk [vmem:[#allocation3] sm:$0xff] %vm1446_vm10, %v11665_v28  ;;  %v11668_v33 = vadd.f32 %v13625_v32, %v11516_v27  ;;  %10924 = vadd.xlane.f32.xlu0 %v10923_v41 }
0x181c   : > { %v11326_v29 = vld [vmem:[#allocation3 + $0x78] sm:$0xff]  ;;  %v11606_v50 = vpop.f32.mrf.mxu0  ;;  %v11521_v52 = vld [vmem:[#allocation3 + $0x40] sm:$0xff] }
0x181d   : > { %11509 = vst.msk [vmem:[#allocation3 + $0x60] sm:$0xff] %vm1446_vm10, %v11493_v7  ;;  %v11496_v49 = vadd.f32 %v13615_v31, %v11326_v29  ;;  %11682 = vst.msk [vmem:[#allocation3 + $0x18] sm:$0xff] %vm1446_vm10, %v11668_v33  ;;  %v11667_v30 = vadd.f32 %v11606_v50, %v11515_v4 }
0x181e   : > { %v11325_v60 = vld [vmem:[#allocation3 + $0x70] sm:$0xff]  ;;  %v13628_v26 = vpop.f32.mrf.mxu0  ;;  %v11524_v21 = vld [vmem:[#allocation3 + $0x58] sm:$0xff] }
0x181f   : > { %11512 = vst.msk [vmem:[#allocation3 + $0x78] sm:$0xff] %vm1446_vm10, %v11496_v49  ;;  %v11495_v55 = vadd.f32 %v11472_v15, %v11325_v60  ;;  %11681 = vst.msk [vmem:[#allocation3 + $0x10] sm:$0xff] %vm1446_vm10, %v11667_v30  ;;  %v11670_v37 = vadd.f32 %v13628_v26, %v11518_v18 }
0x1820   : > { %v11616_v12 = vpop.f32.mrf.mxu0  ;;  %v17321_v2 = vld [vmem:[#allocation3 + $0x8] sm:$0xff]  ;;  %v11523_v43 = vld [vmem:[#allocation3 + $0x50] sm:$0xff] }
0x1821   : > { %11511 = vst.msk [vmem:[#allocation3 + $0x70] sm:$0xff] %vm1446_vm10, %v11495_v55  ;;  %11684 = vst.msk [vmem:[#allocation3 + $0x28] sm:$0xff] %vm1446_vm10, %v11670_v37  ;;  %v11669_v24 = vadd.f32 %v11616_v12, %v11517_v36  ;;  %v11712_v11 = vsel %vm1446_vm10, %v17321_v2, 0.0 }
0x1822   : > { %11713 = vadd.xlane.f32.xlu1 %v11712_v11  ;;  %v13631_v45 = vpop.f32.mrf.mxu0  ;;  %v17327_v51 = vld [vmem:[#allocation3] sm:$0xff]  ;;  %v11526_v7 = vld [vmem:[#allocation3 + $0x68] sm:$0xff] }
0x1823   : > { %11683 = vst.msk [vmem:[#allocation3 + $0x20] sm:$0xff] %vm1446_vm10, %v11669_v24  ;;  %v11672_v8 = vadd.f32 %v13631_v45, %v11520_v47  ;;  %v11709_v1 = vsel %vm1446_vm10, %v17327_v51, 0.0 }
0x1824   : > { %11710 = vadd.xlane.f32.xlu0 %v11709_v1  ;;  %v11626_v22 = vpop.f32.mrf.mxu0  ;;  %v17332_v61 = vld [vmem:[#allocation3 + $0x18] sm:$0xff]  ;;  %v11525_v49 = vld [vmem:[#allocation3 + $0x60] sm:$0xff] }
0x1825   : > { %11686 = vst.msk [vmem:[#allocation3 + $0x38] sm:$0xff] %vm1446_vm10, %v11672_v8  ;;  %v11671_v62 = vadd.f32 %v11626_v22, %v11519_v10  ;;  %v11718_v14 = vsel %vm1446_vm10, %v17332_v61, 0.0 }
0x1826   : > { %11719 = vadd.xlane.f32.xlu1 %v11718_v14  ;;  %v13634_v5 = vpop.f32.mrf.mxu0  ;;  %v17337_v39 = vld [vmem:[#allocation3 + $0x10] sm:$0xff]  ;;  %v17386_v8 = vld [vmem:[#allocation3 + $0x78] sm:$0xff] }
0x1827   : > { %11685 = vst.msk [vmem:[#allocation3 + $0x30] sm:$0xff] %vm1446_vm10, %v11671_v62  ;;  %v11674_v57 = vadd.f32 %v13634_v5, %v11522_v16  ;;  %v11715_v17 = vsel %vm1446_vm10, %v17337_v39, 0.0  ;;  %v11754_v22 = vsel %vm1446_vm10, %v17386_v8, 0.0 }
0x1828   : > { %11716 = vadd.xlane.f32.xlu0 %v11715_v17  ;;  %v11636_v38 = vpop.f32.mrf.mxu0  ;;  %v17342_v23 = vld [vmem:[#allocation3 + $0x28] sm:$0xff]  ;;  %v17390_v10 = vld [vmem:[#allocation3 + $0x70] sm:$0xff] }
0x1829   : > { %11688 = vst.msk [vmem:[#allocation3 + $0x48] sm:$0xff] %vm1446_vm10, %v11674_v57  ;;  %v11673_v19 = vadd.f32 %v11636_v38, %v11521_v52  ;;  %v11724_v53 = vsel %vm1446_vm10, %v17342_v23, 0.0  ;;  %v11751_v62 = vsel %vm1446_vm10, %v17390_v10, 0.0 }
0x182a   : > { %11725 = vadd.xlane.f32.xlu1 %v11724_v53  ;;  %v13637_v20 = vpop.f32.mrf.mxu0  ;;  %v17347_v40 = vld [vmem:[#allocation3 + $0x20] sm:$0xff] }
0x182b   : > { %11687 = vst.msk [vmem:[#allocation3 + $0x40] sm:$0xff] %vm1446_vm10, %v11673_v19  ;;  %v11676_v44 = vadd.f32 %v13637_v20, %v11524_v21  ;;  %v11721_v28 = vsel %vm1446_vm10, %v17347_v40, 0.0 }
0x182c   : > { %11722 = vadd.xlane.f32.xlu0 %v11721_v28  ;;  %v11646_v31 = vpop.f32.mrf.mxu0  ;;  %v17352_v27 = vld [vmem:[#allocation3 + $0x38] sm:$0xff] }
0x182d   : > { %11690 = vst.msk [vmem:[#allocation3 + $0x58] sm:$0xff] %vm1446_vm10, %v11676_v44  ;;  %v11675_v32 = vadd.f32 %v11646_v31, %v11523_v43  ;;  %v11730_v41 = vsel %vm1446_vm10, %v17352_v27, 0.0 }
0x182e   : > { %11731 = vadd.xlane.f32.xlu1 %v11730_v41  ;;  %v13640_v33 = vpop.f32.mrf.mxu0  ;;  %v17357_v29 = vld [vmem:[#allocation3 + $0x30] sm:$0xff] }
0x182f   : > { %11689 = vst.msk [vmem:[#allocation3 + $0x50] sm:$0xff] %vm1446_vm10, %v11675_v32  ;;  %v11678_v4 = vadd.f32 %v13640_v33, %v11526_v7  ;;  %v11727_v50 = vsel %vm1446_vm10, %v17357_v29, 0.0 }
0x1830   : > { %11728 = vadd.xlane.f32.xlu0 %v11727_v50  ;;  %v11656_v30 = vpop.f32.mrf.mxu0  ;;  %v17362_v60 = vld [vmem:[#allocation3 + $0x48] sm:$0xff] }
0x1831   : > { %11692 = vst.msk [vmem:[#allocation3 + $0x68] sm:$0xff] %vm1446_vm10, %v11678_v4  ;;  %v11677_v15 = vadd.f32 %v11656_v30, %v11525_v49  ;;  %v11736_v18 = vsel %vm1446_vm10, %v17362_v60, 0.0 }
0x1832   : > { %11737 = vadd.xlane.f32.xlu1 %v11736_v18  ;;  %v17367_v26 = vld [vmem:[#allocation3 + $0x40] sm:$0xff] }
0x1833   : > { %11691 = vst.msk [vmem:[#allocation3 + $0x60] sm:$0xff] %vm1446_vm10, %v11677_v15  ;;  %v11733_v55 = vsel %vm1446_vm10, %v17367_v26, 0.0 }
0x1834   : > { %11734 = vadd.xlane.f32.xlu0 %v11733_v55  ;;  %v17372_v37 = vld [vmem:[#allocation3 + $0x58] sm:$0xff] }
0x1835   : > { %v11742_v36 = vsel %vm1446_vm10, %v17372_v37, 0.0 }
0x1836   : > { %11743 = vadd.xlane.f32.xlu1 %v11742_v36  ;;  %v17376_v12 = vld [vmem:[#allocation3 + $0x50] sm:$0xff] }
0x1837   : > { %v11739_v24 = vsel %vm1446_vm10, %v17376_v12, 0.0 }
0x1838   : > { %11740 = vadd.xlane.f32.xlu0 %v11739_v24  ;;  %v17380_v11 = vld [vmem:[#allocation3 + $0x68] sm:$0xff] }
0x1839   : > { %v11748_v47 = vsel %vm1446_vm10, %v17380_v11, 0.0 }
0x183a   : > { %11749 = vadd.xlane.f32.xlu1 %v11748_v47  ;;  %v17384_v45 = vld [vmem:[#allocation3 + $0x60] sm:$0xff] }
0x183b   : > { %v11745_v1 = vsel %vm1446_vm10, %v17384_v45, 0.0 }
0x183c   : > { %11746 = vadd.xlane.f32.xlu0 %v11745_v1 }
0x183e   : > { %11755 = vadd.xlane.f32.xlu1 %v11754_v22 }
0x1840   : > { %11752 = vadd.xlane.f32.xlu0 %v11751_v62  ;;  %v17420_v62 = vld [vmem:[#allocation26] ss:$0 sm:$0xff] }
0x186b   : > { %v10837_v14 = vpop.xlane.xlu0 %10836 }
0x186c   : > { %v10858_v16 = vmul.f32 0.0625, %v10837_v14 }
0x186d   : > { %v10834_v5 = vpop.xlane.xlu1 %10833 }
0x186e   : > { %v17397_v57 = vsub.f32 %v17192_v48, %v10858_v16  ;;  %v10857_v17 = vmul.f32 0.0625, %v10834_v5  ;;  %v17423_v5 = vld [vmem:[#allocation27] ss:$0 sm:$0xff] }
0x186f   : > { %v10843_v52 = vpop.xlane.xlu0 %10842 }
0x1870   : > { %v17400_v38 = vsub.f32 %v17202_v63, %v10857_v17  ;;  %v10860_v19 = vmul.f32 0.0625, %v10843_v52  ;;  %v10890_v53 = vmul.f32 %v17397_v57, %v17397_v57 }
0x1872   : > { %v17405_v21 = vsub.f32 %v17194_v3, %v10860_v19  ;;  %v10932_v20 = vsel %vm1446_vm10, %v10890_v53, 0.0  ;;  %v10889_v44 = vmul.f32 %v17400_v38, %v17400_v38 }
0x1873   : > { %v10840_v28 = vpop.xlane.xlu0 %10839  ;;  %10933 = vadd.xlane.f32.xlu1 %v10932_v20 }
0x1874   : > { %v10859_v48 = vmul.f32 0.0625, %v10840_v28  ;;  %v10929_v43 = vsel %vm1446_vm10, %v10889_v44, 0.0  ;;  %v10892_v63 = vmul.f32 %v17405_v21, %v17405_v21 }
0x1875   : > { %10930 = vadd.xlane.f32.xlu0 %v10929_v43 }
0x1876   : > { %v17414_v31 = vsub.f32 %v17204_v34, %v10859_v48  ;;  %v10938_v3 = vsel %vm1446_vm10, %v10892_v63, 0.0 }
0x1877   : > { %10939 = vadd.xlane.f32.xlu1 %v10938_v3 }
0x1878   : > { %v10898_v32 = vpop.xlane.xlu0 %10897  ;;  %v10891_v41 = vmul.f32 %v17414_v31, %v17414_v31 }
0x1879   : > { %v10942_v7 = vmul.f32 0.0625, %v10898_v32 }
0x187a   : > { %v10935_v33 = vsel %vm1446_vm10, %v10891_v41, 0.0 }
0x187b   : > { %v10958_v4 = vadd.f32 1e-05, %v10942_v7  ;;  %10936 = vadd.xlane.f32.xlu0 %v10935_v33 }
0x187c   : > { %v10895_v50 = vpop.xlane.xlu0 %10894 }
0x187d   : > { %14051 = vrsqrt.f32 %v10958_v4  ;;  %v10941_v49 = vmul.f32 0.0625, %v10895_v50 }
0x187f   : > { %v10957_v30 = vadd.f32 1e-05, %v10941_v49 }
0x1880   : > { %v10904_v15 = vpop.xlane.xlu0 %10903 }
0x1881   : > { %14053 = vrsqrt.f32 %v10957_v30  ;;  %v10944_v34 = vmul.f32 0.0625, %v10904_v15 }
0x1883   : > { %v10960_v18 = vadd.f32 1e-05, %v10944_v34 }
0x1884   : > { %v10901_v55 = vpop.xlane.xlu0 %10900 }
0x1885   : > { %14055 = vrsqrt.f32 %v10960_v18  ;;  %v10943_v36 = vmul.f32 0.0625, %v10901_v55 }
0x1887   : > { %v10959_v24 = vadd.f32 1e-05, %v10943_v36 }
0x1888   : > { %v10910_v47 = vpop.xlane.xlu0 %10909 }
0x1889   : > { %14057 = vrsqrt.f32 %v10959_v24  ;;  %v10946_v1 = vmul.f32 0.0625, %v10910_v47 }
0x188a   : > { %v14052_v22 = vpop.eup %14051 }
0x188b   : > { %v10990_v14 = vmul.f32 %v14052_v22, %v17217_v9  ;;  %v10962_v16 = vadd.f32 1e-05, %v10946_v1 }
0x188c   : > { %v10907_v17 = vpop.xlane.xlu0 %10906 }
0x188d   : > { %v11013_v52 = vmul.f32 %v17420_v62, %v10990_v14  ;;  %14059 = vrsqrt.f32 %v10962_v16  ;;  %v10945_v19 = vmul.f32 0.0625, %v10907_v17 }
0x188e   : > { %v14054_v53 = vpop.eup %14053 }
0x188f   : > { %v11036_v20 = vadd.f32 %v17423_v5, %v11013_v52  ;;  %v10989_v9 = vmul.f32 %v14054_v53, %v17222_v58  ;;  %v10961_v44 = vadd.f32 1e-05, %v10945_v19 }
0x1890   : > { %v10916_v28 = vpop.xlane.xlu1 %10915 }
0x1891   : > { %11052 = vst.msk [vmem:[%s17430_s1 + $0x8] sm:$0xff] %vm1446_vm10, %v11036_v20  ;;  %v11012_v48 = vmul.f32 %v17420_v62, %v10989_v9  ;;  %14061 = vrsqrt.f32 %v10961_v44  ;;  %v10948_v43 = vmul.f32 0.0625, %v10916_v28 }
0x1892   : > { %v14056_v63 = vpop.eup %14055 }
0x1893   : > { %v11035_v3 = vadd.f32 %v17423_v5, %v11012_v48  ;;  %v10992_v32 = vmul.f32 %v14056_v63, %v17228_v25  ;;  %v10964_v41 = vadd.f32 1e-05, %v10948_v43 }
0x1894   : > { %v10913_v7 = vpop.xlane.xlu0 %10912 }
0x1895   : > { %11051 = vst.msk [vmem:[%s17430_s1] sm:$0xff] %vm1446_vm10, %v11035_v3  ;;  %v11015_v58 = vmul.f32 %v17420_v62, %v10992_v32  ;;  %14063 = vrsqrt.f32 %v10964_v41  ;;  %v10947_v33 = vmul.f32 0.0625, %v10913_v7 }
0x1896   : > { %v14058_v4 = vpop.eup %14057 }
0x1897   : > { %v11038_v50 = vadd.f32 %v17423_v5, %v11015_v58  ;;  %v10991_v49 = vmul.f32 %v14058_v4, %v17234_v35  ;;  %v10963_v30 = vadd.f32 1e-05, %v10947_v33 }
0x1898   : > { %v10922_v15 = vpop.xlane.xlu1 %10921 }
0x1899   : > { %11054 = vst.msk [vmem:[%s17430_s1 + $0x18] sm:$0xff] %vm1446_vm10, %v11038_v50  ;;  %v11014_v25 = vmul.f32 %v17420_v62, %v10991_v49  ;;  %14065 = vrsqrt.f32 %v10963_v30  ;;  %v10950_v34 = vmul.f32 0.0625, %v10922_v15 }
0x189a   : > { %v14060_v18 = vpop.eup %14059 }
0x189b   : > { %v11037_v55 = vadd.f32 %v17423_v5, %v11014_v25  ;;  %v10994_v36 = vmul.f32 %v14060_v18, %v17240_v13  ;;  %v10966_v24 = vadd.f32 1e-05, %v10950_v34 }
0x189c   : > { %v10919_v47 = vpop.xlane.xlu0 %10918 }
0x189d   : > { %11053 = vst.msk [vmem:[%s17430_s1 + $0x10] sm:$0xff] %vm1446_vm10, %v11037_v55  ;;  %v11017_v35 = vmul.f32 %v17420_v62, %v10994_v36  ;;  %14067 = vrsqrt.f32 %v10966_v24  ;;  %v10949_v1 = vmul.f32 0.0625, %v10919_v47 }
0x189e   : > { %v14062_v22 = vpop.eup %14061 }
0x189f   : > { %v11040_v14 = vadd.f32 %v17423_v5, %v11017_v35  ;;  %v10993_v16 = vmul.f32 %v14062_v22, %v17248_v0  ;;  %v10965_v17 = vadd.f32 1e-05, %v10949_v1 }
0x18a0   : > { %v10928_v52 = vpop.xlane.xlu1 %10927 }
0x18a1   : > { %11056 = vst.msk [vmem:[%s17430_s1 + $0x28] sm:$0xff] %vm1446_vm10, %v11040_v14  ;;  %v11016_v13 = vmul.f32 %v17420_v62, %v10993_v16  ;;  %14069 = vrsqrt.f32 %v10965_v17  ;;  %v10952_v19 = vmul.f32 0.0625, %v10928_v52 }
0x18a2   : > { %v14064_v53 = vpop.eup %14063 }
0x18a3   : > { %v11039_v20 = vadd.f32 %v17423_v5, %v11016_v13  ;;  %v10996_v9 = vmul.f32 %v14064_v53, %v17257_v42  ;;  %v10968_v44 = vadd.f32 1e-05, %v10952_v19 }
0x18a4   : > { %v10925_v28 = vpop.xlane.xlu0 %10924 }
0x18a5   : > { %11055 = vst.msk [vmem:[%s17430_s1 + $0x20] sm:$0xff] %vm1446_vm10, %v11039_v20  ;;  %v11019_v0 = vmul.f32 %v17420_v62, %v10996_v9  ;;  %14071 = vrsqrt.f32 %v10968_v44  ;;  %v10951_v48 = vmul.f32 0.0625, %v10925_v28 }
0x18a6   : > { %v14066_v43 = vpop.eup %14065 }
0x18a7   : > { %v11042_v63 = vadd.f32 %v17423_v5, %v11019_v0  ;;  %v10995_v3 = vmul.f32 %v14066_v43, %v17265_v46  ;;  %v10967_v32 = vadd.f32 1e-05, %v10951_v48 }
0x18a9   : > { %11058 = vst.msk [vmem:[%s17430_s1 + $0x38] sm:$0xff] %vm1446_vm10, %v11042_v63  ;;  %v11018_v41 = vmul.f32 %v17420_v62, %v10995_v3  ;;  %14073 = vrsqrt.f32 %v10967_v32 }
0x18aa   : > { %v14068_v42 = vpop.eup %14067 }
0x18ab   : > { %v11041_v7 = vadd.f32 %v17423_v5, %v11018_v41  ;;  %v10998_v58 = vmul.f32 %v14068_v42, %v17275_v56  ;;  %v11714_v33 = vpop.xlane.xlu1 %11713 }
0x18ac   : > { %v11758_v4 = vmul.f32 0.0625, %v11714_v33 }
0x18ad   : > { %11057 = vst.msk [vmem:[%s17430_s1 + $0x30] sm:$0xff] %vm1446_vm10, %v11041_v7  ;;  %v11021_v50 = vmul.f32 %v17420_v62, %v10998_v58  ;;  %v11711_v49 = vpop.xlane.xlu0 %11710 }
0x18ae   : > { %v14070_v46 = vpop.eup %14069  ;;  %v17473_v30 = vsub.f32 %v17321_v2, %v11758_v4  ;;  %v11757_v15 = vmul.f32 0.0625, %v11711_v49 }
0x18af   : > { %v11044_v25 = vadd.f32 %v17423_v5, %v11021_v50  ;;  %v10997_v34 = vmul.f32 %v14070_v46, %v17285_v59  ;;  %v11720_v18 = vpop.xlane.xlu1 %11719 }
0x18b0   : > { %v17478_v55 = vsub.f32 %v17327_v51, %v11757_v15  ;;  %v11760_v56 = vmul.f32 0.0625, %v11720_v18  ;;  %v11790_v36 = vmul.f32 %v17473_v30, %v17473_v30 }
0x18b1   : > { %11060 = vst.msk [vmem:[%s17430_s1 + $0x48] sm:$0xff] %vm1446_vm10, %v11044_v25  ;;  %v11020_v24 = vmul.f32 %v17420_v62, %v10997_v34  ;;  %v11717_v2 = vpop.xlane.xlu0 %11716 }
0x18b2   : > { %v14072_v47 = vpop.eup %14071  ;;  %v17486_v35 = vsub.f32 %v17332_v61, %v11760_v56  ;;  %v11759_v1 = vmul.f32 0.0625, %v11717_v2  ;;  %v11808_v59 = vsel %vm1446_vm10, %v11790_v36, 0.0  ;;  %v11789_v51 = vmul.f32 %v17478_v55, %v17478_v55 }
0x18b3   : > { %v11043_v22 = vadd.f32 %v17423_v5, %v11020_v24  ;;  %v11000_v14 = vmul.f32 %v14072_v47, %v17295_v6  ;;  %v11726_v16 = vpop.xlane.xlu1 %11725  ;;  %11809 = vadd.xlane.f32.xlu1 %v11808_v59 }
0x18b4   : > { %v17494_v17 = vsub.f32 %v17337_v39, %v11759_v1  ;;  %v11762_v52 = vmul.f32 0.0625, %v11726_v16  ;;  %v11805_v13 = vsel %vm1446_vm10, %v11789_v51, 0.0  ;;  %v11792_v61 = vmul.f32 %v17486_v35, %v17486_v35 }
0x18b5   : > { %11059 = vst.msk [vmem:[%s17430_s1 + $0x40] sm:$0xff] %vm1446_vm10, %v11043_v22  ;;  %v11023_v19 = vmul.f32 %v17420_v62, %v11000_v14  ;;  %v11723_v53 = vpop.xlane.xlu0 %11722  ;;  %11806 = vadd.xlane.f32.xlu0 %v11805_v13 }
0x18b6   : > { %v14074_v20 = vpop.eup %14073  ;;  %v17503_v6 = vsub.f32 %v17342_v23, %v11762_v52  ;;  %v11761_v9 = vmul.f32 0.0625, %v11723_v53  ;;  %v11814_v39 = vsel %vm1446_vm10, %v11792_v61, 0.0  ;;  %v11791_v44 = vmul.f32 %v17494_v17, %v17494_v17 }
0x18b7   : > { %v11046_v28 = vadd.f32 %v17423_v5, %v11023_v19  ;;  %v10999_v0 = vmul.f32 %v14074_v20, %v17305_v54  ;;  %v11732_v48 = vpop.xlane.xlu1 %11731  ;;  %11815 = vadd.xlane.f32.xlu1 %v11814_v39 }
0x18b8   : > { %v17511_v43 = vsub.f32 %v17347_v40, %v11761_v9  ;;  %v11764_v63 = vmul.f32 0.0625, %v11732_v48  ;;  %v11811_v3 = vsel %vm1446_vm10, %v11791_v44, 0.0  ;;  %v11794_v23 = vmul.f32 %v17503_v6, %v17503_v6 }
0x18b9   : > { %11062 = vst.msk [vmem:[%s17430_s1 + $0x58] sm:$0xff] %vm1446_vm10, %v11046_v28  ;;  %v11022_v32 = vmul.f32 %v17420_v62, %v10999_v0  ;;  %v11729_v41 = vpop.xlane.xlu0 %11728  ;;  %11812 = vadd.xlane.f32.xlu0 %v11811_v3 }
0x18ba   : > { %v17520_v54 = vsub.f32 %v17352_v27, %v11764_v63  ;;  %v11763_v42 = vmul.f32 0.0625, %v11729_v41  ;;  %v11820_v40 = vsel %vm1446_vm10, %v11794_v23, 0.0  ;;  %v11793_v7 = vmul.f32 %v17511_v43, %v17511_v43 }
0x18bb   : > { %v11045_v58 = vadd.f32 %v17423_v5, %v11022_v32  ;;  %v11738_v33 = vpop.xlane.xlu1 %11737  ;;  %11821 = vadd.xlane.f32.xlu1 %v11820_v40 }
0x18bc   : > { %v17527_v4 = vsub.f32 %v17357_v29, %v11763_v42  ;;  %v11766_v50 = vmul.f32 0.0625, %v11738_v33  ;;  %v11817_v49 = vsel %vm1446_vm10, %v11793_v7, 0.0  ;;  %v11796_v27 = vmul.f32 %v17520_v54, %v17520_v54 }
0x18bd   : > { %11061 = vst.msk [vmem:[%s17430_s1 + $0x50] sm:$0xff] %vm1446_vm10, %v11045_v58  ;;  %v11735_v46 = vpop.xlane.xlu0 %11734  ;;  %11818 = vadd.xlane.f32.xlu0 %v11817_v49 }
0x18be   : > { %v17535_v15 = vsub.f32 %v17362_v60, %v11766_v50  ;;  %v11765_v25 = vmul.f32 0.0625, %v11735_v46  ;;  %v11826_v34 = vsel %vm1446_vm10, %v11796_v27, 0.0  ;;  %v11795_v29 = vmul.f32 %v17527_v4, %v17527_v4 }
0x18bf   : > { %v11744_v18 = vpop.xlane.xlu1 %11743  ;;  %11827 = vadd.xlane.f32.xlu1 %v11826_v34 }
0x18c0   : > { %v17541_v56 = vsub.f32 %v17367_v26, %v11765_v25  ;;  %v11768_v36 = vmul.f32 0.0625, %v11744_v18  ;;  %v11823_v24 = vsel %vm1446_vm10, %v11795_v29, 0.0  ;;  %v11798_v2 = vmul.f32 %v17535_v15, %v17535_v15 }
0x18c1   : > { %v11741_v47 = vpop.xlane.xlu0 %11740  ;;  %11824 = vadd.xlane.f32.xlu0 %v11823_v24 }
0x18c2   : > { %v17547_v60 = vsub.f32 %v17372_v37, %v11768_v36  ;;  %v11767_v1 = vmul.f32 0.0625, %v11741_v47  ;;  %v11832_v59 = vsel %vm1446_vm10, %v11798_v2, 0.0  ;;  %v11797_v51 = vmul.f32 %v17541_v56, %v17541_v56 }
0x18c3   : > { %11833 = vadd.xlane.f32.xlu1 %v11832_v59  ;;  %v11750_v26 = vpop.xlane.xlu1 %11749 }
0x18c4   : > { %v17553_v22 = vsub.f32 %v17376_v12, %v11767_v1  ;;  %v11770_v14 = vmul.f32 0.0625, %v11750_v26  ;;  %v11829_v16 = vsel %vm1446_vm10, %v11797_v51, 0.0  ;;  %v11800_v52 = vmul.f32 %v17547_v60, %v17547_v60 }
0x18c5   : > { %v11747_v13 = vpop.xlane.xlu0 %11746  ;;  %11830 = vadd.xlane.f32.xlu0 %v11829_v16 }
0x18c6   : > { %v17559_v37 = vsub.f32 %v17380_v11, %v11770_v14  ;;  %v11769_v61 = vmul.f32 0.0625, %v11747_v13  ;;  %v11838_v19 = vsel %vm1446_vm10, %v11800_v52, 0.0  ;;  %v11799_v53 = vmul.f32 %v17553_v22, %v17553_v22 }
0x18c7   : > { %11839 = vadd.xlane.f32.xlu1 %v11838_v19  ;;  %v11756_v12 = vpop.xlane.xlu1 %11755 }
0x18c8   : > { %v17565_v20 = vsub.f32 %v17384_v45, %v11769_v61  ;;  %v11772_v9 = vmul.f32 0.0625, %v11756_v12  ;;  %v11835_v39 = vsel %vm1446_vm10, %v11799_v53, 0.0  ;;  %v11802_v44 = vmul.f32 %v17559_v37, %v17559_v37 }
0x18c9   : > { %11836 = vadd.xlane.f32.xlu0 %v11835_v39  ;;  %v11753_v11 = vpop.xlane.xlu0 %11752 }
0x18ca   : > { %v17571_v28 = vsub.f32 %v17386_v8, %v11772_v9  ;;  %v11771_v0 = vmul.f32 0.0625, %v11753_v11  ;;  %v11844_v48 = vsel %vm1446_vm10, %v11802_v44, 0.0  ;;  %v11801_v63 = vmul.f32 %v17565_v20, %v17565_v20 }
0x18cb   : > { %11845 = vadd.xlane.f32.xlu1 %v11844_v48 }
0x18cc   : > { %v17577_v45 = vsub.f32 %v17390_v10, %v11771_v0  ;;  %v11841_v3 = vsel %vm1446_vm10, %v11801_v63, 0.0  ;;  %v11804_v23 = vmul.f32 %v17571_v28, %v17571_v28 }
0x18cd   : > { %11842 = vadd.xlane.f32.xlu0 %v11841_v3 }
0x18ce   : > { %v11850_v32 = vsel %vm1446_vm10, %v11804_v23, 0.0  ;;  %v11803_v8 = vmul.f32 %v17577_v45, %v17577_v45 }
0x18cf   : > { %11851 = vadd.xlane.f32.xlu1 %v11850_v32 }
0x18d0   : > { %v11847_v41 = vsel %vm1446_vm10, %v11803_v8, 0.0 }
0x18d1   : > { %11848 = vadd.xlane.f32.xlu0 %v11847_v41 }
0x18fc   : > { %v10934_v42 = vpop.xlane.xlu1 %10933 }
0x18fd   : > { %v10954_v40 = vmul.f32 0.0625, %v10934_v42 }
0x18fe   : > { %v10931_v7 = vpop.xlane.xlu0 %10930 }
0x18ff   : > { %v10970_v10 = vadd.f32 1e-05, %v10954_v40  ;;  %v10953_v58 = vmul.f32 0.0625, %v10931_v7 }
0x1900   : > { %v10940_v33 = vpop.xlane.xlu1 %10939 }
0x1901   : > { %14075 = vrsqrt.f32 %v10970_v10  ;;  %v10969_v50 = vadd.f32 1e-05, %v10953_v58  ;;  %v10956_v49 = vmul.f32 0.0625, %v10940_v33 }
0x1903   : > { %14077 = vrsqrt.f32 %v10969_v50  ;;  %v10972_v27 = vadd.f32 1e-05, %v10956_v49  ;;  %v17606_v49 = vld [vmem:[#allocation32] ss:$0 sm:$0xff] }
0x1904   : > { %v10937_v46 = vpop.xlane.xlu0 %10936 }
0x1905   : > { %14079 = vrsqrt.f32 %v10972_v27  ;;  %v10955_v25 = vmul.f32 0.0625, %v10937_v46 }
0x1907   : > { %v10971_v34 = vadd.f32 1e-05, %v10955_v25 }
0x1909   : > { %14081 = vrsqrt.f32 %v10971_v34 }
0x190e   : > { %v14076_v29 = vpop.eup %14075 }
0x190f   : > { %v11002_v18 = vmul.f32 %v14076_v29, %v17397_v57 }
0x1910   : > { %v14078_v36 = vpop.eup %14077 }
0x1911   : > { %v11025_v24 = vmul.f32 %v17420_v62, %v11002_v18  ;;  %v11001_v2 = vmul.f32 %v14078_v36, %v17400_v38  ;;  %v17609_v18 = vld [vmem:[#allocation33] ss:$0 sm:$0xff] }
0x1912   : > { %v14080_v47 = vpop.eup %14079 }
0x1913   : > { %v11048_v1 = vadd.f32 %v17423_v5, %v11025_v24  ;;  %v11024_v59 = vmul.f32 %v17420_v62, %v11001_v2  ;;  %v11004_v51 = vmul.f32 %v14080_v47, %v17405_v21 }
0x1915   : > { %11064 = vst.msk [vmem:[%s17430_s1 + $0x68] sm:$0xff] %vm1446_vm10, %v11048_v1  ;;  %v11047_v26 = vadd.f32 %v17423_v5, %v11024_v59  ;;  %v11027_v14 = vmul.f32 %v17420_v62, %v11004_v51 }
0x1916   : > { %v14082_v57 = vpop.eup %14081 }
0x1917   : > { %11063 = vst.msk [vmem:[%s17430_s1 + $0x60] sm:$0xff] %vm1446_vm10, %v11047_v26  ;;  %v11050_v16 = vadd.f32 %v17423_v5, %v11027_v14  ;;  %v11003_v38 = vmul.f32 %v14082_v57, %v17414_v31 }
0x1919   : > { %11066 = vst.msk [vmem:[%s17430_s1 + $0x78] sm:$0xff] %vm1446_vm10, %v11050_v16  ;;  %v11026_v52 = vmul.f32 %v17420_v62, %v11003_v38 }
0x191b   : > { %v11049_v13 = vadd.f32 %v17423_v5, %v11026_v52 }
0x191d   : > { %11065 = vst.msk [vmem:[%s17430_s1 + $0x70] sm:$0xff] %vm1446_vm10, %v11049_v13 }
0x193c   : > { %v11810_v21 = vpop.xlane.xlu1 %11809 }
0x193d   : > { %v11854_v61 = vmul.f32 0.0625, %v11810_v21 }
0x193e   : > { %v11807_v19 = vpop.xlane.xlu0 %11806 }
0x193f   : > { %v11870_v53 = vadd.f32 1e-05, %v11854_v61  ;;  %v11853_v12 = vmul.f32 0.0625, %v11807_v19 }
0x1940   : > { %v11816_v9 = vpop.xlane.xlu1 %11815 }
0x1941   : > { %14083 = vrsqrt.f32 %v11870_v53  ;;  %v11869_v39 = vadd.f32 1e-05, %v11853_v12  ;;  %v11856_v44 = vmul.f32 0.0625, %v11816_v9 }
0x1942   : > { %v11813_v11 = vpop.xlane.xlu0 %11812 }
0x1943   : > { %14085 = vrsqrt.f32 %v11869_v39  ;;  %v11872_v31 = vadd.f32 1e-05, %v11856_v44  ;;  %v11855_v0 = vmul.f32 0.0625, %v11813_v11 }
0x1944   : > { %v11822_v48 = vpop.xlane.xlu1 %11821 }
0x1945   : > { %14087 = vrsqrt.f32 %v11872_v31  ;;  %v11871_v62 = vadd.f32 1e-05, %v11855_v0  ;;  %v11858_v63 = vmul.f32 0.0625, %v11822_v48 }
0x1946   : > { %v11819_v5 = vpop.xlane.xlu0 %11818 }
0x1947   : > { %14089 = vrsqrt.f32 %v11871_v62  ;;  %v11874_v3 = vadd.f32 1e-05, %v11858_v63  ;;  %v11857_v23 = vmul.f32 0.0625, %v11819_v5 }
0x1948   : > { %v11828_v32 = vpop.xlane.xlu1 %11827 }
0x1949   : > { %14091 = vrsqrt.f32 %v11874_v3  ;;  %v11873_v8 = vadd.f32 1e-05, %v11857_v23  ;;  %v11860_v41 = vmul.f32 0.0625, %v11828_v32 }
0x194a   : > { %v11825_v42 = vpop.xlane.xlu0 %11824 }
0x194b   : > { %14093 = vrsqrt.f32 %v11873_v8  ;;  %v11876_v40 = vadd.f32 1e-05, %v11860_v41  ;;  %v11859_v7 = vmul.f32 0.0625, %v11825_v42 }
0x194c   : > { %v11834_v10 = vpop.xlane.xlu1 %11833 }
0x194d   : > { %14095 = vrsqrt.f32 %v11876_v40  ;;  %v11875_v58 = vadd.f32 1e-05, %v11859_v7  ;;  %v11862_v33 = vmul.f32 0.0625, %v11834_v10 }
0x194e   : > { %v14084_v50 = vpop.eup %14083  ;;  %v11831_v27 = vpop.xlane.xlu0 %11830 }
0x194f   : > { %v11902_v46 = vmul.f32 %v14084_v50, %v17473_v30  ;;  %14097 = vrsqrt.f32 %v11875_v58  ;;  %v11878_v25 = vadd.f32 1e-05, %v11862_v33  ;;  %v11861_v34 = vmul.f32 0.0625, %v11831_v27 }
0x1950   : > { %v14086_v29 = vpop.eup %14085  ;;  %v11840_v36 = vpop.xlane.xlu1 %11839 }
0x1951   : > { %v11925_v24 = vmul.f32 %v17606_v49, %v11902_v46  ;;  %v11901_v2 = vmul.f32 %v14086_v29, %v17478_v55  ;;  %14099 = vrsqrt.f32 %v11878_v25  ;;  %v11877_v47 = vadd.f32 1e-05, %v11861_v34 }
0x1952   : > { %v14088_v1 = vpop.eup %14087  ;;  %v11864_v30 = vmul.f32 0.0625, %v11840_v36  ;;  %v11837_v59 = vpop.xlane.xlu0 %11836 }
0x1953   : > { %v11948_v51 = vadd.f32 %v17609_v18, %v11925_v24  ;;  %v11924_v26 = vmul.f32 %v17606_v49, %v11901_v2  ;;  %v11904_v14 = vmul.f32 %v14088_v1, %v17486_v35  ;;  %14101 = vrsqrt.f32 %v11877_v47 }
0x1954   : > { %v14090_v55 = vpop.eup %14089  ;;  %v11880_v57 = vadd.f32 1e-05, %v11864_v30  ;;  %v11863_v16 = vmul.f32 0.0625, %v11837_v59  ;;  %v11846_v38 = vpop.xlane.xlu1 %11845 }
0x1955   : > { %11964 = vst.msk [vmem:[%s17617_s6 + $0x8] sm:$0xff] %vm1446_vm10, %v11948_v51  ;;  %v11947_v52 = vadd.f32 %v17609_v18, %v11924_v26  ;;  %v11927_v13 = vmul.f32 %v17606_v49, %v11904_v14  ;;  %v11903_v21 = vmul.f32 %v14090_v55, %v17494_v17  ;;  %v11866_v61 = vmul.f32 0.0625, %v11846_v38 }
0x1956   : > { %v14092_v19 = vpop.eup %14091  ;;  %14103 = vrsqrt.f32 %v11880_v57  ;;  %v11879_v53 = vadd.f32 1e-05, %v11863_v16  ;;  %v11843_v12 = vpop.xlane.xlu0 %11842 }
0x1957   : > { %11963 = vst.msk [vmem:[%s17617_s6] sm:$0xff] %vm1446_vm10, %v11947_v52  ;;  %v11950_v35 = vadd.f32 %v17609_v18, %v11927_v13  ;;  %v11926_v9 = vmul.f32 %v17606_v49, %v11903_v21  ;;  %v11906_v39 = vmul.f32 %v14092_v19, %v17503_v6  ;;  %v11882_v44 = vadd.f32 1e-05, %v11866_v61 }
0x1958   : > { %v14094_v11 = vpop.eup %14093  ;;  %14105 = vrsqrt.f32 %v11879_v53  ;;  %v11865_v31 = vmul.f32 0.0625, %v11843_v12  ;;  %v11852_v0 = vpop.xlane.xlu1 %11851 }
0x1959   : > { %11966 = vst.msk [vmem:[%s17617_s6 + $0x18] sm:$0xff] %vm1446_vm10, %v11950_v35  ;;  %v11949_v17 = vadd.f32 %v17609_v18, %v11926_v9  ;;  %v11929_v48 = vmul.f32 %v17606_v49, %v11906_v39  ;;  %v11905_v62 = vmul.f32 %v14094_v11, %v17511_v43  ;;  %14107 = vrsqrt.f32 %v11882_v44 }
0x195a   : > { %v14096_v63 = vpop.eup %14095  ;;  %v11881_v5 = vadd.f32 1e-05, %v11865_v31  ;;  %v11868_v3 = vmul.f32 0.0625, %v11852_v0  ;;  %v11849_v23 = vpop.xlane.xlu0 %11848 }
0x195b   : > { %11965 = vst.msk [vmem:[%s17617_s6 + $0x10] sm:$0xff] %vm1446_vm10, %v11949_v17  ;;  %v11952_v6 = vadd.f32 %v17609_v18, %v11929_v48  ;;  %v11928_v32 = vmul.f32 %v17606_v49, %v11905_v62  ;;  %v11908_v8 = vmul.f32 %v14096_v63, %v17520_v54  ;;  %v11867_v41 = vmul.f32 0.0625, %v11849_v23 }
0x195c   : > { %v14098_v42 = vpop.eup %14097  ;;  %14109 = vrsqrt.f32 %v11881_v5  ;;  %v11884_v40 = vadd.f32 1e-05, %v11868_v3 }
0x195d   : > { %11968 = vst.msk [vmem:[%s17617_s6 + $0x28] sm:$0xff] %vm1446_vm10, %v11952_v6  ;;  %v11951_v43 = vadd.f32 %v17609_v18, %v11928_v32  ;;  %v11931_v7 = vmul.f32 %v17606_v49, %v11908_v8  ;;  %v11907_v10 = vmul.f32 %v14098_v42, %v17527_v4  ;;  %v11883_v58 = vadd.f32 1e-05, %v11867_v41 }
0x195e   : > { %v14100_v33 = vpop.eup %14099  ;;  %14111 = vrsqrt.f32 %v11884_v40 }
0x195f   : > { %11967 = vst.msk [vmem:[%s17617_s6 + $0x20] sm:$0xff] %vm1446_vm10, %v11951_v43  ;;  %v11954_v54 = vadd.f32 %v17609_v18, %v11931_v7  ;;  %v11930_v50 = vmul.f32 %v17606_v49, %v11907_v10  ;;  %v11910_v27 = vmul.f32 %v14100_v33, %v17535_v15  ;;  %14113 = vrsqrt.f32 %v11883_v58 }
0x1960   : > { %v14102_v46 = vpop.eup %14101 }
0x1961   : > { %11970 = vst.msk [vmem:[%s17617_s6 + $0x38] sm:$0xff] %vm1446_vm10, %v11954_v54  ;;  %v11953_v25 = vadd.f32 %v17609_v18, %v11930_v50  ;;  %v11933_v4 = vmul.f32 %v17606_v49, %v11910_v27  ;;  %v11909_v34 = vmul.f32 %v14102_v46, %v17541_v56 }
0x1963   : > { %v14104_v29 = vpop.eup %14103  ;;  %11969 = vst.msk [vmem:[%s17617_s6 + $0x30] sm:$0xff] %vm1446_vm10, %v11953_v25  ;;  %v11956_v36 = vadd.f32 %v17609_v18, %v11933_v4  ;;  %v11932_v24 = vmul.f32 %v17606_v49, %v11909_v34 }
0x1964   : > { %v11912_v15 = vmul.f32 %v14104_v29, %v17547_v60 }
0x1965   : > { %v14106_v2 = vpop.eup %14105  ;;  %11972 = vst.msk [vmem:[%s17617_s6 + $0x48] sm:$0xff] %vm1446_vm10, %v11956_v36  ;;  %v11955_v47 = vadd.f32 %v17609_v18, %v11932_v24 }
0x1966   : > { %v14108_v1 = vpop.eup %14107  ;;  %v11935_v30 = vmul.f32 %v17606_v49, %v11912_v15  ;;  %v11911_v56 = vmul.f32 %v14106_v2, %v17553_v22 }
0x1967   : > { %11971 = vst.msk [vmem:[%s17617_s6 + $0x40] sm:$0xff] %vm1446_vm10, %v11955_v47  ;;  %v11914_v59 = vmul.f32 %v14108_v1, %v17559_v37 }
0x1968   : > { %v11958_v51 = vadd.f32 %v17609_v18, %v11935_v30  ;;  %v11934_v60 = vmul.f32 %v17606_v49, %v11911_v56 }
0x1969   : > { %v14110_v26 = vpop.eup %14109  ;;  %v11937_v14 = vmul.f32 %v17606_v49, %v11914_v59 }
0x196a   : > { %11974 = vst.msk [vmem:[%s17617_s6 + $0x58] sm:$0xff] %vm1446_vm10, %v11958_v51  ;;  %v11957_v55 = vadd.f32 %v17609_v18, %v11934_v60  ;;  %v11913_v22 = vmul.f32 %v14110_v26, %v17565_v20 }
0x196b   : > { %v14112_v57 = vpop.eup %14111  ;;  %v11960_v16 = vadd.f32 %v17609_v18, %v11937_v14 }
0x196c   : > { %v14114_v37 = vpop.eup %14113  ;;  %11973 = vst.msk [vmem:[%s17617_s6 + $0x50] sm:$0xff] %vm1446_vm10, %v11957_v55  ;;  %v11936_v38 = vmul.f32 %v17606_v49, %v11913_v22  ;;  %v11916_v52 = vmul.f32 %v14112_v57, %v17571_v28 }
0x196d   : > { %11976 = vst.msk [vmem:[%s17617_s6 + $0x68] sm:$0xff] %vm1446_vm10, %v11960_v16  ;;  %v11915_v13 = vmul.f32 %v14114_v37, %v17577_v45 }
0x196e   : > { %v11959_v21 = vadd.f32 %v17609_v18, %v11936_v38  ;;  %v11939_v61 = vmul.f32 %v17606_v49, %v11916_v52 }
0x196f   : > { %v11938_v20 = vmul.f32 %v17606_v49, %v11915_v13 }
0x1970   : > { %11975 = vst.msk [vmem:[%s17617_s6 + $0x60] sm:$0xff] %vm1446_vm10, %v11959_v21  ;;  %v11962_v19 = vadd.f32 %v17609_v18, %v11939_v61 }
0x1971   : > { %v11961_v53 = vadd.f32 %v17609_v18, %v11938_v20 }
0x1972   : > { %11978 = vst.msk [vmem:[%s17617_s6 + $0x78] sm:$0xff] %vm1446_vm10, %v11962_v19 }
0x1973   : > { %11977 = vst.msk [vmem:[%s17617_s6 + $0x70] sm:$0xff] %vm1446_vm10, %v11961_v53 }
0x1974 PF: > { %s17821_s7 = sld [smem:[#allocation46_spill]] }
0x197a   : > { %s47_s29 = sadd.s32 1, %s17821_s7  }
0x197b   : > { %p44_p11 = scmp.ge.s32.totalorder %s47_s29, 4  }
0x197d   :  { %46 = sbr.rel (!%p44_p11) target bundleno = 22 (0x16), region = 262 }
0x1982   :  { %12016 = vsyncpa [#allocation5], 1 }
0x1983   :  { %12018 = vsyncpa [#allocation5 + $0x1], 1 }
0x1984   :  { %12019 = vsyncpa [#allocation7], 1 }
0x1985   :  { %12020 = vsyncpa [#allocation10], 1 }
0x1986   :  { %12021 = vsyncpa [#allocation13], 1 }
0x1987   :  { %12022 = vsyncpa [#allocation16], 1 }
0x1988   :  { %12023 = vsyncpa [#allocation19], 1 }
0x1989   :  { %12024 = vsyncpa [#allocation22], 1 }
0x198a   :  { %12025 = vsyncpa [#allocation25], 1 }
0x198b   :  { %12026 = vsyncpa [#allocation28], 1 }
0x198c   :  { %12027 = vsyncpa [#allocation31], 1 }
0x198d   :  { %12028 = vsyncpa [#allocation34], 1 }

</bundles_post_ra>
